<compile_context>
chip_gen: v6e
topology: v6e:2x2x1
jax: 0.10.0
libtpu: 0.0.40
codegen_flags: <defaults>
</compile_context>

<pallas_src>
import functools
import math

import jax
import jax.numpy as jnp
from jax.experimental import pallas as pl
from jax.experimental.pallas import tpu as pltpu

_BN_EPS = 1e-5
_MXU_DTYPE = jnp.bfloat16          # matmul operand dtype (accumulation stays f32)

_PARAM_ORDER = ('s1i', 'b1i', 'w1i', 's2i', 'b2i', 'w3i',
                's1u', 'b1u', 'w1u', 's2u', 'b2u', 'w3u')


# ----------------------------------------------------------------------- kernel

def _make_rk_block_kernel(H, W, G, S, U, wk):
    """Fused RK_block forward for one batch element (NHWC, channels on lanes)."""
    M = H * W

    def kernel(x_ref,
               s1i_ref, b1i_ref, w1i_ref, s2i_ref, b2i_ref, w3i_ref,
               s1u_ref, b1u_ref, w1u_ref, s2u_ref, b2u_ref, w3u_ref,
               o_ref, pad_ref):
        # Zero the conv scratch once per image.  Only the interior
        # [1:H+1, 8:8+W] is ever re-written, so the zero border provides the
        # 'same' padding for every 3x3 conv in the block.
        pad_ref[...] = jnp.zeros_like(pad_ref)

        x_flat = x_ref[0].astype(jnp.float32).reshape(M, G)       # (H*W, G)

        def bn_relu(v, scale, shift):
            return jnp.maximum(v * scale.astype(jnp.float32)
                               + shift.astype(jnp.float32), 0.0)

        def conv1x1(parts, s1_ref, b1_ref, w1_ref, stage):
            # BN -> ReLU -> 1x1 conv over channel-concat(parts), decomposed as a
            # sum of per-part matmuls (no in-kernel concatenation needed).
            acc = jnp.zeros((M, wk), jnp.float32)
            for p, part in enumerate(parts):
                y = bn_relu(part, s1_ref[stage, p], b1_ref[stage, p])
                acc = acc + jnp.dot(y.astype(_MXU_DTYPE), w1_ref[stage, p],
                                    preferred_element_type=jnp.float32)
            return acc                                            # (M, wk) f32

        def conv3x3(t, s2_ref, b2_ref, w3_ref, stage):
            # BN -> ReLU -> 3x3 'same' conv.  Padding lives in the VMEM scratch;
            # the 9 taps are shifted-window bf16 MXU matmuls with f32 accumulation.
            y = bn_relu(t, s2_ref[stage], b2_ref[stage])          # (M, wk) f32
            pad_ref[1:H + 1, 8:8 + W, :] = y.reshape(H, W, wk)    # aligned store
            acc = jnp.zeros((M, G), jnp.float32)
            for dy in range(3):
                for dx in range(3):
                    win = pad_ref[dy:dy + H, dx + 7:dx + 7 + W, :]   # (H, W, wk)
                    acc = acc + jnp.dot(
                        win.reshape(M, wk).astype(_MXU_DTYPE),
                        w3_ref[stage, dy, dx],
                        preferred_element_type=jnp.float32)
            return acc                                            # (M, G) f32

        # ---- init stages ----
        blobs = []
        for j in range(S):
            parts = [x_flat] + blobs[:j]          # concat order: [x, blob_0..blob_{j-1}]
            t = conv1x1(parts, s1i_ref, b1i_ref, w1i_ref, j)
            blobs.append(conv3x3(t, s2i_ref, b2i_ref, w3i_ref, j))

        # ---- update iterations (replace=False path) ----
        for _ in range(U):
            middle = blobs
            blobs = []
            for i in range(S):
                parts = [x_flat] + [middle[b] for b in range(S) if b != i]
                t = conv1x1(parts, s1u_ref, b1u_ref, w1u_ref, i)
                blobs.append(conv3x3(t, s2u_ref, b2u_ref, w3u_ref, i))

        out = x_flat
        for b in blobs:
            out = out + b
        o_ref[0] = out.reshape(H, W, G).astype(o_ref.dtype)

    return kernel


def rk_block_forward(x_nchw, packed, *, G, S, U, wk):
    """RK_block.forward (eval, keep_prob=1, if_b=True, replace=False). x is NCHW."""
    x = jnp.transpose(x_nchw, (0, 2, 3, 1)).astype(jnp.float32)   # NCHW -> NHWC
    N, H, W, C = x.shape
    assert C == G, (C, G)

    kernel = _make_rk_block_kernel(H, W, G, S, U, wk)
    param_args = [packed[k] for k in _PARAM_ORDER]

    def _full_spec(a):
        nd = a.ndim
        return pl.BlockSpec(a.shape, lambda n, _nd=nd: (0,) * _nd)

    in_specs = [pl.BlockSpec((1, H, W, G), lambda n: (n, 0, 0, 0))]
    in_specs += [_full_spec(a) for a in param_args]

    out_nhwc = pl.pallas_call(
        kernel,
        out_shape=jax.ShapeDtypeStruct((N, H, W, G), x.dtype),
        grid=(N,),
        in_specs=in_specs,
        out_specs=pl.BlockSpec((1, H, W, G), lambda n: (n, 0, 0, 0)),
        scratch_shapes=[pltpu.VMEM((H + 2, W + 16, wk), jnp.float32)],
        compiler_params=pltpu.CompilerParams(
            dimension_semantics=("parallel",),        # batch -> both v7x TCs
            vmem_limit_bytes=32 * 1024 * 1024),       # safe on v5e/v6e/v7x
    )(x, *param_args)
    return jnp.transpose(out_nhwc, (0, 3, 1, 2))      # NHWC -> NCHW


# ----------------------------------------------------------------------- params

def _bn_init(c):
    # Eval-mode BatchNorm2d at default init (gamma=1, beta=0, mean=0, var=1).
    return dict(gamma=jnp.ones((c,), jnp.float32),
                beta=jnp.zeros((c,), jnp.float32),
                mean=jnp.zeros((c,), jnp.float32),
                var=jnp.ones((c,), jnp.float32))


def _fold_bn(bn):
    scale = bn['gamma'] / jnp.sqrt(bn['var'] + _BN_EPS)
    shift = bn['beta'] - bn['mean'] * scale
    return scale, shift


def _kaiming(key, shape, fan_in):
    return math.sqrt(2.0 / fan_in) * jax.random.normal(key, shape, jnp.float32)


def init_rk_block_params(key, G, S, U, wk):
    """Demo parameters.  1x1 conv weights stored as (cin, wk); 3x3 as HWIO (3,3,cin,cout)."""
    p = dict(init=[], update=[])
    for j in range(S):
        cin = G * (1 + j)
        key, k1, k2 = jax.random.split(key, 3)
        p['init'].append(dict(bn1=_bn_init(cin), w1=_kaiming(k1, (cin, wk), cin),
                              bn3=_bn_init(wk), w3=_kaiming(k2, (3, 3, wk, G), 9 * wk)))
    if U > 0:
        cin = G * S
        for _ in range(S):
            key, k1, k2 = jax.random.split(key, 3)
            p['update'].append(dict(bn1=_bn_init(cin), w1=_kaiming(k1, (cin, wk), cin),
                                    bn3=_bn_init(wk), w3=_kaiming(k2, (3, 3, wk, G), 9 * wk)))
    return p


def pack_rk_block_params(p, G, S, U, wk):
    """Stack/pad per-stage params so the fused kernel indexes them by [stage, part]."""
    def stack_1x1(stages, widths):
        scs, shs, ws = [], [], []
        for q, nparts in zip(stages, widths):
            scale, shift = _fold_bn(q['bn1'])
            sc = scale.reshape(nparts, 1, G)
            sh = shift.reshape(nparts, 1, G)
            w = q['w1'].reshape(nparts, G, wk)
            pad = S - nparts
            if pad:                        # pad part dim; zero weights kill padding
                sc = jnp.concatenate([sc, jnp.ones((pad, 1, G), jnp.float32)], 0)
                sh = jnp.concatenate([sh, jnp.zeros((pad, 1, G), jnp.float32)], 0)
                w = jnp.concatenate([w, jnp.zeros((pad, G, wk), jnp.float32)], 0)
            scs.append(sc); shs.append(sh); ws.append(w)
        return jnp.stack(scs), jnp.stack(shs), jnp.stack(ws).astype(_MXU_DTYPE)

    def stack_3x3(stages):
        s2s, b2s, w3s = [], [], []
        for q in stages:
            scale, shift = _fold_bn(q['bn3'])
            s2s.append(scale.reshape(1, wk)); b2s.append(shift.reshape(1, wk))
            w3s.append(q['w3'])
        return jnp.stack(s2s), jnp.stack(b2s), jnp.stack(w3s).astype(_MXU_DTYPE)

    s1i, b1i, w1i = stack_1x1(p['init'], [1 + j for j in range(S)])
    s2i, b2i, w3i = stack_3x3(p['init'])
    if p['update']:
        s1u, b1u, w1u = stack_1x1(p['update'], [S] * S)
        s2u, b2u, w3u = stack_3x3(p['update'])
    else:                                   # unused by the kernel when U == 0
        s1u = jnp.ones((S, S, 1, G), jnp.float32); b1u = jnp.zeros_like(s1u)
        w1u = jnp.zeros((S, S, G, wk), _MXU_DTYPE)
        s2u = jnp.ones((S, 1, wk), jnp.float32); b2u = jnp.zeros_like(s2u)
        w3u = jnp.zeros((S, 3, 3, wk, G), _MXU_DTYPE)
    return dict(s1i=s1i, b1i=b1i, w1i=w1i, s2i=s2i, b2i=b2i, w3i=w3i,
                s1u=s1u, b1u=b1u, w1u=w1u, s2u=s2u, b2u=b2u, w3u=w3u)


# ---------------------------------------------------------------------- reference

def rk_block_reference(x_nchw, p, G, S, U, wk):
    """Pure-JAX/XLA reference (same bf16-at-the-matmul convention, f32 accumulation)."""
    x = jnp.transpose(x_nchw, (0, 2, 3, 1)).astype(jnp.float32)

    def bn_relu(v, bn):
        scale, shift = _fold_bn(bn)
        return jnp.maximum(v * scale + shift, 0.0)

    def conv1x1(v, w):
        return jnp.einsum('nhwc,cd->nhwd', v.astype(_MXU_DTYPE), w.astype(_MXU_DTYPE),
                          preferred_element_type=jnp.float32)

    def conv3x3(v, w):
        return jax.lax.conv_general_dilated(
            v.astype(_MXU_DTYPE), w.astype(_MXU_DTYPE),
            window_strides=(1, 1), padding='SAME',
            dimension_numbers=('NHWC', 'HWIO', 'NHWC'),
            preferred_element_type=jnp.float32)

    bottom, blobs = x, []
    for j in range(S):
        q = p['init'][j]
        t = conv1x1(bn_relu(bottom, q['bn1']), q['w1'])
        nxt = conv3x3(bn_relu(t, q['bn3']), q['w3'])
        bottom = jnp.concatenate([bottom, nxt], axis=-1)
        blobs.append(nxt)
    for _ in range(U):
        middle, blobs = blobs, []
        for i in range(S):
            q = p['update'][i]
            bb = jnp.concatenate([x] + [middle[b] for b in range(S) if b != i], axis=-1)
            t = conv1x1(bn_relu(bb, q['bn1']), q['w1'])
            blobs.append(conv3x3(bn_relu(t, q['bn3']), q['w3']))
    out = x
    for b in blobs:
        out = out + b
    return jnp.transpose(out, (0, 3, 1, 2))


# -------------------------------------------------------------------------- main

if __name__ == "__main__":
    # RK_block(input_channels=G, growth_rate=G, s=S, update_num=U, keep_prob=1.0,
    #          if_b=True, wk=neck*G, replace=False)
    G, S, U, NECK = 8, 2, 1, 2
    WK = NECK * G
    N, H, W = 2, 16, 16

    key = jax.random.PRNGKey(0)
    pkey, xkey = jax.random.split(key)
    params = init_rk_block_params(pkey, G, S, U, WK)
    packed = pack_rk_block_params(params, G, S, U, WK)

    # PyTorch-style NCHW input.
    x = jax.random.normal(xkey, (N, G, H, W), jnp.float32)

    fwd = jax.jit(functools.partial(rk_block_forward, G=G, S=S, U=U, wk=WK))
    out = fwd(x, packed)
    jax.block_until_ready(out)

    ref = rk_block_reference(x, params, G, S, U, WK)
    assert out.shape == (N, G, H, W), out.shape
    assert bool(jnp.all(jnp.isfinite(out)))
    max_err = float(jnp.max(jnp.abs(out - ref)))
    assert max_err < 1e-2, f"kernel vs reference mismatch: {max_err}"
    print("KERNEL_OK")
</pallas_src>

<mosaic_0001>
module attributes {stable_mosaic.version = 11 : i64} {
  func.func @kernel(%arg0: i32, %arg1: memref<1x16x16x8xf32, #tpu.memory_space<vmem>>, %arg2: memref<2x2x1x8xf32, #tpu.memory_space<vmem>>, %arg3: memref<2x2x1x8xf32, #tpu.memory_space<vmem>>, %arg4: memref<2x2x8x16xbf16, #tpu.memory_space<vmem>>, %arg5: memref<2x1x16xf32, #tpu.memory_space<vmem>>, %arg6: memref<2x1x16xf32, #tpu.memory_space<vmem>>, %arg7: memref<2x3x3x16x8xbf16, #tpu.memory_space<vmem>>, %arg8: memref<2x2x1x8xf32, #tpu.memory_space<vmem>>, %arg9: memref<2x2x1x8xf32, #tpu.memory_space<vmem>>, %arg10: memref<2x2x8x16xbf16, #tpu.memory_space<vmem>>, %arg11: memref<2x1x16xf32, #tpu.memory_space<vmem>>, %arg12: memref<2x1x16xf32, #tpu.memory_space<vmem>>, %arg13: memref<2x3x3x16x8xbf16, #tpu.memory_space<vmem>>, %arg14: memref<1x16x16x8xf32, #tpu.memory_space<vmem>>, %arg15: memref<18x32x16xf32, #tpu.memory_space<vmem>>) attributes {dimension_semantics = [#tpu.dimension_semantics<parallel>], iteration_bounds = array<i64: 2>, scalar_prefetch = 0 : i64, scratch_operands = 1 : i64, tpu.core_type = #tpu.core_type<tc>, window_params = [{transform_indices = @transform_0, window_bounds = array<i64: 1, 16, 16, 8>}, {pipeline_mode = #tpu.pipeline_mode<synchronous>, transform_indices = @transform_1, window_bounds = array<i64: 2, 2, 1, 8>}, {pipeline_mode = #tpu.pipeline_mode<synchronous>, transform_indices = @transform_2, window_bounds = array<i64: 2, 2, 1, 8>}, {pipeline_mode = #tpu.pipeline_mode<synchronous>, transform_indices = @transform_3, window_bounds = array<i64: 2, 2, 8, 16>}, {pipeline_mode = #tpu.pipeline_mode<synchronous>, transform_indices = @transform_4, window_bounds = array<i64: 2, 1, 16>}, {pipeline_mode = #tpu.pipeline_mode<synchronous>, transform_indices = @transform_5, window_bounds = array<i64: 2, 1, 16>}, {pipeline_mode = #tpu.pipeline_mode<synchronous>, transform_indices = @transform_6, window_bounds = array<i64: 2, 3, 3, 16, 8>}, {pipeline_mode = #tpu.pipeline_mode<synchronous>, transform_indices = @transform_7, window_bounds = array<i64: 2, 2, 1, 8>}, {pipeline_mode = #tpu.pipeline_mode<synchronous>, transform_indices = @transform_8, window_bounds = array<i64: 2, 2, 1, 8>}, {pipeline_mode = #tpu.pipeline_mode<synchronous>, transform_indices = @transform_9, window_bounds = array<i64: 2, 2, 8, 16>}, {pipeline_mode = #tpu.pipeline_mode<synchronous>, transform_indices = @transform_10, window_bounds = array<i64: 2, 1, 16>}, {pipeline_mode = #tpu.pipeline_mode<synchronous>, transform_indices = @transform_11, window_bounds = array<i64: 2, 1, 16>}, {pipeline_mode = #tpu.pipeline_mode<synchronous>, transform_indices = @transform_12, window_bounds = array<i64: 2, 3, 3, 16, 8>}, {transform_indices = @transform_13, window_bounds = array<i64: 1, 16, 16, 8>}]} {
    %cst = arith.constant 0.000000e+00 : f32
    %0 = vector.broadcast %cst : f32 to vector<18x32x16xf32>
    %c0 = arith.constant 0 : index
    %c0_0 = arith.constant 0 : index
    %c0_1 = arith.constant 0 : index
    %1 = vector.load %arg15[%c0, %c0_0, %c0_1] : memref<18x32x16xf32, #tpu.memory_space<vmem>>, vector<18x32x16xf32>
    tpu.vector_store %arg15[%c0, %c0_0, %c0_1], %0 {strides = array<i32>} : memref<18x32x16xf32, #tpu.memory_space<vmem>>, vector<18x32x16xf32>,
    %c0_2 = arith.constant 0 : index
    %c0_3 = arith.constant 0 : index
    %c0_4 = arith.constant 0 : index
    %c0_5 = arith.constant 0 : index
    %2 = vector.load %arg1[%c0_2, %c0_3, %c0_4, %c0_5] : memref<1x16x16x8xf32, #tpu.memory_space<vmem>>, vector<1x16x16x8xf32>
    %3 = vector.shape_cast %2 : vector<1x16x16x8xf32> to vector<16x16x8xf32>
    %4 = vector.shape_cast %3 : vector<16x16x8xf32> to vector<256x8xf32>
    %cst_6 = arith.constant 0.000000e+00 : f32
    %5 = vector.broadcast %cst_6 : f32 to vector<256x16xf32>
    %c0_7 = arith.constant 0 : index
    %c0_8 = arith.constant 0 : index
    %c0_9 = arith.constant 0 : index
    %c0_10 = arith.constant 0 : index
    %6 = vector.load %arg2[%c0_7, %c0_8, %c0_9, %c0_10] : memref<2x2x1x8xf32, #tpu.memory_space<vmem>>, vector<1x1x1x8xf32>
    %7 = vector.shape_cast %6 : vector<1x1x1x8xf32> to vector<1x8xf32>
    %c0_11 = arith.constant 0 : index
    %c0_12 = arith.constant 0 : index
    %c0_13 = arith.constant 0 : index
    %c0_14 = arith.constant 0 : index
    %8 = vector.load %arg3[%c0_11, %c0_12, %c0_13, %c0_14] : memref<2x2x1x8xf32, #tpu.memory_space<vmem>>, vector<1x1x1x8xf32>
    %9 = vector.shape_cast %8 : vector<1x1x1x8xf32> to vector<1x8xf32>
    %10 = vector.broadcast %7 : vector<1x8xf32> to vector<256x8xf32>
    %11 = arith.mulf %4, %10 : vector<256x8xf32>
    %12 = vector.broadcast %9 : vector<1x8xf32> to vector<256x8xf32>
    %13 = arith.addf %11, %12 : vector<256x8xf32>
    %cst_15 = arith.constant 0.000000e+00 : f32
    %14 = vector.broadcast %cst_15 : f32 to vector<256x8xf32>
    %15 = arith.maximumf %13, %14 : vector<256x8xf32>
    %16 = arith.truncf %15 : vector<256x8xf32> to vector<256x8xbf16>
    %c0_16 = arith.constant 0 : index
    %c0_17 = arith.constant 0 : index
    %c0_18 = arith.constant 0 : index
    %c0_19 = arith.constant 0 : index
    %17 = vector.load %arg4[%c0_16, %c0_17, %c0_18, %c0_19] : memref<2x2x8x16xbf16, #tpu.memory_space<vmem>>, vector<1x1x8x16xbf16>
    %18 = vector.shape_cast %17 : vector<1x1x8x16xbf16> to vector<8x16xbf16>
    %cst_20 = arith.constant dense<0.000000e+00> : vector<256x16xf32>
    %19 = tpu.matmul %16, %18, %cst_20 {dimension_numbers = #tpu.dot_dimension_numbers<[1], [0], [0], [1], [0, 0, 1, 1], [], []>} : vector<256x8xbf16>, vector<8x16xbf16>, vector<256x16xf32> -> vector<256x16xf32>
    %20 = arith.addf %5, %19 : vector<256x16xf32>
    %c0_21 = arith.constant 0 : index
    %c0_22 = arith.constant 0 : index
    %c0_23 = arith.constant 0 : index
    %21 = vector.load %arg5[%c0_21, %c0_22, %c0_23] : memref<2x1x16xf32, #tpu.memory_space<vmem>>, vector<1x1x16xf32>
    %22 = vector.shape_cast %21 : vector<1x1x16xf32> to vector<1x16xf32>
    %c0_24 = arith.constant 0 : index
    %c0_25 = arith.constant 0 : index
    %c0_26 = arith.constant 0 : index
    %23 = vector.load %arg6[%c0_24, %c0_25, %c0_26] : memref<2x1x16xf32, #tpu.memory_space<vmem>>, vector<1x1x16xf32>
    %24 = vector.shape_cast %23 : vector<1x1x16xf32> to vector<1x16xf32>
    %25 = vector.broadcast %22 : vector<1x16xf32> to vector<256x16xf32>
    %26 = arith.mulf %20, %25 : vector<256x16xf32>
    %27 = vector.broadcast %24 : vector<1x16xf32> to vector<256x16xf32>
    %28 = arith.addf %26, %27 : vector<256x16xf32>
    %cst_27 = arith.constant 0.000000e+00 : f32
    %29 = vector.broadcast %cst_27 : f32 to vector<256x16xf32>
    %30 = arith.maximumf %28, %29 : vector<256x16xf32>
    %31 = vector.shape_cast %30 : vector<256x16xf32> to vector<16x16x16xf32>
    %c1 = arith.constant 1 : index
    %c8 = arith.constant 8 : index
    %c0_28 = arith.constant 0 : index
    %32 = vector.load %arg15[%c1, %c8, %c0_28] : memref<18x32x16xf32, #tpu.memory_space<vmem>>, vector<16x16x16xf32>
    tpu.vector_store %arg15[%c1, %c8, %c0_28], %31 {strides = array<i32>} : memref<18x32x16xf32, #tpu.memory_space<vmem>>, vector<16x16x16xf32>,
    %cst_29 = arith.constant 0.000000e+00 : f32
    %33 = vector.broadcast %cst_29 : f32 to vector<256x8xf32>
    %c0_30 = arith.constant 0 : index
    %c7 = arith.constant 7 : index
    %c0_31 = arith.constant 0 : index
    %34 = vector.load %arg15[%c0_30, %c7, %c0_31] : memref<18x32x16xf32, #tpu.memory_space<vmem>>, vector<16x16x16xf32>
    %35 = vector.shape_cast %34 : vector<16x16x16xf32> to vector<256x16xf32>
    %36 = arith.truncf %35 : vector<256x16xf32> to vector<256x16xbf16>
    %c0_32 = arith.constant 0 : index
    %c0_33 = arith.constant 0 : index
    %c0_34 = arith.constant 0 : index
    %c0_35 = arith.constant 0 : index
    %c0_36 = arith.constant 0 : index
    %37 = vector.load %arg7[%c0_32, %c0_33, %c0_34, %c0_35, %c0_36] : memref<2x3x3x16x8xbf16, #tpu.memory_space<vmem>>, vector<1x1x1x16x8xbf16>
    %38 = vector.shape_cast %37 : vector<1x1x1x16x8xbf16> to vector<16x8xbf16>
    %cst_37 = arith.constant dense<0.000000e+00> : vector<256x8xf32>
    %39 = tpu.matmul %36, %38, %cst_37 {dimension_numbers = #tpu.dot_dimension_numbers<[1], [0], [0], [1], [0, 0, 1, 1], [], []>} : vector<256x16xbf16>, vector<16x8xbf16>, vector<256x8xf32> -> vector<256x8xf32>
    %40 = arith.addf %33, %39 : vector<256x8xf32>
    %c0_38 = arith.constant 0 : index
    %c8_39 = arith.constant 8 : index
    %c0_40 = arith.constant 0 : index
    %41 = vector.load %arg15[%c0_38, %c8_39, %c0_40] : memref<18x32x16xf32, #tpu.memory_space<vmem>>, vector<16x16x16xf32>
    %42 = vector.shape_cast %41 : vector<16x16x16xf32> to vector<256x16xf32>
    %43 = arith.truncf %42 : vector<256x16xf32> to vector<256x16xbf16>
    %c0_41 = arith.constant 0 : index
    %c0_42 = arith.constant 0 : index
    %c1_43 = arith.constant 1 : index
    %c0_44 = arith.constant 0 : index
    %c0_45 = arith.constant 0 : index
    %44 = vector.load %arg7[%c0_41, %c0_42, %c1_43, %c0_44, %c0_45] : memref<2x3x3x16x8xbf16, #tpu.memory_space<vmem>>, vector<1x1x1x16x8xbf16>
    %45 = vector.shape_cast %44 : vector<1x1x1x16x8xbf16> to vector<16x8xbf16>
    %cst_46 = arith.constant dense<0.000000e+00> : vector<256x8xf32>
    %46 = tpu.matmul %43, %45, %cst_46 {dimension_numbers = #tpu.dot_dimension_numbers<[1], [0], [0], [1], [0, 0, 1, 1], [], []>} : vector<256x16xbf16>, vector<16x8xbf16>, vector<256x8xf32> -> vector<256x8xf32>
    %47 = arith.addf %40, %46 : vector<256x8xf32>
    %c0_47 = arith.constant 0 : index
    %c9 = arith.constant 9 : index
    %c0_48 = arith.constant 0 : index
    %48 = vector.load %arg15[%c0_47, %c9, %c0_48] : memref<18x32x16xf32, #tpu.memory_space<vmem>>, vector<16x16x16xf32>
    %49 = vector.shape_cast %48 : vector<16x16x16xf32> to vector<256x16xf32>
    %50 = arith.truncf %49 : vector<256x16xf32> to vector<256x16xbf16>
    %c0_49 = arith.constant 0 : index
    %c0_50 = arith.constant 0 : index
    %c2 = arith.constant 2 : index
    %c0_51 = arith.constant 0 : index
    %c0_52 = arith.constant 0 : index
    %51 = vector.load %arg7[%c0_49, %c0_50, %c2, %c0_51, %c0_52] : memref<2x3x3x16x8xbf16, #tpu.memory_space<vmem>>, vector<1x1x1x16x8xbf16>
    %52 = vector.shape_cast %51 : vector<1x1x1x16x8xbf16> to vector<16x8xbf16>
    %cst_53 = arith.constant dense<0.000000e+00> : vector<256x8xf32>
    %53 = tpu.matmul %50, %52, %cst_53 {dimension_numbers = #tpu.dot_dimension_numbers<[1], [0], [0], [1], [0, 0, 1, 1], [], []>} : vector<256x16xbf16>, vector<16x8xbf16>, vector<256x8xf32> -> vector<256x8xf32>
    %54 = arith.addf %47, %53 : vector<256x8xf32>
    %c1_54 = arith.constant 1 : index
    %c7_55 = arith.constant 7 : index
    %c0_56 = arith.constant 0 : index
    %55 = vector.load %arg15[%c1_54, %c7_55, %c0_56] : memref<18x32x16xf32, #tpu.memory_space<vmem>>, vector<16x16x16xf32>
    %56 = vector.shape_cast %55 : vector<16x16x16xf32> to vector<256x16xf32>
    %57 = arith.truncf %56 : vector<256x16xf32> to vector<256x16xbf16>
    %c0_57 = arith.constant 0 : index
    %c1_58 = arith.constant 1 : index
    %c0_59 = arith.constant 0 : index
    %c0_60 = arith.constant 0 : index
    %c0_61 = arith.constant 0 : index
    %58 = vector.load %arg7[%c0_57, %c1_58, %c0_59, %c0_60, %c0_61] : memref<2x3x3x16x8xbf16, #tpu.memory_space<vmem>>, vector<1x1x1x16x8xbf16>
    %59 = vector.shape_cast %58 : vector<1x1x1x16x8xbf16> to vector<16x8xbf16>
    %cst_62 = arith.constant dense<0.000000e+00> : vector<256x8xf32>
    %60 = tpu.matmul %57, %59, %cst_62 {dimension_numbers = #tpu.dot_dimension_numbers<[1], [0], [0], [1], [0, 0, 1, 1], [], []>} : vector<256x16xbf16>, vector<16x8xbf16>, vector<256x8xf32> -> vector<256x8xf32>
    %61 = arith.addf %54, %60 : vector<256x8xf32>
    %c1_63 = arith.constant 1 : index
    %c8_64 = arith.constant 8 : index
    %c0_65 = arith.constant 0 : index
    %62 = vector.load %arg15[%c1_63, %c8_64, %c0_65] : memref<18x32x16xf32, #tpu.memory_space<vmem>>, vector<16x16x16xf32>
    %63 = vector.shape_cast %62 : vector<16x16x16xf32> to vector<256x16xf32>
    %64 = arith.truncf %63 : vector<256x16xf32> to vector<256x16xbf16>
    %c0_66 = arith.constant 0 : index
    %c1_67 = arith.constant 1 : index
    %c1_68 = arith.constant 1 : index
    %c0_69 = arith.constant 0 : index
    %c0_70 = arith.constant 0 : index
    %65 = vector.load %arg7[%c0_66, %c1_67, %c1_68, %c0_69, %c0_70] : memref<2x3x3x16x8xbf16, #tpu.memory_space<vmem>>, vector<1x1x1x16x8xbf16>
    %66 = vector.shape_cast %65 : vector<1x1x1x16x8xbf16> to vector<16x8xbf16>
    %cst_71 = arith.constant dense<0.000000e+00> : vector<256x8xf32>
    %67 = tpu.matmul %64, %66, %cst_71 {dimension_numbers = #tpu.dot_dimension_numbers<[1], [0], [0], [1], [0, 0, 1, 1], [], []>} : vector<256x16xbf16>, vector<16x8xbf16>, vector<256x8xf32> -> vector<256x8xf32>
    %68 = arith.addf %61, %67 : vector<256x8xf32>
    %c1_72 = arith.constant 1 : index
    %c9_73 = arith.constant 9 : index
    %c0_74 = arith.constant 0 : index
    %69 = vector.load %arg15[%c1_72, %c9_73, %c0_74] : memref<18x32x16xf32, #tpu.memory_space<vmem>>, vector<16x16x16xf32>
    %70 = vector.shape_cast %69 : vector<16x16x16xf32> to vector<256x16xf32>
    %71 = arith.truncf %70 : vector<256x16xf32> to vector<256x16xbf16>
    %c0_75 = arith.constant 0 : index
    %c1_76 = arith.constant 1 : index
    %c2_77 = arith.constant 2 : index
    %c0_78 = arith.constant 0 : index
    %c0_79 = arith.constant 0 : index
    %72 = vector.load %arg7[%c0_75, %c1_76, %c2_77, %c0_78, %c0_79] : memref<2x3x3x16x8xbf16, #tpu.memory_space<vmem>>, vector<1x1x1x16x8xbf16>
    %73 = vector.shape_cast %72 : vector<1x1x1x16x8xbf16> to vector<16x8xbf16>
    %cst_80 = arith.constant dense<0.000000e+00> : vector<256x8xf32>
    %74 = tpu.matmul %71, %73, %cst_80 {dimension_numbers = #tpu.dot_dimension_numbers<[1], [0], [0], [1], [0, 0, 1, 1], [], []>} : vector<256x16xbf16>, vector<16x8xbf16>, vector<256x8xf32> -> vector<256x8xf32>
    %75 = arith.addf %68, %74 : vector<256x8xf32>
    %c2_81 = arith.constant 2 : index
    %c7_82 = arith.constant 7 : index
    %c0_83 = arith.constant 0 : index
    %76 = vector.load %arg15[%c2_81, %c7_82, %c0_83] : memref<18x32x16xf32, #tpu.memory_space<vmem>>, vector<16x16x16xf32>
    %77 = vector.shape_cast %76 : vector<16x16x16xf32> to vector<256x16xf32>
    %78 = arith.truncf %77 : vector<256x16xf32> to vector<256x16xbf16>
    %c0_84 = arith.constant 0 : index
    %c2_85 = arith.constant 2 : index
    %c0_86 = arith.constant 0 : index
    %c0_87 = arith.constant 0 : index
    %c0_88 = arith.constant 0 : index
    %79 = vector.load %arg7[%c0_84, %c2_85, %c0_86, %c0_87, %c0_88] : memref<2x3x3x16x8xbf16, #tpu.memory_space<vmem>>, vector<1x1x1x16x8xbf16>
    %80 = vector.shape_cast %79 : vector<1x1x1x16x8xbf16> to vector<16x8xbf16>
    %cst_89 = arith.constant dense<0.000000e+00> : vector<256x8xf32>
    %81 = tpu.matmul %78, %80, %cst_89 {dimension_numbers = #tpu.dot_dimension_numbers<[1], [0], [0], [1], [0, 0, 1, 1], [], []>} : vector<256x16xbf16>, vector<16x8xbf16>, vector<256x8xf32> -> vector<256x8xf32>
    %82 = arith.addf %75, %81 : vector<256x8xf32>
    %c2_90 = arith.constant 2 : index
    %c8_91 = arith.constant 8 : index
    %c0_92 = arith.constant 0 : index
    %83 = vector.load %arg15[%c2_90, %c8_91, %c0_92] : memref<18x32x16xf32, #tpu.memory_space<vmem>>, vector<16x16x16xf32>
    %84 = vector.shape_cast %83 : vector<16x16x16xf32> to vector<256x16xf32>
    %85 = arith.truncf %84 : vector<256x16xf32> to vector<256x16xbf16>
    %c0_93 = arith.constant 0 : index
    %c2_94 = arith.constant 2 : index
    %c1_95 = arith.constant 1 : index
    %c0_96 = arith.constant 0 : index
    %c0_97 = arith.constant 0 : index
    %86 = vector.load %arg7[%c0_93, %c2_94, %c1_95, %c0_96, %c0_97] : memref<2x3x3x16x8xbf16, #tpu.memory_space<vmem>>, vector<1x1x1x16x8xbf16>
    %87 = vector.shape_cast %86 : vector<1x1x1x16x8xbf16> to vector<16x8xbf16>
    %cst_98 = arith.constant dense<0.000000e+00> : vector<256x8xf32>
    %88 = tpu.matmul %85, %87, %cst_98 {dimension_numbers = #tpu.dot_dimension_numbers<[1], [0], [0], [1], [0, 0, 1, 1], [], []>} : vector<256x16xbf16>, vector<16x8xbf16>, vector<256x8xf32> -> vector<256x8xf32>
    %89 = arith.addf %82, %88 : vector<256x8xf32>
    %c2_99 = arith.constant 2 : index
    %c9_100 = arith.constant 9 : index
    %c0_101 = arith.constant 0 : index
    %90 = vector.load %arg15[%c2_99, %c9_100, %c0_101] : memref<18x32x16xf32, #tpu.memory_space<vmem>>, vector<16x16x16xf32>
    %91 = vector.shape_cast %90 : vector<16x16x16xf32> to vector<256x16xf32>
    %92 = arith.truncf %91 : vector<256x16xf32> to vector<256x16xbf16>
    %c0_102 = arith.constant 0 : index
    %c2_103 = arith.constant 2 : index
    %c2_104 = arith.constant 2 : index
    %c0_105 = arith.constant 0 : index
    %c0_106 = arith.constant 0 : index
    %93 = vector.load %arg7[%c0_102, %c2_103, %c2_104, %c0_105, %c0_106] : memref<2x3x3x16x8xbf16, #tpu.memory_space<vmem>>, vector<1x1x1x16x8xbf16>
    %94 = vector.shape_cast %93 : vector<1x1x1x16x8xbf16> to vector<16x8xbf16>
    %cst_107 = arith.constant dense<0.000000e+00> : vector<256x8xf32>
    %95 = tpu.matmul %92, %94, %cst_107 {dimension_numbers = #tpu.dot_dimension_numbers<[1], [0], [0], [1], [0, 0, 1, 1], [], []>} : vector<256x16xbf16>, vector<16x8xbf16>, vector<256x8xf32> -> vector<256x8xf32>
    %96 = arith.addf %89, %95 : vector<256x8xf32>
    %cst_108 = arith.constant 0.000000e+00 : f32
    %97 = vector.broadcast %cst_108 : f32 to vector<256x16xf32>
    %c1_109 = arith.constant 1 : index
    %c0_110 = arith.constant 0 : index
    %c0_111 = arith.constant 0 : index
    %c0_112 = arith.constant 0 : index
    %98 = vector.load %arg2[%c1_109, %c0_110, %c0_111, %c0_112] : memref<2x2x1x8xf32, #tpu.memory_space<vmem>>, vector<1x1x1x8xf32>
    %99 = vector.shape_cast %98 : vector<1x1x1x8xf32> to vector<1x8xf32>
    %c1_113 = arith.constant 1 : index
    %c0_114 = arith.constant 0 : index
    %c0_115 = arith.constant 0 : index
    %c0_116 = arith.constant 0 : index
    %100 = vector.load %arg3[%c1_113, %c0_114, %c0_115, %c0_116] : memref<2x2x1x8xf32, #tpu.memory_space<vmem>>, vector<1x1x1x8xf32>
    %101 = vector.shape_cast %100 : vector<1x1x1x8xf32> to vector<1x8xf32>
    %102 = vector.broadcast %99 : vector<1x8xf32> to vector<256x8xf32>
    %103 = arith.mulf %4, %102 : vector<256x8xf32>
    %104 = vector.broadcast %101 : vector<1x8xf32> to vector<256x8xf32>
    %105 = arith.addf %103, %104 : vector<256x8xf32>
    %cst_117 = arith.constant 0.000000e+00 : f32
    %106 = vector.broadcast %cst_117 : f32 to vector<256x8xf32>
    %107 = arith.maximumf %105, %106 : vector<256x8xf32>
    %108 = arith.truncf %107 : vector<256x8xf32> to vector<256x8xbf16>
    %c1_118 = arith.constant 1 : index
    %c0_119 = arith.constant 0 : index
    %c0_120 = arith.constant 0 : index
    %c0_121 = arith.constant 0 : index
    %109 = vector.load %arg4[%c1_118, %c0_119, %c0_120, %c0_121] : memref<2x2x8x16xbf16, #tpu.memory_space<vmem>>, vector<1x1x8x16xbf16>
    %110 = vector.shape_cast %109 : vector<1x1x8x16xbf16> to vector<8x16xbf16>
    %cst_122 = arith.constant dense<0.000000e+00> : vector<256x16xf32>
    %111 = tpu.matmul %108, %110, %cst_122 {dimension_numbers = #tpu.dot_dimension_numbers<[1], [0], [0], [1], [0, 0, 1, 1], [], []>} : vector<256x8xbf16>, vector<8x16xbf16>, vector<256x16xf32> -> vector<256x16xf32>
    %112 = arith.addf %97, %111 : vector<256x16xf32>
    %c1_123 = arith.constant 1 : index
    %c1_124 = arith.constant 1 : index
    %c0_125 = arith.constant 0 : index
    %c0_126 = arith.constant 0 : index
    %113 = vector.load %arg2[%c1_123, %c1_124, %c0_125, %c0_126] : memref<2x2x1x8xf32, #tpu.memory_space<vmem>>, vector<1x1x1x8xf32>
    %114 = vector.shape_cast %113 : vector<1x1x1x8xf32> to vector<1x8xf32>
    %c1_127 = arith.constant 1 : index
    %c1_128 = arith.constant 1 : index
    %c0_129 = arith.constant 0 : index
    %c0_130 = arith.constant 0 : index
    %115 = vector.load %arg3[%c1_127, %c1_128, %c0_129, %c0_130] : memref<2x2x1x8xf32, #tpu.memory_space<vmem>>, vector<1x1x1x8xf32>
    %116 = vector.shape_cast %115 : vector<1x1x1x8xf32> to vector<1x8xf32>
    %117 = vector.broadcast %114 : vector<1x8xf32> to vector<256x8xf32>
    %118 = arith.mulf %96, %117 : vector<256x8xf32>
    %119 = vector.broadcast %116 : vector<1x8xf32> to vector<256x8xf32>
    %120 = arith.addf %118, %119 : vector<256x8xf32>
    %cst_131 = arith.constant 0.000000e+00 : f32
    %121 = vector.broadcast %cst_131 : f32 to vector<256x8xf32>
    %122 = arith.maximumf %120, %121 : vector<256x8xf32>
    %123 = arith.truncf %122 : vector<256x8xf32> to vector<256x8xbf16>
    %c1_132 = arith.constant 1 : index
    %c1_133 = arith.constant 1 : index
    %c0_134 = arith.constant 0 : index
    %c0_135 = arith.constant 0 : index
    %124 = vector.load %arg4[%c1_132, %c1_133, %c0_134, %c0_135] : memref<2x2x8x16xbf16, #tpu.memory_space<vmem>>, vector<1x1x8x16xbf16>
    %125 = vector.shape_cast %124 : vector<1x1x8x16xbf16> to vector<8x16xbf16>
    %cst_136 = arith.constant dense<0.000000e+00> : vector<256x16xf32>
    %126 = tpu.matmul %123, %125, %cst_136 {dimension_numbers = #tpu.dot_dimension_numbers<[1], [0], [0], [1], [0, 0, 1, 1], [], []>} : vector<256x8xbf16>, vector<8x16xbf16>, vector<256x16xf32> -> vector<256x16xf32>
    %127 = arith.addf %112, %126 : vector<256x16xf32>
    %c1_137 = arith.constant 1 : index
    %c0_138 = arith.constant 0 : index
    %c0_139 = arith.constant 0 : index
    %128 = vector.load %arg5[%c1_137, %c0_138, %c0_139] : memref<2x1x16xf32, #tpu.memory_space<vmem>>, vector<1x1x16xf32>
    %129 = vector.shape_cast %128 : vector<1x1x16xf32> to vector<1x16xf32>
    %c1_140 = arith.constant 1 : index
    %c0_141 = arith.constant 0 : index
    %c0_142 = arith.constant 0 : index
    %130 = vector.load %arg6[%c1_140, %c0_141, %c0_142] : memref<2x1x16xf32, #tpu.memory_space<vmem>>, vector<1x1x16xf32>
    %131 = vector.shape_cast %130 : vector<1x1x16xf32> to vector<1x16xf32>
    %132 = vector.broadcast %129 : vector<1x16xf32> to vector<256x16xf32>
    %133 = arith.mulf %127, %132 : vector<256x16xf32>
    %134 = vector.broadcast %131 : vector<1x16xf32> to vector<256x16xf32>
    %135 = arith.addf %133, %134 : vector<256x16xf32>
    %cst_143 = arith.constant 0.000000e+00 : f32
    %136 = vector.broadcast %cst_143 : f32 to vector<256x16xf32>
    %137 = arith.maximumf %135, %136 : vector<256x16xf32>
    %138 = vector.shape_cast %137 : vector<256x16xf32> to vector<16x16x16xf32>
    %c1_144 = arith.constant 1 : index
    %c8_145 = arith.constant 8 : index
    %c0_146 = arith.constant 0 : index
    %139 = vector.load %arg15[%c1_144, %c8_145, %c0_146] : memref<18x32x16xf32, #tpu.memory_space<vmem>>, vector<16x16x16xf32>
    tpu.vector_store %arg15[%c1_144, %c8_145, %c0_146], %138 {strides = array<i32>} : memref<18x32x16xf32, #tpu.memory_space<vmem>>, vector<16x16x16xf32>,
    %cst_147 = arith.constant 0.000000e+00 : f32
    %140 = vector.broadcast %cst_147 : f32 to vector<256x8xf32>
    %c0_148 = arith.constant 0 : index
    %c7_149 = arith.constant 7 : index
    %c0_150 = arith.constant 0 : index
    %141 = vector.load %arg15[%c0_148, %c7_149, %c0_150] : memref<18x32x16xf32, #tpu.memory_space<vmem>>, vector<16x16x16xf32>
    %142 = vector.shape_cast %141 : vector<16x16x16xf32> to vector<256x16xf32>
    %143 = arith.truncf %142 : vector<256x16xf32> to vector<256x16xbf16>
    %c1_151 = arith.constant 1 : index
    %c0_152 = arith.constant 0 : index
    %c0_153 = arith.constant 0 : index
    %c0_154 = arith.constant 0 : index
    %c0_155 = arith.constant 0 : index
    %144 = vector.load %arg7[%c1_151, %c0_152, %c0_153, %c0_154, %c0_155] : memref<2x3x3x16x8xbf16, #tpu.memory_space<vmem>>, vector<1x1x1x16x8xbf16>
    %145 = vector.shape_cast %144 : vector<1x1x1x16x8xbf16> to vector<16x8xbf16>
    %cst_156 = arith.constant dense<0.000000e+00> : vector<256x8xf32>
    %146 = tpu.matmul %143, %145, %cst_156 {dimension_numbers = #tpu.dot_dimension_numbers<[1], [0], [0], [1], [0, 0, 1, 1], [], []>} : vector<256x16xbf16>, vector<16x8xbf16>, vector<256x8xf32> -> vector<256x8xf32>
    %147 = arith.addf %140, %146 : vector<256x8xf32>
    %c0_157 = arith.constant 0 : index
    %c8_158 = arith.constant 8 : index
    %c0_159 = arith.constant 0 : index
    %148 = vector.load %arg15[%c0_157, %c8_158, %c0_159] : memref<18x32x16xf32, #tpu.memory_space<vmem>>, vector<16x16x16xf32>
    %149 = vector.shape_cast %148 : vector<16x16x16xf32> to vector<256x16xf32>
    %150 = arith.truncf %149 : vector<256x16xf32> to vector<256x16xbf16>
    %c1_160 = arith.constant 1 : index
    %c0_161 = arith.constant 0 : index
    %c1_162 = arith.constant 1 : index
    %c0_163 = arith.constant 0 : index
    %c0_164 = arith.constant 0 : index
    %151 = vector.load %arg7[%c1_160, %c0_161, %c1_162, %c0_163, %c0_164] : memref<2x3x3x16x8xbf16, #tpu.memory_space<vmem>>, vector<1x1x1x16x8xbf16>
    %152 = vector.shape_cast %151 : vector<1x1x1x16x8xbf16> to vector<16x8xbf16>
    %cst_165 = arith.constant dense<0.000000e+00> : vector<256x8xf32>
    %153 = tpu.matmul %150, %152, %cst_165 {dimension_numbers = #tpu.dot_dimension_numbers<[1], [0], [0], [1], [0, 0, 1, 1], [], []>} : vector<256x16xbf16>, vector<16x8xbf16>, vector<256x8xf32> -> vector<256x8xf32>
    %154 = arith.addf %147, %153 : vector<256x8xf32>
    %c0_166 = arith.constant 0 : index
    %c9_167 = arith.constant 9 : index
    %c0_168 = arith.constant 0 : index
    %155 = vector.load %arg15[%c0_166, %c9_167, %c0_168] : memref<18x32x16xf32, #tpu.memory_space<vmem>>, vector<16x16x16xf32>
    %156 = vector.shape_cast %155 : vector<16x16x16xf32> to vector<256x16xf32>
    %157 = arith.truncf %156 : vector<256x16xf32> to vector<256x16xbf16>
    %c1_169 = arith.constant 1 : index
    %c0_170 = arith.constant 0 : index
    %c2_171 = arith.constant 2 : index
    %c0_172 = arith.constant 0 : index
    %c0_173 = arith.constant 0 : index
    %158 = vector.load %arg7[%c1_169, %c0_170, %c2_171, %c0_172, %c0_173] : memref<2x3x3x16x8xbf16, #tpu.memory_space<vmem>>, vector<1x1x1x16x8xbf16>
    %159 = vector.shape_cast %158 : vector<1x1x1x16x8xbf16> to vector<16x8xbf16>
    %cst_174 = arith.constant dense<0.000000e+00> : vector<256x8xf32>
    %160 = tpu.matmul %157, %159, %cst_174 {dimension_numbers = #tpu.dot_dimension_numbers<[1], [0], [0], [1], [0, 0, 1, 1], [], []>} : vector<256x16xbf16>, vector<16x8xbf16>, vector<256x8xf32> -> vector<256x8xf32>
    %161 = arith.addf %154, %160 : vector<256x8xf32>
    %c1_175 = arith.constant 1 : index
    %c7_176 = arith.constant 7 : index
    %c0_177 = arith.constant 0 : index
    %162 = vector.load %arg15[%c1_175, %c7_176, %c0_177] : memref<18x32x16xf32, #tpu.memory_space<vmem>>, vector<16x16x16xf32>
    %163 = vector.shape_cast %162 : vector<16x16x16xf32> to vector<256x16xf32>
    %164 = arith.truncf %163 : vector<256x16xf32> to vector<256x16xbf16>
    %c1_178 = arith.constant 1 : index
    %c1_179 = arith.constant 1 : index
    %c0_180 = arith.constant 0 : index
    %c0_181 = arith.constant 0 : index
    %c0_182 = arith.constant 0 : index
    %165 = vector.load %arg7[%c1_178, %c1_179, %c0_180, %c0_181, %c0_182] : memref<2x3x3x16x8xbf16, #tpu.memory_space<vmem>>, vector<1x1x1x16x8xbf16>
    %166 = vector.shape_cast %165 : vector<1x1x1x16x8xbf16> to vector<16x8xbf16>
    %cst_183 = arith.constant dense<0.000000e+00> : vector<256x8xf32>
    %167 = tpu.matmul %164, %166, %cst_183 {dimension_numbers = #tpu.dot_dimension_numbers<[1], [0], [0], [1], [0, 0, 1, 1], [], []>} : vector<256x16xbf16>, vector<16x8xbf16>, vector<256x8xf32> -> vector<256x8xf32>
    %168 = arith.addf %161, %167 : vector<256x8xf32>
    %c1_184 = arith.constant 1 : index
    %c8_185 = arith.constant 8 : index
    %c0_186 = arith.constant 0 : index
    %169 = vector.load %arg15[%c1_184, %c8_185, %c0_186] : memref<18x32x16xf32, #tpu.memory_space<vmem>>, vector<16x16x16xf32>
    %170 = vector.shape_cast %169 : vector<16x16x16xf32> to vector<256x16xf32>
    %171 = arith.truncf %170 : vector<256x16xf32> to vector<256x16xbf16>
    %c1_187 = arith.constant 1 : index
    %c1_188 = arith.constant 1 : index
    %c1_189 = arith.constant 1 : index
    %c0_190 = arith.constant 0 : index
    %c0_191 = arith.constant 0 : index
    %172 = vector.load %arg7[%c1_187, %c1_188, %c1_189, %c0_190, %c0_191] : memref<2x3x3x16x8xbf16, #tpu.memory_space<vmem>>, vector<1x1x1x16x8xbf16>
    %173 = vector.shape_cast %172 : vector<1x1x1x16x8xbf16> to vector<16x8xbf16>
    %cst_192 = arith.constant dense<0.000000e+00> : vector<256x8xf32>
    %174 = tpu.matmul %171, %173, %cst_192 {dimension_numbers = #tpu.dot_dimension_numbers<[1], [0], [0], [1], [0, 0, 1, 1], [], []>} : vector<256x16xbf16>, vector<16x8xbf16>, vector<256x8xf32> -> vector<256x8xf32>
    %175 = arith.addf %168, %174 : vector<256x8xf32>
    %c1_193 = arith.constant 1 : index
    %c9_194 = arith.constant 9 : index
    %c0_195 = arith.constant 0 : index
    %176 = vector.load %arg15[%c1_193, %c9_194, %c0_195] : memref<18x32x16xf32, #tpu.memory_space<vmem>>, vector<16x16x16xf32>
    %177 = vector.shape_cast %176 : vector<16x16x16xf32> to vector<256x16xf32>
    %178 = arith.truncf %177 : vector<256x16xf32> to vector<256x16xbf16>
    %c1_196 = arith.constant 1 : index
    %c1_197 = arith.constant 1 : index
    %c2_198 = arith.constant 2 : index
    %c0_199 = arith.constant 0 : index
    %c0_200 = arith.constant 0 : index
    %179 = vector.load %arg7[%c1_196, %c1_197, %c2_198, %c0_199, %c0_200] : memref<2x3x3x16x8xbf16, #tpu.memory_space<vmem>>, vector<1x1x1x16x8xbf16>
    %180 = vector.shape_cast %179 : vector<1x1x1x16x8xbf16> to vector<16x8xbf16>
    %cst_201 = arith.constant dense<0.000000e+00> : vector<256x8xf32>
    %181 = tpu.matmul %178, %180, %cst_201 {dimension_numbers = #tpu.dot_dimension_numbers<[1], [0], [0], [1], [0, 0, 1, 1], [], []>} : vector<256x16xbf16>, vector<16x8xbf16>, vector<256x8xf32> -> vector<256x8xf32>
    %182 = arith.addf %175, %181 : vector<256x8xf32>
    %c2_202 = arith.constant 2 : index
    %c7_203 = arith.constant 7 : index
    %c0_204 = arith.constant 0 : index
    %183 = vector.load %arg15[%c2_202, %c7_203, %c0_204] : memref<18x32x16xf32, #tpu.memory_space<vmem>>, vector<16x16x16xf32>
    %184 = vector.shape_cast %183 : vector<16x16x16xf32> to vector<256x16xf32>
    %185 = arith.truncf %184 : vector<256x16xf32> to vector<256x16xbf16>
    %c1_205 = arith.constant 1 : index
    %c2_206 = arith.constant 2 : index
    %c0_207 = arith.constant 0 : index
    %c0_208 = arith.constant 0 : index
    %c0_209 = arith.constant 0 : index
    %186 = vector.load %arg7[%c1_205, %c2_206, %c0_207, %c0_208, %c0_209] : memref<2x3x3x16x8xbf16, #tpu.memory_space<vmem>>, vector<1x1x1x16x8xbf16>
    %187 = vector.shape_cast %186 : vector<1x1x1x16x8xbf16> to vector<16x8xbf16>
    %cst_210 = arith.constant dense<0.000000e+00> : vector<256x8xf32>
    %188 = tpu.matmul %185, %187, %cst_210 {dimension_numbers = #tpu.dot_dimension_numbers<[1], [0], [0], [1], [0, 0, 1, 1], [], []>} : vector<256x16xbf16>, vector<16x8xbf16>, vector<256x8xf32> -> vector<256x8xf32>
    %189 = arith.addf %182, %188 : vector<256x8xf32>
    %c2_211 = arith.constant 2 : index
    %c8_212 = arith.constant 8 : index
    %c0_213 = arith.constant 0 : index
    %190 = vector.load %arg15[%c2_211, %c8_212, %c0_213] : memref<18x32x16xf32, #tpu.memory_space<vmem>>, vector<16x16x16xf32>
    %191 = vector.shape_cast %190 : vector<16x16x16xf32> to vector<256x16xf32>
    %192 = arith.truncf %191 : vector<256x16xf32> to vector<256x16xbf16>
    %c1_214 = arith.constant 1 : index
    %c2_215 = arith.constant 2 : index
    %c1_216 = arith.constant 1 : index
    %c0_217 = arith.constant 0 : index
    %c0_218 = arith.constant 0 : index
    %193 = vector.load %arg7[%c1_214, %c2_215, %c1_216, %c0_217, %c0_218] : memref<2x3x3x16x8xbf16, #tpu.memory_space<vmem>>, vector<1x1x1x16x8xbf16>
    %194 = vector.shape_cast %193 : vector<1x1x1x16x8xbf16> to vector<16x8xbf16>
    %cst_219 = arith.constant dense<0.000000e+00> : vector<256x8xf32>
    %195 = tpu.matmul %192, %194, %cst_219 {dimension_numbers = #tpu.dot_dimension_numbers<[1], [0], [0], [1], [0, 0, 1, 1], [], []>} : vector<256x16xbf16>, vector<16x8xbf16>, vector<256x8xf32> -> vector<256x8xf32>
    %196 = arith.addf %189, %195 : vector<256x8xf32>
    %c2_220 = arith.constant 2 : index
    %c9_221 = arith.constant 9 : index
    %c0_222 = arith.constant 0 : index
    %197 = vector.load %arg15[%c2_220, %c9_221, %c0_222] : memref<18x32x16xf32, #tpu.memory_space<vmem>>, vector<16x16x16xf32>
    %198 = vector.shape_cast %197 : vector<16x16x16xf32> to vector<256x16xf32>
    %199 = arith.truncf %198 : vector<256x16xf32> to vector<256x16xbf16>
    %c1_223 = arith.constant 1 : index
    %c2_224 = arith.constant 2 : index
    %c2_225 = arith.constant 2 : index
    %c0_226 = arith.constant 0 : index
    %c0_227 = arith.constant 0 : index
    %200 = vector.load %arg7[%c1_223, %c2_224, %c2_225, %c0_226, %c0_227] : memref<2x3x3x16x8xbf16, #tpu.memory_space<vmem>>, vector<1x1x1x16x8xbf16>
    %201 = vector.shape_cast %200 : vector<1x1x1x16x8xbf16> to vector<16x8xbf16>
    %cst_228 = arith.constant dense<0.000000e+00> : vector<256x8xf32>
    %202 = tpu.matmul %199, %201, %cst_228 {dimension_numbers = #tpu.dot_dimension_numbers<[1], [0], [0], [1], [0, 0, 1, 1], [], []>} : vector<256x16xbf16>, vector<16x8xbf16>, vector<256x8xf32> -> vector<256x8xf32>
    %203 = arith.addf %196, %202 : vector<256x8xf32>
    %cst_229 = arith.constant 0.000000e+00 : f32
    %204 = vector.broadcast %cst_229 : f32 to vector<256x16xf32>
    %c0_230 = arith.constant 0 : index
    %c0_231 = arith.constant 0 : index
    %c0_232 = arith.constant 0 : index
    %c0_233 = arith.constant 0 : index
    %205 = vector.load %arg8[%c0_230, %c0_231, %c0_232, %c0_233] : memref<2x2x1x8xf32, #tpu.memory_space<vmem>>, vector<1x1x1x8xf32>
    %206 = vector.shape_cast %205 : vector<1x1x1x8xf32> to vector<1x8xf32>
    %c0_234 = arith.constant 0 : index
    %c0_235 = arith.constant 0 : index
    %c0_236 = arith.constant 0 : index
    %c0_237 = arith.constant 0 : index
    %207 = vector.load %arg9[%c0_234, %c0_235, %c0_236, %c0_237] : memref<2x2x1x8xf32, #tpu.memory_space<vmem>>, vector<1x1x1x8xf32>
    %208 = vector.shape_cast %207 : vector<1x1x1x8xf32> to vector<1x8xf32>
    %209 = vector.broadcast %206 : vector<1x8xf32> to vector<256x8xf32>
    %210 = arith.mulf %4, %209 : vector<256x8xf32>
    %211 = vector.broadcast %208 : vector<1x8xf32> to vector<256x8xf32>
    %212 = arith.addf %210, %211 : vector<256x8xf32>
    %cst_238 = arith.constant 0.000000e+00 : f32
    %213 = vector.broadcast %cst_238 : f32 to vector<256x8xf32>
    %214 = arith.maximumf %212, %213 : vector<256x8xf32>
    %215 = arith.truncf %214 : vector<256x8xf32> to vector<256x8xbf16>
    %c0_239 = arith.constant 0 : index
    %c0_240 = arith.constant 0 : index
    %c0_241 = arith.constant 0 : index
    %c0_242 = arith.constant 0 : index
    %216 = vector.load %arg10[%c0_239, %c0_240, %c0_241, %c0_242] : memref<2x2x8x16xbf16, #tpu.memory_space<vmem>>, vector<1x1x8x16xbf16>
    %217 = vector.shape_cast %216 : vector<1x1x8x16xbf16> to vector<8x16xbf16>
    %cst_243 = arith.constant dense<0.000000e+00> : vector<256x16xf32>
    %218 = tpu.matmul %215, %217, %cst_243 {dimension_numbers = #tpu.dot_dimension_numbers<[1], [0], [0], [1], [0, 0, 1, 1], [], []>} : vector<256x8xbf16>, vector<8x16xbf16>, vector<256x16xf32> -> vector<256x16xf32>
    %219 = arith.addf %204, %218 : vector<256x16xf32>
    %c0_244 = arith.constant 0 : index
    %c1_245 = arith.constant 1 : index
    %c0_246 = arith.constant 0 : index
    %c0_247 = arith.constant 0 : index
    %220 = vector.load %arg8[%c0_244, %c1_245, %c0_246, %c0_247] : memref<2x2x1x8xf32, #tpu.memory_space<vmem>>, vector<1x1x1x8xf32>
    %221 = vector.shape_cast %220 : vector<1x1x1x8xf32> to vector<1x8xf32>
    %c0_248 = arith.constant 0 : index
    %c1_249 = arith.constant 1 : index
    %c0_250 = arith.constant 0 : index
    %c0_251 = arith.constant 0 : index
    %222 = vector.load %arg9[%c0_248, %c1_249, %c0_250, %c0_251] : memref<2x2x1x8xf32, #tpu.memory_space<vmem>>, vector<1x1x1x8xf32>
    %223 = vector.shape_cast %222 : vector<1x1x1x8xf32> to vector<1x8xf32>
    %224 = vector.broadcast %221 : vector<1x8xf32> to vector<256x8xf32>
    %225 = arith.mulf %203, %224 : vector<256x8xf32>
    %226 = vector.broadcast %223 : vector<1x8xf32> to vector<256x8xf32>
    %227 = arith.addf %225, %226 : vector<256x8xf32>
    %cst_252 = arith.constant 0.000000e+00 : f32
    %228 = vector.broadcast %cst_252 : f32 to vector<256x8xf32>
    %229 = arith.maximumf %227, %228 : vector<256x8xf32>
    %230 = arith.truncf %229 : vector<256x8xf32> to vector<256x8xbf16>
    %c0_253 = arith.constant 0 : index
    %c1_254 = arith.constant 1 : index
    %c0_255 = arith.constant 0 : index
    %c0_256 = arith.constant 0 : index
    %231 = vector.load %arg10[%c0_253, %c1_254, %c0_255, %c0_256] : memref<2x2x8x16xbf16, #tpu.memory_space<vmem>>, vector<1x1x8x16xbf16>
    %232 = vector.shape_cast %231 : vector<1x1x8x16xbf16> to vector<8x16xbf16>
    %cst_257 = arith.constant dense<0.000000e+00> : vector<256x16xf32>
    %233 = tpu.matmul %230, %232, %cst_257 {dimension_numbers = #tpu.dot_dimension_numbers<[1], [0], [0], [1], [0, 0, 1, 1], [], []>} : vector<256x8xbf16>, vector<8x16xbf16>, vector<256x16xf32> -> vector<256x16xf32>
    %234 = arith.addf %219, %233 : vector<256x16xf32>
    %c0_258 = arith.constant 0 : index
    %c0_259 = arith.constant 0 : index
    %c0_260 = arith.constant 0 : index
    %235 = vector.load %arg11[%c0_258, %c0_259, %c0_260] : memref<2x1x16xf32, #tpu.memory_space<vmem>>, vector<1x1x16xf32>
    %236 = vector.shape_cast %235 : vector<1x1x16xf32> to vector<1x16xf32>
    %c0_261 = arith.constant 0 : index
    %c0_262 = arith.constant 0 : index
    %c0_263 = arith.constant 0 : index
    %237 = vector.load %arg12[%c0_261, %c0_262, %c0_263] : memref<2x1x16xf32, #tpu.memory_space<vmem>>, vector<1x1x16xf32>
    %238 = vector.shape_cast %237 : vector<1x1x16xf32> to vector<1x16xf32>
    %239 = vector.broadcast %236 : vector<1x16xf32> to vector<256x16xf32>
    %240 = arith.mulf %234, %239 : vector<256x16xf32>
    %241 = vector.broadcast %238 : vector<1x16xf32> to vector<256x16xf32>
    %242 = arith.addf %240, %241 : vector<256x16xf32>
    %cst_264 = arith.constant 0.000000e+00 : f32
    %243 = vector.broadcast %cst_264 : f32 to vector<256x16xf32>
    %244 = arith.maximumf %242, %243 : vector<256x16xf32>
    %245 = vector.shape_cast %244 : vector<256x16xf32> to vector<16x16x16xf32>
    %c1_265 = arith.constant 1 : index
    %c8_266 = arith.constant 8 : index
    %c0_267 = arith.constant 0 : index
    %246 = vector.load %arg15[%c1_265, %c8_266, %c0_267] : memref<18x32x16xf32, #tpu.memory_space<vmem>>, vector<16x16x16xf32>
    tpu.vector_store %arg15[%c1_265, %c8_266, %c0_267], %245 {strides = array<i32>} : memref<18x32x16xf32, #tpu.memory_space<vmem>>, vector<16x16x16xf32>,
    %cst_268 = arith.constant 0.000000e+00 : f32
    %247 = vector.broadcast %cst_268 : f32 to vector<256x8xf32>
    %c0_269 = arith.constant 0 : index
    %c7_270 = arith.constant 7 : index
    %c0_271 = arith.constant 0 : index
    %248 = vector.load %arg15[%c0_269, %c7_270, %c0_271] : memref<18x32x16xf32, #tpu.memory_space<vmem>>, vector<16x16x16xf32>
    %249 = vector.shape_cast %248 : vector<16x16x16xf32> to vector<256x16xf32>
    %250 = arith.truncf %249 : vector<256x16xf32> to vector<256x16xbf16>
    %c0_272 = arith.constant 0 : index
    %c0_273 = arith.constant 0 : index
    %c0_274 = arith.constant 0 : index
    %c0_275 = arith.constant 0 : index
    %c0_276 = arith.constant 0 : index
    %251 = vector.load %arg13[%c0_272, %c0_273, %c0_274, %c0_275, %c0_276] : memref<2x3x3x16x8xbf16, #tpu.memory_space<vmem>>, vector<1x1x1x16x8xbf16>
    %252 = vector.shape_cast %251 : vector<1x1x1x16x8xbf16> to vector<16x8xbf16>
    %cst_277 = arith.constant dense<0.000000e+00> : vector<256x8xf32>
    %253 = tpu.matmul %250, %252, %cst_277 {dimension_numbers = #tpu.dot_dimension_numbers<[1], [0], [0], [1], [0, 0, 1, 1], [], []>} : vector<256x16xbf16>, vector<16x8xbf16>, vector<256x8xf32> -> vector<256x8xf32>
    %254 = arith.addf %247, %253 : vector<256x8xf32>
    %c0_278 = arith.constant 0 : index
    %c8_279 = arith.constant 8 : index
    %c0_280 = arith.constant 0 : index
    %255 = vector.load %arg15[%c0_278, %c8_279, %c0_280] : memref<18x32x16xf32, #tpu.memory_space<vmem>>, vector<16x16x16xf32>
    %256 = vector.shape_cast %255 : vector<16x16x16xf32> to vector<256x16xf32>
    %257 = arith.truncf %256 : vector<256x16xf32> to vector<256x16xbf16>
    %c0_281 = arith.constant 0 : index
    %c0_282 = arith.constant 0 : index
    %c1_283 = arith.constant 1 : index
    %c0_284 = arith.constant 0 : index
    %c0_285 = arith.constant 0 : index
    %258 = vector.load %arg13[%c0_281, %c0_282, %c1_283, %c0_284, %c0_285] : memref<2x3x3x16x8xbf16, #tpu.memory_space<vmem>>, vector<1x1x1x16x8xbf16>
    %259 = vector.shape_cast %258 : vector<1x1x1x16x8xbf16> to vector<16x8xbf16>
    %cst_286 = arith.constant dense<0.000000e+00> : vector<256x8xf32>
    %260 = tpu.matmul %257, %259, %cst_286 {dimension_numbers = #tpu.dot_dimension_numbers<[1], [0], [0], [1], [0, 0, 1, 1], [], []>} : vector<256x16xbf16>, vector<16x8xbf16>, vector<256x8xf32> -> vector<256x8xf32>
    %261 = arith.addf %254, %260 : vector<256x8xf32>
    %c0_287 = arith.constant 0 : index
    %c9_288 = arith.constant 9 : index
    %c0_289 = arith.constant 0 : index
    %262 = vector.load %arg15[%c0_287, %c9_288, %c0_289] : memref<18x32x16xf32, #tpu.memory_space<vmem>>, vector<16x16x16xf32>
    %263 = vector.shape_cast %262 : vector<16x16x16xf32> to vector<256x16xf32>
    %264 = arith.truncf %263 : vector<256x16xf32> to vector<256x16xbf16>
    %c0_290 = arith.constant 0 : index
    %c0_291 = arith.constant 0 : index
    %c2_292 = arith.constant 2 : index
    %c0_293 = arith.constant 0 : index
    %c0_294 = arith.constant 0 : index
    %265 = vector.load %arg13[%c0_290, %c0_291, %c2_292, %c0_293, %c0_294] : memref<2x3x3x16x8xbf16, #tpu.memory_space<vmem>>, vector<1x1x1x16x8xbf16>
    %266 = vector.shape_cast %265 : vector<1x1x1x16x8xbf16> to vector<16x8xbf16>
    %cst_295 = arith.constant dense<0.000000e+00> : vector<256x8xf32>
    %267 = tpu.matmul %264, %266, %cst_295 {dimension_numbers = #tpu.dot_dimension_numbers<[1], [0], [0], [1], [0, 0, 1, 1], [], []>} : vector<256x16xbf16>, vector<16x8xbf16>, vector<256x8xf32> -> vector<256x8xf32>
    %268 = arith.addf %261, %267 : vector<256x8xf32>
    %c1_296 = arith.constant 1 : index
    %c7_297 = arith.constant 7 : index
    %c0_298 = arith.constant 0 : index
    %269 = vector.load %arg15[%c1_296, %c7_297, %c0_298] : memref<18x32x16xf32, #tpu.memory_space<vmem>>, vector<16x16x16xf32>
    %270 = vector.shape_cast %269 : vector<16x16x16xf32> to vector<256x16xf32>
    %271 = arith.truncf %270 : vector<256x16xf32> to vector<256x16xbf16>
    %c0_299 = arith.constant 0 : index
    %c1_300 = arith.constant 1 : index
    %c0_301 = arith.constant 0 : index
    %c0_302 = arith.constant 0 : index
    %c0_303 = arith.constant 0 : index
    %272 = vector.load %arg13[%c0_299, %c1_300, %c0_301, %c0_302, %c0_303] : memref<2x3x3x16x8xbf16, #tpu.memory_space<vmem>>, vector<1x1x1x16x8xbf16>
    %273 = vector.shape_cast %272 : vector<1x1x1x16x8xbf16> to vector<16x8xbf16>
    %cst_304 = arith.constant dense<0.000000e+00> : vector<256x8xf32>
    %274 = tpu.matmul %271, %273, %cst_304 {dimension_numbers = #tpu.dot_dimension_numbers<[1], [0], [0], [1], [0, 0, 1, 1], [], []>} : vector<256x16xbf16>, vector<16x8xbf16>, vector<256x8xf32> -> vector<256x8xf32>
    %275 = arith.addf %268, %274 : vector<256x8xf32>
    %c1_305 = arith.constant 1 : index
    %c8_306 = arith.constant 8 : index
    %c0_307 = arith.constant 0 : index
    %276 = vector.load %arg15[%c1_305, %c8_306, %c0_307] : memref<18x32x16xf32, #tpu.memory_space<vmem>>, vector<16x16x16xf32>
    %277 = vector.shape_cast %276 : vector<16x16x16xf32> to vector<256x16xf32>
    %278 = arith.truncf %277 : vector<256x16xf32> to vector<256x16xbf16>
    %c0_308 = arith.constant 0 : index
    %c1_309 = arith.constant 1 : index
    %c1_310 = arith.constant 1 : index
    %c0_311 = arith.constant 0 : index
    %c0_312 = arith.constant 0 : index
    %279 = vector.load %arg13[%c0_308, %c1_309, %c1_310, %c0_311, %c0_312] : memref<2x3x3x16x8xbf16, #tpu.memory_space<vmem>>, vector<1x1x1x16x8xbf16>
    %280 = vector.shape_cast %279 : vector<1x1x1x16x8xbf16> to vector<16x8xbf16>
    %cst_313 = arith.constant dense<0.000000e+00> : vector<256x8xf32>
    %281 = tpu.matmul %278, %280, %cst_313 {dimension_numbers = #tpu.dot_dimension_numbers<[1], [0], [0], [1], [0, 0, 1, 1], [], []>} : vector<256x16xbf16>, vector<16x8xbf16>, vector<256x8xf32> -> vector<256x8xf32>
    %282 = arith.addf %275, %281 : vector<256x8xf32>
    %c1_314 = arith.constant 1 : index
    %c9_315 = arith.constant 9 : index
    %c0_316 = arith.constant 0 : index
    %283 = vector.load %arg15[%c1_314, %c9_315, %c0_316] : memref<18x32x16xf32, #tpu.memory_space<vmem>>, vector<16x16x16xf32>
    %284 = vector.shape_cast %283 : vector<16x16x16xf32> to vector<256x16xf32>
    %285 = arith.truncf %284 : vector<256x16xf32> to vector<256x16xbf16>
    %c0_317 = arith.constant 0 : index
    %c1_318 = arith.constant 1 : index
    %c2_319 = arith.constant 2 : index
    %c0_320 = arith.constant 0 : index
    %c0_321 = arith.constant 0 : index
    %286 = vector.load %arg13[%c0_317, %c1_318, %c2_319, %c0_320, %c0_321] : memref<2x3x3x16x8xbf16, #tpu.memory_space<vmem>>, vector<1x1x1x16x8xbf16>
    %287 = vector.shape_cast %286 : vector<1x1x1x16x8xbf16> to vector<16x8xbf16>
    %cst_322 = arith.constant dense<0.000000e+00> : vector<256x8xf32>
    %288 = tpu.matmul %285, %287, %cst_322 {dimension_numbers = #tpu.dot_dimension_numbers<[1], [0], [0], [1], [0, 0, 1, 1], [], []>} : vector<256x16xbf16>, vector<16x8xbf16>, vector<256x8xf32> -> vector<256x8xf32>
    %289 = arith.addf %282, %288 : vector<256x8xf32>
    %c2_323 = arith.constant 2 : index
    %c7_324 = arith.constant 7 : index
    %c0_325 = arith.constant 0 : index
    %290 = vector.load %arg15[%c2_323, %c7_324, %c0_325] : memref<18x32x16xf32, #tpu.memory_space<vmem>>, vector<16x16x16xf32>
    %291 = vector.shape_cast %290 : vector<16x16x16xf32> to vector<256x16xf32>
    %292 = arith.truncf %291 : vector<256x16xf32> to vector<256x16xbf16>
    %c0_326 = arith.constant 0 : index
    %c2_327 = arith.constant 2 : index
    %c0_328 = arith.constant 0 : index
    %c0_329 = arith.constant 0 : index
    %c0_330 = arith.constant 0 : index
    %293 = vector.load %arg13[%c0_326, %c2_327, %c0_328, %c0_329, %c0_330] : memref<2x3x3x16x8xbf16, #tpu.memory_space<vmem>>, vector<1x1x1x16x8xbf16>
    %294 = vector.shape_cast %293 : vector<1x1x1x16x8xbf16> to vector<16x8xbf16>
    %cst_331 = arith.constant dense<0.000000e+00> : vector<256x8xf32>
    %295 = tpu.matmul %292, %294, %cst_331 {dimension_numbers = #tpu.dot_dimension_numbers<[1], [0], [0], [1], [0, 0, 1, 1], [], []>} : vector<256x16xbf16>, vector<16x8xbf16>, vector<256x8xf32> -> vector<256x8xf32>
    %296 = arith.addf %289, %295 : vector<256x8xf32>
    %c2_332 = arith.constant 2 : index
    %c8_333 = arith.constant 8 : index
    %c0_334 = arith.constant 0 : index
    %297 = vector.load %arg15[%c2_332, %c8_333, %c0_334] : memref<18x32x16xf32, #tpu.memory_space<vmem>>, vector<16x16x16xf32>
    %298 = vector.shape_cast %297 : vector<16x16x16xf32> to vector<256x16xf32>
    %299 = arith.truncf %298 : vector<256x16xf32> to vector<256x16xbf16>
    %c0_335 = arith.constant 0 : index
    %c2_336 = arith.constant 2 : index
    %c1_337 = arith.constant 1 : index
    %c0_338 = arith.constant 0 : index
    %c0_339 = arith.constant 0 : index
    %300 = vector.load %arg13[%c0_335, %c2_336, %c1_337, %c0_338, %c0_339] : memref<2x3x3x16x8xbf16, #tpu.memory_space<vmem>>, vector<1x1x1x16x8xbf16>
    %301 = vector.shape_cast %300 : vector<1x1x1x16x8xbf16> to vector<16x8xbf16>
    %cst_340 = arith.constant dense<0.000000e+00> : vector<256x8xf32>
    %302 = tpu.matmul %299, %301, %cst_340 {dimension_numbers = #tpu.dot_dimension_numbers<[1], [0], [0], [1], [0, 0, 1, 1], [], []>} : vector<256x16xbf16>, vector<16x8xbf16>, vector<256x8xf32> -> vector<256x8xf32>
    %303 = arith.addf %296, %302 : vector<256x8xf32>
    %c2_341 = arith.constant 2 : index
    %c9_342 = arith.constant 9 : index
    %c0_343 = arith.constant 0 : index
    %304 = vector.load %arg15[%c2_341, %c9_342, %c0_343] : memref<18x32x16xf32, #tpu.memory_space<vmem>>, vector<16x16x16xf32>
    %305 = vector.shape_cast %304 : vector<16x16x16xf32> to vector<256x16xf32>
    %306 = arith.truncf %305 : vector<256x16xf32> to vector<256x16xbf16>
    %c0_344 = arith.constant 0 : index
    %c2_345 = arith.constant 2 : index
    %c2_346 = arith.constant 2 : index
    %c0_347 = arith.constant 0 : index
    %c0_348 = arith.constant 0 : index
    %307 = vector.load %arg13[%c0_344, %c2_345, %c2_346, %c0_347, %c0_348] : memref<2x3x3x16x8xbf16, #tpu.memory_space<vmem>>, vector<1x1x1x16x8xbf16>
    %308 = vector.shape_cast %307 : vector<1x1x1x16x8xbf16> to vector<16x8xbf16>
    %cst_349 = arith.constant dense<0.000000e+00> : vector<256x8xf32>
    %309 = tpu.matmul %306, %308, %cst_349 {dimension_numbers = #tpu.dot_dimension_numbers<[1], [0], [0], [1], [0, 0, 1, 1], [], []>} : vector<256x16xbf16>, vector<16x8xbf16>, vector<256x8xf32> -> vector<256x8xf32>
    %310 = arith.addf %303, %309 : vector<256x8xf32>
    %cst_350 = arith.constant 0.000000e+00 : f32
    %311 = vector.broadcast %cst_350 : f32 to vector<256x16xf32>
    %c1_351 = arith.constant 1 : index
    %c0_352 = arith.constant 0 : index
    %c0_353 = arith.constant 0 : index
    %c0_354 = arith.constant 0 : index
    %312 = vector.load %arg8[%c1_351, %c0_352, %c0_353, %c0_354] : memref<2x2x1x8xf32, #tpu.memory_space<vmem>>, vector<1x1x1x8xf32>
    %313 = vector.shape_cast %312 : vector<1x1x1x8xf32> to vector<1x8xf32>
    %c1_355 = arith.constant 1 : index
    %c0_356 = arith.constant 0 : index
    %c0_357 = arith.constant 0 : index
    %c0_358 = arith.constant 0 : index
    %314 = vector.load %arg9[%c1_355, %c0_356, %c0_357, %c0_358] : memref<2x2x1x8xf32, #tpu.memory_space<vmem>>, vector<1x1x1x8xf32>
    %315 = vector.shape_cast %314 : vector<1x1x1x8xf32> to vector<1x8xf32>
    %316 = vector.broadcast %313 : vector<1x8xf32> to vector<256x8xf32>
    %317 = arith.mulf %4, %316 : vector<256x8xf32>
    %318 = vector.broadcast %315 : vector<1x8xf32> to vector<256x8xf32>
    %319 = arith.addf %317, %318 : vector<256x8xf32>
    %cst_359 = arith.constant 0.000000e+00 : f32
    %320 = vector.broadcast %cst_359 : f32 to vector<256x8xf32>
    %321 = arith.maximumf %319, %320 : vector<256x8xf32>
    %322 = arith.truncf %321 : vector<256x8xf32> to vector<256x8xbf16>
    %c1_360 = arith.constant 1 : index
    %c0_361 = arith.constant 0 : index
    %c0_362 = arith.constant 0 : index
    %c0_363 = arith.constant 0 : index
    %323 = vector.load %arg10[%c1_360, %c0_361, %c0_362, %c0_363] : memref<2x2x8x16xbf16, #tpu.memory_space<vmem>>, vector<1x1x8x16xbf16>
    %324 = vector.shape_cast %323 : vector<1x1x8x16xbf16> to vector<8x16xbf16>
    %cst_364 = arith.constant dense<0.000000e+00> : vector<256x16xf32>
    %325 = tpu.matmul %322, %324, %cst_364 {dimension_numbers = #tpu.dot_dimension_numbers<[1], [0], [0], [1], [0, 0, 1, 1], [], []>} : vector<256x8xbf16>, vector<8x16xbf16>, vector<256x16xf32> -> vector<256x16xf32>
    %326 = arith.addf %311, %325 : vector<256x16xf32>
    %c1_365 = arith.constant 1 : index
    %c1_366 = arith.constant 1 : index
    %c0_367 = arith.constant 0 : index
    %c0_368 = arith.constant 0 : index
    %327 = vector.load %arg8[%c1_365, %c1_366, %c0_367, %c0_368] : memref<2x2x1x8xf32, #tpu.memory_space<vmem>>, vector<1x1x1x8xf32>
    %328 = vector.shape_cast %327 : vector<1x1x1x8xf32> to vector<1x8xf32>
    %c1_369 = arith.constant 1 : index
    %c1_370 = arith.constant 1 : index
    %c0_371 = arith.constant 0 : index
    %c0_372 = arith.constant 0 : index
    %329 = vector.load %arg9[%c1_369, %c1_370, %c0_371, %c0_372] : memref<2x2x1x8xf32, #tpu.memory_space<vmem>>, vector<1x1x1x8xf32>
    %330 = vector.shape_cast %329 : vector<1x1x1x8xf32> to vector<1x8xf32>
    %331 = vector.broadcast %328 : vector<1x8xf32> to vector<256x8xf32>
    %332 = arith.mulf %96, %331 : vector<256x8xf32>
    %333 = vector.broadcast %330 : vector<1x8xf32> to vector<256x8xf32>
    %334 = arith.addf %332, %333 : vector<256x8xf32>
    %cst_373 = arith.constant 0.000000e+00 : f32
    %335 = vector.broadcast %cst_373 : f32 to vector<256x8xf32>
    %336 = arith.maximumf %334, %335 : vector<256x8xf32>
    %337 = arith.truncf %336 : vector<256x8xf32> to vector<256x8xbf16>
    %c1_374 = arith.constant 1 : index
    %c1_375 = arith.constant 1 : index
    %c0_376 = arith.constant 0 : index
    %c0_377 = arith.constant 0 : index
    %338 = vector.load %arg10[%c1_374, %c1_375, %c0_376, %c0_377] : memref<2x2x8x16xbf16, #tpu.memory_space<vmem>>, vector<1x1x8x16xbf16>
    %339 = vector.shape_cast %338 : vector<1x1x8x16xbf16> to vector<8x16xbf16>
    %cst_378 = arith.constant dense<0.000000e+00> : vector<256x16xf32>
    %340 = tpu.matmul %337, %339, %cst_378 {dimension_numbers = #tpu.dot_dimension_numbers<[1], [0], [0], [1], [0, 0, 1, 1], [], []>} : vector<256x8xbf16>, vector<8x16xbf16>, vector<256x16xf32> -> vector<256x16xf32>
    %341 = arith.addf %326, %340 : vector<256x16xf32>
    %c1_379 = arith.constant 1 : index
    %c0_380 = arith.constant 0 : index
    %c0_381 = arith.constant 0 : index
    %342 = vector.load %arg11[%c1_379, %c0_380, %c0_381] : memref<2x1x16xf32, #tpu.memory_space<vmem>>, vector<1x1x16xf32>
    %343 = vector.shape_cast %342 : vector<1x1x16xf32> to vector<1x16xf32>
    %c1_382 = arith.constant 1 : index
    %c0_383 = arith.constant 0 : index
    %c0_384 = arith.constant 0 : index
    %344 = vector.load %arg12[%c1_382, %c0_383, %c0_384] : memref<2x1x16xf32, #tpu.memory_space<vmem>>, vector<1x1x16xf32>
    %345 = vector.shape_cast %344 : vector<1x1x16xf32> to vector<1x16xf32>
    %346 = vector.broadcast %343 : vector<1x16xf32> to vector<256x16xf32>
    %347 = arith.mulf %341, %346 : vector<256x16xf32>
    %348 = vector.broadcast %345 : vector<1x16xf32> to vector<256x16xf32>
    %349 = arith.addf %347, %348 : vector<256x16xf32>
    %cst_385 = arith.constant 0.000000e+00 : f32
    %350 = vector.broadcast %cst_385 : f32 to vector<256x16xf32>
    %351 = arith.maximumf %349, %350 : vector<256x16xf32>
    %352 = vector.shape_cast %351 : vector<256x16xf32> to vector<16x16x16xf32>
    %c1_386 = arith.constant 1 : index
    %c8_387 = arith.constant 8 : index
    %c0_388 = arith.constant 0 : index
    %353 = vector.load %arg15[%c1_386, %c8_387, %c0_388] : memref<18x32x16xf32, #tpu.memory_space<vmem>>, vector<16x16x16xf32>
    tpu.vector_store %arg15[%c1_386, %c8_387, %c0_388], %352 {strides = array<i32>} : memref<18x32x16xf32, #tpu.memory_space<vmem>>, vector<16x16x16xf32>,
    %cst_389 = arith.constant 0.000000e+00 : f32
    %354 = vector.broadcast %cst_389 : f32 to vector<256x8xf32>
    %c0_390 = arith.constant 0 : index
    %c7_391 = arith.constant 7 : index
    %c0_392 = arith.constant 0 : index
    %355 = vector.load %arg15[%c0_390, %c7_391, %c0_392] : memref<18x32x16xf32, #tpu.memory_space<vmem>>, vector<16x16x16xf32>
    %356 = vector.shape_cast %355 : vector<16x16x16xf32> to vector<256x16xf32>
    %357 = arith.truncf %356 : vector<256x16xf32> to vector<256x16xbf16>
    %c1_393 = arith.constant 1 : index
    %c0_394 = arith.constant 0 : index
    %c0_395 = arith.constant 0 : index
    %c0_396 = arith.constant 0 : index
    %c0_397 = arith.constant 0 : index
    %358 = vector.load %arg13[%c1_393, %c0_394, %c0_395, %c0_396, %c0_397] : memref<2x3x3x16x8xbf16, #tpu.memory_space<vmem>>, vector<1x1x1x16x8xbf16>
    %359 = vector.shape_cast %358 : vector<1x1x1x16x8xbf16> to vector<16x8xbf16>
    %cst_398 = arith.constant dense<0.000000e+00> : vector<256x8xf32>
    %360 = tpu.matmul %357, %359, %cst_398 {dimension_numbers = #tpu.dot_dimension_numbers<[1], [0], [0], [1], [0, 0, 1, 1], [], []>} : vector<256x16xbf16>, vector<16x8xbf16>, vector<256x8xf32> -> vector<256x8xf32>
    %361 = arith.addf %354, %360 : vector<256x8xf32>
    %c0_399 = arith.constant 0 : index
    %c8_400 = arith.constant 8 : index
    %c0_401 = arith.constant 0 : index
    %362 = vector.load %arg15[%c0_399, %c8_400, %c0_401] : memref<18x32x16xf32, #tpu.memory_space<vmem>>, vector<16x16x16xf32>
    %363 = vector.shape_cast %362 : vector<16x16x16xf32> to vector<256x16xf32>
    %364 = arith.truncf %363 : vector<256x16xf32> to vector<256x16xbf16>
    %c1_402 = arith.constant 1 : index
    %c0_403 = arith.constant 0 : index
    %c1_404 = arith.constant 1 : index
    %c0_405 = arith.constant 0 : index
    %c0_406 = arith.constant 0 : index
    %365 = vector.load %arg13[%c1_402, %c0_403, %c1_404, %c0_405, %c0_406] : memref<2x3x3x16x8xbf16, #tpu.memory_space<vmem>>, vector<1x1x1x16x8xbf16>
    %366 = vector.shape_cast %365 : vector<1x1x1x16x8xbf16> to vector<16x8xbf16>
    %cst_407 = arith.constant dense<0.000000e+00> : vector<256x8xf32>
    %367 = tpu.matmul %364, %366, %cst_407 {dimension_numbers = #tpu.dot_dimension_numbers<[1], [0], [0], [1], [0, 0, 1, 1], [], []>} : vector<256x16xbf16>, vector<16x8xbf16>, vector<256x8xf32> -> vector<256x8xf32>
    %368 = arith.addf %361, %367 : vector<256x8xf32>
    %c0_408 = arith.constant 0 : index
    %c9_409 = arith.constant 9 : index
    %c0_410 = arith.constant 0 : index
    %369 = vector.load %arg15[%c0_408, %c9_409, %c0_410] : memref<18x32x16xf32, #tpu.memory_space<vmem>>, vector<16x16x16xf32>
    %370 = vector.shape_cast %369 : vector<16x16x16xf32> to vector<256x16xf32>
    %371 = arith.truncf %370 : vector<256x16xf32> to vector<256x16xbf16>
    %c1_411 = arith.constant 1 : index
    %c0_412 = arith.constant 0 : index
    %c2_413 = arith.constant 2 : index
    %c0_414 = arith.constant 0 : index
    %c0_415 = arith.constant 0 : index
    %372 = vector.load %arg13[%c1_411, %c0_412, %c2_413, %c0_414, %c0_415] : memref<2x3x3x16x8xbf16, #tpu.memory_space<vmem>>, vector<1x1x1x16x8xbf16>
    %373 = vector.shape_cast %372 : vector<1x1x1x16x8xbf16> to vector<16x8xbf16>
    %cst_416 = arith.constant dense<0.000000e+00> : vector<256x8xf32>
    %374 = tpu.matmul %371, %373, %cst_416 {dimension_numbers = #tpu.dot_dimension_numbers<[1], [0], [0], [1], [0, 0, 1, 1], [], []>} : vector<256x16xbf16>, vector<16x8xbf16>, vector<256x8xf32> -> vector<256x8xf32>
    %375 = arith.addf %368, %374 : vector<256x8xf32>
    %c1_417 = arith.constant 1 : index
    %c7_418 = arith.constant 7 : index
    %c0_419 = arith.constant 0 : index
    %376 = vector.load %arg15[%c1_417, %c7_418, %c0_419] : memref<18x32x16xf32, #tpu.memory_space<vmem>>, vector<16x16x16xf32>
    %377 = vector.shape_cast %376 : vector<16x16x16xf32> to vector<256x16xf32>
    %378 = arith.truncf %377 : vector<256x16xf32> to vector<256x16xbf16>
    %c1_420 = arith.constant 1 : index
    %c1_421 = arith.constant 1 : index
    %c0_422 = arith.constant 0 : index
    %c0_423 = arith.constant 0 : index
    %c0_424 = arith.constant 0 : index
    %379 = vector.load %arg13[%c1_420, %c1_421, %c0_422, %c0_423, %c0_424] : memref<2x3x3x16x8xbf16, #tpu.memory_space<vmem>>, vector<1x1x1x16x8xbf16>
    %380 = vector.shape_cast %379 : vector<1x1x1x16x8xbf16> to vector<16x8xbf16>
    %cst_425 = arith.constant dense<0.000000e+00> : vector<256x8xf32>
    %381 = tpu.matmul %378, %380, %cst_425 {dimension_numbers = #tpu.dot_dimension_numbers<[1], [0], [0], [1], [0, 0, 1, 1], [], []>} : vector<256x16xbf16>, vector<16x8xbf16>, vector<256x8xf32> -> vector<256x8xf32>
    %382 = arith.addf %375, %381 : vector<256x8xf32>
    %c1_426 = arith.constant 1 : index
    %c8_427 = arith.constant 8 : index
    %c0_428 = arith.constant 0 : index
    %383 = vector.load %arg15[%c1_426, %c8_427, %c0_428] : memref<18x32x16xf32, #tpu.memory_space<vmem>>, vector<16x16x16xf32>
    %384 = vector.shape_cast %383 : vector<16x16x16xf32> to vector<256x16xf32>
    %385 = arith.truncf %384 : vector<256x16xf32> to vector<256x16xbf16>
    %c1_429 = arith.constant 1 : index
    %c1_430 = arith.constant 1 : index
    %c1_431 = arith.constant 1 : index
    %c0_432 = arith.constant 0 : index
    %c0_433 = arith.constant 0 : index
    %386 = vector.load %arg13[%c1_429, %c1_430, %c1_431, %c0_432, %c0_433] : memref<2x3x3x16x8xbf16, #tpu.memory_space<vmem>>, vector<1x1x1x16x8xbf16>
    %387 = vector.shape_cast %386 : vector<1x1x1x16x8xbf16> to vector<16x8xbf16>
    %cst_434 = arith.constant dense<0.000000e+00> : vector<256x8xf32>
    %388 = tpu.matmul %385, %387, %cst_434 {dimension_numbers = #tpu.dot_dimension_numbers<[1], [0], [0], [1], [0, 0, 1, 1], [], []>} : vector<256x16xbf16>, vector<16x8xbf16>, vector<256x8xf32> -> vector<256x8xf32>
    %389 = arith.addf %382, %388 : vector<256x8xf32>
    %c1_435 = arith.constant 1 : index
    %c9_436 = arith.constant 9 : index
    %c0_437 = arith.constant 0 : index
    %390 = vector.load %arg15[%c1_435, %c9_436, %c0_437] : memref<18x32x16xf32, #tpu.memory_space<vmem>>, vector<16x16x16xf32>
    %391 = vector.shape_cast %390 : vector<16x16x16xf32> to vector<256x16xf32>
    %392 = arith.truncf %391 : vector<256x16xf32> to vector<256x16xbf16>
    %c1_438 = arith.constant 1 : index
    %c1_439 = arith.constant 1 : index
    %c2_440 = arith.constant 2 : index
    %c0_441 = arith.constant 0 : index
    %c0_442 = arith.constant 0 : index
    %393 = vector.load %arg13[%c1_438, %c1_439, %c2_440, %c0_441, %c0_442] : memref<2x3x3x16x8xbf16, #tpu.memory_space<vmem>>, vector<1x1x1x16x8xbf16>
    %394 = vector.shape_cast %393 : vector<1x1x1x16x8xbf16> to vector<16x8xbf16>
    %cst_443 = arith.constant dense<0.000000e+00> : vector<256x8xf32>
    %395 = tpu.matmul %392, %394, %cst_443 {dimension_numbers = #tpu.dot_dimension_numbers<[1], [0], [0], [1], [0, 0, 1, 1], [], []>} : vector<256x16xbf16>, vector<16x8xbf16>, vector<256x8xf32> -> vector<256x8xf32>
    %396 = arith.addf %389, %395 : vector<256x8xf32>
    %c2_444 = arith.constant 2 : index
    %c7_445 = arith.constant 7 : index
    %c0_446 = arith.constant 0 : index
    %397 = vector.load %arg15[%c2_444, %c7_445, %c0_446] : memref<18x32x16xf32, #tpu.memory_space<vmem>>, vector<16x16x16xf32>
    %398 = vector.shape_cast %397 : vector<16x16x16xf32> to vector<256x16xf32>
    %399 = arith.truncf %398 : vector<256x16xf32> to vector<256x16xbf16>
    %c1_447 = arith.constant 1 : index
    %c2_448 = arith.constant 2 : index
    %c0_449 = arith.constant 0 : index
    %c0_450 = arith.constant 0 : index
    %c0_451 = arith.constant 0 : index
    %400 = vector.load %arg13[%c1_447, %c2_448, %c0_449, %c0_450, %c0_451] : memref<2x3x3x16x8xbf16, #tpu.memory_space<vmem>>, vector<1x1x1x16x8xbf16>
    %401 = vector.shape_cast %400 : vector<1x1x1x16x8xbf16> to vector<16x8xbf16>
    %cst_452 = arith.constant dense<0.000000e+00> : vector<256x8xf32>
    %402 = tpu.matmul %399, %401, %cst_452 {dimension_numbers = #tpu.dot_dimension_numbers<[1], [0], [0], [1], [0, 0, 1, 1], [], []>} : vector<256x16xbf16>, vector<16x8xbf16>, vector<256x8xf32> -> vector<256x8xf32>
    %403 = arith.addf %396, %402 : vector<256x8xf32>
    %c2_453 = arith.constant 2 : index
    %c8_454 = arith.constant 8 : index
    %c0_455 = arith.constant 0 : index
    %404 = vector.load %arg15[%c2_453, %c8_454, %c0_455] : memref<18x32x16xf32, #tpu.memory_space<vmem>>, vector<16x16x16xf32>
    %405 = vector.shape_cast %404 : vector<16x16x16xf32> to vector<256x16xf32>
    %406 = arith.truncf %405 : vector<256x16xf32> to vector<256x16xbf16>
    %c1_456 = arith.constant 1 : index
    %c2_457 = arith.constant 2 : index
    %c1_458 = arith.constant 1 : index
    %c0_459 = arith.constant 0 : index
    %c0_460 = arith.constant 0 : index
    %407 = vector.load %arg13[%c1_456, %c2_457, %c1_458, %c0_459, %c0_460] : memref<2x3x3x16x8xbf16, #tpu.memory_space<vmem>>, vector<1x1x1x16x8xbf16>
    %408 = vector.shape_cast %407 : vector<1x1x1x16x8xbf16> to vector<16x8xbf16>
    %cst_461 = arith.constant dense<0.000000e+00> : vector<256x8xf32>
    %409 = tpu.matmul %406, %408, %cst_461 {dimension_numbers = #tpu.dot_dimension_numbers<[1], [0], [0], [1], [0, 0, 1, 1], [], []>} : vector<256x16xbf16>, vector<16x8xbf16>, vector<256x8xf32> -> vector<256x8xf32>
    %410 = arith.addf %403, %409 : vector<256x8xf32>
    %c2_462 = arith.constant 2 : index
    %c9_463 = arith.constant 9 : index
    %c0_464 = arith.constant 0 : index
    %411 = vector.load %arg15[%c2_462, %c9_463, %c0_464] : memref<18x32x16xf32, #tpu.memory_space<vmem>>, vector<16x16x16xf32>
    %412 = vector.shape_cast %411 : vector<16x16x16xf32> to vector<256x16xf32>
    %413 = arith.truncf %412 : vector<256x16xf32> to vector<256x16xbf16>
    %c1_465 = arith.constant 1 : index
    %c2_466 = arith.constant 2 : index
    %c2_467 = arith.constant 2 : index
    %c0_468 = arith.constant 0 : index
    %c0_469 = arith.constant 0 : index
    %414 = vector.load %arg13[%c1_465, %c2_466, %c2_467, %c0_468, %c0_469] : memref<2x3x3x16x8xbf16, #tpu.memory_space<vmem>>, vector<1x1x1x16x8xbf16>
    %415 = vector.shape_cast %414 : vector<1x1x1x16x8xbf16> to vector<16x8xbf16>
    %cst_470 = arith.constant dense<0.000000e+00> : vector<256x8xf32>
    %416 = tpu.matmul %413, %415, %cst_470 {dimension_numbers = #tpu.dot_dimension_numbers<[1], [0], [0], [1], [0, 0, 1, 1], [], []>} : vector<256x16xbf16>, vector<16x8xbf16>, vector<256x8xf32> -> vector<256x8xf32>
    %417 = arith.addf %410, %416 : vector<256x8xf32>
    %418 = arith.addf %4, %310 : vector<256x8xf32>
    %419 = arith.addf %418, %417 : vector<256x8xf32>
    %420 = vector.shape_cast %419 : vector<256x8xf32> to vector<16x16x8xf32>
    %c0_471 = arith.constant 0 : index
    %c0_472 = arith.constant 0 : index
    %c0_473 = arith.constant 0 : index
    %c0_474 = arith.constant 0 : index
    %421 = vector.load %arg14[%c0_471, %c0_472, %c0_473, %c0_474] : memref<1x16x16x8xf32, #tpu.memory_space<vmem>>, vector<1x16x16x8xf32>
    %422 = vector.shape_cast %421 : vector<1x16x16x8xf32> to vector<16x16x8xf32>
    %423 = vector.shape_cast %420 : vector<16x16x8xf32> to vector<1x16x16x8xf32>
    tpu.vector_store %arg14[%c0_471, %c0_472, %c0_473, %c0_474], %423 {strides = array<i32>} : memref<1x16x16x8xf32, #tpu.memory_space<vmem>>, vector<1x16x16x8xf32>,
    return
  }
  func.func @transform_0(%arg0: i32) -> (i32, i32, i32, i32) {
    %c0_i32 = arith.constant 0 : i32
    %c0_i32_0 = arith.constant 0 : i32
    %c0_i32_1 = arith.constant 0 : i32
    %c0_i32_2 = arith.constant 0 : i32
    return %arg0, %c0_i32, %c0_i32_0, %c0_i32_1 : i32, i32, i32, i32
  }
  func.func @transform_1(%arg0: i32) -> (i32, i32, i32, i32) {
    %c0_i32 = arith.constant 0 : i32
    %c0_i32_0 = arith.constant 0 : i32
    %c0_i32_1 = arith.constant 0 : i32
    %c0_i32_2 = arith.constant 0 : i32
    %c0_i32_3 = arith.constant 0 : i32
    return %c0_i32, %c0_i32_0, %c0_i32_1, %c0_i32_2 : i32, i32, i32, i32
  }
  func.func @transform_2(%arg0: i32) -> (i32, i32, i32, i32) {
    %c0_i32 = arith.constant 0 : i32
    %c0_i32_0 = arith.constant 0 : i32
    %c0_i32_1 = arith.constant 0 : i32
    %c0_i32_2 = arith.constant 0 : i32
    %c0_i32_3 = arith.constant 0 : i32
    return %c0_i32, %c0_i32_0, %c0_i32_1, %c0_i32_2 : i32, i32, i32, i32
  }
  func.func @transform_3(%arg0: i32) -> (i32, i32, i32, i32) {
    %c0_i32 = arith.constant 0 : i32
    %c0_i32_0 = arith.constant 0 : i32
    %c0_i32_1 = arith.constant 0 : i32
    %c0_i32_2 = arith.constant 0 : i32
    %c0_i32_3 = arith.constant 0 : i32
    return %c0_i32, %c0_i32_0, %c0_i32_1, %c0_i32_2 : i32, i32, i32, i32
  }
  func.func @transform_4(%arg0: i32) -> (i32, i32, i32) {
    %c0_i32 = arith.constant 0 : i32
    %c0_i32_0 = arith.constant 0 : i32
    %c0_i32_1 = arith.constant 0 : i32
    %c0_i32_2 = arith.constant 0 : i32
    return %c0_i32, %c0_i32_0, %c0_i32_1 : i32, i32, i32
  }
  func.func @transform_5(%arg0: i32) -> (i32, i32, i32) {
    %c0_i32 = arith.constant 0 : i32
    %c0_i32_0 = arith.constant 0 : i32
    %c0_i32_1 = arith.constant 0 : i32
    %c0_i32_2 = arith.constant 0 : i32
    return %c0_i32, %c0_i32_0, %c0_i32_1 : i32, i32, i32
  }
  func.func @transform_6(%arg0: i32) -> (i32, i32, i32, i32, i32) {
    %c0_i32 = arith.constant 0 : i32
    %c0_i32_0 = arith.constant 0 : i32
    %c0_i32_1 = arith.constant 0 : i32
    %c0_i32_2 = arith.constant 0 : i32
    %c0_i32_3 = arith.constant 0 : i32
    %c0_i32_4 = arith.constant 0 : i32
    return %c0_i32, %c0_i32_0, %c0_i32_1, %c0_i32_2, %c0_i32_3 : i32, i32, i32, i32, i32
  }
  func.func @transform_7(%arg0: i32) -> (i32, i32, i32, i32) {
    %c0_i32 = arith.constant 0 : i32
    %c0_i32_0 = arith.constant 0 : i32
    %c0_i32_1 = arith.constant 0 : i32
    %c0_i32_2 = arith.constant 0 : i32
    %c0_i32_3 = arith.constant 0 : i32
    return %c0_i32, %c0_i32_0, %c0_i32_1, %c0_i32_2 : i32, i32, i32, i32
  }
  func.func @transform_8(%arg0: i32) -> (i32, i32, i32, i32) {
    %c0_i32 = arith.constant 0 : i32
    %c0_i32_0 = arith.constant 0 : i32
    %c0_i32_1 = arith.constant 0 : i32
    %c0_i32_2 = arith.constant 0 : i32
    %c0_i32_3 = arith.constant 0 : i32
    return %c0_i32, %c0_i32_0, %c0_i32_1, %c0_i32_2 : i32, i32, i32, i32
  }
  func.func @transform_9(%arg0: i32) -> (i32, i32, i32, i32) {
    %c0_i32 = arith.constant 0 : i32
    %c0_i32_0 = arith.constant 0 : i32
    %c0_i32_1 = arith.constant 0 : i32
    %c0_i32_2 = arith.constant 0 : i32
    %c0_i32_3 = arith.constant 0 : i32
    return %c0_i32, %c0_i32_0, %c0_i32_1, %c0_i32_2 : i32, i32, i32, i32
  }
  func.func @transform_10(%arg0: i32) -> (i32, i32, i32) {
    %c0_i32 = arith.constant 0 : i32
    %c0_i32_0 = arith.constant 0 : i32
    %c0_i32_1 = arith.constant 0 : i32
    %c0_i32_2 = arith.constant 0 : i32
    return %c0_i32, %c0_i32_0, %c0_i32_1 : i32, i32, i32
  }
  func.func @transform_11(%arg0: i32) -> (i32, i32, i32) {
    %c0_i32 = arith.constant 0 : i32
    %c0_i32_0 = arith.constant 0 : i32
    %c0_i32_1 = arith.constant 0 : i32
    %c0_i32_2 = arith.constant 0 : i32
    return %c0_i32, %c0_i32_0, %c0_i32_1 : i32, i32, i32
  }
  func.func @transform_12(%arg0: i32) -> (i32, i32, i32, i32, i32) {
    %c0_i32 = arith.constant 0 : i32
    %c0_i32_0 = arith.constant 0 : i32
    %c0_i32_1 = arith.constant 0 : i32
    %c0_i32_2 = arith.constant 0 : i32
    %c0_i32_3 = arith.constant 0 : i32
    %c0_i32_4 = arith.constant 0 : i32
    return %c0_i32, %c0_i32_0, %c0_i32_1, %c0_i32_2, %c0_i32_3 : i32, i32, i32, i32, i32
  }
  func.func @transform_13(%arg0: i32) -> (i32, i32, i32, i32) {
    %c0_i32 = arith.constant 0 : i32
    %c0_i32_0 = arith.constant 0 : i32
    %c0_i32_1 = arith.constant 0 : i32
    %c0_i32_2 = arith.constant 0 : i32
    return %arg0, %c0_i32, %c0_i32_0, %c0_i32_1 : i32, i32, i32, i32
  }
}

</mosaic_0001>

<bundles_post_ra>
// kernel: rk_block_forward.1
= control target key start
LH: loop header
LB: loop body
LE: loop exit
PB: predicated region body
PF: predicated region fallthrough
CT: control target
= control target key end

     0   :  { %s17433_s25 = smov 0   ;;  %s22991_s0 = inlined_call_operand.vmem [shape: f32[2,16,16,8], index: 0, kind: input, shape index: {}]   ;;  %s22992_s1 = inlined_call_operand.vmem [shape: f32[2,2,1,8], index: 1, kind: input, shape index: {}]   ;;  %s22993_s2 = inlined_call_operand.vmem [shape: f32[2,2,1,8], index: 2, kind: input, shape index: {}]   ;;  %s22994_s3 = inlined_call_operand.vmem [shape: bf16[2,2,8,16], index: 3, kind: input, shape index: {}]   ;;  %s22995_s4 = inlined_call_operand.vmem [shape: f32[2,1,16], index: 4, kind: input, shape index: {}]   ;;  %s22996_s5 = inlined_call_operand.vmem [shape: f32[2,1,16], index: 5, kind: input, shape index: {}]   ;;  %s22997_s6 = inlined_call_operand.vmem [shape: bf16[2,3,3,16,8], index: 6, kind: input, shape index: {}]   ;;  %s22998_s7 = inlined_call_operand.vmem [shape: f32[2,2,1,8], index: 7, kind: input, shape index: {}]   ;;  %s22999_s8 = inlined_call_operand.vmem [shape: f32[2,2,1,8], index: 8, kind: input, shape index: {}]   ;;  %s23000_s9 = inlined_call_operand.vmem [shape: bf16[2,2,8,16], index: 9, kind: input, shape index: {}]   ;;  %s23001_s10 = inlined_call_operand.vmem [shape: f32[2,1,16], index: 10, kind: input, shape index: {}]   ;;  %s23002_s11 = inlined_call_operand.vmem [shape: f32[2,1,16], index: 11, kind: input, shape index: {}]   ;;  %s23003_s12 = inlined_call_operand.vmem [shape: bf16[2,3,3,16,8], index: 12, kind: input, shape index: {}]   ;;  %s23004_s13 = inlined_call_operand.vmem [shape: f32[2,16,16,8], index: 13, kind: output, shape index: {}]  }
   0x1 LB: > { %s14132_s26 = sadd.s32 4294967295, %s17360_s25   ;;  %p14136_p0 = scmp.ge.s32.totalorder %s17360_s25, 1  ;;  %s17360_s25 = sphi %s17433_s25, %s23_s25  }
   0x2   : > { %p387_p1 = scmp.lt.s32.totalorder %s17360_s25, 3 }
   0x4   : > { %p388_p2 = pnand %p14136_p0, %p387_p1 }
   0x6   : > { %391 = sbr.rel (%p388_p2) target bundleno = 2669 (0xa6d), region = 72 }
   0xb   : > { %v673_v0 = vld [vmem:[%s22994_s3] sm:$0xf]  ;;  %vm723_vm0 = vcmask 1043456   ;;  %p431_p3 = scmp.lt.s32.totalorder %s14132_s26, 1  ;;  %v17457_v3 = vld [vmem:[%s22997_s6 + $0x8] sm:$0xff]   ;;  %vm442_vm1 = vcmask 130048  }
   0xc   : > { %17173 = vmatprep.subr.msk.bf16.mxu0 %vm723_vm0, %v673_v0  ;;  %v725_v1 = vsel %vm723_vm0, %v673_v0, 0  ;;  %17174 = vmatprep.subr.msk.bf16.mxu1 %vm723_vm0, %v673_v0  ;;  %v17452_v2 = vld [vmem:[%s22992_s1] ss:$0 sm:$0xff]  ;;  %v17362_v5 = vmov 0.0   ;;  %vm674_vm2 = vcmask 64512  }
   0xd   : > { %15710 = vmatpush3.bf16.msra.mxu0 %v725_v1  ;;  %s23385_s26 = smov (!%p431_p3, %s14132_s26), 1  ;;  %17172 = vmatpush3.bf16.msra.mxu1 %v725_v1  ;;  %v17463_v4 = vld [vmem:[%s22993_s2] ss:$0 sm:$0xff]  ;;  %452 = vst.msk [vmem:[#allocation2 + $0x48] sm:$0xff] %vm442_vm1, %v17362_v5  ;;  %443 = vst.msk [vmem:[#allocation2] sm:$0xff] %vm442_vm1, %v17362_v5 }
   0xe   : > { %s14976_s16 = sshll.u32 %s23385_s26, 8  ;;  %15743 = vmatprep.subr.bf16.mxu1 %v17457_v3  ;;  %444 = vst.msk [vmem:[#allocation2 + $0x8] sm:$0xff] %vm442_vm1, %v17362_v5  ;;  %445 = vst.msk [vmem:[#allocation2 + $0x10] sm:$0xff] %vm442_vm1, %v17362_v5 }
   0xf   : > { %446 = vst.msk [vmem:[#allocation2 + $0x18] sm:$0xff] %vm442_vm1, %v17362_v5  ;;  %447 = vst.msk [vmem:[#allocation2 + $0x20] sm:$0xff] %vm442_vm1, %v17362_v5  ;;  %s17615_s21 = scalar_lea.vmem %s22991_s0, %s14976_s16  ;;  %s22707_s14 = scalar_lea.vmem %s23004_s13, %s14976_s16 }
  0x10   : > { %448 = vst.msk [vmem:[#allocation2 + $0x28] sm:$0xff] %vm442_vm1, %v17362_v5  ;;  %449 = vst.msk [vmem:[#allocation2 + $0x30] sm:$0xff] %vm442_vm1, %v17362_v5  ;;  %v515_v6 = vld [vmem:[%s17615_s21] sm:$0xff]  ;;  %v516_v7 = vld [vmem:[%s17615_s21 + $0x8] sm:$0xff] }
  0x11   : > { %450 = vst.msk [vmem:[#allocation2 + $0x38] sm:$0xff] %vm442_vm1, %v17362_v5  ;;  %451 = vst.msk [vmem:[#allocation2 + $0x40] sm:$0xff] %vm442_vm1, %v17362_v5  ;;  %v517_v8 = vld [vmem:[%s17615_s21 + $0x10] sm:$0xff]  ;;  %v555_v9 = vmul.f32 %v17452_v2, %v515_v6  ;;  %v556_v10 = vmul.f32 %v17452_v2, %v516_v7  ;;  %v518_v11 = vld [vmem:[%s17615_s21 + $0x18] sm:$0xff] }
  0x12   : > { %453 = vst.msk [vmem:[#allocation2 + $0x50] sm:$0xff] %vm442_vm1, %v17362_v5  ;;  %454 = vst.msk [vmem:[#allocation2 + $0x58] sm:$0xff] %vm442_vm1, %v17362_v5  ;;  %v557_v12 = vmul.f32 %v17452_v2, %v517_v8  ;;  %v519_v13 = vld [vmem:[%s17615_s21 + $0x20] sm:$0xff]  ;;  %v520_v14 = vld [vmem:[%s17615_s21 + $0x28] sm:$0xff]  ;;  %v558_v15 = vmul.f32 %v17452_v2, %v518_v11 }
  0x13   : > { %455 = vst.msk [vmem:[#allocation2 + $0x60] sm:$0xff] %vm442_vm1, %v17362_v5  ;;  %456 = vst.msk [vmem:[#allocation2 + $0x68] sm:$0xff] %vm442_vm1, %v17362_v5  ;;  %v521_v16 = vld [vmem:[%s17615_s21 + $0x30] sm:$0xff]  ;;  %v593_v17 = vadd.f32 %v17463_v4, %v555_v9  ;;  %v594_v18 = vadd.f32 %v17463_v4, %v556_v10  ;;  %v522_v20 = vld [vmem:[%s17615_s21 + $0x38] sm:$0xff]  ;;  %v559_v22 = vmul.f32 %v17452_v2, %v519_v13 }
  0x14   : > { %457 = vst.msk [vmem:[#allocation2 + $0x70] sm:$0xff] %vm442_vm1, %v17362_v5  ;;  %458 = vst.msk [vmem:[#allocation2 + $0x78] sm:$0xff] %vm442_vm1, %v17362_v5  ;;  %v595_v19 = vadd.f32 %v17463_v4, %v557_v12  ;;  %v596_v21 = vadd.f32 %v17463_v4, %v558_v15  ;;  %v560_v23 = vmul.f32 %v17452_v2, %v520_v14  ;;  %v523_v24 = vld [vmem:[%s17615_s21 + $0x40] sm:$0xff]  ;;  %v524_v25 = vld [vmem:[%s17615_s21 + $0x48] sm:$0xff] }
  0x15   : > { %459 = vst.msk [vmem:[#allocation2 + $0x80] sm:$0xff] %vm442_vm1, %v17362_v5  ;;  %460 = vst.msk [vmem:[#allocation2 + $0x88] sm:$0xff] %vm442_vm1, %v17362_v5  ;;  %v625_v26 = vmax.f32 %v593_v17, 0.0  ;;  %v626_v27 = vmax.f32 %v594_v18, 0.0  ;;  %v561_v29 = vmul.f32 %v17452_v2, %v521_v16  ;;  %v597_v31 = vadd.f32 %v17463_v4, %v559_v22  ;;  %v525_v34 = vld [vmem:[%s17615_s21 + $0x50] sm:$0xff]  ;;  %v526_v39 = vld [vmem:[%s17615_s21 + $0x58] sm:$0xff] }
  0x16   : > { %461 = vst.msk [vmem:[#allocation2 + $0x90] sm:$0xff] %vm442_vm1, %v17362_v5  ;;  %462 = vst.msk [vmem:[#allocation2 + $0x98] sm:$0xff] %vm442_vm1, %v17362_v5  ;;  %v627_v28 = vmax.f32 %v595_v19, 0.0  ;;  %v628_v30 = vmax.f32 %v596_v21, 0.0  ;;  %v598_v32 = vadd.f32 %v17463_v4, %v560_v23  ;;  %v562_v33 = vmul.f32 %v17452_v2, %v522_v20  ;;  %v527_v40 = vld [vmem:[%s17615_s21 + $0x60] sm:$0xff]  ;;  %v528_v45 = vld [vmem:[%s17615_s21 + $0x68] sm:$0xff] }
  0x17   : > { %463 = vst.msk [vmem:[#allocation2 + $0xa0] sm:$0xff] %vm442_vm1, %v17362_v5  ;;  %464 = vst.msk [vmem:[#allocation2 + $0xa8] sm:$0xff] %vm442_vm1, %v17362_v5  ;;  %v657_v35 = vpack.c.bf16 %v626_v27, %v625_v26  ;;  %v599_v36 = vadd.f32 %v17463_v4, %v561_v29  ;;  %v563_v37 = vmul.f32 %v17452_v2, %v523_v24  ;;  %v629_v42 = vmax.f32 %v597_v31, 0.0  ;;  %v529_v50 = vld [vmem:[%s17615_s21 + $0x70] sm:$0xff]  ;;  %v530_v51 = vld [vmem:[%s17615_s21 + $0x78] sm:$0xff] }
  0x18   : > { %465 = vst.msk [vmem:[#allocation2 + $0xb0] sm:$0xff] %vm442_vm1, %v17362_v5  ;;  %466 = vst.msk [vmem:[#allocation2 + $0xb8] sm:$0xff] %vm442_vm1, %v17362_v5  ;;  %v564_v38 = vmul.f32 %v17452_v2, %v524_v25  ;;  %v658_v41 = vpack.c.bf16 %v628_v30, %v627_v28  ;;  %v630_v43 = vmax.f32 %v598_v32, 0.0  ;;  %v600_v44 = vadd.f32 %v17463_v4, %v562_v33  ;;  %v531_v52 = vld [vmem:[%s17615_s21 + $0x80] sm:$0xff]  ;;  %v532_v57 = vld [vmem:[%s17615_s21 + $0x88] sm:$0xff] }
  0x19   : > { %467 = vst.msk [vmem:[#allocation2 + $0xc0] sm:$0xff] %vm442_vm1, %v17362_v5  ;;  %468 = vst.msk [vmem:[#allocation2 + $0xc8] sm:$0xff] %vm442_vm1, %v17362_v5  ;;  %15711 = vmatprep.mubr.msk.bf16.mxu0 %vm674_vm2, %v657_v35  ;;  %v631_v46 = vmax.f32 %v599_v36, 0.0  ;;  %v601_v47 = vadd.f32 %v17463_v4, %v563_v37  ;;  %v565_v49 = vmul.f32 %v17452_v2, %v525_v34  ;;  %v533_v58 = vld [vmem:[%s17615_s21 + $0x90] sm:$0xff]  ;;  %v534_v63 = vld [vmem:[%s17615_s21 + $0x98] sm:$0xff] }
  0x1a   : > { %469 = vst.msk [vmem:[#allocation2 + $0xd0] sm:$0xff] %vm442_vm1, %v17362_v5  ;;  %470 = vst.msk [vmem:[#allocation2 + $0xd8] sm:$0xff] %vm442_vm1, %v17362_v5  ;;  %v602_v48 = vadd.f32 %v17463_v4, %v564_v38  ;;  %15712 = vmatmul.mubr.msk.bf16.vlgmr.msra.gmra.mxu0 %vm674_vm2, %v658_v41  ;;  %v659_v53 = vpack.c.bf16 %v630_v43, %v629_v42  ;;  %v632_v54 = vmax.f32 %v600_v44, 0.0  ;;  %v535_v11 = vld [vmem:[%s17615_s21 + $0xa0] sm:$0xff]  ;;  %v536_v12 = vld [vmem:[%s17615_s21 + $0xa8] sm:$0xff] }
  0x1b   : > { %471 = vst.msk [vmem:[#allocation2 + $0xe0] sm:$0xff] %vm442_vm1, %v17362_v5  ;;  %472 = vst.msk [vmem:[#allocation2 + $0xe8] sm:$0xff] %vm442_vm1, %v17362_v5  ;;  %v566_v55 = vmul.f32 %v17452_v2, %v526_v39  ;;  %v567_v56 = vmul.f32 %v17452_v2, %v527_v40  ;;  %v633_v59 = vmax.f32 %v601_v47, 0.0  ;;  %v603_v61 = vadd.f32 %v17463_v4, %v565_v49  ;;  %v537_v17 = vld [vmem:[%s17615_s21 + $0xb0] sm:$0xff]  ;;  %v538_v22 = vld [vmem:[%s17615_s21 + $0xb8] sm:$0xff] }
  0x1c   : > { %473 = vst.msk [vmem:[#allocation2 + $0xf0] sm:$0xff] %vm442_vm1, %v17362_v5  ;;  %474 = vst.msk [vmem:[#allocation2 + $0xf8] sm:$0xff] %vm442_vm1, %v17362_v5  ;;  %v634_v60 = vmax.f32 %v602_v48, 0.0  ;;  %v568_v62 = vmul.f32 %v17452_v2, %v528_v45  ;;  %15715 = vmatprep.mubr.msk.bf16.mxu0 %vm674_vm2, %v659_v53  ;;  %v660_v0 = vpack.c.bf16 %v632_v54, %v631_v46  ;;  %v539_v26 = vld [vmem:[%s17615_s21 + $0xc0] sm:$0xff]  ;;  %v540_v27 = vld [vmem:[%s17615_s21 + $0xc8] sm:$0xff] }
  0x1d   : > { %475 = vst.msk [vmem:[#allocation2 + $0x100] sm:$0xff] %vm442_vm1, %v17362_v5  ;;  %476 = vst.msk [vmem:[#allocation2 + $0x108] sm:$0xff] %vm442_vm1, %v17362_v5  ;;  %v604_v1 = vadd.f32 %v17463_v4, %v566_v55  ;;  %v569_v6 = vmul.f32 %v17452_v2, %v529_v50  ;;  %v635_v8 = vmax.f32 %v603_v61, 0.0  ;;  %v570_v10 = vmul.f32 %v17452_v2, %v530_v51  ;;  %v541_v36 = vld [vmem:[%s17615_s21 + $0xd0] sm:$0xff]  ;;  %v542_v41 = vld [vmem:[%s17615_s21 + $0xd8] sm:$0xff] }
  0x1e   : > { %477 = vst.msk [vmem:[#allocation2 + $0x110] sm:$0xff] %vm442_vm1, %v17362_v5  ;;  %478 = vst.msk [vmem:[#allocation2 + $0x118] sm:$0xff] %vm442_vm1, %v17362_v5  ;;  %v661_v7 = vpack.c.bf16 %v634_v60, %v633_v59  ;;  %v606_v9 = vadd.f32 %v17463_v4, %v568_v62  ;;  %v571_v16 = vmul.f32 %v17452_v2, %v531_v52  ;;  %v543_v42 = vld [vmem:[%s17615_s21 + $0xe0] sm:$0xff]  ;;  %v544_v47 = vld [vmem:[%s17615_s21 + $0xe8] sm:$0xff] }
  0x1f   : > { %479 = vst.msk [vmem:[#allocation2 + $0x120] sm:$0xff] %vm442_vm1, %v17362_v5  ;;  %480 = vst.msk [vmem:[#allocation2 + $0x128] sm:$0xff] %vm442_vm1, %v17362_v5  ;;  %v636_v13 = vmax.f32 %v604_v1, 0.0  ;;  %v17673_v15 = vadd.f32 %v17463_v4, %v569_v6  ;;  %v17678_v19 = vadd.f32 %v17463_v4, %v570_v10  ;;  %v572_v20 = vmul.f32 %v17452_v2, %v532_v57 }
  0x20   : > { %481 = vst.msk [vmem:[#allocation2 + $0x130] sm:$0xff] %vm442_vm1, %v17362_v5  ;;  %482 = vst.msk [vmem:[#allocation2 + $0x138] sm:$0xff] %vm442_vm1, %v17362_v5  ;;  %v638_v18 = vmax.f32 %v606_v9, 0.0  ;;  %v573_v21 = vmul.f32 %v17452_v2, %v533_v58  ;;  %v609_v24 = vadd.f32 %v17463_v4, %v571_v16  ;;  %v574_v25 = vmul.f32 %v17452_v2, %v534_v63 }
  0x21   : > { %483 = vst.msk [vmem:[#allocation2 + $0x140] sm:$0xff] %vm442_vm1, %v17362_v5  ;;  %484 = vst.msk [vmem:[#allocation2 + $0x148] sm:$0xff] %vm442_vm1, %v17362_v5  ;;  %v662_v23 = vpack.c.bf16 %v636_v13, %v635_v8  ;;  %v639_v28 = vmax.f32 %v17673_v15, 0.0  ;;  %v640_v29 = vmax.f32 %v17678_v19, 0.0  ;;  %v610_v30 = vadd.f32 %v17463_v4, %v572_v20  ;;  %v546_v13 = vld [vmem:[%s17615_s21 + $0xf8] sm:$0xff] }
  0x22   : > { %485 = vst.msk [vmem:[#allocation2 + $0x150] sm:$0xff] %vm442_vm1, %v17362_v5  ;;  %486 = vst.msk [vmem:[#allocation2 + $0x158] sm:$0xff] %vm442_vm1, %v17362_v5  ;;  %v611_v31 = vadd.f32 %v17463_v4, %v573_v21  ;;  %15716 = vmatmul.mubr.msk.bf16.gmra.mxu0 %vm674_vm2, %v660_v0  ;;  %v641_v32 = vmax.f32 %v609_v24, 0.0  ;;  %v612_v33 = vadd.f32 %v17463_v4, %v574_v25 }
  0x23   : > { %487 = vst.msk [vmem:[#allocation2 + $0x160] sm:$0xff] %vm442_vm1, %v17362_v5  ;;  %488 = vst.msk [vmem:[#allocation2 + $0x168] sm:$0xff] %vm442_vm1, %v17362_v5  ;;  %v575_v34 = vmul.f32 %v17452_v2, %v535_v11  ;;  %v576_v35 = vmul.f32 %v17452_v2, %v536_v12  ;;  %15719 = vmatprep.mubr.msk.bf16.mxu0 %vm674_vm2, %v661_v7  ;;  %v642_v38 = vmax.f32 %v610_v30, 0.0  ;;  %v545_v11 = vld [vmem:[%s17615_s21 + $0xf0] sm:$0xff] }
  0x24   : > { %489 = vst.msk [vmem:[#allocation2 + $0x170] sm:$0xff] %vm442_vm1, %v17362_v5  ;;  %490 = vst.msk [vmem:[#allocation2 + $0x178] sm:$0xff] %vm442_vm1, %v17362_v5  ;;  %v643_v39 = vmax.f32 %v611_v31, 0.0  ;;  %v577_v40 = vmul.f32 %v17452_v2, %v537_v17  ;;  %v644_v43 = vmax.f32 %v612_v33, 0.0  ;;  %v578_v46 = vmul.f32 %v17452_v2, %v538_v22  ;;  %v1032_v30 = vld [vmem:[#allocation2 + $0xf] sm:$0xff]  ;;  %v17750_v33 = vld [vmem:[%s22997_s6 + $0x18] sm:$0xff]  }
  0x25   : > { %491 = vst.msk [vmem:[#allocation2 + $0x180] sm:$0xff] %vm442_vm1, %v17362_v5  ;;  %492 = vst.msk [vmem:[#allocation2 + $0x188] sm:$0xff] %vm442_vm1, %v17362_v5  ;;  %v613_v44 = vadd.f32 %v17463_v4, %v575_v34  ;;  %v614_v45 = vadd.f32 %v17463_v4, %v576_v35  ;;  %v665_v48 = vpack.c.bf16 %v642_v38, %v641_v32  ;;  %v17744_v32 = vld [vmem:[%s22997_s6 + $0x10] sm:$0xff]   ;;  %v17756_v34 = vld [vmem:[%s22995_s4] ss:$0 sm:$0xff] }
  0x26   : > { %493 = vst.msk [vmem:[#allocation2 + $0x190] sm:$0xff] %vm442_vm1, %v17362_v5  ;;  %494 = vst.msk [vmem:[#allocation2 + $0x198] sm:$0xff] %vm442_vm1, %v17362_v5  ;;  %v615_v49 = vadd.f32 %v17463_v4, %v577_v40  ;;  %v579_v50 = vmul.f32 %v17452_v2, %v539_v26  ;;  %v580_v51 = vmul.f32 %v17452_v2, %v540_v27  ;;  %v1081_v27 = vld [vmem:[#allocation2 + $0x8] sm:$0xff] }
  0x27   : > { %495 = vst.msk [vmem:[#allocation2 + $0x1a0] sm:$0xff] %vm442_vm1, %v17362_v5  ;;  %496 = vst.msk [vmem:[#allocation2 + $0x1a8] sm:$0xff] %vm442_vm1, %v17362_v5  ;;  %v666_v52 = vpack.c.bf16 %v644_v43, %v643_v39  ;;  %v645_v53 = vmax.f32 %v613_v44, 0.0  ;;  %v646_v54 = vmax.f32 %v614_v45, 0.0  ;;  %v616_v55 = vadd.f32 %v17463_v4, %v578_v46  ;;  %15727 = vmatprep.mubr.msk.bf16.mxu1 %vm674_vm2, %v665_v48 }
  0x28   : > { %497 = vst.msk [vmem:[#allocation2 + $0x1b0] sm:$0xff] %vm442_vm1, %v17362_v5  ;;  %498 = vst.msk [vmem:[#allocation2 + $0x1b8] sm:$0xff] %vm442_vm1, %v17362_v5  ;;  %v617_v57 = vadd.f32 %v17463_v4, %v579_v50  ;;  %v618_v58 = vadd.f32 %v17463_v4, %v580_v51  ;;  %v581_v59 = vmul.f32 %v17452_v2, %v541_v36  ;;  %v17761_v36 = vld [vmem:[%s22996_s5] ss:$0 sm:$0xff] }
  0x29   : > { %499 = vst.msk [vmem:[#allocation2 + $0x1c0] sm:$0xff] %vm442_vm1, %v17362_v5  ;;  %500 = vst.msk [vmem:[#allocation2 + $0x1c8] sm:$0xff] %vm442_vm1, %v17362_v5  ;;  %15728 = vmatmul.mubr.msk.bf16.vlgmr.msra.gmra.mxu1 %vm674_vm2, %v666_v52  ;;  %v667_v60 = vpack.c.bf16 %v646_v54, %v645_v53  ;;  %v648_v61 = vmax.f32 %v616_v55, 0.0  ;;  %v582_v62 = vmul.f32 %v17452_v2, %v542_v41 }
  0x2a   : > { %501 = vst.msk [vmem:[#allocation2 + $0x1d0] sm:$0xff] %vm442_vm1, %v17362_v5  ;;  %502 = vst.msk [vmem:[#allocation2 + $0x1d8] sm:$0xff] %vm442_vm1, %v17362_v5  ;;  %v583_v63 = vmul.f32 %v17452_v2, %v543_v42  ;;  %v649_v0 = vmax.f32 %v617_v57, 0.0  ;;  %v650_v1 = vmax.f32 %v618_v58, 0.0  ;;  %15744 = vmatpush3.bf16.msra.mxu1 %v17457_v3  ;;  %15720 = vmatmul.mubr.msk.bf16.gmra.mxu0 %vm674_vm2, %v662_v23 }
  0x2b   : > { %503 = vst.msk [vmem:[#allocation2 + $0x1e0] sm:$0xff] %vm442_vm1, %v17362_v5  ;;  %504 = vst.msk [vmem:[#allocation2 + $0x1e8] sm:$0xff] %vm442_vm1, %v17362_v5  ;;  %15731 = vmatprep.mubr.msk.bf16.mxu1 %vm674_vm2, %v667_v60  ;;  %v619_v6 = vadd.f32 %v17463_v4, %v581_v59  ;;  %v620_v7 = vadd.f32 %v17463_v4, %v582_v62  ;;  %v586_v19 = vmul.f32 %v17452_v2, %v546_v13 }
  0x2c   : > { %505 = vst.msk [vmem:[#allocation2 + $0x1f0] sm:$0xff] %vm442_vm1, %v17362_v5  ;;  %506 = vst.msk [vmem:[#allocation2 + $0x1f8] sm:$0xff] %vm442_vm1, %v17362_v5  ;;  %v621_v9 = vadd.f32 %v17463_v4, %v583_v63  ;;  %v669_v12 = vpack.c.bf16 %v650_v1, %v649_v0  ;;  %15811 = vmatprep.subr.bf16.mxu1 %v17744_v32 }
  0x2d   : > { %507 = vst.msk [vmem:[#allocation2 + $0x200] sm:$0xff] %vm442_vm1, %v17362_v5  ;;  %508 = vst.msk [vmem:[#allocation2 + $0x208] sm:$0xff] %vm442_vm1, %v17362_v5  ;;  %v651_v3 = vmax.f32 %v619_v6, 0.0  ;;  %v652_v15 = vmax.f32 %v620_v7, 0.0  ;;  %v624_v22 = vadd.f32 %v17463_v4, %v586_v19 }
  0x2e   : > { %509 = vst.msk [vmem:[#allocation2 + $0x210] sm:$0xff] %vm442_vm1, %v17362_v5  ;;  %510 = vst.msk [vmem:[#allocation2 + $0x218] sm:$0xff] %vm442_vm1, %v17362_v5  ;;  %v653_v16 = vmax.f32 %v621_v9, 0.0 }
  0x2f   : > { %511 = vst.msk [vmem:[#allocation2 + $0x220] sm:$0xff] %vm442_vm1, %v17362_v5  ;;  %512 = vst.msk [vmem:[#allocation2 + $0x228] sm:$0xff] %vm442_vm1, %v17362_v5  ;;  %v670_v20 = vpack.c.bf16 %v652_v15, %v651_v3  ;;  %v656_v25 = vmax.f32 %v624_v22, 0.0 }
  0x30   : > { %513 = vst.msk [vmem:[#allocation2 + $0x230] sm:$0xff] %vm442_vm1, %v17362_v5  ;;  %514 = vst.msk [vmem:[#allocation2 + $0x238] sm:$0xff] %vm442_vm1, %v17362_v5  ;;  %v605_v5 = vadd.f32 %v17463_v4, %v567_v56  ;;  %v647_v56 = vmax.f32 %v615_v49, 0.0 }
  0x32   : > { %v637_v14 = vmax.f32 %v605_v5, 0.0  ;;  %v584_v5 = vmul.f32 %v17452_v2, %v544_v47  ;;  %v668_v8 = vpack.c.bf16 %v648_v61, %v647_v56 }
  0x34   : > { %v663_v37 = vpack.c.bf16 %v638_v18, %v637_v14  ;;  %v622_v10 = vadd.f32 %v17463_v4, %v584_v5  ;;  %v664_v14 = vpack.c.bf16 %v640_v29, %v639_v28  ;;  %15732 = vmatmul.mubr.msk.bf16.gmra.mxu1 %vm674_vm2, %v668_v8  ;;  %v585_v18 = vmul.f32 %v17452_v2, %v545_v11  ;;  %v17191_v2 = vld [vmem:[%s22997_s6] sm:$0xff]   ;;  %v1082_v28 = vld [vmem:[#allocation2 + $0x10] sm:$0xff] }
  0x35   : > { %15735 = vmatprep.mubr.msk.bf16.mxu1 %vm674_vm2, %v669_v12  ;;  %15777 = vmatprep.subr.bf16.mxu0 %v17191_v2  ;;  %v1031_v29 = vld [vmem:[#allocation2 + $0x7] sm:$0xff] }
  0x36   : > { %15723 = vmatprep.mubr.msk.bf16.mxu0 %vm674_vm2, %v663_v37  ;;  %v654_v17 = vmax.f32 %v622_v10, 0.0  ;;  %v623_v21 = vadd.f32 %v17463_v4, %v585_v18  ;;  %15778 = vmatpush3.bf16.msra.mxu0 %v17191_v2  ;;  %v1113_v4 = vpack.c.bf16 %v1082_v28, %v1081_v27  ;;  %v1063_v31 = vpack.c.bf16 %v1032_v30, %v1031_v29 }
  0x37   : > { %15724 = vmatmul.mubr.msk.bf16.gmra.mxu0 %vm674_vm2, %v664_v14  ;;  %15845 = vmatprep.subr.bf16.mxu0 %v17750_v33 }
  0x38   : > { %v671_v23 = vpack.c.bf16 %v654_v17, %v653_v16  ;;  %v655_v24 = vmax.f32 %v623_v21, 0.0  ;;  %15779 = vmatprep.mubr.msk.bf16.mxu0 %vm442_vm1, %v1063_v31 }
  0x3a   : > { %v672_v26 = vpack.c.bf16 %v656_v25, %v655_v24 }
  0x3c   : > { %15736 = vmatmul.mubr.msk.bf16.gmra.mxu1 %vm674_vm2, %v670_v20 }
  0x3d   : > { %15739 = vmatprep.mubr.msk.bf16.mxu1 %vm674_vm2, %v671_v23 }
  0x44   : > { %15740 = vmatmul.mubr.msk.bf16.gmra.mxu1 %vm674_vm2, %v672_v26 }
  0x45   : > { %15745 = vmatprep.mubr.msk.bf16.mxu1 %vm442_vm1, %v1113_v4 }
  0xda   : > { %v15713_v35 = vpop.f32.mrf.mxu0 }
  0xdb   : > { %v898_v37 = vmul.f32 %v15713_v35, %v17756_v34 }
  0xdc   : > { %v761_v38 = vpop.f32.mrf.mxu0 }
  0xdd   : > { %v936_v39 = vadd.f32 %v17761_v36, %v898_v37  ;;  %v896_v40 = vmul.f32 %v17756_v34, %v761_v38 }
  0xde   : > { %v15714_v41 = vpop.f32.mrf.mxu0 }
  0xdf   : > { %v968_v42 = vmax.f32 %v936_v39, 0.0  ;;  %v934_v43 = vadd.f32 %v17761_v36, %v896_v40  ;;  %v899_v44 = vmul.f32 %v15714_v41, %v17756_v34 }
  0xe0   : > { %v764_v45 = vpop.f32.mrf.mxu0 }
  0xe1   : > { %1001 = vst.msk [vmem:[#allocation2 + $0x48] sm:$0xff] %vm442_vm1, %v968_v42  ;;  %v966_v46 = vmax.f32 %v934_v43, 0.0  ;;  %v937_v47 = vadd.f32 %v17761_v36, %v899_v44  ;;  %v897_v48 = vmul.f32 %v17756_v34, %v764_v45  ;;  %v17811_v44 = vld [vmem:[%s22997_s6 + $0x20] sm:$0xff]  }
  0xe2   : > { %v15717_v49 = vpop.f32.mrf.mxu0 }
  0xe3   : > { %999 = vst.msk [vmem:[#allocation2 + $0x28] sm:$0xff] %vm442_vm1, %v966_v46  ;;  %v969_v50 = vmax.f32 %v937_v47, 0.0  ;;  %v935_v51 = vadd.f32 %v17761_v36, %v897_v48  ;;  %v902_v52 = vmul.f32 %v15717_v49, %v17756_v34  ;;  %v17822_v49 = vld [vmem:[%s22997_s6 + $0x28] sm:$0xff]  }
  0xe4   : > { %v777_v53 = vpop.f32.mrf.mxu0 }
  0xe5   : > { %1002 = vst.msk [vmem:[#allocation2 + $0x50] sm:$0xff] %vm442_vm1, %v969_v50  ;;  %v967_v54 = vmax.f32 %v935_v51, 0.0  ;;  %v940_v55 = vadd.f32 %v17761_v36, %v902_v52  ;;  %v900_v56 = vmul.f32 %v17756_v34, %v777_v53 }
  0xe6   : > { %v15718_v57 = vpop.f32.mrf.mxu0 }
  0xe7   : > { %1000 = vst.msk [vmem:[#allocation2 + $0x30] sm:$0xff] %vm442_vm1, %v967_v54  ;;  %v972_v58 = vmax.f32 %v940_v55, 0.0  ;;  %v938_v59 = vadd.f32 %v17761_v36, %v900_v56  ;;  %v903_v60 = vmul.f32 %v15718_v57, %v17756_v34 }
  0xe8   : > { %v780_v61 = vpop.f32.mrf.mxu0  ;;  %v1085_v13 = vld [vmem:[#allocation2 + $0x48] sm:$0xff] }
  0xe9   : > { %v15729_v62 = vpop.f32.mrf.mxu1  ;;  %1005 = vst.msk [vmem:[#allocation2 + $0x88] sm:$0xff] %vm442_vm1, %v972_v58  ;;  %v970_v63 = vmax.f32 %v938_v59, 0.0  ;;  %v941_v0 = vadd.f32 %v17761_v36, %v903_v60  ;;  %v901_v1 = vmul.f32 %v17756_v34, %v780_v61  ;;  %v1035_v21 = vld [vmem:[#allocation2 + $0x47] sm:$0xff] }
  0xea   : > { %v914_v5 = vmul.f32 %v15729_v62, %v17756_v34  ;;  %v15721_v6 = vpop.f32.mrf.mxu0  ;;  %v1083_v23 = vld [vmem:[#allocation2 + $0x28] sm:$0xff] }
  0xeb   : > { %v825_v7 = vpop.f32.mrf.mxu1  ;;  %1003 = vst.msk [vmem:[#allocation2 + $0x68] sm:$0xff] %vm442_vm1, %v970_v63  ;;  %v973_v8 = vmax.f32 %v941_v0, 0.0  ;;  %v939_v9 = vadd.f32 %v17761_v36, %v901_v1  ;;  %v906_v10 = vmul.f32 %v15721_v6, %v17756_v34  ;;  %v1033_v37 = vld [vmem:[#allocation2 + $0x27] sm:$0xff] }
  0xec   : > { %v952_v11 = vadd.f32 %v17761_v36, %v914_v5  ;;  %v793_v12 = vpop.f32.mrf.mxu0  ;;  %v1086_v14 = vld [vmem:[#allocation2 + $0x50] sm:$0xff]  ;;  %v912_v15 = vmul.f32 %v17756_v34, %v825_v7 }
  0xed   : > { %v1036_v3 = vld [vmem:[#allocation2 + $0x4f] sm:$0xff]  ;;  %v15730_v16 = vpop.f32.mrf.mxu1  ;;  %1006 = vst.msk [vmem:[#allocation2 + $0x90] sm:$0xff] %vm442_vm1, %v973_v8  ;;  %v971_v17 = vmax.f32 %v939_v9, 0.0  ;;  %v944_v18 = vadd.f32 %v17761_v36, %v906_v10  ;;  %v904_v19 = vmul.f32 %v17756_v34, %v793_v12  ;;  %v17792_v20 = vpack.c.bf16 %v1086_v14, %v1085_v13 }
  0xee   : > { %v15722_v22 = vpop.f32.mrf.mxu0  ;;  %v1084_v24 = vld [vmem:[#allocation2 + $0x30] sm:$0xff]  ;;  %v17794_v26 = vpack.c.bf16 %v1036_v3, %v1035_v21  ;;  %v984_v2 = vmax.f32 %v952_v11, 0.0  ;;  %v950_v27 = vadd.f32 %v17761_v36, %v912_v15  ;;  %v915_v28 = vmul.f32 %v15730_v16, %v17756_v34 }
  0xef   : > { %v1034_v25 = vld [vmem:[#allocation2 + $0x2f] sm:$0xff]  ;;  %v828_v29 = vpop.f32.mrf.mxu1  ;;  %1004 = vst.msk [vmem:[#allocation2 + $0x70] sm:$0xff] %vm442_vm1, %v971_v17  ;;  %v976_v4 = vmax.f32 %v944_v18, 0.0  ;;  %v942_v30 = vadd.f32 %v17761_v36, %v904_v19  ;;  %v907_v31 = vmul.f32 %v15722_v22, %v17756_v34  ;;  %v17801_v35 = vpack.c.bf16 %v1084_v24, %v1083_v23 }
  0xf0   : > { %v796_v38 = vpop.f32.mrf.mxu0  ;;  %v17803_v39 = vpack.c.bf16 %v1034_v25, %v1033_v37  ;;  %1017 = vst.msk [vmem:[#allocation2 + $0x148] sm:$0xff] %vm442_vm1, %v984_v2  ;;  %v982_v40 = vmax.f32 %v950_v27, 0.0  ;;  %v953_v41 = vadd.f32 %v17761_v36, %v915_v28  ;;  %v913_v42 = vmul.f32 %v17756_v34, %v828_v29  ;;  %v1089_v59 = vld [vmem:[#allocation2 + $0x88] sm:$0xff] }
  0xf1   : > { %1009 = vst.msk [vmem:[#allocation2 + $0xc8] sm:$0xff] %vm442_vm1, %v976_v4  ;;  %v974_v45 = vmax.f32 %v942_v30, 0.0  ;;  %v945_v46 = vadd.f32 %v17761_v36, %v907_v31  ;;  %v905_v47 = vmul.f32 %v17756_v34, %v796_v38  ;;  %15746 = vmatmul.mubr.msk.bf16.vlgmr.msra.gmra.mxu1 %vm442_vm1, %v17801_v35  ;;  %v1039_v7 = vld [vmem:[#allocation2 + $0x87] sm:$0xff] }
  0xf2   : > { %15780 = vmatmul.mubr.msk.bf16.vlgmr.msra.gmra.mxu0 %vm442_vm1, %v17803_v39  ;;  %15812 = vmatpush3.bf16.msra.mxu1 %v17744_v32  ;;  %1015 = vst.msk [vmem:[#allocation2 + $0x128] sm:$0xff] %vm442_vm1, %v982_v40  ;;  %v985_v51 = vmax.f32 %v953_v41, 0.0  ;;  %v951_v52 = vadd.f32 %v17761_v36, %v913_v42  ;;  %v1087_v9 = vld [vmem:[#allocation2 + $0x68] sm:$0xff] }
  0xf3   : > { %1007 = vst.msk [vmem:[#allocation2 + $0xa8] sm:$0xff] %vm442_vm1, %v974_v45  ;;  %v977_v54 = vmax.f32 %v945_v46, 0.0  ;;  %v943_v55 = vadd.f32 %v17761_v36, %v905_v47  ;;  %15749 = vmatprep.mubr.msk.bf16.mxu1 %vm442_vm1, %v17792_v20  ;;  %15783 = vmatprep.mubr.msk.bf16.mxu0 %vm442_vm1, %v17794_v26  ;;  %v1037_v19 = vld [vmem:[#allocation2 + $0x67] sm:$0xff] }
  0xf4   : > { %v15733_v43 = vpop.f32.mrf.mxu1  ;;  %1018 = vst.msk [vmem:[#allocation2 + $0x150] sm:$0xff] %vm442_vm1, %v985_v51  ;;  %v983_v58 = vmax.f32 %v951_v52, 0.0  ;;  %v1090_v60 = vld [vmem:[#allocation2 + $0x90] sm:$0xff]  ;;  %15846 = vmatpush3.bf16.msra.mxu0 %v17750_v33  ;;  %15879 = vmatprep.subr.bf16.mxu1 %v17811_v44 }
  0xf5   : > { %v918_v48 = vmul.f32 %v15733_v43, %v17756_v34  ;;  %v1040_v61 = vld [vmem:[#allocation2 + $0x8f] sm:$0xff]  ;;  %1010 = vst.msk [vmem:[#allocation2 + $0xd0] sm:$0xff] %vm442_vm1, %v977_v54  ;;  %v975_v0 = vmax.f32 %v943_v55, 0.0  ;;  %v17844_v6 = vpack.c.bf16 %v1090_v60, %v1089_v59  ;;  %15913 = vmatprep.subr.bf16.mxu0 %v17822_v49 }
  0xf6   : > { %v841_v53 = vpop.f32.mrf.mxu1  ;;  %v1088_v10 = vld [vmem:[#allocation2 + $0x70] sm:$0xff]  ;;  %1016 = vst.msk [vmem:[#allocation2 + $0x130] sm:$0xff] %vm442_vm1, %v983_v58  ;;  %v17848_v33 = vpack.c.bf16 %v1040_v61, %v1039_v7 }
  0xf7   : > { %v15725_v50 = vpop.f32.mrf.mxu0  ;;  %v956_v32 = vadd.f32 %v17761_v36, %v918_v48  ;;  %v916_v62 = vmul.f32 %v17756_v34, %v841_v53  ;;  %v1038_v11 = vld [vmem:[#allocation2 + $0x6f] sm:$0xff]  ;;  %1008 = vst.msk [vmem:[#allocation2 + $0xb0] sm:$0xff] %vm442_vm1, %v975_v0  ;;  %v17855_v18 = vpack.c.bf16 %v1088_v10, %v1087_v9 }
  0xf8   : > { %v910_v56 = vmul.f32 %v15725_v50, %v17756_v34  ;;  %v15734_v63 = vpop.f32.mrf.mxu1  ;;  %v17857_v22 = vpack.c.bf16 %v1038_v11, %v1037_v19  ;;  %v1093_v59 = vld [vmem:[#allocation2 + $0xc8] sm:$0xff] }
  0xf9   : > { %v809_v57 = vpop.f32.mrf.mxu0  ;;  %v988_v12 = vmax.f32 %v956_v32, 0.0  ;;  %v954_v13 = vadd.f32 %v17761_v36, %v916_v62  ;;  %v919_v14 = vmul.f32 %v15734_v63, %v17756_v34  ;;  %15750 = vmatmul.mubr.msk.bf16.gmra.mxu1 %vm442_vm1, %v17855_v18  ;;  %v1043_v62 = vld [vmem:[#allocation2 + $0xc7] sm:$0xff] }
  0xfa   : > { %v948_v1 = vadd.f32 %v17761_v36, %v910_v56  ;;  %v908_v5 = vmul.f32 %v17756_v34, %v809_v57  ;;  %v844_v3 = vpop.f32.mrf.mxu1  ;;  %15784 = vmatmul.mubr.msk.bf16.gmra.mxu0 %vm442_vm1, %v17857_v22  ;;  %15753 = vmatprep.mubr.msk.bf16.mxu1 %vm442_vm1, %v17844_v6  ;;  %v1091_v47 = vld [vmem:[#allocation2 + $0xa8] sm:$0xff] }
  0xfb   : > { %v15726_v8 = vpop.f32.mrf.mxu0  ;;  %1021 = vst.msk [vmem:[#allocation2 + $0x188] sm:$0xff] %vm442_vm1, %v988_v12  ;;  %v986_v23 = vmax.f32 %v954_v13, 0.0  ;;  %v957_v24 = vadd.f32 %v17761_v36, %v919_v14  ;;  %v917_v25 = vmul.f32 %v17756_v34, %v844_v3  ;;  %15787 = vmatprep.mubr.msk.bf16.mxu0 %vm442_vm1, %v17848_v33  ;;  %v1041_v48 = vld [vmem:[#allocation2 + $0xa7] sm:$0xff] }
  0xfc   : > { %v980_v15 = vmax.f32 %v948_v1, 0.0  ;;  %v946_v16 = vadd.f32 %v17761_v36, %v908_v5  ;;  %v911_v17 = vmul.f32 %v15726_v8, %v17756_v34  ;;  %v15737_v2 = vpop.f32.mrf.mxu1  ;;  %v1094_v50 = vld [vmem:[#allocation2 + $0xd0] sm:$0xff] }
  0xfd   : > { %v812_v21 = vpop.f32.mrf.mxu0  ;;  %v922_v4 = vmul.f32 %v15737_v2, %v17756_v34  ;;  %1019 = vst.msk [vmem:[#allocation2 + $0x168] sm:$0xff] %vm442_vm1, %v986_v23  ;;  %v989_v30 = vmax.f32 %v957_v24, 0.0  ;;  %v955_v31 = vadd.f32 %v17761_v36, %v917_v25  ;;  %v1044_v54 = vld [vmem:[#allocation2 + $0xcf] sm:$0xff]  ;;  %v17892_v61 = vpack.c.bf16 %v1094_v50, %v1093_v59  ;;  %v1051_v50 = vld [vmem:[#allocation2 + $0x147] sm:$0xff] }
  0xfe   : > { %1013 = vst.msk [vmem:[#allocation2 + $0x108] sm:$0xff] %vm442_vm1, %v980_v15  ;;  %v978_v27 = vmax.f32 %v946_v16, 0.0  ;;  %v949_v28 = vadd.f32 %v17761_v36, %v911_v17  ;;  %v909_v29 = vmul.f32 %v17756_v34, %v812_v21  ;;  %v857_v37 = vpop.f32.mrf.mxu1  ;;  %v1092_v52 = vld [vmem:[#allocation2 + $0xb0] sm:$0xff]  ;;  %v17897_v5 = vpack.c.bf16 %v1044_v54, %v1043_v62 }
  0xff   : > { %v960_v41 = vadd.f32 %v17761_v36, %v922_v4  ;;  %v920_v42 = vmul.f32 %v17756_v34, %v857_v37  ;;  %1022 = vst.msk [vmem:[#allocation2 + $0x190] sm:$0xff] %vm442_vm1, %v989_v30  ;;  %v987_v43 = vmax.f32 %v955_v31, 0.0  ;;  %v1042_v53 = vld [vmem:[#allocation2 + $0xaf] sm:$0xff]  ;;  %v17886_v57 = vpack.c.bf16 %v1092_v52, %v1091_v47  ;;  %v1049_v47 = vld [vmem:[#allocation2 + $0x127] sm:$0xff] }
 0x100   : > { %1011 = vst.msk [vmem:[#allocation2 + $0xe8] sm:$0xff] %vm442_vm1, %v978_v27  ;;  %v981_v38 = vmax.f32 %v949_v28, 0.0  ;;  %v947_v40 = vadd.f32 %v17761_v36, %v909_v29  ;;  %v15738_v45 = vpop.f32.mrf.mxu1  ;;  %v17888_v58 = vpack.c.bf16 %v1042_v53, %v1041_v48  ;;  %v1050_v48 = vld [vmem:[#allocation2 + $0x12f] sm:$0xff] }
 0x101   : > { %v992_v51 = vmax.f32 %v960_v41, 0.0  ;;  %1020 = vst.msk [vmem:[#allocation2 + $0x170] sm:$0xff] %vm442_vm1, %v987_v43  ;;  %v958_v55 = vadd.f32 %v17761_v36, %v920_v42  ;;  %v923_v56 = vmul.f32 %v15738_v45, %v17756_v34  ;;  %15754 = vmatmul.mubr.msk.bf16.gmra.mxu1 %vm442_vm1, %v17886_v57  ;;  %v1099_v43 = vld [vmem:[#allocation2 + $0x128] sm:$0xff]  ;;  %v1100_v45 = vld [vmem:[#allocation2 + $0x130] sm:$0xff]  ;;  %v17939_v53 = vpack.c.bf16 %v1050_v48, %v1049_v47 }
 0x102   : > { %1014 = vst.msk [vmem:[#allocation2 + $0x110] sm:$0xff] %vm442_vm1, %v981_v38  ;;  %v979_v46 = vmax.f32 %v947_v40, 0.0  ;;  %v860_v32 = vpop.f32.mrf.mxu1  ;;  %15788 = vmatmul.mubr.msk.bf16.gmra.mxu0 %vm442_vm1, %v17888_v58  ;;  %15757 = vmatprep.mubr.msk.bf16.mxu1 %vm442_vm1, %v17892_v61  ;;  %v17937_v52 = vpack.c.bf16 %v1100_v45, %v1099_v43  ;;  %v1105_v59 = vld [vmem:[#allocation2 + $0x188] sm:$0xff]  ;;  %v1565_v43 = vld [vmem:[#allocation2 + $0x31] sm:$0xff] }
 0x103   : > { %1025 = vst.msk [vmem:[#allocation2 + $0x1c8] sm:$0xff] %vm442_vm1, %v992_v51  ;;  %v921_v60 = vmul.f32 %v17756_v34, %v860_v32  ;;  %v990_v63 = vmax.f32 %v958_v55, 0.0  ;;  %v961_v0 = vadd.f32 %v17761_v36, %v923_v56  ;;  %15791 = vmatprep.mubr.msk.bf16.mxu0 %vm442_vm1, %v17897_v5  ;;  %v1052_v51 = vld [vmem:[#allocation2 + $0x14f] sm:$0xff] }
 0x104   : > { %1012 = vst.msk [vmem:[#allocation2 + $0xf0] sm:$0xff] %vm442_vm1, %v979_v46  ;;  %v15741_v1 = vpop.f32.mrf.mxu1  ;;  %v1101_v46 = vld [vmem:[#allocation2 + $0x148] sm:$0xff]  ;;  %v17945_v55 = vpack.c.bf16 %v1052_v51, %v1051_v50  ;;  %v18001_v48 = vld [vmem:[%s22997_s6 + $0x30] sm:$0xff]  }
 0x105   : > { %v959_v7 = vadd.f32 %v17761_v36, %v921_v60  ;;  %v926_v8 = vmul.f32 %v15741_v1, %v17756_v34  ;;  %1023 = vst.msk [vmem:[#allocation2 + $0x1a8] sm:$0xff] %vm442_vm1, %v990_v63  ;;  %v993_v9 = vmax.f32 %v961_v0, 0.0  ;;  %v1097_v29 = vld [vmem:[#allocation2 + $0x108] sm:$0xff]  ;;  %v1569_v51 = vld [vmem:[#allocation2 + $0x71] sm:$0xff] }
 0x106   : > { %v873_v10 = vpop.f32.mrf.mxu1  ;;  %v1047_v37 = vld [vmem:[#allocation2 + $0x107] sm:$0xff]  ;;  %v1106_v63 = vld [vmem:[#allocation2 + $0x190] sm:$0xff] }
 0x107   : > { %v991_v11 = vmax.f32 %v959_v7, 0.0  ;;  %v964_v12 = vadd.f32 %v17761_v36, %v926_v8  ;;  %v924_v13 = vmul.f32 %v17756_v34, %v873_v10  ;;  %1026 = vst.msk [vmem:[#allocation2 + $0x1d0] sm:$0xff] %vm442_vm1, %v993_v9  ;;  %v1095_v3 = vld [vmem:[#allocation2 + $0xe8] sm:$0xff]  ;;  %v17957_v9 = vpack.c.bf16 %v1106_v63, %v1105_v59  ;;  %v1575_v63 = vld [vmem:[#allocation2 + $0xd1] sm:$0xff] }
 0x108   : > { %v15742_v14 = vpop.f32.mrf.mxu1  ;;  %v1045_v15 = vld [vmem:[#allocation2 + $0xe7] sm:$0xff]  ;;  %v1104_v32 = vld [vmem:[#allocation2 + $0x170] sm:$0xff] }
 0x109   : > { %1024 = vst.msk [vmem:[#allocation2 + $0x1b0] sm:$0xff] %vm442_vm1, %v991_v11  ;;  %v1098_v16 = vld [vmem:[#allocation2 + $0x110] sm:$0xff]  ;;  %v996_v17 = vmax.f32 %v964_v12, 0.0  ;;  %v962_v19 = vadd.f32 %v17761_v36, %v924_v13  ;;  %v927_v25 = vmul.f32 %v15742_v14, %v17756_v34  ;;  %v1103_v56 = vld [vmem:[#allocation2 + $0x168] sm:$0xff] }
 0x10a   : > { %v1048_v24 = vld [vmem:[#allocation2 + $0x10f] sm:$0xff]  ;;  %v876_v2 = vpop.f32.mrf.mxu1  ;;  %v17920_v31 = vpack.c.bf16 %v1098_v16, %v1097_v29  ;;  %v1053_v60 = vld [vmem:[#allocation2 + $0x167] sm:$0xff]  ;;  %v17953_v7 = vpack.c.bf16 %v1104_v32, %v1103_v56 }
 0x10b   : > { %v1096_v21 = vld [vmem:[#allocation2 + $0xf0] sm:$0xff]  ;;  %1029 = vst.msk [vmem:[#allocation2 + $0x208] sm:$0xff] %vm442_vm1, %v996_v17  ;;  %v994_v4 = vmax.f32 %v962_v19, 0.0  ;;  %v925_v30 = vmul.f32 %v17756_v34, %v876_v2  ;;  %v965_v38 = vadd.f32 %v17761_v36, %v927_v25  ;;  %v17925_v40 = vpack.c.bf16 %v1048_v24, %v1047_v37  ;;  %v1055_v0 = vld [vmem:[#allocation2 + $0x187] sm:$0xff] }
 0x10c   : > { %v1046_v23 = vld [vmem:[#allocation2 + $0xef] sm:$0xff]  ;;  %v17914_v27 = vpack.c.bf16 %v1096_v21, %v1095_v3  ;;  %v1057_v14 = vld [vmem:[#allocation2 + $0x1a7] sm:$0xff] }
 0x10d   : > { %v17916_v28 = vpack.c.bf16 %v1046_v23, %v1045_v15  ;;  %1027 = vst.msk [vmem:[#allocation2 + $0x1e8] sm:$0xff] %vm442_vm1, %v994_v4  ;;  %v963_v41 = vadd.f32 %v17761_v36, %v925_v30  ;;  %v997_v34 = vmax.f32 %v965_v38, 0.0  ;;  %v1102_v36 = vld [vmem:[#allocation2 + $0x150] sm:$0xff]  ;;  %v1107_v11 = vld [vmem:[#allocation2 + $0x1a8] sm:$0xff] }
 0x10e   : > { %15758 = vmatmul.mubr.msk.bf16.gmra.mxu1 %vm442_vm1, %v17914_v27  ;;  %v17941_v54 = vpack.c.bf16 %v1102_v36, %v1101_v46  ;;  %v1054_v62 = vld [vmem:[#allocation2 + $0x16f] sm:$0xff]  ;;  %v1059_v16 = vld [vmem:[#allocation2 + $0x1c7] sm:$0xff] }
 0x10f   : > { %15792 = vmatmul.mubr.msk.bf16.gmra.mxu0 %vm442_vm1, %v17916_v28  ;;  %15761 = vmatprep.mubr.msk.bf16.mxu1 %vm442_vm1, %v17920_v31  ;;  %v995_v42 = vmax.f32 %v963_v41, 0.0  ;;  %1030 = vst.msk [vmem:[#allocation2 + $0x210] sm:$0xff] %vm442_vm1, %v997_v34  ;;  %v1056_v1 = vld [vmem:[#allocation2 + $0x18f] sm:$0xff]  ;;  %v17955_v8 = vpack.c.bf16 %v1054_v62, %v1053_v60 }
 0x110   : > { %15795 = vmatprep.mubr.msk.bf16.mxu0 %vm442_vm1, %v17925_v40  ;;  %v17961_v10 = vpack.c.bf16 %v1056_v1, %v1055_v0  ;;  %v1108_v12 = vld [vmem:[#allocation2 + $0x1b0] sm:$0xff]  ;;  %v1109_v13 = vld [vmem:[#allocation2 + $0x1c8] sm:$0xff] }
 0x111   : > { %1028 = vst.msk [vmem:[#allocation2 + $0x1f0] sm:$0xff] %vm442_vm1, %v995_v42  ;;  %v1058_v3 = vld [vmem:[#allocation2 + $0x1af] sm:$0xff]  ;;  %v17969_v19 = vpack.c.bf16 %v1108_v12, %v1107_v11 }
 0x112   : > { %v1110_v15 = vld [vmem:[#allocation2 + $0x1d0] sm:$0xff]  ;;  %v17971_v21 = vpack.c.bf16 %v1058_v3, %v1057_v14 }
 0x113   : > { %v1060_v17 = vld [vmem:[#allocation2 + $0x1cf] sm:$0xff]  ;;  %v17973_v23 = vpack.c.bf16 %v1110_v15, %v1109_v13 }
 0x114   : > { %v17977_v24 = vpack.c.bf16 %v1060_v17, %v1059_v16  ;;  %v1562_v25 = vld [vmem:[#allocation2 + $0x9] sm:$0xff]  ;;  %v1563_v2 = vld [vmem:[#allocation2 + $0x11] sm:$0xff] }
 0x115   : > { %v1111_v29 = vld [vmem:[#allocation2 + $0x1e8] sm:$0xff]  ;;  %v1594_v38 = vpack.c.bf16 %v1563_v2, %v1562_v25  ;;  %v1567_v46 = vld [vmem:[#allocation2 + $0x51] sm:$0xff] }
 0x116   : > { %15762 = vmatmul.mubr.msk.bf16.gmra.mxu1 %vm442_vm1, %v17937_v52  ;;  %v1061_v30 = vld [vmem:[#allocation2 + $0x1e7] sm:$0xff]  ;;  %v1571_v32 = vld [vmem:[#allocation2 + $0x91] sm:$0xff] }
 0x117   : > { %15796 = vmatmul.mubr.msk.bf16.gmra.mxu0 %vm442_vm1, %v17939_v53  ;;  %15765 = vmatprep.mubr.msk.bf16.mxu1 %vm442_vm1, %v17941_v54  ;;  %v1564_v42 = vld [vmem:[#allocation2 + $0x29] sm:$0xff]  ;;  %v1577_v12 = vld [vmem:[#allocation2 + $0xf1] sm:$0xff] }
 0x118   : > { %15799 = vmatprep.mubr.msk.bf16.mxu0 %vm442_vm1, %v17945_v55  ;;  %v1112_v4 = vld [vmem:[#allocation2 + $0x1f0] sm:$0xff]  ;;  %v17996_v47 = vpack.c.bf16 %v1565_v43, %v1564_v42 }
 0x119   : > { %v1062_v37 = vld [vmem:[#allocation2 + $0x1ef] sm:$0xff]  ;;  %v17985_v41 = vpack.c.bf16 %v1112_v4, %v1111_v29 }
 0x11a   : > { %v17987_v34 = vpack.c.bf16 %v1062_v37, %v1061_v30  ;;  %v1566_v45 = vld [vmem:[#allocation2 + $0x49] sm:$0xff]  ;;  %v1579_v14 = vld [vmem:[#allocation2 + $0x111] sm:$0xff] }
 0x11b   : > { %v18005_v36 = vpack.c.bf16 %v1567_v46, %v1566_v45  ;;  %v1568_v50 = vld [vmem:[#allocation2 + $0x69] sm:$0xff]  ;;  %v1581_v17 = vld [vmem:[#allocation2 + $0x131] sm:$0xff] }
 0x11c   : > { %v1570_v56 = vld [vmem:[#allocation2 + $0x89] sm:$0xff]  ;;  %v18022_v59 = vpack.c.bf16 %v1569_v51, %v1568_v50  ;;  %v1583_v2 = vld [vmem:[#allocation2 + $0x151] sm:$0xff] }
 0x11d   : > { %v18024_v60 = vpack.c.bf16 %v1571_v32, %v1570_v56  ;;  %v1574_v62 = vld [vmem:[#allocation2 + $0xc9] sm:$0xff]  ;;  %v1585_v37 = vld [vmem:[#allocation2 + $0x171] sm:$0xff] }
 0x11e   : > { %15766 = vmatmul.mubr.msk.bf16.gmra.mxu1 %vm442_vm1, %v17953_v7  ;;  %v18036_v1 = vpack.c.bf16 %v1575_v63, %v1574_v62  ;;  %v1576_v11 = vld [vmem:[#allocation2 + $0xe9] sm:$0xff]  ;;  %v1587_v42 = vld [vmem:[#allocation2 + $0x191] sm:$0xff] }
 0x11f   : > { %15800 = vmatmul.mubr.msk.bf16.gmra.mxu0 %vm442_vm1, %v17955_v8  ;;  %15769 = vmatprep.mubr.msk.bf16.mxu1 %vm442_vm1, %v17957_v9  ;;  %v1578_v13 = vld [vmem:[#allocation2 + $0x109] sm:$0xff]  ;;  %v18046_v3 = vpack.c.bf16 %v1577_v12, %v1576_v11  ;;  %v1589_v50 = vld [vmem:[#allocation2 + $0x1b1] sm:$0xff] }
 0x120   : > { %15803 = vmatprep.mubr.msk.bf16.mxu0 %vm442_vm1, %v17961_v10  ;;  %v18048_v15 = vpack.c.bf16 %v1579_v14, %v1578_v13  ;;  %v1580_v16 = vld [vmem:[#allocation2 + $0x129] sm:$0xff]  ;;  %v1591_v56 = vld [vmem:[#allocation2 + $0x1d1] sm:$0xff]  ;;  %v17198_v14 = vld [vmem:[%s22997_s6 + $0x40] sm:$0xff]  }
 0x121   : > { %v1582_v25 = vld [vmem:[#allocation2 + $0x149] sm:$0xff]  ;;  %v18058_v29 = vpack.c.bf16 %v1581_v17, %v1580_v16  ;;  %v1593_v62 = vld [vmem:[#allocation2 + $0x1f1] sm:$0xff] }
 0x122   : > { %v18060_v4 = vpack.c.bf16 %v1583_v2, %v1582_v25  ;;  %v1584_v30 = vld [vmem:[#allocation2 + $0x169] sm:$0xff] }
 0x123   : > { %v1605_v43 = vpack.c.bf16 %v1585_v37, %v1584_v30  ;;  %v1588_v46 = vld [vmem:[#allocation2 + $0x1a9] sm:$0xff] }
 0x124   : > { %v1590_v51 = vld [vmem:[#allocation2 + $0x1c9] sm:$0xff]  ;;  %v1607_v32 = vpack.c.bf16 %v1589_v50, %v1588_v46 }
 0x125   : > { %v1890_v63 = vld [vmem:[#allocation2 + $0x207] sm:$0xff]  ;;  %v1891_v11 = vld [vmem:[#allocation2 + $0x20f] sm:$0xff] }
 0x126   : > { %15770 = vmatmul.mubr.msk.bf16.gmra.mxu1 %vm442_vm1, %v17969_v19  ;;  %v18085_v13 = vpack.c.bf16 %v1891_v11, %v1890_v63 }
 0x127   : > { %15804 = vmatmul.mubr.msk.bf16.gmra.mxu0 %vm442_vm1, %v17971_v21  ;;  %15773 = vmatprep.mubr.msk.bf16.mxu1 %vm442_vm1, %v17973_v23 }
 0x128   : > { %15807 = vmatprep.mubr.msk.bf16.mxu0 %vm442_vm1, %v17977_v24 }
 0x12e   : > { %15774 = vmatmul.mubr.msk.bf16.gmra.mxu1 %vm442_vm1, %v17985_v41 }
 0x12f   : > { %15808 = vmatmul.mubr.msk.bf16.gmra.mxu0 %vm442_vm1, %v17987_v34  ;;  %15813 = vmatprep.mubr.msk.bf16.mxu1 %vm442_vm1, %v1594_v38  ;;  %v1586_v38 = vld [vmem:[#allocation2 + $0x189] sm:$0xff] }
 0x130   : > { %15847 = vmatprep.mubr.msk.bf16.mxu0 %vm442_vm1, %v17803_v39  ;;  %v18010_v39 = vld [vmem:[%s22997_s6 + $0x38] sm:$0xff]   ;;  %v18070_v45 = vpack.c.bf16 %v1587_v42, %v1586_v38 }
 0x136   : > { %15814 = vmatmul.mubr.msk.bf16.vlgmr.msra.gmra.mxu1 %vm442_vm1, %v17996_v47 }
 0x137   : > { %15848 = vmatmul.mubr.msk.bf16.vlgmr.msra.gmra.mxu0 %vm442_vm1, %v17794_v26  ;;  %15880 = vmatpush3.bf16.msra.mxu1 %v17811_v44  ;;  %v1572_v44 = vld [vmem:[#allocation2 + $0xa9] sm:$0xff] }
 0x138   : > { %15817 = vmatprep.mubr.msk.bf16.mxu1 %vm442_vm1, %v18005_v36  ;;  %15851 = vmatprep.mubr.msk.bf16.mxu0 %vm442_vm1, %v17857_v22 }
 0x139   : > { %15914 = vmatpush3.bf16.msra.mxu0 %v17822_v49  ;;  %15947 = vmatprep.subr.bf16.mxu1 %v18001_v48  ;;  %v1573_v49 = vld [vmem:[#allocation2 + $0xb1] sm:$0xff] }
 0x13a   : > { %15981 = vmatprep.subr.bf16.mxu0 %v18010_v39  ;;  %v18034_v0 = vpack.c.bf16 %v1573_v49, %v1572_v44  ;;  %v1608_v44 = vpack.c.bf16 %v1591_v56, %v1590_v51  ;;  %v1592_v49 = vld [vmem:[#allocation2 + $0x1e9] sm:$0xff] }
 0x13b   : > { %v1609_v12 = vpack.c.bf16 %v1593_v62, %v1592_v49 }
 0x13e   : > { %15818 = vmatmul.mubr.msk.bf16.gmra.mxu1 %vm442_vm1, %v18022_v59 }
 0x13f   : > { %15852 = vmatmul.mubr.msk.bf16.gmra.mxu0 %vm442_vm1, %v17848_v33  ;;  %15821 = vmatprep.mubr.msk.bf16.mxu1 %vm442_vm1, %v18024_v60 }
 0x140   : > { %15855 = vmatprep.mubr.msk.bf16.mxu0 %vm442_vm1, %v17888_v58 }
 0x146   : > { %15822 = vmatmul.mubr.msk.bf16.gmra.mxu1 %vm442_vm1, %v18034_v0 }
 0x147   : > { %15856 = vmatmul.mubr.msk.bf16.gmra.mxu0 %vm442_vm1, %v17897_v5  ;;  %15825 = vmatprep.mubr.msk.bf16.mxu1 %vm442_vm1, %v18036_v1 }
 0x148   : > { %15859 = vmatprep.mubr.msk.bf16.mxu0 %vm442_vm1, %v17916_v28 }
 0x14e   : > { %15826 = vmatmul.mubr.msk.bf16.gmra.mxu1 %vm442_vm1, %v18046_v3 }
 0x14f   : > { %15860 = vmatmul.mubr.msk.bf16.gmra.mxu0 %vm442_vm1, %v17925_v40  ;;  %15829 = vmatprep.mubr.msk.bf16.mxu1 %vm442_vm1, %v18048_v15 }
 0x150   : > { %15863 = vmatprep.mubr.msk.bf16.mxu0 %vm442_vm1, %v17939_v53 }
 0x156   : > { %15830 = vmatmul.mubr.msk.bf16.gmra.mxu1 %vm442_vm1, %v18058_v29 }
 0x157   : > { %15864 = vmatmul.mubr.msk.bf16.gmra.mxu0 %vm442_vm1, %v17945_v55  ;;  %15833 = vmatprep.mubr.msk.bf16.mxu1 %vm442_vm1, %v18060_v4 }
 0x158   : > { %15867 = vmatprep.mubr.msk.bf16.mxu0 %vm442_vm1, %v17955_v8 }
 0x15e   : > { %15834 = vmatmul.mubr.msk.bf16.gmra.mxu1 %vm442_vm1, %v1605_v43 }
 0x15f   : > { %15868 = vmatmul.mubr.msk.bf16.gmra.mxu0 %vm442_vm1, %v17961_v10  ;;  %15837 = vmatprep.mubr.msk.bf16.mxu1 %vm442_vm1, %v18070_v45 }
 0x160   : > { %15871 = vmatprep.mubr.msk.bf16.mxu0 %vm442_vm1, %v17971_v21 }
 0x166   : > { %15838 = vmatmul.mubr.msk.bf16.gmra.mxu1 %vm442_vm1, %v1607_v32 }
 0x167   : > { %15872 = vmatmul.mubr.msk.bf16.gmra.mxu0 %vm442_vm1, %v17977_v24  ;;  %15841 = vmatprep.mubr.msk.bf16.mxu1 %vm442_vm1, %v1608_v44 }
 0x168   : > { %15875 = vmatprep.mubr.msk.bf16.mxu0 %vm442_vm1, %v17987_v34 }
 0x16e   : > { %15842 = vmatmul.mubr.msk.bf16.gmra.mxu1 %vm442_vm1, %v1609_v12 }
 0x16f   : > { %15876 = vmatmul.mubr.msk.bf16.gmra.mxu0 %vm442_vm1, %v18085_v13  ;;  %15881 = vmatprep.mubr.msk.bf16.mxu1 %vm442_vm1, %v17801_v35  ;;  %v2188_v35 = vld [vmem:[#allocation2 + $0x208] sm:$0xff] }
 0x170   : > { %15915 = vmatprep.mubr.msk.bf16.mxu0 %vm442_vm1, %v17996_v47  ;;  %v2189_v47 = vld [vmem:[#allocation2 + $0x210] sm:$0xff] }
 0x171   : > { %v18151_v16 = vpack.c.bf16 %v2189_v47, %v2188_v35 }
 0x176   : > { %15882 = vmatmul.mubr.msk.bf16.vlgmr.msra.gmra.mxu1 %vm442_vm1, %v17792_v20 }
 0x177   : > { %15916 = vmatmul.mubr.msk.bf16.vlgmr.msra.gmra.mxu0 %vm442_vm1, %v18005_v36  ;;  %15948 = vmatpush3.bf16.msra.mxu1 %v18001_v48  ;;  %v2486_v48 = vld [vmem:[#allocation2 + $0x209] sm:$0xff] }
 0x178   : > { %15885 = vmatprep.mubr.msk.bf16.mxu1 %vm442_vm1, %v17855_v18  ;;  %15919 = vmatprep.mubr.msk.bf16.mxu0 %vm442_vm1, %v18022_v59 }
 0x179   : > { %15982 = vmatpush3.bf16.msra.mxu0 %v18010_v39  ;;  %16015 = vmatprep.subr.bf16.mxu1 %v17198_v14  ;;  %v2487_v39 = vld [vmem:[#allocation2 + $0x211] sm:$0xff] }
 0x17a   : > { %v18153_v17 = vpack.c.bf16 %v2487_v39, %v2486_v48 }
 0x17e   : > { %15886 = vmatmul.mubr.msk.bf16.gmra.mxu1 %vm442_vm1, %v17844_v6 }
 0x17f   : > { %15920 = vmatmul.mubr.msk.bf16.gmra.mxu0 %vm442_vm1, %v18024_v60  ;;  %15889 = vmatprep.mubr.msk.bf16.mxu1 %vm442_vm1, %v17886_v57 }
 0x180   : > { %15923 = vmatprep.mubr.msk.bf16.mxu0 %vm442_vm1, %v18034_v0 }
 0x186   : > { %15890 = vmatmul.mubr.msk.bf16.gmra.mxu1 %vm442_vm1, %v17892_v61 }
 0x187   : > { %15924 = vmatmul.mubr.msk.bf16.gmra.mxu0 %vm442_vm1, %v18036_v1  ;;  %15893 = vmatprep.mubr.msk.bf16.mxu1 %vm442_vm1, %v17914_v27 }
 0x188   : > { %15927 = vmatprep.mubr.msk.bf16.mxu0 %vm442_vm1, %v18046_v3 }
 0x18e   : > { %15894 = vmatmul.mubr.msk.bf16.gmra.mxu1 %vm442_vm1, %v17920_v31 }
 0x18f   : > { %15928 = vmatmul.mubr.msk.bf16.gmra.mxu0 %vm442_vm1, %v18048_v15  ;;  %15897 = vmatprep.mubr.msk.bf16.mxu1 %vm442_vm1, %v17937_v52 }
 0x190   : > { %15931 = vmatprep.mubr.msk.bf16.mxu0 %vm442_vm1, %v18058_v29 }
 0x196   : > { %15898 = vmatmul.mubr.msk.bf16.gmra.mxu1 %vm442_vm1, %v17941_v54 }
 0x197   : > { %15932 = vmatmul.mubr.msk.bf16.gmra.mxu0 %vm442_vm1, %v18060_v4  ;;  %15901 = vmatprep.mubr.msk.bf16.mxu1 %vm442_vm1, %v17953_v7 }
 0x198   : > { %15935 = vmatprep.mubr.msk.bf16.mxu0 %vm442_vm1, %v1605_v43 }
 0x19e   : > { %15902 = vmatmul.mubr.msk.bf16.gmra.mxu1 %vm442_vm1, %v17957_v9 }
 0x19f   : > { %15936 = vmatmul.mubr.msk.bf16.gmra.mxu0 %vm442_vm1, %v18070_v45  ;;  %15905 = vmatprep.mubr.msk.bf16.mxu1 %vm442_vm1, %v17969_v19 }
 0x1a0   : > { %15939 = vmatprep.mubr.msk.bf16.mxu0 %vm442_vm1, %v1607_v32 }
 0x1a6   : > { %15906 = vmatmul.mubr.msk.bf16.gmra.mxu1 %vm442_vm1, %v17973_v23 }
 0x1a7   : > { %15940 = vmatmul.mubr.msk.bf16.gmra.mxu0 %vm442_vm1, %v1608_v44  ;;  %15909 = vmatprep.mubr.msk.bf16.mxu1 %vm442_vm1, %v17985_v41 }
 0x1a8   : > { %15943 = vmatprep.mubr.msk.bf16.mxu0 %vm442_vm1, %v1609_v12 }
 0x1ae   : > { %15910 = vmatmul.mubr.msk.bf16.gmra.mxu1 %vm442_vm1, %v18151_v16 }
 0x1af   : > { %15944 = vmatmul.mubr.msk.bf16.gmra.mxu0 %vm442_vm1, %v18153_v17  ;;  %15949 = vmatprep.mubr.msk.bf16.mxu1 %vm442_vm1, %v17794_v26 }
 0x1b0   : > { %15983 = vmatprep.mubr.msk.bf16.mxu0 %vm442_vm1, %v17792_v20 }
 0x1b1   : > { %v15747_v25 = vpop.f32.mrf.mxu1 }
 0x1b2   : > { %v15781_v2 = vpop.f32.mrf.mxu0 }
 0x1b3   : > { %v18167_v30 = vadd.f32 %v15781_v2, %v15747_v25  ;;  %v1220_v26 = vpop.f32.mrf.mxu1 }
 0x1b4   : > { %v1435_v37 = vpop.f32.mrf.mxu0 }
 0x1b5   : > { %v18173_v20 = vadd.f32 %v1435_v37, %v1220_v26  ;;  %v15748_v38 = vpop.f32.mrf.mxu1 }
 0x1b6   : > { %15950 = vmatmul.mubr.msk.bf16.vlgmr.msra.gmra.mxu1 %vm442_vm1, %v17857_v22  ;;  %v15782_v42 = vpop.f32.mrf.mxu0 }
 0x1b7   : > { %15984 = vmatmul.mubr.msk.bf16.vlgmr.msra.gmra.mxu0 %vm442_vm1, %v17855_v18  ;;  %16016 = vmatpush3.bf16.msra.mxu1 %v17198_v14  ;;  %v18175_v22 = vadd.f32 %v15782_v42, %v15748_v38  ;;  %v1223_v43 = vpop.f32.mrf.mxu1 }
 0x1b8   : > { %15953 = vmatprep.mubr.msk.bf16.mxu1 %vm442_vm1, %v17848_v33  ;;  %15987 = vmatprep.mubr.msk.bf16.mxu0 %vm442_vm1, %v17844_v6  ;;  %v1438_v46 = vpop.f32.mrf.mxu0 }
 0x1b9   : > { %v18177_v18 = vadd.f32 %v1438_v46, %v1223_v43  ;;  %v15751_v50 = vpop.f32.mrf.mxu1 }
 0x1ba   : > { %v15785_v33 = vpop.f32.mrf.mxu0 }
 0x1bb   : > { %v18185_v6 = vadd.f32 %v15785_v33, %v15751_v50  ;;  %v1236_v51 = vpop.f32.mrf.mxu1 }
 0x1bc   : > { %v1451_v56 = vpop.f32.mrf.mxu0 }
 0x1bd   : > { %v18189_v32 = vadd.f32 %v1451_v56, %v1236_v51  ;;  %v15752_v44 = vpop.f32.mrf.mxu1 }
 0x1be   : > { %15954 = vmatmul.mubr.msk.bf16.gmra.mxu1 %vm442_vm1, %v17888_v58  ;;  %v15786_v49 = vpop.f32.mrf.mxu0 }
 0x1bf   : > { %15988 = vmatmul.mubr.msk.bf16.gmra.mxu0 %vm442_vm1, %v17886_v57  ;;  %15957 = vmatprep.mubr.msk.bf16.mxu1 %vm442_vm1, %v17897_v5  ;;  %v18191_v62 = vadd.f32 %v15786_v49, %v15752_v44  ;;  %v1239_v58 = vpop.f32.mrf.mxu1 }
 0x1c0   : > { %15991 = vmatprep.mubr.msk.bf16.mxu0 %vm442_vm1, %v17892_v61  ;;  %v1454_v63 = vpop.f32.mrf.mxu0 }
 0x1c1   : > { %v18193_v11 = vadd.f32 %v1454_v63, %v1239_v58  ;;  %v15755_v57 = vpop.f32.mrf.mxu1 }
 0x1c2   : > { %v15789_v5 = vpop.f32.mrf.mxu0 }
 0x1c3   : > { %v18201_v61 = vadd.f32 %v15789_v5, %v15755_v57  ;;  %v1252_v12 = vpop.f32.mrf.mxu1 }
 0x1c4   : > { %v1467_v14 = vpop.f32.mrf.mxu0 }
 0x1c5   : > { %v18205_v35 = vadd.f32 %v1467_v14, %v1252_v12  ;;  %v15756_v47 = vpop.f32.mrf.mxu1 }
 0x1c6   : > { %15958 = vmatmul.mubr.msk.bf16.gmra.mxu1 %vm442_vm1, %v17916_v28  ;;  %v15790_v48 = vpop.f32.mrf.mxu0 }
 0x1c7   : > { %15992 = vmatmul.mubr.msk.bf16.gmra.mxu0 %vm442_vm1, %v17914_v27  ;;  %15961 = vmatprep.mubr.msk.bf16.mxu1 %vm442_vm1, %v17925_v40  ;;  %v18207_v39 = vadd.f32 %v15790_v48, %v15756_v47  ;;  %v1255_v28 = vpop.f32.mrf.mxu1 }
 0x1c8   : > { %15995 = vmatprep.mubr.msk.bf16.mxu0 %vm442_vm1, %v17920_v31  ;;  %v1470_v25 = vpop.f32.mrf.mxu0 }
 0x1c9   : > { %v18209_v2 = vadd.f32 %v1470_v25, %v1255_v28 }
 0x1ce   : > { %v15759_v27 = vpop.f32.mrf.mxu1  ;;  %15962 = vmatmul.mubr.msk.bf16.gmra.mxu1 %vm442_vm1, %v17939_v53 }
 0x1cf   : > { %v15793_v40 = vpop.f32.mrf.mxu0  ;;  %15996 = vmatmul.mubr.msk.bf16.gmra.mxu0 %vm442_vm1, %v17937_v52  ;;  %15965 = vmatprep.mubr.msk.bf16.mxu1 %vm442_vm1, %v17945_v55 }
 0x1d0   : > { %v18217_v31 = vadd.f32 %v15793_v40, %v15759_v27  ;;  %15999 = vmatprep.mubr.msk.bf16.mxu0 %vm442_vm1, %v17941_v54  ;;  %v1268_v26 = vpop.f32.mrf.mxu1  ;;  %v2786_v27 = vld [vmem:[#allocation2 + $0x22f] sm:$0xff] }
 0x1d1   : > { %v1483_v37 = vpop.f32.mrf.mxu0 }
 0x1d2   : > { %v18221_v38 = vadd.f32 %v1483_v37, %v1268_v26  ;;  %v15760_v42 = vpop.f32.mrf.mxu1  ;;  %v3083_v37 = vld [vmem:[#allocation2 + $0x228] sm:$0xff] }
 0x1d3   : > { %v15794_v43 = vpop.f32.mrf.mxu0 }
 0x1d4   : > { %v18223_v46 = vadd.f32 %v15794_v43, %v15760_v42  ;;  %v1271_v53 = vpop.f32.mrf.mxu1  ;;  %v3084_v42 = vld [vmem:[#allocation2 + $0x230] sm:$0xff] }
 0x1d5   : > { %v1486_v50 = vpop.f32.mrf.mxu0 }
 0x1d6   : > { %v18225_v33 = vadd.f32 %v1486_v50, %v1271_v53  ;;  %v15763_v52 = vpop.f32.mrf.mxu1  ;;  %15966 = vmatmul.mubr.msk.bf16.gmra.mxu1 %vm442_vm1, %v17955_v8 }
 0x1d7   : > { %v15797_v55 = vpop.f32.mrf.mxu0  ;;  %16000 = vmatmul.mubr.msk.bf16.gmra.mxu0 %vm442_vm1, %v17953_v7  ;;  %15969 = vmatprep.mubr.msk.bf16.mxu1 %vm442_vm1, %v17961_v10 }
 0x1d8   : > { %v18233_v54 = vadd.f32 %v15797_v55, %v15763_v52  ;;  %16003 = vmatprep.mubr.msk.bf16.mxu0 %vm442_vm1, %v17957_v9  ;;  %v1284_v51 = vpop.f32.mrf.mxu1 }
 0x1d9   : > { %v1499_v56 = vpop.f32.mrf.mxu0 }
 0x1da   : > { %v18237_v44 = vadd.f32 %v1499_v56, %v1284_v51  ;;  %v15764_v49 = vpop.f32.mrf.mxu1 }
 0x1db   : > { %v15798_v58 = vpop.f32.mrf.mxu0 }
 0x1dc   : > { %v18239_v63 = vadd.f32 %v15798_v58, %v15764_v49  ;;  %v18241_v8 = vpop.f32.mrf.mxu1 }
 0x1dd   : > { %v18243_v57 = vpop.f32.mrf.mxu0 }
 0x1de   : > { %v15767_v7 = vpop.f32.mrf.mxu1  ;;  %15970 = vmatmul.mubr.msk.bf16.gmra.mxu1 %vm442_vm1, %v17971_v21 }
 0x1df   : > { %v15801_v10 = vpop.f32.mrf.mxu0  ;;  %16004 = vmatmul.mubr.msk.bf16.gmra.mxu0 %vm442_vm1, %v17969_v19  ;;  %15973 = vmatprep.mubr.msk.bf16.mxu1 %vm442_vm1, %v17977_v24 }
 0x1e0   : > { %v18251_v9 = vadd.f32 %v15801_v10, %v15767_v7  ;;  %16007 = vmatprep.mubr.msk.bf16.mxu0 %vm442_vm1, %v17973_v23  ;;  %v1300_v5 = vpop.f32.mrf.mxu1  ;;  %v2785_v23 = vld [vmem:[#allocation2 + $0x227] sm:$0xff] }
 0x1e1   : > { %v1515_v12 = vpop.f32.mrf.mxu0  ;;  %v2802_v50 = vpack.c.bf16 %v2786_v27, %v2785_v23 }
 0x1e2   : > { %v18255_v14 = vadd.f32 %v1515_v12, %v1300_v5  ;;  %v15768_v47 = vpop.f32.mrf.mxu1 }
 0x1e3   : > { %v15802_v48 = vpop.f32.mrf.mxu0 }
 0x1e4   : > { %v18257_v28 = vadd.f32 %v15802_v48, %v15768_v47  ;;  %v18259_v21 = vpop.f32.mrf.mxu1 }
 0x1e5   : > { %v18261_v25 = vpop.f32.mrf.mxu0 }
 0x1e6   : > { %v15771_v19 = vpop.f32.mrf.mxu1  ;;  %15974 = vmatmul.mubr.msk.bf16.gmra.mxu1 %vm442_vm1, %v17987_v34 }
 0x1e7   : > { %v15805_v24 = vpop.f32.mrf.mxu0  ;;  %16008 = vmatmul.mubr.msk.bf16.gmra.mxu0 %vm442_vm1, %v17985_v41  ;;  %15977 = vmatprep.mubr.msk.bf16.mxu1 %vm442_vm1, %v18085_v13  ;;  %v3100_v41 = vpack.c.bf16 %v3084_v42, %v3083_v37 }
 0x1e8   : > { %v18269_v40 = vadd.f32 %v15805_v24, %v15771_v19  ;;  %16011 = vmatprep.mubr.msk.bf16.mxu0 %vm442_vm1, %v18151_v16  ;;  %v1316_v26 = vpop.f32.mrf.mxu1 }
 0x1e9   : > { %v1531_v43 = vpop.f32.mrf.mxu0 }
 0x1ea   : > { %v18273_v53 = vadd.f32 %v1531_v43, %v1316_v26  ;;  %v15772_v34 = vpop.f32.mrf.mxu1 }
 0x1eb   : > { %v15806_v52 = vpop.f32.mrf.mxu0 }
 0x1ec   : > { %v18275_v55 = vadd.f32 %v15806_v52, %v15772_v34  ;;  %v18277_v13 = vpop.f32.mrf.mxu1 }
 0x1ed   : > { %v18279_v51 = vpop.f32.mrf.mxu0 }
 0x1ee   : > { %v15775_v56 = vpop.f32.mrf.mxu1  ;;  %15978 = vmatmul.mubr.msk.bf16.gmra.mxu1 %vm442_vm1, %v2802_v50 }
 0x1ef   : > { %v15809_v16 = vpop.f32.mrf.mxu0  ;;  %16017 = vmatprep.mubr.msk.bf16.mxu1 %vm442_vm1, %v18005_v36  ;;  %16012 = vmatmul.mubr.msk.bf16.gmra.mxu0 %vm442_vm1, %v3100_v41 }
 0x1f0   : > { %v18285_v49 = vadd.f32 %v15809_v16, %v15775_v56  ;;  %v1332_v58 = vpop.f32.mrf.mxu1 }
 0x1f1   : > { %v1547_v7 = vpop.f32.mrf.mxu0 }
 0x1f2   : > { %v18287_v10 = vadd.f32 %v1547_v7, %v1332_v58  ;;  %v15776_v5 = vpop.f32.mrf.mxu1 }
 0x1f3   : > { %v15810_v12 = vpop.f32.mrf.mxu0 }
 0x1f4   : > { %v18289_v47 = vadd.f32 %v15810_v12, %v15776_v5  ;;  %v18291_v48 = vpop.f32.mrf.mxu1 }
 0x1f5   : > { %v18293_v19 = vpop.f32.mrf.mxu0 }
 0x1f6   : > { %v15815_v24 = vpop.f32.mrf.mxu1  ;;  %16018 = vmatmul.mubr.msk.bf16.vlgmr.msra.gmra.mxu1 %vm442_vm1, %v18022_v59 }
 0x1f7   : > { %v1830_v36 = vadd.f32 %v15815_v24, %v18167_v30  ;;  %v15849_v23 = vpop.f32.mrf.mxu0  ;;  %16021 = vmatprep.mubr.msk.bf16.mxu1 %vm442_vm1, %v18024_v60 }
 0x1f8   : > { %v1701_v27 = vpop.f32.mrf.mxu1 }
 0x1f9   : > { %v18300_v26 = vadd.f32 %v15849_v23, %v1830_v36  ;;  %v1828_v37 = vadd.f32 %v1701_v27, %v18173_v20  ;;  %v1999_v42 = vpop.f32.mrf.mxu0 }
 0x1fa   : > { %v15816_v43 = vpop.f32.mrf.mxu1 }
 0x1fb   : > { %v18303_v34 = vadd.f32 %v1999_v42, %v1828_v37  ;;  %v1831_v50 = vadd.f32 %v15816_v43, %v18175_v22  ;;  %v15850_v52 = vpop.f32.mrf.mxu0 }
 0x1fc   : > { %v1704_v41 = vpop.f32.mrf.mxu1 }
 0x1fd   : > { %v18306_v59 = vadd.f32 %v15850_v52, %v1831_v50  ;;  %v18309_v30 = vadd.f32 %v1704_v41, %v18177_v18  ;;  %v18311_v56 = vpop.f32.mrf.mxu0 }
 0x1fe   : > { %v15819_v60 = vpop.f32.mrf.mxu1  ;;  %16022 = vmatmul.mubr.msk.bf16.gmra.mxu1 %vm442_vm1, %v18034_v0 }
 0x1ff   : > { %v1834_v20 = vadd.f32 %v15819_v60, %v18185_v6  ;;  %v15853_v16 = vpop.f32.mrf.mxu0  ;;  %16025 = vmatprep.mubr.msk.bf16.mxu1 %vm442_vm1, %v18036_v1 }
 0x200   : > { %v1717_v22 = vpop.f32.mrf.mxu1 }
 0x201   : > { %v18318_v58 = vadd.f32 %v15853_v16, %v1834_v20  ;;  %v1832_v7 = vadd.f32 %v1717_v22, %v18189_v32  ;;  %v2015_v5 = vpop.f32.mrf.mxu0 }
 0x202   : > { %v15820_v18 = vpop.f32.mrf.mxu1 }
 0x203   : > { %v18321_v12 = vadd.f32 %v2015_v5, %v1832_v7  ;;  %v1835_v24 = vadd.f32 %v15820_v18, %v18191_v62  ;;  %v15854_v36 = vpop.f32.mrf.mxu0 }
 0x204   : > { %v1720_v23 = vpop.f32.mrf.mxu1 }
 0x205   : > { %v18324_v0 = vadd.f32 %v15854_v36, %v1835_v24  ;;  %v18327_v6 = vadd.f32 %v1720_v23, %v18193_v11  ;;  %v18329_v27 = vpop.f32.mrf.mxu0  ;;  %v14339_v11 = vld [vmem:[%s22994_s3 + $0xc] sm:$0xf] }
 0x206   : > { %v15823_v1 = vpop.f32.mrf.mxu1  ;;  %16026 = vmatmul.mubr.msk.bf16.gmra.mxu1 %vm442_vm1, %v18046_v3  ;;  %v14334_v3 = vld [vmem:[%s22994_s3 + $0x8] sm:$0xf]  ;;  %17175 = vmatprep.subr.msk.bf16.mxu0 %vm723_vm0, %v14339_v11 }
 0x207   : > { %v1838_v32 = vadd.f32 %v15823_v1, %v18201_v61  ;;  %v15857_v37 = vpop.f32.mrf.mxu0  ;;  %16029 = vmatprep.mubr.msk.bf16.mxu1 %vm442_vm1, %v18048_v15  ;;  %17176 = vmatprep.subr.msk.bf16.mxu1 %vm723_vm0, %v14334_v3  ;;  %v4170_v60 = vsel %vm723_vm0, %v14334_v3, 0 }
 0x208   : > { %v1733_v62 = vpop.f32.mrf.mxu1  ;;  %16084 = vmatpush3.bf16.msra.mxu1 %v4170_v60 }
 0x209   : > { %v18336_v42 = vadd.f32 %v15857_v37, %v1838_v32  ;;  %v1836_v43 = vadd.f32 %v1733_v62, %v18205_v35  ;;  %v2031_v50 = vpop.f32.mrf.mxu0  ;;  %v3958_v35 = vsel %vm723_vm0, %v14339_v11, 0  ;;  %v3370_v32 = vld [vmem:[#allocation2 + $0x171] sm:$0xff] }
 0x20a   : > { %v15824_v52 = vpop.f32.mrf.mxu1  ;;  %16050 = vmatpush3.bf16.msra.mxu0 %v3958_v35 }
 0x20b   : > { %v18347_v15 = vadd.f32 %v2031_v50, %v1836_v43  ;;  %v1839_v61 = vadd.f32 %v15824_v52, %v18207_v39  ;;  %v15858_v41 = vpop.f32.mrf.mxu0 }
 0x20c   : > { %v1736_v20 = vpop.f32.mrf.mxu1 }
 0x20d   : > { %v18352_v16 = vadd.f32 %v15858_v41, %v1839_v61  ;;  %v18355_v22 = vadd.f32 %v1736_v20, %v18209_v2  ;;  %v18357_v7 = vpop.f32.mrf.mxu0  ;;  %v3369_v2 = vld [vmem:[#allocation2 + $0x169] sm:$0xff] }
 0x20e   : > { %v15827_v5 = vpop.f32.mrf.mxu1  ;;  %16030 = vmatmul.mubr.msk.bf16.gmra.mxu1 %vm442_vm1, %v18058_v29  ;;  %v3373_v20 = vld [vmem:[#allocation2 + $0x1a9] sm:$0xff] }
 0x20f   : > { %v1842_v39 = vadd.f32 %v15827_v5, %v18217_v31  ;;  %v15861_v18 = vpop.f32.mrf.mxu0  ;;  %16033 = vmatprep.mubr.msk.bf16.mxu1 %vm442_vm1, %v18060_v4  ;;  %v3392_v31 = vpack.c.bf16 %v3370_v32, %v3369_v2 }
 0x210   : > { %v1749_v24 = vpop.f32.mrf.mxu1 }
 0x211   : > { %v18364_v36 = vadd.f32 %v15861_v18, %v1842_v39  ;;  %v1840_v23 = vadd.f32 %v1749_v24, %v18221_v38  ;;  %v2047_v1 = vpop.f32.mrf.mxu0  ;;  %v3375_v39 = vld [vmem:[#allocation2 + $0x1c9] sm:$0xff]  ;;  %v3376_v18 = vld [vmem:[#allocation2 + $0x1d1] sm:$0xff]  ;;  %v1503_v24 = vadd.f32 %v18243_v57, %v18241_v8 }
 0x212   : > { %v15828_v37 = vpop.f32.mrf.mxu1 }
 0x213   : > { %v18367_v62 = vadd.f32 %v2047_v1, %v1840_v23  ;;  %v1843_v43 = vadd.f32 %v15828_v37, %v18223_v46  ;;  %v15862_v29 = vpop.f32.mrf.mxu0 }
 0x214   : > { %v1752_v50 = vpop.f32.mrf.mxu1 }
 0x215   : > { %v18370_v11 = vadd.f32 %v15862_v29, %v1843_v43  ;;  %v18373_v4 = vadd.f32 %v1752_v50, %v18225_v33  ;;  %v18375_v3 = vpop.f32.mrf.mxu0  ;;  %v3374_v33 = vld [vmem:[#allocation2 + $0x1b1] sm:$0xff]  ;;  %v3395_v43 = vpack.c.bf16 %v3376_v18, %v3375_v39 }
 0x216   : > { %v15831_v52 = vpop.f32.mrf.mxu1  ;;  %16034 = vmatmul.mubr.msk.bf16.gmra.mxu1 %vm442_vm1, %v3392_v31  ;;  %v3394_v2 = vpack.c.bf16 %v3374_v33, %v3373_v20 }
 0x217   : > { %v1846_v38 = vadd.f32 %v15831_v52, %v18233_v54  ;;  %v15865_v61 = vpop.f32.mrf.mxu0  ;;  %16037 = vmatprep.mubr.msk.bf16.mxu1 %vm442_vm1, %v18070_v45 }
 0x218   : > { %v1765_v46 = vpop.f32.mrf.mxu1 }
 0x219   : > { %v18381_v41 = vadd.f32 %v15865_v61, %v1846_v38  ;;  %v1844_v35 = vadd.f32 %v1765_v46, %v18237_v44  ;;  %v2063_v60 = vpop.f32.mrf.mxu0  ;;  %v3377_v38 = vld [vmem:[#allocation2 + $0x1e9] sm:$0xff]  ;;  %v3378_v61 = vld [vmem:[#allocation2 + $0x1f1] sm:$0xff] }
 0x21a   : > { %v15832_v5 = vpop.f32.mrf.mxu1 }
 0x21b   : > { %v18386_v23 = vadd.f32 %v2063_v60, %v1844_v35  ;;  %v1847_v54 = vadd.f32 %v15832_v5, %v18239_v63  ;;  %v15866_v1 = vpop.f32.mrf.mxu0  ;;  %v1519_v35 = vadd.f32 %v18261_v25, %v18259_v21  ;;  %v3396_v5 = vpack.c.bf16 %v3378_v61, %v3377_v38  ;;  %v3381_v21 = vld [vmem:[#allocation2 + $0x229] sm:$0xff] }
 0x21c   : > { %v1768_v45 = vpop.f32.mrf.mxu1 }
 0x21d   : > { %v18389_v32 = vadd.f32 %v15866_v1, %v1847_v54  ;;  %v18391_v37 = vadd.f32 %v1768_v45, %v1503_v24  ;;  %v18393_v44 = vpop.f32.mrf.mxu0 }
 0x21e   : > { %v15835_v29 = vpop.f32.mrf.mxu1  ;;  %16038 = vmatmul.mubr.msk.bf16.gmra.mxu1 %vm442_vm1, %v3394_v2 }
 0x21f   : > { %v1850_v50 = vadd.f32 %v15835_v29, %v18251_v9  ;;  %v15869_v8 = vpop.f32.mrf.mxu0  ;;  %16041 = vmatprep.mubr.msk.bf16.mxu1 %vm442_vm1, %v3395_v43 }
 0x220   : > { %v1781_v57 = vpop.f32.mrf.mxu1 }
 0x221   : > { %v18398_v63 = vadd.f32 %v15869_v8, %v1850_v50  ;;  %v1848_v31 = vadd.f32 %v1781_v57, %v18255_v14  ;;  %v2079_v52 = vpop.f32.mrf.mxu0  ;;  %v1535_v8 = vadd.f32 %v18279_v51, %v18277_v13 }
 0x222   : > { %v15836_v46 = vpop.f32.mrf.mxu1 }
 0x223   : > { %v18403_v60 = vadd.f32 %v2079_v52, %v1848_v31  ;;  %v1851_v20 = vadd.f32 %v15836_v46, %v18257_v28  ;;  %v15870_v9 = vpop.f32.mrf.mxu0  ;;  %v3382_v28 = vld [vmem:[#allocation2 + $0x231] sm:$0xff] }
 0x224   : > { %v1784_v33 = vpop.f32.mrf.mxu1  ;;  %v3398_v50 = vpack.c.bf16 %v3382_v28, %v3381_v21 }
 0x225   : > { %v18406_v39 = vadd.f32 %v15870_v9, %v1851_v20  ;;  %v18408_v18 = vadd.f32 %v1784_v33, %v1519_v35  ;;  %v18410_v24 = vpop.f32.mrf.mxu0  ;;  %v1551_v33 = vadd.f32 %v18293_v19, %v18291_v48 }
 0x226   : > { %v15839_v14 = vpop.f32.mrf.mxu1  ;;  %16042 = vmatmul.mubr.msk.bf16.gmra.mxu1 %vm442_vm1, %v3396_v5 }
 0x227   : > { %v1854_v54 = vadd.f32 %v15839_v14, %v18269_v40  ;;  %v15873_v1 = vpop.f32.mrf.mxu0  ;;  %16045 = vmatprep.mubr.msk.bf16.mxu1 %vm442_vm1, %v18153_v17 }
 0x228   : > { %v1797_v25 = vpop.f32.mrf.mxu1 }
 0x229   : > { %v18416_v45 = vadd.f32 %v15873_v1, %v1854_v54  ;;  %v1852_v2 = vadd.f32 %v1797_v25, %v18273_v53  ;;  %v2095_v43 = vpop.f32.mrf.mxu0 }
 0x22a   : > { %v15840_v29 = vpop.f32.mrf.mxu1 }
 0x22b   : > { %v18421_v57 = vadd.f32 %v2095_v43, %v1852_v2  ;;  %v1855_v40 = vadd.f32 %v15840_v29, %v18275_v55  ;;  %v15874_v31 = vpop.f32.mrf.mxu0  ;;  %v18453_v29 = vld [vmem:[%s22992_s1 + $0x2] ss:$0 sm:$0xff] }
 0x22c   : > { %v1800_v52 = vpop.f32.mrf.mxu1 }
 0x22d   : > { %v18424_v17 = vadd.f32 %v15874_v31, %v1855_v40  ;;  %v18426_v38 = vadd.f32 %v1800_v52, %v1535_v8  ;;  %v18428_v61 = vpop.f32.mrf.mxu0  ;;  %v2127_v8 = vadd.f32 %v18311_v56, %v18309_v30  ;;  %v17226_v52 = vld [vmem:[%s17615_s21 + $0x10] sm:$0xff]  ;;  %v17228_v30 = vld [vmem:[%s17615_s21] sm:$0xff] }
 0x22e   : > { %v15843_v46 = vpop.f32.mrf.mxu1  ;;  %16046 = vmatmul.mubr.msk.bf16.gmra.mxu1 %vm442_vm1, %v3398_v50  ;;  %v3659_v56 = vmul.f32 %v17228_v30, %v18453_v29 }
 0x22f   : > { %v1858_v53 = vadd.f32 %v15843_v46, %v18285_v49  ;;  %v15877_v35 = vpop.f32.mrf.mxu0  ;;  %v3661_v46 = vmul.f32 %v17226_v52, %v18453_v29 }
 0x230   : > { %v1813_v20 = vpop.f32.mrf.mxu1 }
 0x231   : > { %v18432_v13 = vadd.f32 %v15877_v35, %v1858_v53  ;;  %v1856_v51 = vadd.f32 %v1813_v20, %v18287_v10  ;;  %v2111_v55 = vpop.f32.mrf.mxu0  ;;  %v17227_v53 = vld [vmem:[%s17615_s21 + $0x18] sm:$0xff] }
 0x232   : > { %v15844_v9 = vpop.f32.mrf.mxu1  ;;  %v3662_v35 = vmul.f32 %v17227_v53, %v18453_v29 }
 0x233   : > { %v18437_v5 = vadd.f32 %v2111_v55, %v1856_v51  ;;  %v1859_v14 = vadd.f32 %v15844_v9, %v18289_v47  ;;  %v15878_v54 = vpop.f32.mrf.mxu0  ;;  %v17229_v9 = vld [vmem:[%s17615_s21 + $0x8] sm:$0xff] }
 0x234   : > { %v1816_v1 = vpop.f32.mrf.mxu1 }
 0x235   : > { %v18440_v21 = vadd.f32 %v15878_v54, %v1859_v14  ;;  %v18442_v49 = vadd.f32 %v1816_v1, %v1551_v33  ;;  %v18444_v28 = vpop.f32.mrf.mxu0  ;;  %v18480_v54 = vld [vmem:[%s22993_s2 + $0x2] ss:$0 sm:$0xff] }
 0x236   : > { %v15883_v25 = vpop.f32.mrf.mxu1 }
 0x237   : > { %v2426_v10 = vadd.f32 %v15883_v25, %v18300_v26  ;;  %v15917_v2 = vpop.f32.mrf.mxu0  ;;  %v3697_v25 = vadd.f32 %v18480_v54, %v3659_v56 }
 0x238   : > { %v2297_v43 = vpop.f32.mrf.mxu1 }
 0x239   : > { %v18447_v48 = vadd.f32 %v15917_v2, %v2426_v10  ;;  %v2424_v19 = vadd.f32 %v2297_v43, %v18303_v34  ;;  %v2595_v47 = vpop.f32.mrf.mxu0 }
 0x23a   : > { %v15884_v50 = vpop.f32.mrf.mxu1 }
 0x23b   : > { %v18457_v40 = vadd.f32 %v2595_v47, %v2424_v19  ;;  %v18460_v26 = vadd.f32 %v15884_v50, %v18306_v59  ;;  %v18462_v31 = vpop.f32.mrf.mxu0  ;;  %v3660_v59 = vmul.f32 %v17229_v9, %v18453_v29  ;;  %v3699_v47 = vadd.f32 %v18480_v54, %v3661_v46 }
 0x23c   : > { %v2300_v34 = vpop.f32.mrf.mxu1  ;;  %v2131_v50 = vadd.f32 %v18329_v27, %v18327_v6 }
 0x23d   : > { %v18468_v20 = vadd.f32 %v2300_v34, %v2127_v8  ;;  %v18470_v51 = vpop.f32.mrf.mxu0  ;;  %v3698_v10 = vadd.f32 %v18480_v54, %v3660_v59  ;;  %v3729_v34 = vmax.f32 %v3697_v25, 0.0  ;;  %v3731_v56 = vmax.f32 %v3699_v47, 0.0 }
 0x23e   : > { %v15887_v55 = vpop.f32.mrf.mxu1 }
 0x23f   : > { %v2430_v33 = vadd.f32 %v15887_v55, %v18318_v58  ;;  %v15921_v14 = vpop.f32.mrf.mxu0  ;;  %v3700_v58 = vadd.f32 %v18480_v54, %v3662_v35  ;;  %v3730_v52 = vmax.f32 %v3698_v10, 0.0 }
 0x240   : > { %v2313_v1 = vpop.f32.mrf.mxu1 }
 0x241   : > { %v18484_v2 = vadd.f32 %v15921_v14, %v2430_v33  ;;  %v2428_v43 = vadd.f32 %v2313_v1, %v18321_v12  ;;  %v2611_v19 = vpop.f32.mrf.mxu0  ;;  %v3732_v12 = vmax.f32 %v3700_v58, 0.0  ;;  %v3761_v46 = vpack.c.bf16 %v3730_v52, %v3729_v34  ;;  %v17230_v14 = vld [vmem:[%s17615_s21 + $0x20] sm:$0xff]  ;;  %v17231_v1 = vld [vmem:[%s17615_s21 + $0x28] sm:$0xff]  ;;  %v17233_v58 = vld [vmem:[%s17615_s21 + $0x38] sm:$0xff] }
 0x242   : > { %v15888_v8 = vpop.f32.mrf.mxu1  ;;  %v3664_v25 = vmul.f32 %v17231_v1, %v18453_v29 }
 0x243   : > { %v18491_v53 = vadd.f32 %v2611_v19, %v2428_v43  ;;  %v2431_v55 = vadd.f32 %v15888_v8, %v18324_v0  ;;  %v15922_v30 = vpop.f32.mrf.mxu0  ;;  %v3762_v27 = vpack.c.bf16 %v3732_v12, %v3731_v56  ;;  %16085 = vmatprep.mubr.msk.bf16.mxu1 %vm674_vm2, %v3761_v46  ;;  %v3663_v0 = vmul.f32 %v17230_v14, %v18453_v29  ;;  %v17232_v19 = vld [vmem:[%s17615_s21 + $0x30] sm:$0xff] }
 0x244   : > { %v2316_v9 = vpop.f32.mrf.mxu1  ;;  %v3665_v47 = vmul.f32 %v17232_v19, %v18453_v29  ;;  %v3702_v52 = vadd.f32 %v18480_v54, %v3664_v25 }
 0x245   : > { %v18494_v35 = vadd.f32 %v15922_v30, %v2431_v55  ;;  %v18496_v59 = vadd.f32 %v2316_v9, %v2131_v50  ;;  %v18498_v6 = vpop.f32.mrf.mxu0  ;;  %16086 = vmatmul.mubr.msk.bf16.vlgmr.msra.gmra.mxu1 %vm674_vm2, %v3762_v27  ;;  %v3666_v50 = vmul.f32 %v17233_v58, %v18453_v29  ;;  %v3701_v34 = vadd.f32 %v18480_v54, %v3663_v0 }
 0x246   : > { %v15891_v33 = vpop.f32.mrf.mxu1  ;;  %v2135_v9 = vadd.f32 %v18357_v7, %v18355_v22 }
 0x247   : > { %v2434_v10 = vadd.f32 %v15891_v33, %v18336_v42  ;;  %v15925_v43 = vpop.f32.mrf.mxu0  ;;  %v3703_v42 = vadd.f32 %v18480_v54, %v3665_v47  ;;  %v3704_v12 = vadd.f32 %v18480_v54, %v3666_v50  ;;  %v3733_v27 = vmax.f32 %v3701_v34, 0.0  ;;  %v17234_v50 = vld [vmem:[%s17615_s21 + $0x40] sm:$0xff] }
 0x248   : > { %v2329_v8 = vpop.f32.mrf.mxu1  ;;  %v3734_v33 = vmax.f32 %v3702_v52, 0.0 }
 0x249   : > { %v18513_v55 = vadd.f32 %v15925_v43, %v2434_v10  ;;  %v2432_v30 = vadd.f32 %v2329_v8, %v18347_v15  ;;  %v2627_v56 = vpop.f32.mrf.mxu0  ;;  %v3735_v25 = vmax.f32 %v3703_v42, 0.0  ;;  %v3736_v15 = vmax.f32 %v3704_v12, 0.0  ;;  %v17235_v8 = vld [vmem:[%s17615_s21 + $0x48] sm:$0xff]  ;;  %v17237_v12 = vld [vmem:[%s17615_s21 + $0x58] sm:$0xff] }
 0x24a   : > { %v15892_v46 = vpop.f32.mrf.mxu1  ;;  %v3763_v43 = vpack.c.bf16 %v3734_v33, %v3733_v27  ;;  %v3668_v34 = vmul.f32 %v17235_v8, %v18453_v29 }
 0x24b   : > { %v18520_v14 = vadd.f32 %v2627_v56, %v2432_v30  ;;  %v2435_v0 = vadd.f32 %v15892_v46, %v18352_v16  ;;  %v15926_v1 = vpop.f32.mrf.mxu0  ;;  %v3764_v7 = vpack.c.bf16 %v3736_v15, %v3735_v25  ;;  %v3667_v16 = vmul.f32 %v17234_v50, %v18453_v29  ;;  %v17236_v56 = vld [vmem:[%s17615_s21 + $0x50] sm:$0xff] }
 0x24c   : > { %v2332_v10 = vpop.f32.mrf.mxu1  ;;  %16089 = vmatprep.mubr.msk.bf16.mxu1 %vm674_vm2, %v3763_v43  ;;  %v3669_v42 = vmul.f32 %v17236_v56, %v18453_v29  ;;  %v3706_v33 = vadd.f32 %v18480_v54, %v3668_v34 }
 0x24d   : > { %v18523_v19 = vadd.f32 %v15926_v1, %v2435_v0  ;;  %v18525_v47 = vadd.f32 %v2332_v10, %v2135_v9  ;;  %v18527_v22 = vpop.f32.mrf.mxu0  ;;  %16090 = vmatmul.mubr.msk.bf16.gmra.mxu1 %vm674_vm2, %v3764_v7  ;;  %v3670_v9 = vmul.f32 %v17237_v12, %v18453_v29  ;;  %v3705_v27 = vadd.f32 %v18480_v54, %v3667_v16 }
 0x24e   : > { %v15895_v58 = vpop.f32.mrf.mxu1  ;;  %v2139_v10 = vadd.f32 %v18375_v3, %v18373_v4 }
 0x24f   : > { %v2438_v52 = vadd.f32 %v15895_v58, %v18364_v36  ;;  %v15929_v30 = vpop.f32.mrf.mxu0  ;;  %v3707_v36 = vadd.f32 %v18480_v54, %v3669_v42  ;;  %v3708_v15 = vadd.f32 %v18480_v54, %v3670_v9  ;;  %v3737_v7 = vmax.f32 %v3705_v27, 0.0  ;;  %v17238_v9 = vld [vmem:[%s17615_s21 + $0x60] sm:$0xff] }
 0x250   : > { %v2345_v46 = vpop.f32.mrf.mxu1  ;;  %v3738_v58 = vmax.f32 %v3706_v33, 0.0 }
 0x251   : > { %v18542_v0 = vadd.f32 %v15929_v30, %v2438_v52  ;;  %v2436_v1 = vadd.f32 %v2345_v46, %v18367_v62  ;;  %v2643_v25 = vpop.f32.mrf.mxu0  ;;  %v3739_v34 = vmax.f32 %v3707_v36, 0.0  ;;  %v3740_v62 = vmax.f32 %v3708_v15, 0.0  ;;  %v17239_v46 = vld [vmem:[%s17615_s21 + $0x68] sm:$0xff]  ;;  %v17241_v15 = vld [vmem:[%s17615_s21 + $0x78] sm:$0xff] }
 0x252   : > { %v15896_v43 = vpop.f32.mrf.mxu1  ;;  %v3765_v30 = vpack.c.bf16 %v3738_v58, %v3737_v7  ;;  %v3672_v27 = vmul.f32 %v17239_v46, %v18453_v29 }
 0x253   : > { %v18549_v50 = vadd.f32 %v2643_v25, %v2436_v1  ;;  %v2439_v16 = vadd.f32 %v15896_v43, %v18370_v11  ;;  %v15930_v8 = vpop.f32.mrf.mxu0  ;;  %v3766_v3 = vpack.c.bf16 %v3740_v62, %v3739_v34  ;;  %v3671_v11 = vmul.f32 %v17238_v9, %v18453_v29  ;;  %v17240_v25 = vld [vmem:[%s17615_s21 + $0x70] sm:$0xff] }
 0x254   : > { %v2348_v52 = vpop.f32.mrf.mxu1  ;;  %16093 = vmatprep.mubr.msk.bf16.mxu1 %vm674_vm2, %v3765_v30  ;;  %v3673_v36 = vmul.f32 %v17240_v25, %v18453_v29  ;;  %v3710_v58 = vadd.f32 %v18480_v54, %v3672_v27 }
 0x255   : > { %v18552_v56 = vadd.f32 %v15930_v8, %v2439_v16  ;;  %v18554_v42 = vadd.f32 %v2348_v52, %v2139_v10  ;;  %v18556_v4 = vpop.f32.mrf.mxu0  ;;  %16094 = vmatmul.mubr.msk.bf16.gmra.mxu1 %vm674_vm2, %v3766_v3  ;;  %v3674_v10 = vmul.f32 %v17241_v15, %v18453_v29  ;;  %v3709_v7 = vadd.f32 %v18480_v54, %v3671_v11 }
 0x256   : > { %v15899_v12 = vpop.f32.mrf.mxu1  ;;  %v3742_v3 = vmax.f32 %v3710_v58, 0.0 }
 0x257   : > { %v2442_v33 = vadd.f32 %v15899_v12, %v18381_v41  ;;  %v15933_v1 = vpop.f32.mrf.mxu0  ;;  %v3711_v41 = vadd.f32 %v18480_v54, %v3673_v36  ;;  %v3712_v62 = vadd.f32 %v18480_v54, %v3674_v10  ;;  %v3741_v30 = vmax.f32 %v3709_v7, 0.0  ;;  %v17242_v10 = vld [vmem:[%s17615_s21 + $0x80] sm:$0xff] }
 0x258   : > { %v2361_v43 = vpop.f32.mrf.mxu1 }
 0x259   : > { %v18571_v16 = vadd.f32 %v15933_v1, %v2442_v33  ;;  %v2440_v8 = vadd.f32 %v2361_v43, %v18386_v23  ;;  %v2659_v34 = vpop.f32.mrf.mxu0  ;;  %v3743_v46 = vmax.f32 %v3711_v41, 0.0  ;;  %v3744_v27 = vmax.f32 %v3712_v62, 0.0  ;;  %v17245_v62 = vld [vmem:[%s17615_s21 + $0x98] sm:$0xff] }
 0x25a   : > { %v15900_v52 = vpop.f32.mrf.mxu1  ;;  %v3767_v23 = vpack.c.bf16 %v3742_v3, %v3741_v30  ;;  %v3675_v43 = vmul.f32 %v17242_v10, %v18453_v29 }
 0x25b   : > { %v18576_v12 = vadd.f32 %v2659_v34, %v2440_v8  ;;  %v2443_v9 = vadd.f32 %v15900_v52, %v18389_v32  ;;  %v15934_v11 = vpop.f32.mrf.mxu0  ;;  %v3768_v36 = vpack.c.bf16 %v3744_v27, %v3743_v46  ;;  %v17243_v32 = vld [vmem:[%s17615_s21 + $0x88] sm:$0xff]  ;;  %v17244_v34 = vld [vmem:[%s17615_s21 + $0x90] sm:$0xff]  ;;  %v3678_v52 = vmul.f32 %v17245_v62, %v18453_v29 }
 0x25c   : > { %v18579_v33 = vpop.f32.mrf.mxu1  ;;  %16097 = vmatprep.mubr.msk.bf16.mxu1 %vm674_vm2, %v3767_v23  ;;  %v3676_v7 = vmul.f32 %v17243_v32, %v18453_v29  ;;  %v3677_v41 = vmul.f32 %v17244_v34, %v18453_v29  ;;  %v3713_v3 = vadd.f32 %v18480_v54, %v3675_v43 }
 0x25d   : > { %v18581_v1 = vadd.f32 %v15934_v11, %v2443_v9  ;;  %v18583_v25 = vpop.f32.mrf.mxu0  ;;  %16098 = vmatmul.mubr.msk.bf16.gmra.mxu1 %vm674_vm2, %v3768_v36  ;;  %v3716_v23 = vadd.f32 %v18480_v54, %v3678_v52 }
 0x25e   : > { %23006 = vst [vmem:[#allocation3_spill] sm:$0xff] %v18583_v25  ;;  %v15903_v15 = vpop.f32.mrf.mxu1  ;;  %v3714_v9 = vadd.f32 %v18480_v54, %v3676_v7 }
 0x25f   : > { %v2446_v58 = vadd.f32 %v15903_v15, %v18398_v63  ;;  %v15937_v8 = vpop.f32.mrf.mxu0  ;;  %v3715_v63 = vadd.f32 %v18480_v54, %v3677_v41  ;;  %v3745_v15 = vmax.f32 %v3713_v3, 0.0  ;;  %v17246_v3 = vld [vmem:[%s17615_s21 + $0xa0] sm:$0xff] }
 0x260   : > { %v2377_v30 = vpop.f32.mrf.mxu1  ;;  %v3746_v10 = vmax.f32 %v3714_v9, 0.0  ;;  %v3679_v9 = vmul.f32 %v17246_v3, %v18453_v29 }
 0x261   : > { %v18598_v11 = vadd.f32 %v15937_v8, %v2446_v58  ;;  %v2444_v46 = vadd.f32 %v2377_v30, %v18403_v60  ;;  %v2675_v27 = vpop.f32.mrf.mxu0  ;;  %v3747_v7 = vmax.f32 %v3715_v63, 0.0  ;;  %v3748_v58 = vmax.f32 %v3716_v23, 0.0  ;;  %v17248_v23 = vld [vmem:[%s17615_s21 + $0xb0] sm:$0xff] }
 0x262   : > { %v15904_v36 = vpop.f32.mrf.mxu1  ;;  %v3769_v60 = vpack.c.bf16 %v3746_v10, %v3745_v15  ;;  %v17249_v15 = vld [vmem:[%s17615_s21 + $0xb8] sm:$0xff] }
 0x263   : > { %v18603_v32 = vadd.f32 %v2675_v27, %v2444_v46  ;;  %v2447_v43 = vadd.f32 %v15904_v36, %v18406_v39  ;;  %v15938_v34 = vpop.f32.mrf.mxu0  ;;  %v3770_v52 = vpack.c.bf16 %v3748_v58, %v3747_v7  ;;  %v17247_v39 = vld [vmem:[%s17615_s21 + $0xa8] sm:$0xff]  ;;  %v3681_v36 = vmul.f32 %v17248_v23, %v18453_v29 }
 0x264   : > { %v18606_v8 = vpop.f32.mrf.mxu1  ;;  %16101 = vmatprep.mubr.msk.bf16.mxu1 %vm674_vm2, %v3769_v60  ;;  %v3680_v46 = vmul.f32 %v17247_v39, %v18453_v29  ;;  %v3682_v10 = vmul.f32 %v17249_v15, %v18453_v29 }
 0x265   : > { %v18608_v41 = vadd.f32 %v15938_v34, %v2447_v43  ;;  %v18610_v62 = vpop.f32.mrf.mxu0  ;;  %16102 = vmatmul.mubr.msk.bf16.gmra.mxu1 %vm674_vm2, %v3770_v52  ;;  %v3717_v34 = vadd.f32 %v18480_v54, %v3679_v9 }
 0x266   : > { %23007 = vst [vmem:[#allocation4_spill] sm:$0xff] %v18610_v62  ;;  %v15907_v30 = vpop.f32.mrf.mxu1  ;;  %v3718_v7 = vadd.f32 %v18480_v54, %v3680_v46  ;;  %v3720_v52 = vadd.f32 %v18480_v54, %v3682_v10 }
 0x267   : > { %v2450_v27 = vadd.f32 %v15907_v30, %v18416_v45  ;;  %v15941_v63 = vpop.f32.mrf.mxu0  ;;  %v3719_v45 = vadd.f32 %v18480_v54, %v3681_v36  ;;  %v3749_v39 = vmax.f32 %v3717_v34, 0.0 }
 0x268   : > { %v2393_v43 = vpop.f32.mrf.mxu1  ;;  %v3750_v23 = vmax.f32 %v3718_v7, 0.0  ;;  %v17250_v7 = vld [vmem:[%s17615_s21 + $0xc0] sm:$0xff] }
 0x269   : > { %v18625_v58 = vadd.f32 %v15941_v63, %v2450_v27  ;;  %v2448_v60 = vadd.f32 %v2393_v43, %v18421_v57  ;;  %v2691_v3 = vpop.f32.mrf.mxu0  ;;  %v3751_v46 = vmax.f32 %v3719_v45, 0.0  ;;  %v3752_v27 = vmax.f32 %v3720_v52, 0.0 }
 0x26a   : > { %v15908_v30 = vpop.f32.mrf.mxu1  ;;  %v3771_v57 = vpack.c.bf16 %v3750_v23, %v3749_v39  ;;  %v17253_v39 = vld [vmem:[%s17615_s21 + $0xd8] sm:$0xff] }
 0x26b   : > { %v18630_v15 = vadd.f32 %v2691_v3, %v2448_v60  ;;  %v2451_v9 = vadd.f32 %v15908_v30, %v18424_v17  ;;  %v15942_v62 = vpop.f32.mrf.mxu0  ;;  %v3772_v43 = vpack.c.bf16 %v3752_v27, %v3751_v46  ;;  %v3683_v60 = vmul.f32 %v17250_v7, %v18453_v29  ;;  %v17251_v17 = vld [vmem:[%s17615_s21 + $0xc8] sm:$0xff]  ;;  %v17252_v30 = vld [vmem:[%s17615_s21 + $0xd0] sm:$0xff] }
 0x26c   : > { %v18633_v63 = vpop.f32.mrf.mxu1  ;;  %16105 = vmatprep.mubr.msk.bf16.mxu1 %vm674_vm2, %v3771_v57  ;;  %v3684_v3 = vmul.f32 %v17251_v17, %v18453_v29  ;;  %v3686_v23 = vmul.f32 %v17253_v39, %v18453_v29 }
 0x26d   : > { %v18635_v36 = vadd.f32 %v15942_v62, %v2451_v9  ;;  %v18637_v10 = vpop.f32.mrf.mxu0  ;;  %16106 = vmatmul.mubr.msk.bf16.gmra.mxu1 %vm674_vm2, %v3772_v43  ;;  %v3685_v62 = vmul.f32 %v17252_v30, %v18453_v29  ;;  %v3721_v46 = vadd.f32 %v18480_v54, %v3683_v60 }
 0x26e   : > { %23008 = vst [vmem:[#allocation5_spill] sm:$0xff] %v18637_v10  ;;  %v15911_v34 = vpop.f32.mrf.mxu1  ;;  %v3722_v27 = vadd.f32 %v18480_v54, %v3684_v3  ;;  %v3724_v43 = vadd.f32 %v18480_v54, %v3686_v23 }
 0x26f   : > { %v2454_v45 = vadd.f32 %v15911_v34, %v18432_v13  ;;  %v15945_v52 = vpop.f32.mrf.mxu0  ;;  %v3723_v13 = vadd.f32 %v18480_v54, %v3685_v62  ;;  %v3753_v30 = vmax.f32 %v3721_v46, 0.0 }
 0x270   : > { %v2409_v9 = vpop.f32.mrf.mxu1  ;;  %v3754_v10 = vmax.f32 %v3722_v27, 0.0  ;;  %v17254_v27 = vld [vmem:[%s17615_s21 + $0xe0] sm:$0xff] }
 0x271   : > { %v18652_v57 = vadd.f32 %v15945_v52, %v2454_v45  ;;  %v2452_v7 = vadd.f32 %v2409_v9, %v18437_v5  ;;  %v2707_v17 = vpop.f32.mrf.mxu0  ;;  %v3755_v3 = vmax.f32 %v3723_v13, 0.0  ;;  %v3756_v45 = vmax.f32 %v3724_v43, 0.0 }
 0x272   : > { %v15912_v34 = vpop.f32.mrf.mxu1  ;;  %v3773_v5 = vpack.c.bf16 %v3754_v10, %v3753_v30 }
 0x273   : > { %v18657_v39 = vadd.f32 %v2707_v17, %v2452_v7  ;;  %v2455_v60 = vadd.f32 %v15912_v34, %v18440_v21  ;;  %v15946_v25 = vpop.f32.mrf.mxu0  ;;  %v3774_v9 = vpack.c.bf16 %v3756_v45, %v3755_v3  ;;  %v3687_v7 = vmul.f32 %v17254_v27, %v18453_v29  ;;  %v17255_v21 = vld [vmem:[%s17615_s21 + $0xe8] sm:$0xff]  ;;  %v17257_v34 = vld [vmem:[%s17615_s21 + $0xf8] sm:$0xff] }
 0x274   : > { %v18660_v52 = vpop.f32.mrf.mxu1  ;;  %16109 = vmatprep.mubr.msk.bf16.mxu1 %vm674_vm2, %v3773_v5  ;;  %v3688_v17 = vmul.f32 %v17255_v21, %v18453_v29  ;;  %v3690_v30 = vmul.f32 %v17257_v34, %v18453_v29 }
 0x275   : > { %v18662_v62 = vadd.f32 %v15946_v25, %v2455_v60  ;;  %v18664_v23 = vpop.f32.mrf.mxu0  ;;  %16110 = vmatmul.mubr.msk.bf16.gmra.mxu1 %vm674_vm2, %v3774_v9  ;;  %v17256_v25 = vld [vmem:[%s17615_s21 + $0xf0] sm:$0xff]  ;;  %v3725_v3 = vadd.f32 %v18480_v54, %v3687_v7 }
 0x276   : > { %v15951_v46 = vpop.f32.mrf.mxu1  ;;  %v3689_v10 = vmul.f32 %v17256_v25, %v18453_v29  ;;  %v3726_v45 = vadd.f32 %v18480_v54, %v3688_v17  ;;  %v3728_v9 = vadd.f32 %v18480_v54, %v3690_v30 }
 0x277   : > { %23009 = vst [vmem:[#allocation6_spill] sm:$0xff] %v18662_v62  ;;  %v18672_v13 = vadd.f32 %v15951_v46, %v18447_v48  ;;  %v18674_v43 = vpop.f32.mrf.mxu0  ;;  %v3757_v21 = vmax.f32 %v3725_v3, 0.0 }
 0x278   : > { %23010 = vst [vmem:[#allocation7_spill] sm:$0xff] %v18674_v43  ;;  %v2894_v60 = vpop.f32.mrf.mxu1  ;;  %v3727_v46 = vadd.f32 %v18480_v54, %v3689_v10  ;;  %v3758_v25 = vmax.f32 %v3726_v45, 0.0  ;;  %v3760_v34 = vmax.f32 %v3728_v9, 0.0  ;;  %v18713_v9 = vld [vmem:[%s22997_s6 + $0x50] sm:$0xff]  }
 0x279   : > { %v18684_v5 = vadd.f32 %v2894_v60, %v18457_v40  ;;  %v18686_v48 = vpop.f32.mrf.mxu0  ;;  %23011 = vst [vmem:[#allocation8_spill] sm:$0xff] %v18713_v9  ;;  %16117 = vmatprep.subr.bf16.mxu0 %v18713_v9 }
 0x27a   : > { %v18690_v27 = vpop.f32.mrf.mxu1  ;;  %v3759_v29 = vmax.f32 %v3727_v46, 0.0  ;;  %v3775_v17 = vpack.c.bf16 %v3758_v25, %v3757_v21 }
 0x27b   : > { %v18692_v62 = vpop.f32.mrf.mxu0 }
 0x27c   : > { %v18694_v7 = vpop.f32.mrf.mxu1  ;;  %v3776_v40 = vpack.c.bf16 %v3760_v34, %v3759_v29  ;;  %16113 = vmatprep.mubr.msk.bf16.mxu1 %vm674_vm2, %v3775_v17 }
 0x27d   : > { %v18696_v43 = vpop.f32.mrf.mxu0 }
 0x27e   : > { %v15955_v60 = vpop.f32.mrf.mxu1  ;;  %16114 = vmatmul.mubr.msk.bf16.gmra.mxu1 %vm674_vm2, %v3776_v40 }
 0x27f   : > { %v18700_v10 = vadd.f32 %v15955_v60, %v18484_v2  ;;  %v18702_v54 = vpop.f32.mrf.mxu0 }
 0x280   : > { %v2910_v30 = vpop.f32.mrf.mxu1 }
 0x281   : > { %v18706_v3 = vadd.f32 %v2910_v30, %v18491_v53  ;;  %v18708_v45 = vpop.f32.mrf.mxu0 }
 0x282   : > { %v15956_v46 = vpop.f32.mrf.mxu1 }
 0x283   : > { %v18716_v21 = vadd.f32 %v15956_v46, %v18494_v35  ;;  %v18718_v2 = vpop.f32.mrf.mxu0 }
 0x284   : > { %23012 = vst [vmem:[#allocation9_spill] sm:$0xff] %v18718_v2  ;;  %v18720_v25 = vpop.f32.mrf.mxu1 }
 0x285   : > { %v18723_v29 = vpop.f32.mrf.mxu0 }
 0x286   : > { %23013 = vst [vmem:[#allocation10_spill] sm:$0xff] %v18723_v29  ;;  %v15959_v53 = vpop.f32.mrf.mxu1 }
 0x287   : > { %v18726_v34 = vadd.f32 %v15959_v53, %v18513_v55  ;;  %v18728_v17 = vpop.f32.mrf.mxu0 }
 0x288   : > { %23014 = vst [vmem:[#allocation11_spill] sm:$0xff] %v18728_v17  ;;  %v2926_v40 = vpop.f32.mrf.mxu1 }
 0x289   : > { %v18731_v60 = vadd.f32 %v2926_v40, %v18520_v14  ;;  %v18733_v35 = vpop.f32.mrf.mxu0 }
 0x28a   : > { %23015 = vst [vmem:[#allocation12_spill] sm:$0xff] %v18733_v35  ;;  %v15960_v30 = vpop.f32.mrf.mxu1 }
 0x28b   : > { %v18736_v46 = vadd.f32 %v15960_v30, %v18523_v19  ;;  %v18738_v2 = vpop.f32.mrf.mxu0 }
 0x28c   : > { %23017 = vst [vmem:[#allocation14_spill] sm:$0xff] %v18738_v2  ;;  %v18740_v9 = vpop.f32.mrf.mxu1 }
 0x28d   : > { %23016 = vst [vmem:[#allocation13_spill] sm:$0xff] %v18736_v46  ;;  %v18742_v29 = vpop.f32.mrf.mxu0 }
 0x28e   : > { %23018 = vst [vmem:[#allocation15_spill] sm:$0xff] %v18742_v29  ;;  %v15963_v55 = vpop.f32.mrf.mxu1 }
 0x28f   : > { %v18745_v53 = vadd.f32 %v15963_v55, %v18542_v0  ;;  %v18747_v17 = vpop.f32.mrf.mxu0 }
 0x290   : > { %23019 = vst [vmem:[#allocation16_spill] sm:$0xff] %v18747_v17  ;;  %v2942_v14 = vpop.f32.mrf.mxu1 }
 0x291   : > { %v18750_v40 = vadd.f32 %v2942_v14, %v18549_v50  ;;  %v18752_v35 = vpop.f32.mrf.mxu0 }
 0x292   : > { %23020 = vst [vmem:[#allocation17_spill] sm:$0xff] %v18752_v35  ;;  %v15964_v19 = vpop.f32.mrf.mxu1 }
 0x293   : > { %v18755_v30 = vadd.f32 %v15964_v19, %v18552_v56  ;;  %v18757_v2 = vpop.f32.mrf.mxu0 }
 0x294   : > { %23022 = vst [vmem:[#allocation19_spill] sm:$0xff] %v18757_v2  ;;  %v18759_v46 = vpop.f32.mrf.mxu1 }
 0x295   : > { %23021 = vst [vmem:[#allocation18_spill] sm:$0xff] %v18755_v30  ;;  %v18761_v29 = vpop.f32.mrf.mxu0 }
 0x296   : > { %23023 = vst [vmem:[#allocation20_spill] sm:$0xff] %v18761_v29  ;;  %v15967_v0 = vpop.f32.mrf.mxu1 }
 0x297   : > { %v18764_v55 = vadd.f32 %v15967_v0, %v18571_v16  ;;  %v18766_v17 = vpop.f32.mrf.mxu0 }
 0x298   : > { %23024 = vst [vmem:[#allocation21_spill] sm:$0xff] %v18766_v17  ;;  %v2958_v50 = vpop.f32.mrf.mxu1 }
 0x299   : > { %v18769_v14 = vadd.f32 %v2958_v50, %v18576_v12  ;;  %v18771_v35 = vpop.f32.mrf.mxu0 }
 0x29a   : > { %23025 = vst [vmem:[#allocation22_spill] sm:$0xff] %v18771_v35  ;;  %v15968_v56 = vpop.f32.mrf.mxu1 }
 0x29b   : > { %v18774_v19 = vadd.f32 %v15968_v56, %v18581_v1  ;;  %v18776_v2 = vpop.f32.mrf.mxu0 }
 0x29c   : > { %23027 = vst [vmem:[#allocation24_spill] sm:$0xff] %v18776_v2  ;;  %v18778_v30 = vpop.f32.mrf.mxu1 }
 0x29d   : > { %23026 = vst [vmem:[#allocation23_spill] sm:$0xff] %v18774_v19  ;;  %v18780_v29 = vpop.f32.mrf.mxu0 }
 0x29e   : > { %23028 = vst [vmem:[#allocation25_spill] sm:$0xff] %v18780_v29  ;;  %v15971_v16 = vpop.f32.mrf.mxu1 }
 0x29f   : > { %v18783_v0 = vadd.f32 %v15971_v16, %v18598_v11  ;;  %v18785_v17 = vpop.f32.mrf.mxu0 }
 0x2a0   : > { %23029 = vst [vmem:[#allocation26_spill] sm:$0xff] %v18785_v17  ;;  %v2974_v12 = vpop.f32.mrf.mxu1 }
 0x2a1   : > { %v18788_v50 = vadd.f32 %v2974_v12, %v18603_v32  ;;  %v18790_v35 = vpop.f32.mrf.mxu0 }
 0x2a2   : > { %23030 = vst [vmem:[#allocation27_spill] sm:$0xff] %v18790_v35  ;;  %v15972_v1 = vpop.f32.mrf.mxu1 }
 0x2a3   : > { %v18793_v56 = vadd.f32 %v15972_v1, %v18608_v41  ;;  %v18795_v2 = vpop.f32.mrf.mxu0  ;;  %v2143_v1 = vadd.f32 %v18393_v44, %v18391_v37 }
 0x2a4   : > { %v18797_v19 = vpop.f32.mrf.mxu1 }
 0x2a5   : > { %v18799_v29 = vpop.f32.mrf.mxu0  ;;  %v2441_v37 = vadd.f32 %v18579_v33, %v2143_v1 }
 0x2a6   : > { %23031 = vst [vmem:[#allocation28_spill] sm:$0xff] %v18799_v29  ;;  %v15975_v11 = vpop.f32.mrf.mxu1  ;;  %v2147_v29 = vadd.f32 %v18410_v24, %v18408_v18 }
 0x2a7   : > { %v18802_v16 = vadd.f32 %v15975_v11, %v18625_v58  ;;  %v18804_v17 = vpop.f32.mrf.mxu0  ;;  %v2151_v58 = vadd.f32 %v18428_v61, %v18426_v38  ;;  %v2727_v38 = vadd.f32 %v18498_v6, %v18496_v59  ;;  %v2735_v59 = vadd.f32 %v18556_v4, %v18554_v42  ;;  %v23033_v6 = vld [vmem:[#allocation3_spill] sm:$0xff] }
 0x2a8   : > { %23032 = vst [vmem:[#allocation29_spill] sm:$0xff] %v18804_v17  ;;  %v2990_v32 = vpop.f32.mrf.mxu1  ;;  %v2445_v44 = vadd.f32 %v18606_v8, %v2147_v29  ;;  %v3319_v42 = vadd.f32 %v18686_v48, %v18684_v5  ;;  %v23039_v5 = vld [vmem:[#allocation10_spill] sm:$0xff] }
 0x2a9   : > { %v18807_v12 = vadd.f32 %v2990_v32, %v18630_v15  ;;  %v18818_v11 = vpop.f32.mrf.mxu0  ;;  %v2155_v15 = vadd.f32 %v18444_v28, %v18442_v49  ;;  %v2725_v32 = vadd.f32 %v18462_v31, %v18460_v26  ;;  %v2449_v18 = vadd.f32 %v18633_v63, %v2151_v58 }
 0x2aa   : > { %v15976_v35 = vpop.f32.mrf.mxu1  ;;  %v3026_v33 = vadd.f32 %v18720_v25, %v2727_v38  ;;  %v2739_v63 = vadd.f32 %v23033_v6, %v2441_v37  ;;  %v23049_v6 = vld [vmem:[#allocation20_spill] sm:$0xff] }
 0x2ab   : > { %v18810_v41 = vadd.f32 %v15976_v35, %v18635_v36  ;;  %v2723_v36 = vadd.f32 %v18470_v51, %v18468_v20  ;;  %v2453_v61 = vadd.f32 %v18660_v52, %v2155_v15  ;;  %v3024_v28 = vadd.f32 %v18690_v27, %v2725_v32  ;;  %v16010_v31 = vpop.f32.mrf.mxu0  ;;  %v23035_v27 = vld [vmem:[#allocation5_spill] sm:$0xff] }
 0x2ac   : > { %v2993_v17 = vpop.f32.mrf.mxu1  ;;  %v2731_v51 = vadd.f32 %v18527_v22, %v18525_v47  ;;  %v2747_v29 = vadd.f32 %v23035_v27, %v2449_v18  ;;  %v23036_v47 = vld [vmem:[#allocation7_spill] sm:$0xff]  ;;  %v3034_v15 = vadd.f32 %v18759_v46, %v2735_v59  ;;  %v18873_v48 = vadd.f32 %v23039_v5, %v3026_v33  ;;  %v23041_v46 = vld [vmem:[#allocation12_spill] sm:$0xff] }
 0x2ad   : > { %v3022_v26 = vadd.f32 %v18694_v7, %v2723_v36  ;;  %v18849_v35 = vadd.f32 %v18664_v23, %v2453_v61  ;;  %v3321_v22 = vadd.f32 %v23036_v47, %v18672_v13  ;;  %v3322_v4 = vadd.f32 %v18692_v62, %v3024_v28  ;;  %v3291_v32 = vpop.f32.mrf.mxu0  ;;  %v23040_v62 = vld [vmem:[#allocation11_spill] sm:$0xff]  ;;  %v23045_v61 = vld [vmem:[#allocation16_spill] sm:$0xff]  ;;  %v23051_v47 = vld [vmem:[#allocation22_spill] sm:$0xff] }
 0x2ae   : > { %v15979_v24 = vpop.f32.mrf.mxu1  ;;  %v3030_v25 = vadd.f32 %v18740_v9, %v2731_v51  ;;  %v3325_v36 = vadd.f32 %v18702_v54, %v18700_v10  ;;  %v18866_v13 = vadd.f32 %v18708_v45, %v18706_v3  ;;  %v23038_v9 = vld [vmem:[#allocation9_spill] sm:$0xff]  ;;  %v23043_v54 = vld [vmem:[#allocation14_spill] sm:$0xff]  ;;  %v3038_v3 = vadd.f32 %v18778_v30, %v2739_v63  ;;  %v23048_v33 = vld [vmem:[#allocation19_spill] sm:$0xff] }
 0x2af   : > { %v18833_v49 = vadd.f32 %v15979_v24, %v18652_v57  ;;  %v23034_v57 = vld [vmem:[#allocation4_spill] sm:$0xff]  ;;  %v3320_v58 = vadd.f32 %v18696_v43, %v3022_v26  ;;  %v18870_v37 = vadd.f32 %v23038_v9, %v18716_v21  ;;  %v18877_v43 = vadd.f32 %v23040_v62, %v18726_v34  ;;  %v23042_v10 = vld [vmem:[#allocation13_spill] sm:$0xff]  ;;  %v16013_v45 = vpop.f32.mrf.mxu0  ;;  %v18891_v24 = vld [vmem:[%s22992_s1 + $0x3] ss:$0 sm:$0xff] }
 0x2b0   : > { %v3006_v20 = vpop.f32.mrf.mxu1  ;;  %v2743_v52 = vadd.f32 %v23034_v57, %v2445_v44  ;;  %v18881_v44 = vadd.f32 %v23041_v46, %v18731_v60  ;;  %v18885_v18 = vadd.f32 %v23043_v54, %v23042_v10  ;;  %v18896_v34 = vld [vmem:[%s22998_s7 + $0x3] ss:$0 sm:$0xff]  ;;  %v18903_v28 = vadd.f32 %v23045_v61, %v18745_v53  ;;  %v23046_v30 = vld [vmem:[#allocation17_spill] sm:$0xff]  ;;  %v23047_v51 = vld [vmem:[#allocation18_spill] sm:$0xff] }
 0x2b1   : > { %v18841_v8 = vadd.f32 %v3006_v20, %v18657_v39  ;;  %v23037_v39 = vld [vmem:[#allocation6_spill] sm:$0xff]  ;;  %v23044_v60 = vld [vmem:[#allocation15_spill] sm:$0xff]  ;;  %v18907_v26 = vadd.f32 %v23046_v30, %v18750_v40  ;;  %v18911_v59 = vadd.f32 %v23048_v33, %v23047_v51  ;;  %v18914_v63 = vadd.f32 %v23049_v6, %v3034_v15  ;;  %v23050_v57 = vld [vmem:[#allocation21_spill] sm:$0xff]  ;;  %v3304_v10 = vpop.f32.mrf.mxu0 }
 0x2b2   : > { %v15980_v7 = vpop.f32.mrf.mxu1  ;;  %v18899_v38 = vadd.f32 %v23044_v60, %v3030_v25  ;;  %v18918_v27 = vadd.f32 %v23050_v57, %v18764_v55  ;;  %v18923_v25 = vadd.f32 %v23051_v47, %v18769_v14  ;;  %v23052_v9 = vld [vmem:[#allocation23_spill] sm:$0xff]  ;;  %v23053_v5 = vld [vmem:[#allocation24_spill] sm:$0xff]  ;;  %v23054_v62 = vld [vmem:[#allocation25_spill] sm:$0xff]  ;;  %v18967_v51 = vadd.f32 %v18818_v11, %v18807_v12 }
 0x2b3   : > { %v18855_v1 = vadd.f32 %v15980_v7, %v23037_v39  ;;  %v3042_v7 = vadd.f32 %v18797_v19, %v2743_v52  ;;  %v18929_v15 = vadd.f32 %v23053_v5, %v23052_v9  ;;  %v18932_v46 = vadd.f32 %v23054_v62, %v3038_v3  ;;  %v23055_v55 = vld [vmem:[#allocation26_spill] sm:$0xff]  ;;  %v18941_v14 = vld [vmem:[%s22993_s2 + $0x3] ss:$0 sm:$0xff]  ;;  %v23057_v60 = vld [vmem:[#allocation28_spill] sm:$0xff] }
 0x2b4   : > { %v3009_v23 = vpop.f32.mrf.mxu1  ;;  %v18936_v19 = vadd.f32 %v23055_v55, %v18783_v0  ;;  %v3046_v52 = vadd.f32 %v2993_v17, %v2747_v29  ;;  %v23056_v3 = vld [vmem:[#allocation27_spill] sm:$0xff]  ;;  %v18954_v0 = vadd.f32 %v18795_v2, %v18793_v56  ;;  %v23058_v30 = vld [vmem:[#allocation29_spill] sm:$0xff]  ;;  %v18970_v2 = vadd.f32 %v16010_v31, %v18810_v41 }
 0x2b5   : > { %v18959_v61 = vadd.f32 %v23057_v60, %v3042_v7  ;;  %v3050_v41 = vadd.f32 %v3009_v23, %v18849_v35 }
 0x2b6   : > { %v16019_v21 = vpop.f32.mrf.mxu1  ;;  %v18975_v7 = vadd.f32 %v3291_v32, %v3046_v52 }
 0x2b7   : > { %v3619_v20 = vadd.f32 %v16019_v21, %v3321_v22  ;;  %v18950_v21 = vadd.f32 %v23056_v3, %v18788_v50 }
 0x2b8   : > { %v3490_v53 = vpop.f32.mrf.mxu1 }
 0x2b9   : > { %v3791_v40 = vmul.f32 %v18891_v24, %v3619_v20  ;;  %v10677_v22 = vmul.f32 %v18896_v34, %v3619_v20  ;;  %v3617_v39 = vadd.f32 %v3490_v53, %v3319_v42  ;;  %v18946_v42 = vld [vmem:[%s22999_s8 + $0x3] ss:$0 sm:$0xff]  ;;  %v18963_v20 = vadd.f32 %v23058_v30, %v18802_v16  ;;  %v16014_v53 = vpop.f32.mrf.mxu0 }
 0x2ba   : > { %v16020_v54 = vpop.f32.mrf.mxu1 }
 0x2bb   : > { %v3789_v17 = vmul.f32 %v18891_v24, %v3617_v39  ;;  %v10675_v29 = vmul.f32 %v18896_v34, %v3617_v39  ;;  %v3620_v50 = vadd.f32 %v16020_v54, %v3322_v4  ;;  %v3829_v56 = vadd.f32 %v18941_v14, %v3791_v40 }
 0x2bc   : > { %v3493_v33 = vpop.f32.mrf.mxu1  ;;  %v10715_v6 = vadd.f32 %v18946_v42, %v10677_v22  ;;  %v18980_v4 = vadd.f32 %v16013_v45, %v18833_v49  ;;  %v3307_v45 = vpop.f32.mrf.mxu0 }
 0x2bd   : > { %v3827_v57 = vadd.f32 %v18941_v14, %v3789_v17  ;;  %v3792_v16 = vmul.f32 %v18891_v24, %v3620_v50  ;;  %v10678_v47 = vmul.f32 %v18896_v34, %v3620_v50  ;;  %v3618_v12 = vadd.f32 %v3493_v33, %v3320_v58 }
 0x2be   : > { %v16023_v11 = vpop.f32.mrf.mxu1  ;;  %v10713_v31 = vadd.f32 %v18946_v42, %v10675_v29  ;;  %v3861_v62 = vmax.f32 %v3829_v56, 0.0  ;;  %v10747_v58 = vmax.f32 %v10715_v6, 0.0  ;;  %v18997_v6 = vadd.f32 %v3304_v10, %v18841_v8 }
 0x2bf   : > { %v3623_v40 = vadd.f32 %v16023_v11, %v3325_v36  ;;  %v3830_v22 = vadd.f32 %v18941_v14, %v3792_v16  ;;  %v10716_v32 = vadd.f32 %v18946_v42, %v10678_v47  ;;  %v3790_v39 = vmul.f32 %v18891_v24, %v3618_v12 }
 0x2c0   : > { %v10676_v9 = vmul.f32 %v18896_v34, %v3618_v12  ;;  %v3506_v5 = vpop.f32.mrf.mxu1  ;;  %v3859_v55 = vmax.f32 %v3827_v57, 0.0  ;;  %v10745_v3 = vmax.f32 %v10713_v31, 0.0  ;;  %v19000_v57 = vadd.f32 %v16014_v53, %v18855_v1 }
 0x2c1   : > { %v3621_v49 = vadd.f32 %v3506_v5, %v18866_v13  ;;  %v3862_v52 = vmax.f32 %v3830_v22, 0.0  ;;  %v10748_v35 = vmax.f32 %v10716_v32, 0.0  ;;  %v3828_v23 = vadd.f32 %v18941_v14, %v3790_v39 }
 0x2c2   : > { %v10714_v36 = vadd.f32 %v18946_v42, %v10676_v9  ;;  %v16024_v54 = vpop.f32.mrf.mxu1  ;;  %v3795_v17 = vmul.f32 %v18891_v24, %v3623_v40  ;;  %v10681_v29 = vmul.f32 %v18896_v34, %v3623_v40  ;;  %v19002_v16 = vadd.f32 %v3307_v45, %v3050_v41 }
 0x2c3   : > { %v3793_v60 = vmul.f32 %v18891_v24, %v3621_v49  ;;  %v3892_v30 = vpack.c.bf16 %v3862_v52, %v3861_v62  ;;  %v18994_v50 = vpack.c.bf16 %v10748_v35, %v10747_v58  ;;  %v3860_v33 = vmax.f32 %v3828_v23, 0.0  ;;  %v23061_v35 = vld [vmem:[#allocation8_spill] sm:$0xff] }
 0x2c4   : > { %v10746_v13 = vmax.f32 %v10714_v36, 0.0  ;;  %v3509_v56 = vpop.f32.mrf.mxu1  ;;  %v10679_v47 = vmul.f32 %v18896_v34, %v3621_v49  ;;  %v3624_v12 = vadd.f32 %v16024_v54, %v18870_v37  ;;  %v3833_v32 = vadd.f32 %v18941_v14, %v3795_v17 }
 0x2c5   : > { %23059 = vst [vmem:[#allocation3_spill] sm:$0xff] %v18994_v50  ;;  %v3622_v11 = vadd.f32 %v3509_v56, %v18873_v48  ;;  %v3891_v40 = vpack.c.bf16 %v3860_v33, %v3859_v55  ;;  %v10719_v8 = vadd.f32 %v18946_v42, %v10681_v29  ;;  %v3831_v10 = vadd.f32 %v18941_v14, %v3793_v60 }
 0x2c6   : > { %v16027_v31 = vpop.f32.mrf.mxu1  ;;  %v19007_v22 = vpack.c.bf16 %v10746_v13, %v10745_v3  ;;  %v3796_v53 = vmul.f32 %v18891_v24, %v3624_v12  ;;  %v10682_v41 = vmul.f32 %v18896_v34, %v3624_v12  ;;  %v10717_v9 = vadd.f32 %v18946_v42, %v10679_v47 }
 0x2c7   : > { %v3627_v1 = vadd.f32 %v16027_v31, %v18877_v43  ;;  %v3794_v37 = vmul.f32 %v18891_v24, %v3622_v11  ;;  %v10680_v48 = vmul.f32 %v18896_v34, %v3622_v11  ;;  %16051 = vmatprep.mubr.msk.bf16.mxu0 %vm674_vm2, %v3891_v40  ;;  %v3865_v23 = vmax.f32 %v3833_v32, 0.0 }
 0x2c8   : > { %23060 = vst [vmem:[#allocation4_spill] sm:$0xff] %v19007_v22  ;;  %v3522_v39 = vpop.f32.mrf.mxu1  ;;  %16052 = vmatmul.mubr.msk.bf16.vlgmr.msra.gmra.mxu0 %vm674_vm2, %v3892_v30  ;;  %v3834_v43 = vadd.f32 %v18941_v14, %v3796_v53  ;;  %v10720_v55 = vadd.f32 %v18946_v42, %v10682_v41  ;;  %v10751_v36 = vmax.f32 %v10719_v8, 0.0  ;;  %v10749_v33 = vmax.f32 %v10717_v9, 0.0 }
 0x2c9   : > { %v3799_v5 = vmul.f32 %v18891_v24, %v3627_v1  ;;  %v10685_v62 = vmul.f32 %v18896_v34, %v3627_v1  ;;  %v3625_v58 = vadd.f32 %v3522_v39, %v18881_v44  ;;  %v3832_v49 = vadd.f32 %v18941_v14, %v3794_v37  ;;  %16118 = vmatpush3.bf16.msra.mxu0 %v23061_v35 }
 0x2ca   : > { %v10718_v45 = vadd.f32 %v18946_v42, %v10680_v48  ;;  %v16028_v52 = vpop.f32.mrf.mxu1  ;;  %v3863_v44 = vmax.f32 %v3831_v10, 0.0  ;;  %v3866_v17 = vmax.f32 %v3834_v43, 0.0  ;;  %v10752_v29 = vmax.f32 %v10720_v55, 0.0 }
 0x2cb   : > { %v3797_v54 = vmul.f32 %v18891_v24, %v3625_v58  ;;  %v10683_v3 = vmul.f32 %v18896_v34, %v3625_v58  ;;  %v3864_v60 = vmax.f32 %v3832_v49, 0.0  ;;  %v3837_v56 = vadd.f32 %v18941_v14, %v3799_v5 }
 0x2cc   : > { %v3525_v30 = vpop.f32.mrf.mxu1  ;;  %v10750_v13 = vmax.f32 %v10718_v45, 0.0  ;;  %v10723_v47 = vadd.f32 %v18946_v42, %v10685_v62  ;;  %v3894_v12 = vpack.c.bf16 %v3866_v17, %v3865_v23  ;;  %v19032_v11 = vpack.c.bf16 %v10752_v29, %v10751_v36 }
 0x2cd   : > { %v3628_v31 = vadd.f32 %v16028_v52, %v18885_v18  ;;  %v3626_v40 = vadd.f32 %v3525_v30, %v18899_v38  ;;  %v3835_v8 = vadd.f32 %v18941_v14, %v3797_v54  ;;  %v10721_v10 = vadd.f32 %v18946_v42, %v10683_v3 }
 0x2ce   : > { %23062 = vst [vmem:[#allocation5_spill] sm:$0xff] %v19032_v11  ;;  %v16031_v32 = vpop.f32.mrf.mxu1  ;;  %v3893_v53 = vpack.c.bf16 %v3864_v60, %v3863_v44  ;;  %v19047_v62 = vpack.c.bf16 %v10750_v13, %v10749_v33  ;;  %v3869_v45 = vmax.f32 %v3837_v56, 0.0  ;;  %v10755_v52 = vmax.f32 %v10723_v47, 0.0 }
 0x2cf   : > { %v3631_v1 = vadd.f32 %v16031_v32, %v18903_v28  ;;  %v3800_v41 = vmul.f32 %v18891_v24, %v3628_v31  ;;  %v10686_v37 = vmul.f32 %v18896_v34, %v3628_v31  ;;  %v3798_v48 = vmul.f32 %v18891_v24, %v3626_v40 }
 0x2d0   : > { %v10684_v39 = vmul.f32 %v18896_v34, %v3626_v40  ;;  %v3538_v9 = vpop.f32.mrf.mxu1  ;;  %16055 = vmatprep.mubr.msk.bf16.mxu0 %vm674_vm2, %v3893_v53  ;;  %23063 = vst [vmem:[#allocation7_spill] sm:$0xff] %v19047_v62  ;;  %v10753_v17 = vmax.f32 %v10721_v10, 0.0 }
 0x2d1   : > { %v3803_v18 = vmul.f32 %v18891_v24, %v3631_v1  ;;  %v10689_v38 = vmul.f32 %v18896_v34, %v3631_v1  ;;  %v3629_v5 = vadd.f32 %v3538_v9, %v18907_v26  ;;  %v3838_v28 = vadd.f32 %v18941_v14, %v3800_v41  ;;  %16056 = vmatmul.mubr.msk.bf16.gmra.mxu0 %vm674_vm2, %v3894_v12 }
 0x2d2   : > { %v10724_v58 = vadd.f32 %v18946_v42, %v10686_v37  ;;  %v3836_v43 = vadd.f32 %v18941_v14, %v3798_v48  ;;  %v10722_v55 = vadd.f32 %v18946_v42, %v10684_v39  ;;  %v16032_v49 = vpop.f32.mrf.mxu1  ;;  %v3867_v26 = vmax.f32 %v3835_v8, 0.0 }
 0x2d3   : > { %v3801_v35 = vmul.f32 %v18891_v24, %v3629_v5  ;;  %v10687_v23 = vmul.f32 %v18896_v34, %v3629_v5  ;;  %v3870_v36 = vmax.f32 %v3838_v28, 0.0  ;;  %v3841_v60 = vadd.f32 %v18941_v14, %v3803_v18 }
 0x2d4   : > { %v10756_v54 = vmax.f32 %v10724_v58, 0.0  ;;  %v3868_v3 = vmax.f32 %v3836_v43, 0.0  ;;  %v3541_v44 = vpop.f32.mrf.mxu1  ;;  %v10754_v29 = vmax.f32 %v10722_v55, 0.0  ;;  %v10727_v30 = vadd.f32 %v18946_v42, %v10689_v38 }
 0x2d5   : > { %v3896_v33 = vpack.c.bf16 %v3870_v36, %v3869_v45  ;;  %v3632_v56 = vadd.f32 %v16032_v49, %v18911_v59  ;;  %v3630_v47 = vadd.f32 %v3541_v44, %v18914_v63  ;;  %v3839_v31 = vadd.f32 %v18941_v14, %v3801_v35 }
 0x2d6   : > { %v19058_v13 = vpack.c.bf16 %v10756_v54, %v10755_v52  ;;  %v16035_v12 = vpop.f32.mrf.mxu1  ;;  %v10725_v40 = vadd.f32 %v18946_v42, %v10687_v23  ;;  %v3895_v8 = vpack.c.bf16 %v3868_v3, %v3867_v26  ;;  %v19073_v39 = vpack.c.bf16 %v10754_v29, %v10753_v17 }
 0x2d7   : > { %v3635_v32 = vadd.f32 %v16035_v12, %v18918_v27  ;;  %v3804_v10 = vmul.f32 %v18891_v24, %v3632_v56  ;;  %v10690_v1 = vmul.f32 %v18896_v34, %v3632_v56  ;;  %v3802_v53 = vmul.f32 %v18891_v24, %v3630_v47 }
 0x2d8   : > { %23064 = vst [vmem:[#allocation6_spill] sm:$0xff] %v19058_v13  ;;  %v10688_v41 = vmul.f32 %v18896_v34, %v3630_v47  ;;  %v3554_v37 = vpop.f32.mrf.mxu1  ;;  %16059 = vmatprep.mubr.msk.bf16.mxu0 %vm674_vm2, %v3895_v8  ;;  %23065 = vst [vmem:[#allocation9_spill] sm:$0xff] %v19073_v39  ;;  %v3873_v28 = vmax.f32 %v3841_v60, 0.0  ;;  %v10759_v58 = vmax.f32 %v10727_v30, 0.0  ;;  %v10757_v23 = vmax.f32 %v10725_v40, 0.0 }
 0x2d9   : > { %v3807_v59 = vmul.f32 %v18891_v24, %v3635_v32  ;;  %v10693_v63 = vmul.f32 %v18896_v34, %v3635_v32  ;;  %v3633_v48 = vadd.f32 %v3554_v37, %v18923_v25  ;;  %v3842_v27 = vadd.f32 %v18941_v14, %v3804_v10  ;;  %16060 = vmatmul.mubr.msk.bf16.gmra.mxu0 %vm674_vm2, %v3896_v33 }
 0x2da   : > { %v10728_v9 = vadd.f32 %v18946_v42, %v10690_v1  ;;  %v3840_v18 = vadd.f32 %v18941_v14, %v3802_v53  ;;  %v10726_v38 = vadd.f32 %v18946_v42, %v10688_v41  ;;  %v16036_v5 = vpop.f32.mrf.mxu1  ;;  %v3871_v25 = vmax.f32 %v3839_v31, 0.0 }
 0x2db   : > { %v3805_v43 = vmul.f32 %v18891_v24, %v3633_v48  ;;  %v10691_v55 = vmul.f32 %v18896_v34, %v3633_v48  ;;  %v3874_v49 = vmax.f32 %v3842_v27, 0.0  ;;  %v3845_v36 = vadd.f32 %v18941_v14, %v3807_v59 }
 0x2dc   : > { %v10760_v45 = vmax.f32 %v10728_v9, 0.0  ;;  %v3872_v52 = vmax.f32 %v3840_v18, 0.0  ;;  %v3557_v35 = vpop.f32.mrf.mxu1  ;;  %v10758_v26 = vmax.f32 %v10726_v38, 0.0  ;;  %v10731_v54 = vadd.f32 %v18946_v42, %v10693_v63 }
 0x2dd   : > { %v3898_v3 = vpack.c.bf16 %v3874_v49, %v3873_v28  ;;  %v3636_v17 = vadd.f32 %v16036_v5, %v18929_v15  ;;  %v3634_v29 = vadd.f32 %v3557_v35, %v18932_v46  ;;  %v3843_v30 = vadd.f32 %v18941_v14, %v3805_v43 }
 0x2de   : > { %v19084_v44 = vpack.c.bf16 %v10760_v45, %v10759_v58  ;;  %v16039_v60 = vpop.f32.mrf.mxu1  ;;  %v10729_v33 = vadd.f32 %v18946_v42, %v10691_v55  ;;  %v3897_v47 = vpack.c.bf16 %v3872_v52, %v3871_v25  ;;  %v19099_v1 = vpack.c.bf16 %v10758_v26, %v10757_v23 }
 0x2df   : > { %v3639_v56 = vadd.f32 %v16039_v60, %v18936_v19  ;;  %v3808_v12 = vmul.f32 %v18891_v24, %v3636_v17  ;;  %v10694_v31 = vmul.f32 %v18896_v34, %v3636_v17  ;;  %v3806_v40 = vmul.f32 %v18891_v24, %v3634_v29 }
 0x2e0   : > { %23066 = vst [vmem:[#allocation10_spill] sm:$0xff] %v19084_v44  ;;  %v10692_v32 = vmul.f32 %v18896_v34, %v3634_v29  ;;  %v3570_v8 = vpop.f32.mrf.mxu1  ;;  %16063 = vmatprep.mubr.msk.bf16.mxu0 %vm674_vm2, %v3897_v47  ;;  %23067 = vst [vmem:[#allocation11_spill] sm:$0xff] %v19099_v1  ;;  %v3877_v63 = vmax.f32 %v3845_v36, 0.0  ;;  %v10763_v48 = vmax.f32 %v10731_v54, 0.0  ;;  %v10761_v58 = vmax.f32 %v10729_v33, 0.0 }
 0x2e1   : > { %v3811_v15 = vmul.f32 %v18891_v24, %v3639_v56  ;;  %v10697_v46 = vmul.f32 %v18896_v34, %v3639_v56  ;;  %v3637_v10 = vadd.f32 %v3570_v8, %v18950_v21  ;;  %v3846_v19 = vadd.f32 %v18941_v14, %v3808_v12  ;;  %16064 = vmatmul.mubr.msk.bf16.gmra.mxu0 %vm674_vm2, %v3898_v3 }
 0x2e2   : > { %v10732_v53 = vadd.f32 %v18946_v42, %v10694_v31  ;;  %v3844_v41 = vadd.f32 %v18941_v14, %v3806_v40  ;;  %v10730_v37 = vadd.f32 %v18946_v42, %v10692_v32  ;;  %v16040_v59 = vpop.f32.mrf.mxu1  ;;  %v3875_v21 = vmax.f32 %v3843_v30, 0.0 }
 0x2e3   : > { %v3809_v27 = vmul.f32 %v18891_v24, %v3637_v10  ;;  %v10695_v9 = vmul.f32 %v18896_v34, %v3637_v10  ;;  %v3878_v18 = vmax.f32 %v3846_v19, 0.0  ;;  %v3849_v55 = vadd.f32 %v18941_v14, %v3811_v15 }
 0x2e4   : > { %v10764_v38 = vmax.f32 %v10732_v53, 0.0  ;;  %v3876_v5 = vmax.f32 %v3844_v41, 0.0  ;;  %v3573_v28 = vpop.f32.mrf.mxu1  ;;  %v10762_v43 = vmax.f32 %v10730_v37, 0.0  ;;  %v10735_v25 = vadd.f32 %v18946_v42, %v10697_v46 }
 0x2e5   : > { %v3900_v49 = vpack.c.bf16 %v3878_v18, %v3877_v63  ;;  %v3640_v52 = vadd.f32 %v16040_v59, %v18954_v0  ;;  %v3638_v35 = vadd.f32 %v3573_v28, %v18959_v61  ;;  %v3847_v26 = vadd.f32 %v18941_v14, %v3809_v27 }
 0x2e6   : > { %v19110_v45 = vpack.c.bf16 %v10764_v38, %v10763_v48  ;;  %v16043_v23 = vpop.f32.mrf.mxu1  ;;  %v10733_v36 = vadd.f32 %v18946_v42, %v10695_v9  ;;  %v3899_v3 = vpack.c.bf16 %v3876_v5, %v3875_v21  ;;  %v19125_v47 = vpack.c.bf16 %v10762_v43, %v10761_v58 }
 0x2e7   : > { %v3643_v54 = vadd.f32 %v16043_v23, %v18963_v20  ;;  %v3812_v17 = vmul.f32 %v18891_v24, %v3640_v52  ;;  %v10698_v29 = vmul.f32 %v18896_v34, %v3640_v52  ;;  %v3810_v60 = vmul.f32 %v18891_v24, %v3638_v35 }
 0x2e8   : > { %23068 = vst [vmem:[#allocation12_spill] sm:$0xff] %v19110_v45  ;;  %v10696_v30 = vmul.f32 %v18896_v34, %v3638_v35  ;;  %v3586_v33 = vpop.f32.mrf.mxu1  ;;  %16067 = vmatprep.mubr.msk.bf16.mxu0 %vm674_vm2, %v3899_v3  ;;  %23069 = vst [vmem:[#allocation13_spill] sm:$0xff] %v19125_v47  ;;  %v3881_v8 = vmax.f32 %v3849_v55, 0.0  ;;  %v10767_v15 = vmax.f32 %v10735_v25, 0.0  ;;  %v10765_v59 = vmax.f32 %v10733_v36, 0.0 }
 0x2e9   : > { %v3815_v0 = vmul.f32 %v18891_v24, %v3643_v54  ;;  %v10701_v61 = vmul.f32 %v18896_v34, %v3643_v54  ;;  %v3641_v56 = vadd.f32 %v3586_v33, %v18967_v51  ;;  %v3850_v20 = vadd.f32 %v18941_v14, %v3812_v17  ;;  %16068 = vmatmul.mubr.msk.bf16.gmra.mxu0 %vm674_vm2, %v3900_v49 }
 0x2ea   : > { %v10736_v12 = vadd.f32 %v18946_v42, %v10698_v29  ;;  %v3848_v31 = vadd.f32 %v18941_v14, %v3810_v60  ;;  %v10734_v40 = vadd.f32 %v18946_v42, %v10696_v30  ;;  %v16044_v32 = vpop.f32.mrf.mxu1  ;;  %v3879_v51 = vmax.f32 %v3847_v26, 0.0 }
 0x2eb   : > { %v3813_v46 = vmul.f32 %v18891_v24, %v3641_v56  ;;  %v10699_v10 = vmul.f32 %v18896_v34, %v3641_v56  ;;  %v3882_v19 = vmax.f32 %v3850_v20, 0.0  ;;  %v3853_v48 = vadd.f32 %v18941_v14, %v3815_v0 }
 0x2ec   : > { %v10768_v53 = vmax.f32 %v10736_v12, 0.0  ;;  %v3880_v41 = vmax.f32 %v3848_v31, 0.0  ;;  %v3589_v37 = vpop.f32.mrf.mxu1  ;;  %v10766_v63 = vmax.f32 %v10734_v40, 0.0  ;;  %v10739_v27 = vadd.f32 %v18946_v42, %v10701_v61 }
 0x2ed   : > { %v3902_v9 = vpack.c.bf16 %v3882_v19, %v3881_v8  ;;  %v3644_v18 = vadd.f32 %v16044_v32, %v18970_v2  ;;  %v3642_v38 = vadd.f32 %v3589_v37, %v18975_v7  ;;  %v3851_v28 = vadd.f32 %v18941_v14, %v3813_v46 }
 0x2ee   : > { %v19136_v21 = vpack.c.bf16 %v10768_v53, %v10767_v15  ;;  %v16047_v5 = vpop.f32.mrf.mxu1  ;;  %v10737_v58 = vadd.f32 %v18946_v42, %v10699_v10  ;;  %v3901_v55 = vpack.c.bf16 %v3880_v41, %v3879_v51  ;;  %v19151_v36 = vpack.c.bf16 %v10766_v63, %v10765_v59 }
 0x2ef   : > { %v3647_v43 = vadd.f32 %v16047_v5, %v18980_v4  ;;  %v3816_v25 = vmul.f32 %v18891_v24, %v3644_v18  ;;  %v10702_v49 = vmul.f32 %v18896_v34, %v3644_v18  ;;  %v3814_v52 = vmul.f32 %v18891_v24, %v3642_v38 }
 0x2f0   : > { %23070 = vst [vmem:[#allocation14_spill] sm:$0xff] %v19136_v21  ;;  %v10700_v35 = vmul.f32 %v18896_v34, %v3642_v38  ;;  %v3602_v23 = vpop.f32.mrf.mxu1  ;;  %16071 = vmatprep.mubr.msk.bf16.mxu0 %vm674_vm2, %v3901_v55  ;;  %23071 = vst [vmem:[#allocation15_spill] sm:$0xff] %v19151_v36  ;;  %v3885_v60 = vmax.f32 %v3853_v48, 0.0  ;;  %v10771_v30 = vmax.f32 %v10739_v27, 0.0  ;;  %v3883_v31 = vmax.f32 %v3851_v28, 0.0 }
 0x2f1   : > { %v3819_v2 = vmul.f32 %v18891_v24, %v3647_v43  ;;  %v10705_v7 = vmul.f32 %v18896_v34, %v3647_v43  ;;  %v3645_v26 = vadd.f32 %v3602_v23, %v18997_v6  ;;  %v3854_v4 = vadd.f32 %v18941_v14, %v3816_v25  ;;  %16072 = vmatmul.mubr.msk.bf16.gmra.mxu0 %vm674_vm2, %v3902_v9  ;;  %v4529_v23 = vld [vmem:[#allocation2 + $0x10] sm:$0xff] }
 0x2f2   : > { %v10740_v54 = vadd.f32 %v18946_v42, %v10702_v49  ;;  %v3852_v3 = vadd.f32 %v18941_v14, %v3814_v52  ;;  %v10738_v17 = vadd.f32 %v18946_v42, %v10700_v35  ;;  %v16048_v29 = vpop.f32.mrf.mxu1  ;;  %v10769_v40 = vmax.f32 %v10737_v58, 0.0 }
 0x2f3   : > { %v3817_v33 = vmul.f32 %v18891_v24, %v3645_v26  ;;  %v10703_v0 = vmul.f32 %v18896_v34, %v3645_v26  ;;  %v3886_v6 = vmax.f32 %v3854_v4, 0.0  ;;  %v3857_v32 = vadd.f32 %v18941_v14, %v3819_v2  ;;  %v4477_v2 = vld [vmem:[#allocation2 + $0x7] sm:$0xff]  ;;  %v4478_v26 = vld [vmem:[#allocation2 + $0xf] sm:$0xff] }
 0x2f4   : > { %v10772_v61 = vmax.f32 %v10740_v54, 0.0  ;;  %v3884_v56 = vmax.f32 %v3852_v3, 0.0  ;;  %v10770_v20 = vmax.f32 %v10738_v17, 0.0  ;;  %v3605_v12 = vpop.f32.mrf.mxu1  ;;  %v10743_v8 = vadd.f32 %v18946_v42, %v10705_v7  ;;  %v19194_v54 = vld [vmem:[%s22997_s6 + $0x58] sm:$0xff]  }
 0x2f5   : > { %v3904_v15 = vpack.c.bf16 %v3886_v6, %v3885_v60  ;;  %v3648_v10 = vadd.f32 %v16048_v29, %v19000_v57  ;;  %v3646_v51 = vadd.f32 %v3605_v12, %v19002_v16  ;;  %v3855_v19 = vadd.f32 %v18941_v14, %v3817_v33  ;;  %16185 = vmatprep.subr.bf16.mxu0 %v19194_v54  ;;  %v19200_v33 = vld [vmem:[%s22997_s6 + $0x60] sm:$0xff]  }
 0x2f6   : > { %v19162_v46 = vpack.c.bf16 %v10772_v61, %v10771_v30  ;;  %v10741_v53 = vadd.f32 %v18946_v42, %v10703_v0  ;;  %v3903_v41 = vpack.c.bf16 %v3884_v56, %v3883_v31  ;;  %v19168_v37 = vpack.c.bf16 %v10770_v20, %v10769_v40 }
 0x2f7   : > { %v3820_v59 = vmul.f32 %v18891_v24, %v3648_v10  ;;  %v10706_v63 = vmul.f32 %v18896_v34, %v3648_v10  ;;  %v3818_v48 = vmul.f32 %v18891_v24, %v3646_v51  ;;  %v10704_v27 = vmul.f32 %v18896_v34, %v3646_v51  ;;  %v19220_v51 = vld [vmem:[%s22995_s4 + $0x1] ss:$0 sm:$0xff] }
 0x2f8   : > { %23072 = vst [vmem:[#allocation16_spill] sm:$0xff] %v19162_v46  ;;  %23073 = vst [vmem:[#allocation17_spill] sm:$0xff] %v19168_v37  ;;  %16075 = vmatprep.mubr.msk.bf16.mxu0 %vm674_vm2, %v3903_v41  ;;  %v3889_v38 = vmax.f32 %v3857_v32, 0.0  ;;  %v10775_v5 = vmax.f32 %v10743_v8, 0.0  ;;  %v3887_v28 = vmax.f32 %v3855_v19, 0.0  ;;  %v10773_v58 = vmax.f32 %v10741_v53, 0.0 }
 0x2f9   : > { %v3858_v57 = vadd.f32 %v18941_v14, %v3820_v59  ;;  %v10744_v16 = vadd.f32 %v18946_v42, %v10706_v63  ;;  %v3856_v9 = vadd.f32 %v18941_v14, %v3818_v48  ;;  %v10742_v18 = vadd.f32 %v18946_v42, %v10704_v27  ;;  %16076 = vmatmul.mubr.msk.bf16.gmra.mxu0 %vm674_vm2, %v3904_v15  ;;  %v17200_v14 = vld [vmem:[%s22997_s6 + $0x48] sm:$0xff]   ;;  %v19225_v53 = vld [vmem:[%s22996_s5 + $0x1] ss:$0 sm:$0xff] }
 0x2fa   : > { %16151 = vmatprep.subr.bf16.mxu1 %v17200_v14  ;;  %v4528_v42 = vld [vmem:[#allocation2 + $0x8] sm:$0xff]  ;;  %v4509_v4 = vpack.c.bf16 %v4478_v26, %v4477_v2 }
 0x2fb   : > { %v3890_v43 = vmax.f32 %v3858_v57, 0.0  ;;  %v10776_v24 = vmax.f32 %v10744_v16, 0.0  ;;  %v3888_v55 = vmax.f32 %v3856_v9, 0.0  ;;  %v10774_v34 = vmax.f32 %v10742_v18, 0.0  ;;  %16152 = vmatpush3.bf16.msra.mxu1 %v17200_v14 }
 0x2fc   : > { %v4560_v7 = vpack.c.bf16 %v4529_v23, %v4528_v42  ;;  %16153 = vmatprep.mubr.msk.bf16.mxu1 %vm442_vm1, %v4509_v4  ;;  %16219 = vmatprep.subr.bf16.mxu1 %v19200_v33 }
 0x2fd   : > { %v3906_v25 = vpack.c.bf16 %v3890_v43, %v3889_v38  ;;  %v19180_v49 = vpack.c.bf16 %v10776_v24, %v10775_v5  ;;  %v3905_v52 = vpack.c.bf16 %v3888_v55, %v3887_v28  ;;  %v19182_v35 = vpack.c.bf16 %v10774_v34, %v10773_v58 }
 0x2ff   : > { %23074 = vst [vmem:[#allocation18_spill] sm:$0xff] %v19180_v49  ;;  %23075 = vst [vmem:[#allocation19_spill] sm:$0xff] %v19182_v35  ;;  %16079 = vmatprep.mubr.msk.bf16.mxu0 %vm674_vm2, %v3905_v52 }
 0x301   : > { %16080 = vmatmul.mubr.msk.bf16.gmra.mxu0 %vm674_vm2, %v3906_v25 }
 0x302   : > { %16119 = vmatprep.mubr.msk.bf16.mxu0 %vm442_vm1, %v4560_v7 }
 0x305   : > { %v16087_v3 = vpop.f32.mrf.mxu1 }
 0x307   : > { %v4206_v17 = vpop.f32.mrf.mxu1 }
 0x309   : > { %v16088_v29 = vpop.f32.mrf.mxu1 }
 0x30b   : > { %v4209_v60 = vpop.f32.mrf.mxu1 }
 0x30d   : > { %v16091_v30 = vpop.f32.mrf.mxu1 }
 0x30f   : > { %v4222_v0 = vpop.f32.mrf.mxu1 }
 0x311   : > { %v16092_v6 = vpop.f32.mrf.mxu1 }
 0x313   : > { %v4225_v61 = vpop.f32.mrf.mxu1 }
 0x315   : > { %v16095_v56 = vpop.f32.mrf.mxu1 }
 0x317   : > { %v19203_v20 = vpop.f32.mrf.mxu1 }
 0x319   : > { %v19205_v12 = vpop.f32.mrf.mxu1 }
 0x31b   : > { %v19207_v31 = vpop.f32.mrf.mxu1 }
 0x31d   : > { %v19209_v40 = vpop.f32.mrf.mxu1 }
 0x31f   : > { %v19211_v32 = vpop.f32.mrf.mxu1 }
 0x321   : > { %v19213_v8 = vpop.f32.mrf.mxu1 }
 0x323   : > { %v19215_v15 = vpop.f32.mrf.mxu1 }
 0x325   : > { %v19228_v48 = vpop.f32.mrf.mxu1 }
 0x327   : > { %v19234_v43 = vpop.f32.mrf.mxu1 }
 0x329   : > { %v19241_v2 = vpop.f32.mrf.mxu1 }
 0x388   : > { %v16053_v10 = vpop.f32.mrf.mxu0 }
 0x389   : > { %v4215_v19 = vadd.f32 %v16087_v3, %v16053_v10  ;;  %v19248_v10 = vpop.f32.mrf.mxu1 }
 0x38a   : > { %v3994_v41 = vpop.f32.mrf.mxu0 }
 0x38b   : > { %v4345_v59 = vmul.f32 %v19220_v51, %v4215_v19  ;;  %v4207_v63 = vadd.f32 %v4206_v17, %v3994_v41 }
 0x38c   : > { %v16054_v27 = vpop.f32.mrf.mxu0 }
 0x38d   : > { %v4383_v57 = vadd.f32 %v19225_v53, %v4345_v59  ;;  %v4343_v16 = vmul.f32 %v19220_v51, %v4207_v63  ;;  %v4218_v9 = vadd.f32 %v16088_v29, %v16054_v27 }
 0x38e   : > { %v3997_v18 = vpop.f32.mrf.mxu0 }
 0x38f   : > { %v4415_v38 = vmax.f32 %v4383_v57, 0.0  ;;  %v4381_v5 = vadd.f32 %v19225_v53, %v4343_v16  ;;  %v4346_v28 = vmul.f32 %v19220_v51, %v4218_v9  ;;  %v4210_v58 = vadd.f32 %v4209_v60, %v3997_v18  ;;  %v19255_v18 = vpop.f32.mrf.mxu1 }
 0x391   : > { %4447 = vst.msk [vmem:[#allocation2 + $0x48] sm:$0xff] %vm442_vm1, %v4415_v38  ;;  %v4413_v24 = vmax.f32 %v4381_v5, 0.0  ;;  %v4384_v55 = vadd.f32 %v19225_v53, %v4346_v28  ;;  %v4344_v34 = vmul.f32 %v19220_v51, %v4210_v58  ;;  %v16057_v25 = vpop.f32.mrf.mxu0 }
 0x392   : > { %v4231_v52 = vadd.f32 %v16091_v30, %v16057_v25 }
 0x393   : > { %4445 = vst.msk [vmem:[#allocation2 + $0x28] sm:$0xff] %vm442_vm1, %v4413_v24  ;;  %v4416_v14 = vmax.f32 %v4384_v55, 0.0  ;;  %v4382_v42 = vadd.f32 %v19225_v53, %v4344_v34  ;;  %v4010_v23 = vpop.f32.mrf.mxu0 }
 0x394   : > { %v4349_v7 = vmul.f32 %v19220_v51, %v4231_v52  ;;  %v4223_v26 = vadd.f32 %v4222_v0, %v4010_v23 }
 0x395   : > { %4448 = vst.msk [vmem:[#allocation2 + $0x50] sm:$0xff] %vm442_vm1, %v4416_v14  ;;  %v4414_v4 = vmax.f32 %v4382_v42, 0.0  ;;  %v16058_v3 = vpop.f32.mrf.mxu0 }
 0x396   : > { %v4387_v17 = vadd.f32 %v19225_v53, %v4349_v7  ;;  %v4347_v29 = vmul.f32 %v19220_v51, %v4223_v26  ;;  %v4234_v60 = vadd.f32 %v16092_v6, %v16058_v3 }
 0x397   : > { %4446 = vst.msk [vmem:[#allocation2 + $0x30] sm:$0xff] %vm442_vm1, %v4414_v4  ;;  %v4013_v30 = vpop.f32.mrf.mxu0 }
 0x398   : > { %v4419_v19 = vmax.f32 %v4387_v17, 0.0  ;;  %v4385_v41 = vadd.f32 %v19225_v53, %v4347_v29  ;;  %v4350_v59 = vmul.f32 %v19220_v51, %v4234_v60  ;;  %v4226_v0 = vadd.f32 %v4225_v61, %v4013_v30  ;;  %v4532_v25 = vld [vmem:[#allocation2 + $0x48] sm:$0xff]  ;;  %v19271_v29 = vpop.f32.mrf.mxu1 }
 0x399   : > { %v16061_v63 = vpop.f32.mrf.mxu0 }
 0x39a   : > { %4451 = vst.msk [vmem:[#allocation2 + $0x88] sm:$0xff] %vm442_vm1, %v4419_v19  ;;  %v4417_v27 = vmax.f32 %v4385_v41, 0.0  ;;  %v4388_v57 = vadd.f32 %v19225_v53, %v4350_v59  ;;  %v4348_v16 = vmul.f32 %v19220_v51, %v4226_v0  ;;  %v4247_v6 = vadd.f32 %v16095_v56, %v16061_v63  ;;  %v4530_v55 = vld [vmem:[#allocation2 + $0x28] sm:$0xff]  ;;  %v19285_v0 = vld [vmem:[%s22997_s6 + $0x70] sm:$0xff]  }
 0x39b   : > { %v4026_v9 = vpop.f32.mrf.mxu0  ;;  %v4479_v34 = vld [vmem:[#allocation2 + $0x27] sm:$0xff] }
 0x39c   : > { %4449 = vst.msk [vmem:[#allocation2 + $0x68] sm:$0xff] %vm442_vm1, %v4417_v27  ;;  %v4420_v38 = vmax.f32 %v4388_v57, 0.0  ;;  %v4386_v5 = vadd.f32 %v19225_v53, %v4348_v16  ;;  %v4353_v28 = vmul.f32 %v19220_v51, %v4247_v6  ;;  %v4239_v61 = vadd.f32 %v19203_v20, %v4026_v9  ;;  %v4533_v58 = vld [vmem:[#allocation2 + $0x50] sm:$0xff]  ;;  %v4481_v41 = vld [vmem:[#allocation2 + $0x47] sm:$0xff] }
 0x39d   : > { %v16062_v24 = vpop.f32.mrf.mxu0  ;;  %v4482_v26 = vld [vmem:[#allocation2 + $0x4f] sm:$0xff]  ;;  %v19269_v17 = vpack.c.bf16 %v4533_v58, %v4532_v25 }
 0x39e   : > { %4452 = vst.msk [vmem:[#allocation2 + $0x90] sm:$0xff] %vm442_vm1, %v4420_v38  ;;  %v4418_v56 = vmax.f32 %v4386_v5, 0.0  ;;  %v4391_v52 = vadd.f32 %v19225_v53, %v4353_v28  ;;  %v4351_v14 = vmul.f32 %v19220_v51, %v4239_v61  ;;  %v4250_v42 = vadd.f32 %v19205_v12, %v16062_v24  ;;  %v4531_v23 = vld [vmem:[#allocation2 + $0x30] sm:$0xff]  ;;  %v19280_v59 = vld [vmem:[%s22997_s6 + $0x68] sm:$0xff]   ;;  %v19302_v38 = vpop.f32.mrf.mxu1 }
 0x39f   : > { %v4480_v7 = vld [vmem:[#allocation2 + $0x2f] sm:$0xff]  ;;  %v4029_v4 = vpop.f32.mrf.mxu0  ;;  %v19265_v3 = vpack.c.bf16 %v4531_v23, %v4530_v55  ;;  %v19291_v27 = vpack.c.bf16 %v4482_v26, %v4481_v41 }
 0x3a0   : > { %v19267_v20 = vpack.c.bf16 %v4480_v7, %v4479_v34  ;;  %4450 = vst.msk [vmem:[#allocation2 + $0x70] sm:$0xff] %vm442_vm1, %v4418_v56  ;;  %v4423_v60 = vmax.f32 %v4391_v52, 0.0  ;;  %v4389_v30 = vadd.f32 %v19225_v53, %v4351_v14  ;;  %v4354_v19 = vmul.f32 %v19220_v51, %v4250_v42  ;;  %v19315_v42 = vpop.f32.mrf.mxu1 }
 0x3a1   : > { %v4242_v12 = vadd.f32 %v19207_v31, %v4029_v4  ;;  %v16065_v63 = vpop.f32.mrf.mxu0  ;;  %16120 = vmatmul.mubr.msk.bf16.vlgmr.msra.gmra.mxu0 %vm442_vm1, %v19265_v3 }
 0x3a2   : > { %16154 = vmatmul.mubr.msk.bf16.vlgmr.msra.gmra.mxu1 %vm442_vm1, %v19267_v20  ;;  %4455 = vst.msk [vmem:[#allocation2 + $0xc8] sm:$0xff] %vm442_vm1, %v4423_v60  ;;  %v4421_v31 = vmax.f32 %v4389_v30, 0.0  ;;  %v4392_v57 = vadd.f32 %v19225_v53, %v4354_v19  ;;  %v4263_v6 = vadd.f32 %v19209_v40, %v16065_v63  ;;  %16186 = vmatpush3.bf16.msra.mxu0 %v19194_v54 }
 0x3a3   : > { %v4352_v16 = vmul.f32 %v19220_v51, %v4242_v12  ;;  %16123 = vmatprep.mubr.msk.bf16.mxu0 %vm442_vm1, %v19269_v17  ;;  %v4042_v9 = vpop.f32.mrf.mxu0  ;;  %16157 = vmatprep.mubr.msk.bf16.mxu1 %vm442_vm1, %v19291_v27  ;;  %v4534_v60 = vld [vmem:[#allocation2 + $0x68] sm:$0xff] }
 0x3a4   : > { %16220 = vmatpush3.bf16.msra.mxu1 %v19200_v33  ;;  %4453 = vst.msk [vmem:[#allocation2 + $0xa8] sm:$0xff] %vm442_vm1, %v4421_v31  ;;  %v4424_v5 = vmax.f32 %v4392_v57, 0.0  ;;  %v4357_v40 = vmul.f32 %v19220_v51, %v4263_v6  ;;  %v4255_v54 = vadd.f32 %v19211_v32, %v4042_v9  ;;  %16253 = vmatprep.subr.bf16.mxu0 %v19280_v59  ;;  %v4536_v32 = vld [vmem:[#allocation2 + $0x88] sm:$0xff] }
 0x3a5   : > { %v4390_v28 = vadd.f32 %v19225_v53, %v4352_v16  ;;  %16287 = vmatprep.subr.bf16.mxu1 %v19285_v0  ;;  %v16066_v61 = vpop.f32.mrf.mxu0  ;;  %v4537_v34 = vld [vmem:[#allocation2 + $0x90] sm:$0xff]  ;;  %v4483_v30 = vld [vmem:[#allocation2 + $0x67] sm:$0xff] }
 0x3a6   : > { %4456 = vst.msk [vmem:[#allocation2 + $0xd0] sm:$0xff] %vm442_vm1, %v4424_v5  ;;  %v4395_v24 = vadd.f32 %v19225_v53, %v4357_v40  ;;  %v4355_v33 = vmul.f32 %v19220_v51, %v4255_v54  ;;  %v4266_v55 = vadd.f32 %v19213_v8, %v16066_v61  ;;  %v4486_v25 = vld [vmem:[#allocation2 + $0x8f] sm:$0xff]  ;;  %v4485_v8 = vld [vmem:[#allocation2 + $0x87] sm:$0xff]  ;;  %v19325_v63 = vpack.c.bf16 %v4537_v34, %v4536_v32  ;;  %v19337_v5 = vpop.f32.mrf.mxu1 }
 0x3a7   : > { %v4422_v58 = vmax.f32 %v4390_v28, 0.0  ;;  %v4045_v56 = vpop.f32.mrf.mxu0  ;;  %v4535_v52 = vld [vmem:[#allocation2 + $0x70] sm:$0xff]  ;;  %v19327_v31 = vpack.c.bf16 %v4486_v25, %v4485_v8 }
 0x3a8   : > { %v4484_v14 = vld [vmem:[#allocation2 + $0x6f] sm:$0xff]  ;;  %v4427_v23 = vmax.f32 %v4395_v24, 0.0  ;;  %v4393_v7 = vadd.f32 %v19225_v53, %v4355_v33  ;;  %v4358_v26 = vmul.f32 %v19220_v51, %v4266_v55  ;;  %v4258_v4 = vadd.f32 %v19215_v15, %v4045_v56  ;;  %v19351_v32 = vpop.f32.mrf.mxu1 }
 0x3a9   : > { %4454 = vst.msk [vmem:[#allocation2 + $0xb0] sm:$0xff] %vm442_vm1, %v4422_v58  ;;  %v16069_v19 = vpop.f32.mrf.mxu0  ;;  %v19321_v12 = vpack.c.bf16 %v4535_v52, %v4534_v60  ;;  %v19323_v41 = vpack.c.bf16 %v4484_v14, %v4483_v30  ;;  %v4540_v14 = vld [vmem:[#allocation2 + $0xc8] sm:$0xff] }
 0x3aa   : > { %4459 = vst.msk [vmem:[#allocation2 + $0x108] sm:$0xff] %vm442_vm1, %v4427_v23  ;;  %v4425_v57 = vmax.f32 %v4393_v7, 0.0  ;;  %v4396_v16 = vadd.f32 %v19225_v53, %v4358_v26  ;;  %v4356_v6 = vmul.f32 %v19220_v51, %v4258_v4  ;;  %v4279_v15 = vadd.f32 %v19228_v48, %v16069_v19 }
 0x3ab   : > { %16124 = vmatmul.mubr.msk.bf16.gmra.mxu0 %vm442_vm1, %v19321_v12  ;;  %16158 = vmatmul.mubr.msk.bf16.gmra.mxu1 %vm442_vm1, %v19323_v41  ;;  %v4058_v9 = vpop.f32.mrf.mxu0  ;;  %v4538_v60 = vld [vmem:[#allocation2 + $0xa8] sm:$0xff] }
 0x3ac   : > { %4457 = vst.msk [vmem:[#allocation2 + $0xe8] sm:$0xff] %vm442_vm1, %v4425_v57  ;;  %v4428_v28 = vmax.f32 %v4396_v16, 0.0  ;;  %v4394_v40 = vadd.f32 %v19225_v53, %v4356_v6  ;;  %v4361_v54 = vmul.f32 %v19220_v51, %v4279_v15  ;;  %v4271_v61 = vadd.f32 %v19234_v43, %v4058_v9  ;;  %16127 = vmatprep.mubr.msk.bf16.mxu0 %vm442_vm1, %v19325_v63  ;;  %v4487_v30 = vld [vmem:[#allocation2 + $0xa7] sm:$0xff] }
 0x3ad   : > { %16161 = vmatprep.mubr.msk.bf16.mxu1 %vm442_vm1, %v19327_v31  ;;  %v16070_v48 = vpop.f32.mrf.mxu0  ;;  %v4541_v34 = vld [vmem:[#allocation2 + $0xd0] sm:$0xff] }
 0x3ae   : > { %4460 = vst.msk [vmem:[#allocation2 + $0x110] sm:$0xff] %vm442_vm1, %v4428_v28  ;;  %v4426_v58 = vmax.f32 %v4394_v40, 0.0  ;;  %v4399_v24 = vadd.f32 %v19225_v53, %v4361_v54  ;;  %v4359_v33 = vmul.f32 %v19220_v51, %v4271_v61  ;;  %v4282_v55 = vadd.f32 %v19241_v2, %v16070_v48  ;;  %v4490_v25 = vld [vmem:[#allocation2 + $0xcf] sm:$0xff]  ;;  %v4489_v2 = vld [vmem:[#allocation2 + $0xc7] sm:$0xff]  ;;  %v16112_v54 = vpop.f32.mrf.mxu1 }
 0x3af   : > { %v4061_v56 = vpop.f32.mrf.mxu0  ;;  %v19361_v16 = vpack.c.bf16 %v4541_v34, %v4540_v14  ;;  %v19363_v6 = vpack.c.bf16 %v4490_v25, %v4489_v2 }
 0x3b0   : > { %v4539_v43 = vld [vmem:[#allocation2 + $0xb0] sm:$0xff]  ;;  %4458 = vst.msk [vmem:[#allocation2 + $0xf0] sm:$0xff] %vm442_vm1, %v4426_v58  ;;  %v4431_v23 = vmax.f32 %v4399_v24, 0.0  ;;  %v4397_v7 = vadd.f32 %v19225_v53, %v4359_v33  ;;  %v4362_v26 = vmul.f32 %v19220_v51, %v4282_v55  ;;  %v4274_v4 = vadd.f32 %v19248_v10, %v4061_v56 }
 0x3b1   : > { %v4488_v52 = vld [vmem:[#allocation2 + $0xaf] sm:$0xff]  ;;  %v16073_v8 = vpop.f32.mrf.mxu0  ;;  %v19357_v19 = vpack.c.bf16 %v4539_v43, %v4538_v60 }
 0x3b2   : > { %v19359_v57 = vpack.c.bf16 %v4488_v52, %v4487_v30  ;;  %4463 = vst.msk [vmem:[#allocation2 + $0x148] sm:$0xff] %vm442_vm1, %v4431_v23  ;;  %v4429_v15 = vmax.f32 %v4397_v7, 0.0  ;;  %v4400_v9 = vadd.f32 %v19225_v53, %v4362_v26  ;;  %v4360_v28 = vmul.f32 %v19220_v51, %v4274_v4  ;;  %v4544_v7 = vld [vmem:[#allocation2 + $0x108] sm:$0xff] }
 0x3b3   : > { %v4295_v10 = vadd.f32 %v19255_v18, %v16073_v8  ;;  %16128 = vmatmul.mubr.msk.bf16.gmra.mxu0 %vm442_vm1, %v19357_v19  ;;  %v4074_v40 = vpop.f32.mrf.mxu0  ;;  %v4542_v2 = vld [vmem:[#allocation2 + $0xe8] sm:$0xff] }
 0x3b4   : > { %16162 = vmatmul.mubr.msk.bf16.gmra.mxu1 %vm442_vm1, %v19359_v57  ;;  %4461 = vst.msk [vmem:[#allocation2 + $0x128] sm:$0xff] %vm442_vm1, %v4429_v15  ;;  %v4432_v61 = vmax.f32 %v4400_v9, 0.0  ;;  %v4398_v48 = vadd.f32 %v19225_v53, %v4360_v28  ;;  %v4287_v24 = vadd.f32 %v19271_v29, %v4074_v40  ;;  %16131 = vmatprep.mubr.msk.bf16.mxu0 %vm442_vm1, %v19361_v16  ;;  %v4305_v29 = vpop.f32.mrf.mxu1  ;;  %v4491_v8 = vld [vmem:[#allocation2 + $0xe7] sm:$0xff] }
 0x3b5   : > { %v4365_v58 = vmul.f32 %v19220_v51, %v4295_v10  ;;  %16165 = vmatprep.mubr.msk.bf16.mxu1 %vm442_vm1, %v19363_v6  ;;  %v16074_v18 = vpop.f32.mrf.mxu0  ;;  %v4545_v56 = vld [vmem:[#allocation2 + $0x110] sm:$0xff]  ;;  %v4493_v15 = vld [vmem:[#allocation2 + $0x107] sm:$0xff] }
 0x3b6   : > { %4464 = vst.msk [vmem:[#allocation2 + $0x150] sm:$0xff] %vm442_vm1, %v4432_v61  ;;  %v4430_v33 = vmax.f32 %v4398_v48, 0.0  ;;  %v4363_v34 = vmul.f32 %v19220_v51, %v4287_v24  ;;  %v4298_v25 = vadd.f32 %v19302_v38, %v16074_v18  ;;  %v4494_v43 = vld [vmem:[#allocation2 + $0x10f] sm:$0xff]  ;;  %v19393_v10 = vpack.c.bf16 %v4545_v56, %v4544_v7  ;;  %v16115_v18 = vpop.f32.mrf.mxu1 }
 0x3b7   : > { %v4403_v55 = vadd.f32 %v19225_v53, %v4365_v58  ;;  %v4077_v52 = vpop.f32.mrf.mxu0  ;;  %v4543_v14 = vld [vmem:[#allocation2 + $0xf0] sm:$0xff]  ;;  %v19395_v40 = vpack.c.bf16 %v4494_v43, %v4493_v15 }
 0x3b8   : > { %v4492_v23 = vld [vmem:[#allocation2 + $0xef] sm:$0xff]  ;;  %4462 = vst.msk [vmem:[#allocation2 + $0x130] sm:$0xff] %vm442_vm1, %v4430_v33  ;;  %v4401_v4 = vadd.f32 %v19225_v53, %v4363_v34  ;;  %v4366_v60 = vmul.f32 %v19220_v51, %v4298_v25  ;;  %v4290_v30 = vadd.f32 %v19315_v42, %v4077_v52  ;;  %v19389_v9 = vpack.c.bf16 %v4543_v14, %v4542_v2 }
 0x3b9   : > { %v4435_v26 = vmax.f32 %v4403_v55, 0.0  ;;  %v16077_v38 = vpop.f32.mrf.mxu0  ;;  %v19391_v28 = vpack.c.bf16 %v4492_v23, %v4491_v8 }
 0x3ba   : > { %v4433_v61 = vmax.f32 %v4401_v4, 0.0  ;;  %v4404_v48 = vadd.f32 %v19225_v53, %v4366_v60  ;;  %v4364_v58 = vmul.f32 %v19220_v51, %v4290_v30  ;;  %v4311_v42 = vadd.f32 %v19337_v5, %v16077_v38  ;;  %v4548_v30 = vld [vmem:[#allocation2 + $0x148] sm:$0xff] }
 0x3bb   : > { %4467 = vst.msk [vmem:[#allocation2 + $0x188] sm:$0xff] %vm442_vm1, %v4435_v26  ;;  %16132 = vmatmul.mubr.msk.bf16.gmra.mxu0 %vm442_vm1, %v19389_v9  ;;  %v4090_v24 = vpop.f32.mrf.mxu0  ;;  %v4318_v26 = vpop.f32.mrf.mxu1 }
 0x3bc   : > { %16166 = vmatmul.mubr.msk.bf16.gmra.mxu1 %vm442_vm1, %v19391_v28  ;;  %4465 = vst.msk [vmem:[#allocation2 + $0x168] sm:$0xff] %vm442_vm1, %v4433_v61  ;;  %v4436_v33 = vmax.f32 %v4404_v48, 0.0  ;;  %v4402_v55 = vadd.f32 %v19225_v53, %v4364_v58  ;;  %v4369_v34 = vmul.f32 %v19220_v51, %v4311_v42  ;;  %v4303_v25 = vadd.f32 %v19351_v32, %v4090_v24  ;;  %v4546_v61 = vld [vmem:[#allocation2 + $0x128] sm:$0xff] }
 0x3bd   : > { %16135 = vmatprep.mubr.msk.bf16.mxu0 %vm442_vm1, %v19393_v10  ;;  %16169 = vmatprep.mubr.msk.bf16.mxu1 %vm442_vm1, %v19395_v40  ;;  %v16078_v5 = vpop.f32.mrf.mxu0  ;;  %v4549_v23 = vld [vmem:[#allocation2 + $0x150] sm:$0xff]  ;;  %v4495_v48 = vld [vmem:[#allocation2 + $0x127] sm:$0xff] }
 0x3be   : > { %4468 = vst.msk [vmem:[#allocation2 + $0x190] sm:$0xff] %vm442_vm1, %v4436_v33  ;;  %v4434_v56 = vmax.f32 %v4402_v55, 0.0  ;;  %v4407_v43 = vadd.f32 %v19225_v53, %v4369_v34  ;;  %v4367_v52 = vmul.f32 %v19220_v51, %v4303_v25  ;;  %v4314_v14 = vadd.f32 %v16112_v54, %v16078_v5  ;;  %v4498_v7 = vld [vmem:[#allocation2 + $0x14f] sm:$0xff]  ;;  %v4497_v58 = vld [vmem:[#allocation2 + $0x147] sm:$0xff] }
 0x3bf   : > { %v4093_v4 = vpop.f32.mrf.mxu0  ;;  %v4547_v32 = vld [vmem:[#allocation2 + $0x130] sm:$0xff]  ;;  %v19423_v33 = vpack.c.bf16 %v4549_v23, %v4548_v30  ;;  %v19425_v55 = vpack.c.bf16 %v4498_v7, %v4497_v58 }
 0x3c0   : > { %v4496_v60 = vld [vmem:[#allocation2 + $0x12f] sm:$0xff]  ;;  %4466 = vst.msk [vmem:[#allocation2 + $0x170] sm:$0xff] %vm442_vm1, %v4434_v56  ;;  %v4439_v2 = vmax.f32 %v4407_v43, 0.0  ;;  %v4405_v8 = vadd.f32 %v19225_v53, %v4367_v52  ;;  %v4370_v15 = vmul.f32 %v19220_v51, %v4314_v14  ;;  %v4306_v38 = vadd.f32 %v4305_v29, %v4093_v4  ;;  %v16116_v56 = vpop.f32.mrf.mxu1 }
 0x3c1   : > { %v16081_v42 = vpop.f32.mrf.mxu0  ;;  %v19419_v54 = vpack.c.bf16 %v4547_v32, %v4546_v61  ;;  %v19421_v24 = vpack.c.bf16 %v4496_v60, %v4495_v48 }
 0x3c2   : > { %4471 = vst.msk [vmem:[#allocation2 + $0x1c8] sm:$0xff] %vm442_vm1, %v4439_v2  ;;  %v4437_v34 = vmax.f32 %v4405_v8, 0.0  ;;  %v4408_v25 = vadd.f32 %v19225_v53, %v4370_v15  ;;  %v4368_v5 = vmul.f32 %v19220_v51, %v4306_v38  ;;  %v4327_v29 = vadd.f32 %v16115_v18, %v16081_v42  ;;  %v4321_v8 = vpop.f32.mrf.mxu1 }
 0x3c3   : > { %16136 = vmatmul.mubr.msk.bf16.gmra.mxu0 %vm442_vm1, %v19419_v54  ;;  %v4106_v43 = vpop.f32.mrf.mxu0 }
 0x3c4   : > { %16170 = vmatmul.mubr.msk.bf16.gmra.mxu1 %vm442_vm1, %v19421_v24  ;;  %4469 = vst.msk [vmem:[#allocation2 + $0x1a8] sm:$0xff] %vm442_vm1, %v4437_v34  ;;  %v4440_v52 = vmax.f32 %v4408_v25, 0.0  ;;  %v4406_v14 = vadd.f32 %v19225_v53, %v4368_v5  ;;  %v4373_v23 = vmul.f32 %v19220_v51, %v4327_v29  ;;  %v4319_v7 = vadd.f32 %v4318_v26, %v4106_v43  ;;  %v4550_v25 = vld [vmem:[#allocation2 + $0x168] sm:$0xff] }
 0x3c5   : > { %16139 = vmatprep.mubr.msk.bf16.mxu0 %vm442_vm1, %v19423_v33  ;;  %16173 = vmatprep.mubr.msk.bf16.mxu1 %vm442_vm1, %v19425_v55  ;;  %v16082_v18 = vpop.f32.mrf.mxu0  ;;  %v4553_v2 = vld [vmem:[#allocation2 + $0x190] sm:$0xff]  ;;  %v4499_v5 = vld [vmem:[#allocation2 + $0x167] sm:$0xff] }
 0x3c6   : > { %4472 = vst.msk [vmem:[#allocation2 + $0x1d0] sm:$0xff] %vm442_vm1, %v4440_v52  ;;  %v4438_v4 = vmax.f32 %v4406_v14, 0.0  ;;  %v4411_v32 = vadd.f32 %v19225_v53, %v4373_v23  ;;  %v4371_v60 = vmul.f32 %v19220_v51, %v4319_v7  ;;  %v4330_v30 = vadd.f32 %v16116_v56, %v16082_v18  ;;  %v4502_v61 = vld [vmem:[#allocation2 + $0x18f] sm:$0xff]  ;;  %v4501_v14 = vld [vmem:[#allocation2 + $0x187] sm:$0xff] }
 0x3c7   : > { %v4109_v15 = vpop.f32.mrf.mxu0  ;;  %v4551_v38 = vld [vmem:[#allocation2 + $0x170] sm:$0xff]  ;;  %v4552_v29 = vld [vmem:[#allocation2 + $0x188] sm:$0xff] }
 0x3c8   : > { %v4500_v26 = vld [vmem:[#allocation2 + $0x16f] sm:$0xff]  ;;  %4470 = vst.msk [vmem:[#allocation2 + $0x1b0] sm:$0xff] %vm442_vm1, %v4438_v4  ;;  %v4443_v48 = vmax.f32 %v4411_v32, 0.0  ;;  %v4409_v58 = vadd.f32 %v19225_v53, %v4371_v60  ;;  %v4374_v42 = vmul.f32 %v19220_v51, %v4330_v30  ;;  %v4322_v34 = vadd.f32 %v4321_v8, %v4109_v15 }
 0x3c9   : > { %v19447_v43 = vpack.c.bf16 %v4551_v38, %v4550_v25  ;;  %v19449_v56 = vpack.c.bf16 %v4500_v26, %v4499_v5  ;;  %v19451_v52 = vpack.c.bf16 %v4553_v2, %v4552_v29  ;;  %v19456_v4 = vpack.c.bf16 %v4502_v61, %v4501_v14  ;;  %v5009_v25 = vld [vmem:[#allocation2 + $0x9] sm:$0xff]  ;;  %v5010_v5 = vld [vmem:[#allocation2 + $0x11] sm:$0xff] }
 0x3ca   : > { %4475 = vst.msk [vmem:[#allocation2 + $0x208] sm:$0xff] %vm442_vm1, %v4443_v48  ;;  %v4441_v23 = vmax.f32 %v4409_v58, 0.0  ;;  %v4412_v7 = vadd.f32 %v19225_v53, %v4374_v42  ;;  %v4372_v18 = vmul.f32 %v19220_v51, %v4322_v34  ;;  %v4556_v48 = vld [vmem:[#allocation2 + $0x1c8] sm:$0xff]  ;;  %v5034_v49 = vld [vmem:[#allocation2 + $0x191] sm:$0xff] }
 0x3cb   : > { %16140 = vmatmul.mubr.msk.bf16.gmra.mxu0 %vm442_vm1, %v19447_v43  ;;  %v4554_v30 = vld [vmem:[#allocation2 + $0x1a8] sm:$0xff] }
 0x3cc   : > { %16174 = vmatmul.mubr.msk.bf16.gmra.mxu1 %vm442_vm1, %v19449_v56  ;;  %4473 = vst.msk [vmem:[#allocation2 + $0x1e8] sm:$0xff] %vm442_vm1, %v4441_v23  ;;  %v4444_v32 = vmax.f32 %v4412_v7, 0.0  ;;  %v4410_v60 = vadd.f32 %v19225_v53, %v4372_v18  ;;  %16143 = vmatprep.mubr.msk.bf16.mxu0 %vm442_vm1, %v19451_v52  ;;  %v4503_v2 = vld [vmem:[#allocation2 + $0x1a7] sm:$0xff] }
 0x3cd   : > { %16177 = vmatprep.mubr.msk.bf16.mxu1 %vm442_vm1, %v19456_v4  ;;  %v4557_v8 = vld [vmem:[#allocation2 + $0x1d0] sm:$0xff]  ;;  %v4505_v58 = vld [vmem:[#allocation2 + $0x1c7] sm:$0xff] }
 0x3ce   : > { %4476 = vst.msk [vmem:[#allocation2 + $0x210] sm:$0xff] %vm442_vm1, %v4444_v32  ;;  %v4442_v51 = vmax.f32 %v4410_v60, 0.0  ;;  %v4506_v26 = vld [vmem:[#allocation2 + $0x1cf] sm:$0xff]  ;;  %v19474_v42 = vpack.c.bf16 %v4557_v8, %v4556_v48  ;;  %v5041_v60 = vpack.c.bf16 %v5010_v5, %v5009_v25  ;;  %v19509_v48 = vld [vmem:[%s22997_s6 + $0x80] sm:$0xff]  }
 0x3cf   : > { %v4555_v15 = vld [vmem:[#allocation2 + $0x1b0] sm:$0xff]  ;;  %v19476_v34 = vpack.c.bf16 %v4506_v26, %v4505_v58  ;;  %v19504_v26 = vld [vmem:[%s22997_s6 + $0x78] sm:$0xff]  }
 0x3d0   : > { %v4504_v38 = vld [vmem:[#allocation2 + $0x1af] sm:$0xff]  ;;  %4474 = vst.msk [vmem:[#allocation2 + $0x1f0] sm:$0xff] %vm442_vm1, %v4442_v51  ;;  %v19470_v61 = vpack.c.bf16 %v4555_v15, %v4554_v30 }
 0x3d1   : > { %v19472_v53 = vpack.c.bf16 %v4504_v38, %v4503_v2  ;;  %v5011_v51 = vld [vmem:[#allocation2 + $0x29] sm:$0xff]  ;;  %v5012_v30 = vld [vmem:[#allocation2 + $0x31] sm:$0xff] }
 0x3d2   : > { %v5013_v2 = vld [vmem:[#allocation2 + $0x49] sm:$0xff]  ;;  %v5014_v8 = vld [vmem:[#allocation2 + $0x51] sm:$0xff]  ;;  %v19497_v15 = vpack.c.bf16 %v5012_v30, %v5011_v51 }
 0x3d3   : > { %16144 = vmatmul.mubr.msk.bf16.gmra.mxu0 %vm442_vm1, %v19470_v61  ;;  %v4558_v29 = vld [vmem:[#allocation2 + $0x1e8] sm:$0xff]  ;;  %v19499_v38 = vpack.c.bf16 %v5014_v8, %v5013_v2  ;;  %v5016_v58 = vld [vmem:[#allocation2 + $0x71] sm:$0xff] }
 0x3d4   : > { %16178 = vmatmul.mubr.msk.bf16.gmra.mxu1 %vm442_vm1, %v19472_v53  ;;  %16147 = vmatprep.mubr.msk.bf16.mxu0 %vm442_vm1, %v19474_v42  ;;  %v4507_v23 = vld [vmem:[#allocation2 + $0x1e7] sm:$0xff]  ;;  %v5018_v5 = vld [vmem:[#allocation2 + $0x91] sm:$0xff] }
 0x3d5   : > { %16181 = vmatprep.mubr.msk.bf16.mxu1 %vm442_vm1, %v19476_v34  ;;  %v5017_v25 = vld [vmem:[#allocation2 + $0x89] sm:$0xff]  ;;  %v5024_v2 = vld [vmem:[#allocation2 + $0xf1] sm:$0xff] }
 0x3d6   : > { %v5023_v30 = vld [vmem:[#allocation2 + $0xe9] sm:$0xff]  ;;  %v5038_v46 = vld [vmem:[#allocation2 + $0x1d1] sm:$0xff] }
 0x3d7   : > { %v4559_v14 = vld [vmem:[#allocation2 + $0x1f0] sm:$0xff] }
 0x3d8   : > { %v4508_v7 = vld [vmem:[#allocation2 + $0x1ef] sm:$0xff]  ;;  %v19486_v18 = vpack.c.bf16 %v4559_v14, %v4558_v29  ;;  %v19525_v14 = vpack.c.bf16 %v5018_v5, %v5017_v25 }
 0x3d9   : > { %v19488_v32 = vpack.c.bf16 %v4508_v7, %v4507_v23  ;;  %v5021_v23 = vld [vmem:[#allocation2 + $0xc9] sm:$0xff]  ;;  %v5022_v7 = vld [vmem:[#allocation2 + $0xd1] sm:$0xff] }
 0x3da   : > { %v19537_v51 = vpack.c.bf16 %v5022_v7, %v5021_v23  ;;  %v5025_v8 = vld [vmem:[#allocation2 + $0x109] sm:$0xff]  ;;  %v5030_v23 = vld [vmem:[#allocation2 + $0x151] sm:$0xff] }
 0x3db   : > { %16148 = vmatmul.mubr.msk.bf16.gmra.mxu0 %vm442_vm1, %v19486_v18  ;;  %v5027_v5 = vld [vmem:[#allocation2 + $0x129] sm:$0xff] }
 0x3dc   : > { %16182 = vmatmul.mubr.msk.bf16.gmra.mxu1 %vm442_vm1, %v19488_v32  ;;  %16187 = vmatprep.mubr.msk.bf16.mxu0 %vm442_vm1, %v5041_v60  ;;  %v5037_v35 = vld [vmem:[#allocation2 + $0x1c9] sm:$0xff] }
 0x3dd   : > { %16221 = vmatprep.mubr.msk.bf16.mxu1 %vm442_vm1, %v19267_v20  ;;  %v5015_v20 = vld [vmem:[#allocation2 + $0x69] sm:$0xff]  ;;  %v5055_v21 = vpack.c.bf16 %v5038_v46, %v5037_v35 }
 0x3de   : > { %v19523_v29 = vpack.c.bf16 %v5016_v58, %v5015_v20  ;;  %v5026_v20 = vld [vmem:[#allocation2 + $0x111] sm:$0xff]  ;;  %v19547_v58 = vpack.c.bf16 %v5024_v2, %v5023_v30  ;;  %v5031_v2 = vld [vmem:[#allocation2 + $0x169] sm:$0xff] }
 0x3df   : > { %v19549_v25 = vpack.c.bf16 %v5026_v20, %v5025_v8  ;;  %v5032_v8 = vld [vmem:[#allocation2 + $0x171] sm:$0xff]  ;;  %v5033_v20 = vld [vmem:[#allocation2 + $0x189] sm:$0xff] }
 0x3e0   : > { %v17207_v46 = vld [vmem:[%s22997_s6 + $0x88] sm:$0xff]   ;;  %v5636_v35 = vld [vmem:[#allocation2 + $0x210] sm:$0xff] }
 0x3e3   : > { %16188 = vmatmul.mubr.msk.bf16.vlgmr.msra.gmra.mxu0 %vm442_vm1, %v19497_v15 }
 0x3e4   : > { %16222 = vmatmul.mubr.msk.bf16.vlgmr.msra.gmra.mxu1 %vm442_vm1, %v19291_v27  ;;  %16254 = vmatpush3.bf16.msra.mxu0 %v19280_v59  ;;  %v5019_v59 = vld [vmem:[#allocation2 + $0xa9] sm:$0xff] }
 0x3e5   : > { %16191 = vmatprep.mubr.msk.bf16.mxu0 %vm442_vm1, %v19499_v38  ;;  %16225 = vmatprep.mubr.msk.bf16.mxu1 %vm442_vm1, %v19323_v41 }
 0x3e6   : > { %16288 = vmatpush3.bf16.msra.mxu1 %v19285_v0  ;;  %16321 = vmatprep.subr.bf16.mxu0 %v19504_v26  ;;  %v5020_v0 = vld [vmem:[#allocation2 + $0xb1] sm:$0xff] }
 0x3e7   : > { %16355 = vmatprep.subr.bf16.mxu1 %v19509_v48  ;;  %v19535_v60 = vpack.c.bf16 %v5020_v0, %v5019_v59  ;;  %v5028_v59 = vld [vmem:[#allocation2 + $0x131] sm:$0xff]  ;;  %v5029_v0 = vld [vmem:[#allocation2 + $0x149] sm:$0xff] }
 0x3e8   : > { %v19559_v7 = vpack.c.bf16 %v5028_v59, %v5027_v5  ;;  %v19561_v30 = vpack.c.bf16 %v5030_v23, %v5029_v0  ;;  %v5052_v5 = vpack.c.bf16 %v5032_v8, %v5031_v2  ;;  %v19571_v59 = vpack.c.bf16 %v5034_v49, %v5033_v20  ;;  %v5035_v0 = vld [vmem:[#allocation2 + $0x1a9] sm:$0xff]  ;;  %v5036_v23 = vld [vmem:[#allocation2 + $0x1b1] sm:$0xff] }
 0x3e9   : > { %v5054_v37 = vpack.c.bf16 %v5036_v23, %v5035_v0  ;;  %v5039_v49 = vld [vmem:[#allocation2 + $0x1e9] sm:$0xff]  ;;  %v5040_v2 = vld [vmem:[#allocation2 + $0x1f1] sm:$0xff] }
 0x3ea   : > { %v5338_v8 = vld [vmem:[#allocation2 + $0x20f] sm:$0xff]  ;;  %v5337_v20 = vld [vmem:[#allocation2 + $0x207] sm:$0xff]  ;;  %v5056_v36 = vpack.c.bf16 %v5040_v2, %v5039_v49 }
 0x3eb   : > { %16192 = vmatmul.mubr.msk.bf16.gmra.mxu0 %vm442_vm1, %v19523_v29  ;;  %v19586_v45 = vpack.c.bf16 %v5338_v8, %v5337_v20 }
 0x3ec   : > { %16226 = vmatmul.mubr.msk.bf16.gmra.mxu1 %vm442_vm1, %v19327_v31  ;;  %16195 = vmatprep.mubr.msk.bf16.mxu0 %vm442_vm1, %v19525_v14 }
 0x3ed   : > { %16229 = vmatprep.mubr.msk.bf16.mxu1 %vm442_vm1, %v19359_v57 }
 0x3f3   : > { %16196 = vmatmul.mubr.msk.bf16.gmra.mxu0 %vm442_vm1, %v19535_v60 }
 0x3f4   : > { %16230 = vmatmul.mubr.msk.bf16.gmra.mxu1 %vm442_vm1, %v19363_v6  ;;  %16199 = vmatprep.mubr.msk.bf16.mxu0 %vm442_vm1, %v19537_v51 }
 0x3f5   : > { %16233 = vmatprep.mubr.msk.bf16.mxu1 %vm442_vm1, %v19391_v28 }
 0x3fb   : > { %16200 = vmatmul.mubr.msk.bf16.gmra.mxu0 %vm442_vm1, %v19547_v58 }
 0x3fc   : > { %16234 = vmatmul.mubr.msk.bf16.gmra.mxu1 %vm442_vm1, %v19395_v40  ;;  %16203 = vmatprep.mubr.msk.bf16.mxu0 %vm442_vm1, %v19549_v25 }
 0x3fd   : > { %16237 = vmatprep.mubr.msk.bf16.mxu1 %vm442_vm1, %v19421_v24 }
 0x403   : > { %16204 = vmatmul.mubr.msk.bf16.gmra.mxu0 %vm442_vm1, %v19559_v7 }
 0x404   : > { %16238 = vmatmul.mubr.msk.bf16.gmra.mxu1 %vm442_vm1, %v19425_v55  ;;  %16207 = vmatprep.mubr.msk.bf16.mxu0 %vm442_vm1, %v19561_v30 }
 0x405   : > { %16241 = vmatprep.mubr.msk.bf16.mxu1 %vm442_vm1, %v19449_v56 }
 0x40b   : > { %16208 = vmatmul.mubr.msk.bf16.gmra.mxu0 %vm442_vm1, %v5052_v5 }
 0x40c   : > { %16242 = vmatmul.mubr.msk.bf16.gmra.mxu1 %vm442_vm1, %v19456_v4  ;;  %16211 = vmatprep.mubr.msk.bf16.mxu0 %vm442_vm1, %v19571_v59 }
 0x40d   : > { %16245 = vmatprep.mubr.msk.bf16.mxu1 %vm442_vm1, %v19472_v53 }
 0x413   : > { %16212 = vmatmul.mubr.msk.bf16.gmra.mxu0 %vm442_vm1, %v5054_v37 }
 0x414   : > { %16246 = vmatmul.mubr.msk.bf16.gmra.mxu1 %vm442_vm1, %v19476_v34  ;;  %16215 = vmatprep.mubr.msk.bf16.mxu0 %vm442_vm1, %v5055_v21 }
 0x415   : > { %16249 = vmatprep.mubr.msk.bf16.mxu1 %vm442_vm1, %v19488_v32 }
 0x41b   : > { %16216 = vmatmul.mubr.msk.bf16.gmra.mxu0 %vm442_vm1, %v5056_v36 }
 0x41c   : > { %16250 = vmatmul.mubr.msk.bf16.gmra.mxu1 %vm442_vm1, %v19586_v45  ;;  %16255 = vmatprep.mubr.msk.bf16.mxu0 %vm442_vm1, %v19265_v3  ;;  %v5933_v3 = vld [vmem:[#allocation2 + $0x209] sm:$0xff] }
 0x41d   : > { %16289 = vmatprep.mubr.msk.bf16.mxu1 %vm442_vm1, %v19497_v15  ;;  %v6500_v15 = vld [vmem:[#allocation2 + $0x50] sm:$0xff] }
 0x423   : > { %16256 = vmatmul.mubr.msk.bf16.vlgmr.msra.gmra.mxu0 %vm442_vm1, %v19269_v17  ;;  %v5934_v17 = vld [vmem:[#allocation2 + $0x211] sm:$0xff] }
 0x424   : > { %16290 = vmatmul.mubr.msk.bf16.vlgmr.msra.gmra.mxu1 %vm442_vm1, %v19499_v38  ;;  %16322 = vmatpush3.bf16.msra.mxu0 %v19504_v26  ;;  %v5635_v26 = vld [vmem:[#allocation2 + $0x208] sm:$0xff] }
 0x425   : > { %16259 = vmatprep.mubr.msk.bf16.mxu0 %vm442_vm1, %v19321_v12  ;;  %16293 = vmatprep.mubr.msk.bf16.mxu1 %vm442_vm1, %v19523_v29 }
 0x426   : > { %16356 = vmatpush3.bf16.msra.mxu1 %v19509_v48  ;;  %16389 = vmatprep.subr.bf16.mxu0 %v17207_v46  ;;  %v19652_v48 = vpack.c.bf16 %v5636_v35, %v5635_v26 }
 0x42b   : > { %16260 = vmatmul.mubr.msk.bf16.gmra.mxu0 %vm442_vm1, %v19325_v63 }
 0x42c   : > { %16294 = vmatmul.mubr.msk.bf16.gmra.mxu1 %vm442_vm1, %v19525_v14  ;;  %16263 = vmatprep.mubr.msk.bf16.mxu0 %vm442_vm1, %v19357_v19 }
 0x42d   : > { %16297 = vmatprep.mubr.msk.bf16.mxu1 %vm442_vm1, %v19535_v60 }
 0x433   : > { %16264 = vmatmul.mubr.msk.bf16.gmra.mxu0 %vm442_vm1, %v19361_v16 }
 0x434   : > { %16298 = vmatmul.mubr.msk.bf16.gmra.mxu1 %vm442_vm1, %v19537_v51  ;;  %16267 = vmatprep.mubr.msk.bf16.mxu0 %vm442_vm1, %v19389_v9 }
 0x435   : > { %16301 = vmatprep.mubr.msk.bf16.mxu1 %vm442_vm1, %v19547_v58 }
 0x43b   : > { %16268 = vmatmul.mubr.msk.bf16.gmra.mxu0 %vm442_vm1, %v19393_v10 }
 0x43c   : > { %16302 = vmatmul.mubr.msk.bf16.gmra.mxu1 %vm442_vm1, %v19549_v25  ;;  %16271 = vmatprep.mubr.msk.bf16.mxu0 %vm442_vm1, %v19419_v54 }
 0x43d   : > { %16305 = vmatprep.mubr.msk.bf16.mxu1 %vm442_vm1, %v19559_v7 }
 0x443   : > { %16272 = vmatmul.mubr.msk.bf16.gmra.mxu0 %vm442_vm1, %v19423_v33 }
 0x444   : > { %16306 = vmatmul.mubr.msk.bf16.gmra.mxu1 %vm442_vm1, %v19561_v30  ;;  %16275 = vmatprep.mubr.msk.bf16.mxu0 %vm442_vm1, %v19447_v43 }
 0x445   : > { %16309 = vmatprep.mubr.msk.bf16.mxu1 %vm442_vm1, %v5052_v5  ;;  %v19654_v5 = vpack.c.bf16 %v5934_v17, %v5933_v3 }
 0x44b   : > { %16276 = vmatmul.mubr.msk.bf16.gmra.mxu0 %vm442_vm1, %v19451_v52 }
 0x44c   : > { %16310 = vmatmul.mubr.msk.bf16.gmra.mxu1 %vm442_vm1, %v19571_v59  ;;  %16279 = vmatprep.mubr.msk.bf16.mxu0 %vm442_vm1, %v19470_v61 }
 0x44d   : > { %16313 = vmatprep.mubr.msk.bf16.mxu1 %vm442_vm1, %v5054_v37  ;;  %v6499_v37 = vld [vmem:[#allocation2 + $0x48] sm:$0xff] }
 0x44e   : > { %v6531_v0 = vpack.c.bf16 %v6500_v15, %v6499_v37 }
 0x453   : > { %16280 = vmatmul.mubr.msk.bf16.gmra.mxu0 %vm442_vm1, %v19474_v42 }
 0x454   : > { %16314 = vmatmul.mubr.msk.bf16.gmra.mxu1 %vm442_vm1, %v5055_v21  ;;  %16283 = vmatprep.mubr.msk.bf16.mxu0 %vm442_vm1, %v19486_v18 }
 0x455   : > { %16317 = vmatprep.mubr.msk.bf16.mxu1 %vm442_vm1, %v5056_v36 }
 0x45b   : > { %16284 = vmatmul.mubr.msk.bf16.gmra.mxu0 %vm442_vm1, %v19652_v48 }
 0x45c   : > { %16318 = vmatmul.mubr.msk.bf16.gmra.mxu1 %vm442_vm1, %v19654_v5  ;;  %16323 = vmatprep.mubr.msk.bf16.mxu0 %vm442_vm1, %v19291_v27 }
 0x45d   : > { %16357 = vmatprep.mubr.msk.bf16.mxu1 %vm442_vm1, %v6531_v0 }
 0x461   : > { %v16121_v21 = vpop.f32.mrf.mxu0 }
 0x462   : > { %v16155_v36 = vpop.f32.mrf.mxu1 }
 0x463   : > { %v19663_v23 = vadd.f32 %v16155_v36, %v16121_v21  ;;  %16324 = vmatmul.mubr.msk.bf16.vlgmr.msra.gmra.mxu0 %vm442_vm1, %v19323_v41  ;;  %v4667_v49 = vpop.f32.mrf.mxu0 }
 0x464   : > { %16358 = vmatmul.mubr.msk.bf16.vlgmr.msra.gmra.mxu1 %vm442_vm1, %v19321_v12  ;;  %v4882_v2 = vpop.f32.mrf.mxu1  ;;  %16390 = vmatpush3.bf16.msra.mxu0 %v17207_v46 }
 0x465   : > { %16327 = vmatprep.mubr.msk.bf16.mxu0 %vm442_vm1, %v19327_v31  ;;  %v19671_v8 = vadd.f32 %v4882_v2, %v4667_v49  ;;  %16361 = vmatprep.mubr.msk.bf16.mxu1 %vm442_vm1, %v19325_v63  ;;  %v16122_v27 = vpop.f32.mrf.mxu0 }
 0x466   : > { %v16156_v20 = vpop.f32.mrf.mxu1 }
 0x467   : > { %v19675_v35 = vadd.f32 %v16156_v20, %v16122_v27  ;;  %v4670_v3 = vpop.f32.mrf.mxu0 }
 0x468   : > { %v4885_v41 = vpop.f32.mrf.mxu1 }
 0x469   : > { %v19677_v17 = vadd.f32 %v4885_v41, %v4670_v3 }
 0x46b   : > { %v16125_v12 = vpop.f32.mrf.mxu0  ;;  %v16159_v15 = vpop.f32.mrf.mxu1  ;;  %16328 = vmatmul.mubr.msk.bf16.gmra.mxu0 %vm442_vm1, %v19359_v57 }
 0x46c   : > { %16362 = vmatmul.mubr.msk.bf16.gmra.mxu1 %vm442_vm1, %v19357_v19  ;;  %v19683_v31 = vadd.f32 %v16159_v15, %v16125_v12  ;;  %16331 = vmatprep.mubr.msk.bf16.mxu0 %vm442_vm1, %v19363_v6 }
 0x46d   : > { %16365 = vmatprep.mubr.msk.bf16.mxu1 %vm442_vm1, %v19361_v16  ;;  %v4683_v63 = vpop.f32.mrf.mxu0  ;;  %v4898_v46 = vpop.f32.mrf.mxu1 }
 0x46e   : > { %v19689_v26 = vadd.f32 %v4898_v46, %v4683_v63 }
 0x46f   : > { %v16126_v37 = vpop.f32.mrf.mxu0  ;;  %v16160_v0 = vpop.f32.mrf.mxu1 }
 0x470   : > { %v19691_v21 = vadd.f32 %v16160_v0, %v16126_v37 }
 0x471   : > { %v4686_v57 = vpop.f32.mrf.mxu0  ;;  %v4901_v36 = vpop.f32.mrf.mxu1 }
 0x472   : > { %v19693_v49 = vadd.f32 %v4901_v36, %v4686_v57 }
 0x473   : > { %v16129_v19 = vpop.f32.mrf.mxu0  ;;  %16332 = vmatmul.mubr.msk.bf16.gmra.mxu0 %vm442_vm1, %v19391_v28 }
 0x474   : > { %v16163_v2 = vpop.f32.mrf.mxu1  ;;  %16366 = vmatmul.mubr.msk.bf16.gmra.mxu1 %vm442_vm1, %v19389_v9  ;;  %16335 = vmatprep.mubr.msk.bf16.mxu0 %vm442_vm1, %v19395_v40 }
 0x475   : > { %v19699_v16 = vadd.f32 %v16163_v2, %v16129_v19  ;;  %16369 = vmatprep.mubr.msk.bf16.mxu1 %vm442_vm1, %v19393_v10  ;;  %v4699_v6 = vpop.f32.mrf.mxu0 }
 0x476   : > { %v4914_v27 = vpop.f32.mrf.mxu1 }
 0x477   : > { %v19705_v20 = vadd.f32 %v4914_v27, %v4699_v6  ;;  %v16130_v3 = vpop.f32.mrf.mxu0 }
 0x478   : > { %v16164_v41 = vpop.f32.mrf.mxu1 }
 0x479   : > { %v19707_v12 = vadd.f32 %v16164_v41, %v16130_v3  ;;  %v4702_v28 = vpop.f32.mrf.mxu0 }
 0x47a   : > { %v4917_v15 = vpop.f32.mrf.mxu1 }
 0x47b   : > { %v19709_v63 = vadd.f32 %v4917_v15, %v4702_v28  ;;  %v16133_v9 = vpop.f32.mrf.mxu0  ;;  %16336 = vmatmul.mubr.msk.bf16.gmra.mxu0 %vm442_vm1, %v19421_v24 }
 0x47c   : > { %v16167_v46 = vpop.f32.mrf.mxu1  ;;  %16370 = vmatmul.mubr.msk.bf16.gmra.mxu1 %vm442_vm1, %v19419_v54  ;;  %16339 = vmatprep.mubr.msk.bf16.mxu0 %vm442_vm1, %v19425_v55 }
 0x47d   : > { %v19715_v10 = vadd.f32 %v16167_v46, %v16133_v9  ;;  %16373 = vmatprep.mubr.msk.bf16.mxu1 %vm442_vm1, %v19423_v33  ;;  %v4715_v40 = vpop.f32.mrf.mxu0 }
 0x47e   : > { %v4930_v37 = vpop.f32.mrf.mxu1 }
 0x47f   : > { %v19721_v0 = vadd.f32 %v4930_v37, %v4715_v40  ;;  %v16134_v57 = vpop.f32.mrf.mxu0 }
 0x480   : > { %v16168_v36 = vpop.f32.mrf.mxu1 }
 0x481   : > { %v19723_v19 = vadd.f32 %v16168_v36, %v16134_v57  ;;  %v4718_v24 = vpop.f32.mrf.mxu0 }
 0x482   : > { %v4933_v2 = vpop.f32.mrf.mxu1 }
 0x483   : > { %v19725_v6 = vadd.f32 %v4933_v2, %v4718_v24  ;;  %v16137_v54 = vpop.f32.mrf.mxu0  ;;  %16340 = vmatmul.mubr.msk.bf16.gmra.mxu0 %vm442_vm1, %v19449_v56 }
 0x484   : > { %v16171_v27 = vpop.f32.mrf.mxu1  ;;  %16374 = vmatmul.mubr.msk.bf16.gmra.mxu1 %vm442_vm1, %v19447_v43  ;;  %16343 = vmatprep.mubr.msk.bf16.mxu0 %vm442_vm1, %v19456_v4 }
 0x485   : > { %v19731_v33 = vadd.f32 %v16171_v27, %v16137_v54  ;;  %16377 = vmatprep.mubr.msk.bf16.mxu1 %vm442_vm1, %v19451_v52  ;;  %v4731_v55 = vpop.f32.mrf.mxu0 }
 0x486   : > { %v4946_v3 = vpop.f32.mrf.mxu1 }
 0x487   : > { %v19737_v41 = vadd.f32 %v4946_v3, %v4731_v55  ;;  %v16138_v28 = vpop.f32.mrf.mxu0  ;;  %v6232_v55 = vld [vmem:[#allocation2 + $0x22f] sm:$0xff] }
 0x488   : > { %v16172_v15 = vpop.f32.mrf.mxu1  ;;  %v6529_v3 = vld [vmem:[#allocation2 + $0x228] sm:$0xff] }
 0x489   : > { %v19739_v9 = vadd.f32 %v16172_v15, %v16138_v28  ;;  %v19741_v56 = vpop.f32.mrf.mxu0  ;;  %v6530_v28 = vld [vmem:[#allocation2 + $0x230] sm:$0xff] }
 0x48a   : > { %v19743_v46 = vpop.f32.mrf.mxu1 }
 0x48b   : > { %v16141_v43 = vpop.f32.mrf.mxu0  ;;  %16344 = vmatmul.mubr.msk.bf16.gmra.mxu0 %vm442_vm1, %v19472_v53 }
 0x48c   : > { %v16175_v40 = vpop.f32.mrf.mxu1  ;;  %16378 = vmatmul.mubr.msk.bf16.gmra.mxu1 %vm442_vm1, %v19470_v61  ;;  %16347 = vmatprep.mubr.msk.bf16.mxu0 %vm442_vm1, %v19476_v34 }
 0x48d   : > { %v19749_v52 = vadd.f32 %v16175_v40, %v16141_v43  ;;  %16381 = vmatprep.mubr.msk.bf16.mxu1 %vm442_vm1, %v19474_v42  ;;  %v4747_v4 = vpop.f32.mrf.mxu0  ;;  %v6231_v42 = vld [vmem:[#allocation2 + $0x227] sm:$0xff] }
 0x48e   : > { %v4962_v37 = vpop.f32.mrf.mxu1 }
 0x48f   : > { %v19755_v57 = vadd.f32 %v4962_v37, %v4747_v4  ;;  %v16142_v36 = vpop.f32.mrf.mxu0  ;;  %v6248_v37 = vpack.c.bf16 %v6232_v55, %v6231_v42 }
 0x490   : > { %v16176_v24 = vpop.f32.mrf.mxu1 }
 0x491   : > { %v19757_v2 = vadd.f32 %v16176_v24, %v16142_v36  ;;  %v19759_v53 = vpop.f32.mrf.mxu0 }
 0x492   : > { %v19761_v54 = vpop.f32.mrf.mxu1 }
 0x493   : > { %v16145_v61 = vpop.f32.mrf.mxu0  ;;  %16348 = vmatmul.mubr.msk.bf16.gmra.mxu0 %vm442_vm1, %v19488_v32 }
 0x494   : > { %v16179_v27 = vpop.f32.mrf.mxu1  ;;  %16382 = vmatmul.mubr.msk.bf16.gmra.mxu1 %vm442_vm1, %v19486_v18  ;;  %16351 = vmatprep.mubr.msk.bf16.mxu0 %vm442_vm1, %v19586_v45  ;;  %v6546_v18 = vpack.c.bf16 %v6530_v28, %v6529_v3 }
 0x495   : > { %v19767_v34 = vadd.f32 %v16179_v27, %v16145_v61  ;;  %16385 = vmatprep.mubr.msk.bf16.mxu1 %vm442_vm1, %v19652_v48  ;;  %v4763_v15 = vpop.f32.mrf.mxu0 }
 0x496   : > { %v4978_v43 = vpop.f32.mrf.mxu1 }
 0x497   : > { %v19773_v40 = vadd.f32 %v4978_v43, %v4763_v15  ;;  %v16146_v32 = vpop.f32.mrf.mxu0 }
 0x498   : > { %v16180_v4 = vpop.f32.mrf.mxu1 }
 0x499   : > { %v19775_v36 = vadd.f32 %v16180_v4, %v16146_v32  ;;  %v19777_v24 = vpop.f32.mrf.mxu0 }
 0x49a   : > { %v19779_v61 = vpop.f32.mrf.mxu1 }
 0x49b   : > { %v16149_v45 = vpop.f32.mrf.mxu0  ;;  %16352 = vmatmul.mubr.msk.bf16.gmra.mxu0 %vm442_vm1, %v6248_v37 }
 0x49c   : > { %v16183_v27 = vpop.f32.mrf.mxu1  ;;  %16386 = vmatmul.mubr.msk.bf16.gmra.mxu1 %vm442_vm1, %v6546_v18  ;;  %16391 = vmatprep.mubr.msk.bf16.mxu0 %vm442_vm1, %v19499_v38 }
 0x49d   : > { %v19783_v48 = vadd.f32 %v16183_v27, %v16149_v45  ;;  %v4779_v15 = vpop.f32.mrf.mxu0 }
 0x49e   : > { %v4994_v42 = vpop.f32.mrf.mxu1 }
 0x49f   : > { %v19787_v55 = vadd.f32 %v4994_v42, %v4779_v15  ;;  %v16150_v3 = vpop.f32.mrf.mxu0 }
 0x4a0   : > { %v16184_v28 = vpop.f32.mrf.mxu1 }
 0x4a1   : > { %v19789_v43 = vadd.f32 %v16184_v28, %v16150_v3  ;;  %v19791_v32 = vpop.f32.mrf.mxu0 }
 0x4a2   : > { %v19793_v4 = vpop.f32.mrf.mxu1 }
 0x4a3   : > { %v16189_v37 = vpop.f32.mrf.mxu0  ;;  %16392 = vmatmul.mubr.msk.bf16.vlgmr.msra.gmra.mxu0 %vm442_vm1, %v19523_v29 }
 0x4a4   : > { %v16223_v47 = vpop.f32.mrf.mxu1  ;;  %v5277_v18 = vadd.f32 %v16189_v37, %v19663_v23  ;;  %16395 = vmatprep.mubr.msk.bf16.mxu0 %vm442_vm1, %v19525_v14 }
 0x4a5   : > { %v5148_v38 = vpop.f32.mrf.mxu0 }
 0x4a6   : > { %v5446_v45 = vpop.f32.mrf.mxu1  ;;  %v19800_v27 = vadd.f32 %v16223_v47, %v5277_v18  ;;  %v5275_v15 = vadd.f32 %v5148_v38, %v19671_v8 }
 0x4a7   : > { %v16190_v42 = vpop.f32.mrf.mxu0 }
 0x4a8   : > { %v16224_v3 = vpop.f32.mrf.mxu1  ;;  %v19803_v28 = vadd.f32 %v5446_v45, %v5275_v15  ;;  %v5278_v44 = vadd.f32 %v16190_v42, %v19675_v35 }
 0x4a9   : > { %v5151_v1 = vpop.f32.mrf.mxu0 }
 0x4aa   : > { %v19806_v13 = vpop.f32.mrf.mxu1  ;;  %v19808_v29 = vadd.f32 %v16224_v3, %v5278_v44  ;;  %v19811_v23 = vadd.f32 %v5151_v1, %v19677_v17 }
 0x4ab   : > { %v16193_v14 = vpop.f32.mrf.mxu0  ;;  %16396 = vmatmul.mubr.msk.bf16.gmra.mxu0 %vm442_vm1, %v19535_v60 }
 0x4ac   : > { %v16227_v37 = vpop.f32.mrf.mxu1  ;;  %v5281_v47 = vadd.f32 %v16193_v14, %v19683_v31  ;;  %16399 = vmatprep.mubr.msk.bf16.mxu0 %vm442_vm1, %v19537_v51 }
 0x4ad   : > { %v5164_v8 = vpop.f32.mrf.mxu0 }
 0x4ae   : > { %v5462_v35 = vpop.f32.mrf.mxu1  ;;  %v19818_v18 = vadd.f32 %v16227_v37, %v5281_v47  ;;  %v5279_v44 = vadd.f32 %v5164_v8, %v19689_v26  ;;  %v7221_v8 = vld [vmem:[%s23000_s9] sm:$0xf] }
 0x4af   : > { %v16194_v38 = vpop.f32.mrf.mxu0  ;;  %17178 = vmatprep.subr.msk.bf16.mxu0 %vm723_vm0, %v7221_v8 }
 0x4b0   : > { %v16228_v45 = vpop.f32.mrf.mxu1  ;;  %v19821_v1 = vadd.f32 %v5462_v35, %v5279_v44  ;;  %v5282_v17 = vadd.f32 %v16194_v38, %v19691_v21  ;;  %v7613_v44 = vsel %vm723_vm0, %v7221_v8, 0  ;;  %v6816_v8 = vld [vmem:[#allocation2 + $0x171] sm:$0xff] }
 0x4b1   : > { %v5167_v15 = vpop.f32.mrf.mxu0  ;;  %16458 = vmatpush3.bf16.msra.mxu0 %v7613_v44 }
 0x4b2   : > { %v19824_v42 = vpop.f32.mrf.mxu1  ;;  %v19826_v60 = vadd.f32 %v16228_v45, %v5282_v17  ;;  %v19829_v31 = vadd.f32 %v5167_v15, %v19693_v49  ;;  %v14553_v49 = vld [vmem:[%s23000_s9 + $0x4] sm:$0xf] }
 0x4b3   : > { %v16197_v51 = vpop.f32.mrf.mxu0  ;;  %16400 = vmatmul.mubr.msk.bf16.gmra.mxu0 %vm442_vm1, %v19547_v58  ;;  %17177 = vmatprep.subr.msk.bf16.mxu1 %vm723_vm0, %v14553_v49 }
 0x4b4   : > { %v16231_v3 = vpop.f32.mrf.mxu1  ;;  %v5285_v26 = vadd.f32 %v16197_v51, %v19699_v16  ;;  %16403 = vmatprep.mubr.msk.bf16.mxu0 %vm442_vm1, %v19549_v25 }
 0x4b5   : > { %v5180_v14 = vpop.f32.mrf.mxu0 }
 0x4b6   : > { %v5478_v21 = vpop.f32.mrf.mxu1  ;;  %v19836_v37 = vadd.f32 %v16231_v3, %v5285_v26  ;;  %v5283_v47 = vadd.f32 %v5180_v14, %v19705_v20  ;;  %v7401_v20 = vsel %vm723_vm0, %v14553_v49, 0  ;;  %v6815_v49 = vld [vmem:[#allocation2 + $0x169] sm:$0xff] }
 0x4b7   : > { %v16198_v58 = vpop.f32.mrf.mxu0  ;;  %16424 = vmatpush3.bf16.msra.mxu1 %v7401_v20 }
 0x4b8   : > { %v16232_v35 = vpop.f32.mrf.mxu1  ;;  %v19847_v25 = vadd.f32 %v5478_v21, %v5283_v47  ;;  %v5286_v16 = vadd.f32 %v16198_v58, %v19707_v12 }
 0x4b9   : > { %v5183_v38 = vpop.f32.mrf.mxu0 }
 0x4ba   : > { %v19852_v45 = vpop.f32.mrf.mxu1  ;;  %v19854_v17 = vadd.f32 %v16232_v35, %v5286_v16  ;;  %v19857_v15 = vadd.f32 %v5183_v38, %v19709_v63 }
 0x4bb   : > { %v16201_v51 = vpop.f32.mrf.mxu0  ;;  %16404 = vmatmul.mubr.msk.bf16.gmra.mxu0 %vm442_vm1, %v19559_v7 }
 0x4bc   : > { %v16235_v3 = vpop.f32.mrf.mxu1  ;;  %v5289_v12 = vadd.f32 %v16201_v51, %v19715_v10  ;;  %16407 = vmatprep.mubr.msk.bf16.mxu0 %vm442_vm1, %v19561_v30  ;;  %v6838_v10 = vpack.c.bf16 %v6816_v8, %v6815_v49  ;;  %v6821_v8 = vld [vmem:[#allocation2 + $0x1c9] sm:$0xff] }
 0x4bd   : > { %v5196_v26 = vpop.f32.mrf.mxu0 }
 0x4be   : > { %v5494_v14 = vpop.f32.mrf.mxu1  ;;  %v19864_v21 = vadd.f32 %v16235_v3, %v5289_v12  ;;  %v5287_v47 = vadd.f32 %v5196_v26, %v19721_v0 }
 0x4bf   : > { %v16202_v63 = vpop.f32.mrf.mxu0 }
 0x4c0   : > { %v16236_v58 = vpop.f32.mrf.mxu1  ;;  %v19867_v35 = vadd.f32 %v5494_v14, %v5287_v47  ;;  %v5290_v16 = vadd.f32 %v16202_v63, %v19723_v19  ;;  %v6819_v14 = vld [vmem:[#allocation2 + $0x1a9] sm:$0xff]  ;;  %v6820_v47 = vld [vmem:[#allocation2 + $0x1b1] sm:$0xff] }
 0x4c1   : > { %v5199_v7 = vpop.f32.mrf.mxu0  ;;  %v6822_v63 = vld [vmem:[#allocation2 + $0x1d1] sm:$0xff] }
 0x4c2   : > { %v19870_v20 = vpop.f32.mrf.mxu1  ;;  %v19872_v44 = vadd.f32 %v16236_v58, %v5290_v16  ;;  %v19875_v30 = vadd.f32 %v5199_v7, %v19725_v6  ;;  %v4950_v58 = vadd.f32 %v19743_v46, %v19741_v56 }
 0x4c3   : > { %v16205_v38 = vpop.f32.mrf.mxu0  ;;  %16408 = vmatmul.mubr.msk.bf16.gmra.mxu0 %vm442_vm1, %v6838_v10  ;;  %v6840_v10 = vpack.c.bf16 %v6820_v47, %v6819_v14  ;;  %v6824_v14 = vld [vmem:[#allocation2 + $0x1f1] sm:$0xff] }
 0x4c4   : > { %v16239_v51 = vpop.f32.mrf.mxu1  ;;  %v5293_v0 = vadd.f32 %v16205_v38, %v19731_v33  ;;  %16411 = vmatprep.mubr.msk.bf16.mxu0 %vm442_vm1, %v19571_v59 }
 0x4c5   : > { %v5212_v3 = vpop.f32.mrf.mxu0 }
 0x4c6   : > { %v5510_v19 = vpop.f32.mrf.mxu1  ;;  %v19881_v12 = vadd.f32 %v16239_v51, %v5293_v0  ;;  %v5291_v26 = vadd.f32 %v5212_v3, %v19737_v41  ;;  %v6841_v51 = vpack.c.bf16 %v6822_v63, %v6821_v8 }
 0x4c7   : > { %v16206_v49 = vpop.f32.mrf.mxu0 }
 0x4c8   : > { %v16240_v6 = vpop.f32.mrf.mxu1  ;;  %v19886_v16 = vadd.f32 %v5510_v19, %v5291_v26  ;;  %v5294_v33 = vadd.f32 %v16206_v49, %v19739_v9  ;;  %v6823_v26 = vld [vmem:[#allocation2 + $0x1e9] sm:$0xff] }
 0x4c9   : > { %v5215_v59 = vpop.f32.mrf.mxu0 }
 0x4ca   : > { %v19889_v7 = vpop.f32.mrf.mxu1  ;;  %v19891_v38 = vadd.f32 %v16240_v6, %v5294_v33  ;;  %v19893_v41 = vadd.f32 %v5215_v59, %v4950_v58  ;;  %v4966_v6 = vadd.f32 %v19761_v54, %v19759_v53  ;;  %v6842_v33 = vpack.c.bf16 %v6824_v14, %v6823_v26  ;;  %v6827_v53 = vld [vmem:[#allocation2 + $0x229] sm:$0xff]  ;;  %v6828_v54 = vld [vmem:[#allocation2 + $0x231] sm:$0xff] }
 0x4cb   : > { %v16209_v0 = vpop.f32.mrf.mxu0  ;;  %16412 = vmatmul.mubr.msk.bf16.gmra.mxu0 %vm442_vm1, %v6840_v10  ;;  %v6844_v26 = vpack.c.bf16 %v6828_v54, %v6827_v53  ;;  %v4982_v14 = vadd.f32 %v19779_v61, %v19777_v24  ;;  %v4998_v53 = vadd.f32 %v19793_v4, %v19791_v32 }
 0x4cc   : > { %v16243_v3 = vpop.f32.mrf.mxu1  ;;  %v5297_v39 = vadd.f32 %v16209_v0, %v19749_v52  ;;  %16415 = vmatprep.mubr.msk.bf16.mxu0 %vm442_vm1, %v6841_v51 }
 0x4cd   : > { %v5228_v56 = vpop.f32.mrf.mxu0 }
 0x4ce   : > { %v5526_v46 = vpop.f32.mrf.mxu1  ;;  %v19898_v9 = vadd.f32 %v16243_v3, %v5297_v39  ;;  %v5295_v19 = vadd.f32 %v5228_v56, %v19755_v57 }
 0x4cf   : > { %v16210_v47 = vpop.f32.mrf.mxu0 }
 0x4d0   : > { %v16244_v49 = vpop.f32.mrf.mxu1  ;;  %v19903_v8 = vadd.f32 %v5526_v46, %v5295_v19  ;;  %v5298_v63 = vadd.f32 %v16210_v47, %v19757_v2 }
 0x4d1   : > { %v5231_v52 = vpop.f32.mrf.mxu0 }
 0x4d2   : > { %v19906_v58 = vpop.f32.mrf.mxu1  ;;  %v19908_v59 = vadd.f32 %v16244_v49, %v5298_v63  ;;  %v19910_v39 = vadd.f32 %v5231_v52, %v4966_v6 }
 0x4d3   : > { %23076 = vst [vmem:[#allocation20_spill] sm:$0xff] %v19906_v58  ;;  %v16213_v57 = vpop.f32.mrf.mxu0  ;;  %16416 = vmatmul.mubr.msk.bf16.gmra.mxu0 %vm442_vm1, %v6842_v33 }
 0x4d4   : > { %23077 = vst [vmem:[#allocation21_spill] sm:$0xff] %v19910_v39  ;;  %v16247_v10 = vpop.f32.mrf.mxu1  ;;  %v5301_v51 = vadd.f32 %v16213_v57, %v19767_v34  ;;  %16419 = vmatprep.mubr.msk.bf16.mxu0 %vm442_vm1, %v19654_v5 }
 0x4d5   : > { %v5244_v2 = vpop.f32.mrf.mxu0 }
 0x4d6   : > { %v5542_v0 = vpop.f32.mrf.mxu1  ;;  %v19916_v3 = vadd.f32 %v16247_v10, %v5301_v51  ;;  %v5299_v56 = vadd.f32 %v5244_v2, %v19773_v40 }
 0x4d7   : > { %v16214_v46 = vpop.f32.mrf.mxu0 }
 0x4d8   : > { %v16248_v19 = vpop.f32.mrf.mxu1  ;;  %v19921_v47 = vadd.f32 %v5542_v0, %v5299_v56  ;;  %v5302_v34 = vadd.f32 %v16214_v46, %v19775_v36 }
 0x4d9   : > { %v5247_v49 = vpop.f32.mrf.mxu0 }
 0x4da   : > { %v19924_v5 = vpop.f32.mrf.mxu1  ;;  %v19926_v6 = vadd.f32 %v16248_v19, %v5302_v34  ;;  %v19928_v63 = vadd.f32 %v5247_v49, %v4982_v14  ;;  %v17258_v49 = vld [vmem:[%s17615_s21 + $0x10] sm:$0xff] }
 0x4db   : > { %23078 = vst [vmem:[#allocation22_spill] sm:$0xff] %v19924_v5  ;;  %v16217_v52 = vpop.f32.mrf.mxu0  ;;  %16420 = vmatmul.mubr.msk.bf16.gmra.mxu0 %vm442_vm1, %v6844_v26  ;;  %v19949_v26 = vld [vmem:[%s22998_s7] ss:$0 sm:$0xff] }
 0x4dc   : > { %23079 = vst [vmem:[#allocation23_spill] sm:$0xff] %v19928_v63  ;;  %v16251_v33 = vpop.f32.mrf.mxu1  ;;  %v5305_v40 = vadd.f32 %v16217_v52, %v19783_v48  ;;  %v7105_v52 = vmul.f32 %v17258_v49, %v19949_v26 }
 0x4dd   : > { %v5260_v57 = vpop.f32.mrf.mxu0 }
 0x4de   : > { %v5558_v10 = vpop.f32.mrf.mxu1  ;;  %v19932_v24 = vadd.f32 %v16251_v33, %v5305_v40  ;;  %v5303_v61 = vadd.f32 %v5260_v57, %v19787_v55  ;;  %v17259_v33 = vld [vmem:[%s17615_s21 + $0x18] sm:$0xff]  ;;  %v5574_v57 = vadd.f32 %v19806_v13, %v19811_v23  ;;  %v19977_v13 = vld [vmem:[%s22999_s8] ss:$0 sm:$0xff] }
 0x4df   : > { %v16218_v36 = vpop.f32.mrf.mxu0  ;;  %v7106_v40 = vmul.f32 %v17259_v33, %v19949_v26 }
 0x4e0   : > { %v16252_v51 = vpop.f32.mrf.mxu1  ;;  %v19937_v54 = vadd.f32 %v5558_v10, %v5303_v61  ;;  %v5306_v2 = vadd.f32 %v16218_v36, %v19789_v43 }
 0x4e1   : > { %v5263_v0 = vpop.f32.mrf.mxu0 }
 0x4e2   : > { %v19940_v56 = vpop.f32.mrf.mxu1  ;;  %v19942_v48 = vadd.f32 %v16252_v51, %v5306_v2  ;;  %v19944_v46 = vadd.f32 %v5263_v0, %v4998_v53  ;;  %v17260_v51 = vld [vmem:[%s17615_s21] sm:$0xff]  ;;  %v17261_v53 = vld [vmem:[%s17615_s21 + $0x8] sm:$0xff] }
 0x4e3   : > { %23080 = vst [vmem:[#allocation24_spill] sm:$0xff] %v19940_v56  ;;  %v16257_v19 = vpop.f32.mrf.mxu0  ;;  %v7104_v2 = vmul.f32 %v17261_v53, %v19949_v26 }
 0x4e4   : > { %23081 = vst [vmem:[#allocation25_spill] sm:$0xff] %v19944_v46  ;;  %v16291_v55 = vpop.f32.mrf.mxu1  ;;  %v5873_v32 = vadd.f32 %v16257_v19, %v19800_v27 }
 0x4e5   : > { %v5744_v4 = vpop.f32.mrf.mxu0 }
 0x4e6   : > { %v6042_v43 = vpop.f32.mrf.mxu1  ;;  %v19952_v14 = vadd.f32 %v16291_v55, %v5873_v32  ;;  %v5871_v34 = vadd.f32 %v5744_v4, %v19803_v28  ;;  %v7103_v28 = vmul.f32 %v17260_v51, %v19949_v26 }
 0x4e7   : > { %v16258_v10 = vpop.f32.mrf.mxu0 }
 0x4e8   : > { %v19961_v61 = vpop.f32.mrf.mxu1  ;;  %v19963_v27 = vadd.f32 %v6042_v43, %v5871_v34  ;;  %v19966_v36 = vadd.f32 %v16258_v10, %v19808_v29  ;;  %v7141_v55 = vadd.f32 %v19977_v13, %v7103_v28  ;;  %v7142_v29 = vadd.f32 %v19977_v13, %v7104_v2 }
 0x4e9   : > { %v5747_v0 = vpop.f32.mrf.mxu0  ;;  %v7143_v43 = vadd.f32 %v19977_v13, %v7105_v52  ;;  %v7144_v34 = vadd.f32 %v19977_v13, %v7106_v40  ;;  %v5578_v52 = vadd.f32 %v19824_v42, %v19829_v31  ;;  %v17264_v42 = vld [vmem:[%s17615_s21 + $0x30] sm:$0xff] }
 0x4ea   : > { %v19972_v19 = vpop.f32.mrf.mxu1  ;;  %v19979_v23 = vadd.f32 %v5747_v0, %v5574_v57  ;;  %v7173_v33 = vmax.f32 %v7141_v55, 0.0  ;;  %v7174_v10 = vmax.f32 %v7142_v29, 0.0  ;;  %v7109_v31 = vmul.f32 %v17264_v42, %v19949_v26 }
 0x4eb   : > { %v16261_v32 = vpop.f32.mrf.mxu0  ;;  %v7175_v57 = vmax.f32 %v7143_v43, 0.0  ;;  %v7176_v0 = vmax.f32 %v7144_v34, 0.0  ;;  %v17262_v43 = vld [vmem:[%s17615_s21 + $0x20] sm:$0xff]  ;;  %v17263_v34 = vld [vmem:[%s17615_s21 + $0x28] sm:$0xff] }
 0x4ec   : > { %v16295_v4 = vpop.f32.mrf.mxu1  ;;  %v5877_v49 = vadd.f32 %v16261_v32, %v19818_v18  ;;  %v7205_v2 = vpack.c.bf16 %v7174_v10, %v7173_v33  ;;  %v17265_v10 = vld [vmem:[%s17615_s21 + $0x38] sm:$0xff] }
 0x4ed   : > { %v5760_v51 = vpop.f32.mrf.mxu0  ;;  %v7206_v55 = vpack.c.bf16 %v7176_v0, %v7175_v57 }
 0x4ee   : > { %v6058_v53 = vpop.f32.mrf.mxu1  ;;  %v19986_v11 = vadd.f32 %v16295_v4, %v5877_v49  ;;  %v5875_v28 = vadd.f32 %v5760_v51, %v19821_v1  ;;  %16459 = vmatprep.mubr.msk.bf16.mxu0 %vm674_vm2, %v7205_v2  ;;  %v7107_v4 = vmul.f32 %v17262_v43, %v19949_v26  ;;  %v7108_v1 = vmul.f32 %v17263_v34, %v19949_v26 }
 0x4ef   : > { %v16262_v40 = vpop.f32.mrf.mxu0  ;;  %16460 = vmatmul.mubr.msk.bf16.vlgmr.msra.gmra.mxu0 %vm674_vm2, %v7206_v55  ;;  %v7110_v51 = vmul.f32 %v17265_v10, %v19949_v26 }
 0x4f0   : > { %v16296_v18 = vpop.f32.mrf.mxu1  ;;  %v19991_v32 = vadd.f32 %v6058_v53, %v5875_v28  ;;  %v5878_v29 = vadd.f32 %v16262_v40, %v19826_v60  ;;  %v7145_v57 = vadd.f32 %v19977_v13, %v7107_v4  ;;  %v7146_v0 = vadd.f32 %v19977_v13, %v7108_v1 }
 0x4f1   : > { %v5763_v49 = vpop.f32.mrf.mxu0  ;;  %v7147_v40 = vadd.f32 %v19977_v13, %v7109_v31  ;;  %v7148_v55 = vadd.f32 %v19977_v13, %v7110_v51  ;;  %v5582_v31 = vadd.f32 %v19852_v45, %v19857_v15  ;;  %v17268_v45 = vld [vmem:[%s17615_s21 + $0x50] sm:$0xff] }
 0x4f2   : > { %v19999_v33 = vpop.f32.mrf.mxu1  ;;  %v20006_v60 = vadd.f32 %v16296_v18, %v5878_v29  ;;  %v20008_v53 = vadd.f32 %v5763_v49, %v5578_v52  ;;  %v7177_v34 = vmax.f32 %v7145_v57, 0.0  ;;  %v7178_v42 = vmax.f32 %v7146_v0, 0.0 }
 0x4f3   : > { %v16265_v28 = vpop.f32.mrf.mxu0  ;;  %v7179_v52 = vmax.f32 %v7147_v40, 0.0  ;;  %v7180_v29 = vmax.f32 %v7148_v55, 0.0  ;;  %v17266_v40 = vld [vmem:[%s17615_s21 + $0x40] sm:$0xff]  ;;  %v17267_v55 = vld [vmem:[%s17615_s21 + $0x48] sm:$0xff]  ;;  %v7113_v15 = vmul.f32 %v17268_v45, %v19949_v26 }
 0x4f4   : > { %v16299_v2 = vpop.f32.mrf.mxu1  ;;  %v5881_v43 = vadd.f32 %v16265_v28, %v19836_v37  ;;  %v7207_v1 = vpack.c.bf16 %v7178_v42, %v7177_v34  ;;  %v17269_v42 = vld [vmem:[%s17615_s21 + $0x58] sm:$0xff] }
 0x4f5   : > { %v5776_v10 = vpop.f32.mrf.mxu0  ;;  %v7208_v57 = vpack.c.bf16 %v7180_v29, %v7179_v52 }
 0x4f6   : > { %v6074_v18 = vpop.f32.mrf.mxu1  ;;  %v20015_v49 = vadd.f32 %v16299_v2, %v5881_v43  ;;  %v5879_v4 = vadd.f32 %v5776_v10, %v19847_v25  ;;  %16463 = vmatprep.mubr.msk.bf16.mxu0 %vm674_vm2, %v7207_v1  ;;  %v7111_v2 = vmul.f32 %v17266_v40, %v19949_v26  ;;  %v7112_v25 = vmul.f32 %v17267_v55, %v19949_v26 }
 0x4f7   : > { %v16266_v51 = vpop.f32.mrf.mxu0  ;;  %16464 = vmatmul.mubr.msk.bf16.gmra.mxu0 %vm674_vm2, %v7208_v57  ;;  %v7114_v10 = vmul.f32 %v17269_v42, %v19949_v26 }
 0x4f8   : > { %v16300_v37 = vpop.f32.mrf.mxu1  ;;  %v20020_v28 = vadd.f32 %v6074_v18, %v5879_v4  ;;  %v5882_v0 = vadd.f32 %v16266_v51, %v19854_v17  ;;  %v7149_v52 = vadd.f32 %v19977_v13, %v7111_v2  ;;  %v7150_v29 = vadd.f32 %v19977_v13, %v7112_v25 }
 0x4f9   : > { %v5779_v43 = vpop.f32.mrf.mxu0  ;;  %v7151_v51 = vadd.f32 %v19977_v13, %v7113_v15  ;;  %v7152_v57 = vadd.f32 %v19977_v13, %v7114_v10  ;;  %v5586_v15 = vadd.f32 %v19870_v20, %v19875_v30  ;;  %v17272_v20 = vld [vmem:[%s17615_s21 + $0x70] sm:$0xff] }
 0x4fa   : > { %v20028_v34 = vpop.f32.mrf.mxu1  ;;  %v20035_v17 = vadd.f32 %v16300_v37, %v5882_v0  ;;  %v20037_v18 = vadd.f32 %v5779_v43, %v5582_v31  ;;  %v7181_v55 = vmax.f32 %v7149_v52, 0.0  ;;  %v7182_v45 = vmax.f32 %v7150_v29, 0.0 }
 0x4fb   : > { %v16269_v4 = vpop.f32.mrf.mxu0  ;;  %v7183_v31 = vmax.f32 %v7151_v51, 0.0  ;;  %v7184_v0 = vmax.f32 %v7152_v57, 0.0  ;;  %v17270_v51 = vld [vmem:[%s17615_s21 + $0x60] sm:$0xff]  ;;  %v17271_v57 = vld [vmem:[%s17615_s21 + $0x68] sm:$0xff]  ;;  %v7117_v30 = vmul.f32 %v17272_v20, %v19949_v26 }
 0x4fc   : > { %v16303_v1 = vpop.f32.mrf.mxu1  ;;  %v5885_v40 = vadd.f32 %v16269_v4, %v19864_v21  ;;  %v7209_v25 = vpack.c.bf16 %v7182_v45, %v7181_v55  ;;  %v17273_v45 = vld [vmem:[%s17615_s21 + $0x78] sm:$0xff] }
 0x4fd   : > { %v5792_v42 = vpop.f32.mrf.mxu0  ;;  %v7210_v52 = vpack.c.bf16 %v7184_v0, %v7183_v31 }
 0x4fe   : > { %v6090_v37 = vpop.f32.mrf.mxu1  ;;  %v20044_v43 = vadd.f32 %v16303_v1, %v5885_v40  ;;  %v5883_v2 = vadd.f32 %v5792_v42, %v19867_v35  ;;  %16467 = vmatprep.mubr.msk.bf16.mxu0 %vm674_vm2, %v7209_v25  ;;  %v7115_v1 = vmul.f32 %v17270_v51, %v19949_v26  ;;  %v7116_v35 = vmul.f32 %v17271_v57, %v19949_v26 }
 0x4ff   : > { %v16270_v10 = vpop.f32.mrf.mxu0  ;;  %16468 = vmatmul.mubr.msk.bf16.gmra.mxu0 %vm674_vm2, %v7210_v52  ;;  %v7118_v42 = vmul.f32 %v17273_v45, %v19949_v26 }
 0x500   : > { %v16304_v21 = vpop.f32.mrf.mxu1  ;;  %v20049_v4 = vadd.f32 %v6090_v37, %v5883_v2  ;;  %v5886_v29 = vadd.f32 %v16270_v10, %v19872_v44  ;;  %v7153_v31 = vadd.f32 %v19977_v13, %v7115_v1  ;;  %v7154_v0 = vadd.f32 %v19977_v13, %v7116_v35 }
 0x501   : > { %v5795_v40 = vpop.f32.mrf.mxu0  ;;  %v7155_v10 = vadd.f32 %v19977_v13, %v7117_v30  ;;  %v7156_v52 = vadd.f32 %v19977_v13, %v7118_v42 }
 0x502   : > { %v20057_v55 = vpop.f32.mrf.mxu1  ;;  %v20064_v44 = vadd.f32 %v16304_v21, %v5886_v29  ;;  %v20066_v37 = vadd.f32 %v5795_v40, %v5586_v15  ;;  %v7185_v57 = vmax.f32 %v7153_v31, 0.0  ;;  %v7186_v20 = vmax.f32 %v7154_v0, 0.0  ;;  %v17274_v31 = vld [vmem:[%s17615_s21 + $0x80] sm:$0xff] }
 0x503   : > { %v16273_v2 = vpop.f32.mrf.mxu0  ;;  %v7187_v15 = vmax.f32 %v7155_v10, 0.0  ;;  %v7188_v40 = vmax.f32 %v7156_v52, 0.0  ;;  %v7119_v0 = vmul.f32 %v17274_v31, %v19949_v26  ;;  %v17276_v52 = vld [vmem:[%s17615_s21 + $0x90] sm:$0xff] }
 0x504   : > { %v16307_v25 = vpop.f32.mrf.mxu1  ;;  %v5889_v51 = vadd.f32 %v16273_v2, %v19881_v12  ;;  %v7211_v35 = vpack.c.bf16 %v7186_v20, %v7185_v57  ;;  %v17275_v2 = vld [vmem:[%s17615_s21 + $0x88] sm:$0xff]  ;;  %v17277_v57 = vld [vmem:[%s17615_s21 + $0x98] sm:$0xff] }
 0x505   : > { %v5808_v21 = vpop.f32.mrf.mxu0  ;;  %v7212_v42 = vpack.c.bf16 %v7188_v40, %v7187_v15 }
 0x506   : > { %v6106_v29 = vpop.f32.mrf.mxu1  ;;  %v20073_v45 = vadd.f32 %v16307_v25, %v5889_v51  ;;  %v5887_v1 = vadd.f32 %v5808_v21, %v19886_v16  ;;  %16471 = vmatprep.mubr.msk.bf16.mxu0 %vm674_vm2, %v7211_v35  ;;  %v7120_v25 = vmul.f32 %v17275_v2, %v19949_v26  ;;  %v7121_v51 = vmul.f32 %v17276_v52, %v19949_v26 }
 0x507   : > { %v16274_v30 = vpop.f32.mrf.mxu0  ;;  %16472 = vmatmul.mubr.msk.bf16.gmra.mxu0 %vm674_vm2, %v7212_v42  ;;  %v7157_v21 = vadd.f32 %v19977_v13, %v7119_v0 }
 0x508   : > { %v16308_v62 = vpop.f32.mrf.mxu1  ;;  %v20076_v50 = vadd.f32 %v6106_v29, %v5887_v1  ;;  %v5890_v12 = vadd.f32 %v16274_v30, %v19891_v38  ;;  %v7122_v38 = vmul.f32 %v17277_v57, %v19949_v26  ;;  %v7158_v29 = vadd.f32 %v19977_v13, %v7120_v25 }
 0x509   : > { %v20084_v10 = vpop.f32.mrf.mxu0  ;;  %v7159_v1 = vadd.f32 %v19977_v13, %v7121_v51  ;;  %v7189_v42 = vmax.f32 %v7157_v21, 0.0  ;;  %v17278_v21 = vld [vmem:[%s17615_s21 + $0xa0] sm:$0xff] }
 0x50a   : > { %v20086_v16 = vpop.f32.mrf.mxu1  ;;  %v20093_v20 = vadd.f32 %v16308_v62, %v5890_v12  ;;  %v7160_v35 = vadd.f32 %v19977_v13, %v7122_v38  ;;  %v7190_v31 = vmax.f32 %v7158_v29, 0.0  ;;  %v7123_v29 = vmul.f32 %v17278_v21, %v19949_v26 }
 0x50b   : > { %v16277_v15 = vpop.f32.mrf.mxu0  ;;  %v7191_v62 = vmax.f32 %v7159_v1, 0.0 }
 0x50c   : > { %v16311_v40 = vpop.f32.mrf.mxu1  ;;  %v5893_v30 = vadd.f32 %v16277_v15, %v19898_v9  ;;  %v7192_v12 = vmax.f32 %v7160_v35, 0.0  ;;  %v7213_v25 = vpack.c.bf16 %v7190_v31, %v7189_v42  ;;  %v17279_v15 = vld [vmem:[%s17615_s21 + $0xa8] sm:$0xff]  ;;  %v17280_v35 = vld [vmem:[%s17615_s21 + $0xb0] sm:$0xff]  ;;  %v17281_v42 = vld [vmem:[%s17615_s21 + $0xb8] sm:$0xff] }
 0x50d   : > { %v5824_v2 = vpop.f32.mrf.mxu0 }
 0x50e   : > { %v6122_v52 = vpop.f32.mrf.mxu1  ;;  %v20100_v57 = vadd.f32 %v16311_v40, %v5893_v30  ;;  %v5891_v0 = vadd.f32 %v5824_v2, %v19903_v8  ;;  %v7214_v38 = vpack.c.bf16 %v7192_v12, %v7191_v62  ;;  %16475 = vmatprep.mubr.msk.bf16.mxu0 %vm674_vm2, %v7213_v25  ;;  %v7124_v40 = vmul.f32 %v17279_v15, %v19949_v26 }
 0x50f   : > { %v16278_v51 = vpop.f32.mrf.mxu0  ;;  %v7125_v30 = vmul.f32 %v17280_v35, %v19949_v26  ;;  %v7161_v2 = vadd.f32 %v19977_v13, %v7123_v29 }
 0x510   : > { %v16312_v22 = vpop.f32.mrf.mxu1  ;;  %v20103_v56 = vadd.f32 %v6122_v52, %v5891_v0  ;;  %v5894_v9 = vadd.f32 %v16278_v51, %v19908_v59  ;;  %16476 = vmatmul.mubr.msk.bf16.gmra.mxu0 %vm674_vm2, %v7214_v38  ;;  %v7126_v59 = vmul.f32 %v17281_v42, %v19949_v26  ;;  %v7162_v52 = vadd.f32 %v19977_v13, %v7124_v40 }
 0x511   : > { %v20111_v1 = vpop.f32.mrf.mxu0  ;;  %v7163_v0 = vadd.f32 %v19977_v13, %v7125_v30  ;;  %v7193_v38 = vmax.f32 %v7161_v2, 0.0  ;;  %v17282_v2 = vld [vmem:[%s17615_s21 + $0xc0] sm:$0xff] }
 0x512   : > { %23082 = vst [vmem:[#allocation26_spill] sm:$0xff] %v20111_v1  ;;  %v20113_v8 = vpop.f32.mrf.mxu1  ;;  %v20120_v31 = vadd.f32 %v16312_v22, %v5894_v9  ;;  %v7164_v25 = vadd.f32 %v19977_v13, %v7126_v59  ;;  %v7194_v21 = vmax.f32 %v7162_v52, 0.0  ;;  %v7127_v52 = vmul.f32 %v17282_v2, %v19949_v26 }
 0x513   : > { %23083 = vst [vmem:[#allocation27_spill] sm:$0xff] %v20113_v8  ;;  %v16281_v62 = vpop.f32.mrf.mxu0  ;;  %v7195_v22 = vmax.f32 %v7163_v0, 0.0 }
 0x514   : > { %v16315_v12 = vpop.f32.mrf.mxu1  ;;  %v5897_v51 = vadd.f32 %v16281_v62, %v19916_v3  ;;  %v7196_v9 = vmax.f32 %v7164_v25, 0.0  ;;  %v7215_v40 = vpack.c.bf16 %v7194_v21, %v7193_v38  ;;  %v17283_v62 = vld [vmem:[%s17615_s21 + $0xc8] sm:$0xff]  ;;  %v17284_v25 = vld [vmem:[%s17615_s21 + $0xd0] sm:$0xff]  ;;  %v17285_v38 = vld [vmem:[%s17615_s21 + $0xd8] sm:$0xff] }
 0x515   : > { %v5840_v15 = vpop.f32.mrf.mxu0 }
 0x516   : > { %v6138_v35 = vpop.f32.mrf.mxu1  ;;  %v20127_v42 = vadd.f32 %v16315_v12, %v5897_v51  ;;  %v5895_v29 = vadd.f32 %v5840_v15, %v19921_v47  ;;  %v7216_v59 = vpack.c.bf16 %v7196_v9, %v7195_v22  ;;  %16479 = vmatprep.mubr.msk.bf16.mxu0 %vm674_vm2, %v7215_v40  ;;  %v7128_v12 = vmul.f32 %v17283_v62, %v19949_v26 }
 0x517   : > { %v16282_v30 = vpop.f32.mrf.mxu0  ;;  %v7129_v51 = vmul.f32 %v17284_v25, %v19949_v26  ;;  %v7165_v15 = vadd.f32 %v19977_v13, %v7127_v52 }
 0x518   : > { %v16316_v46 = vpop.f32.mrf.mxu1  ;;  %v20130_v5 = vadd.f32 %v6138_v35, %v5895_v29  ;;  %v5898_v3 = vadd.f32 %v16282_v30, %v19926_v6  ;;  %16480 = vmatmul.mubr.msk.bf16.gmra.mxu0 %vm674_vm2, %v7216_v59  ;;  %v7130_v6 = vmul.f32 %v17285_v38, %v19949_v26  ;;  %v7166_v35 = vadd.f32 %v19977_v13, %v7128_v12 }
 0x519   : > { %v20138_v0 = vpop.f32.mrf.mxu0  ;;  %v7167_v29 = vadd.f32 %v19977_v13, %v7129_v51  ;;  %v7197_v59 = vmax.f32 %v7165_v15, 0.0  ;;  %v17286_v15 = vld [vmem:[%s17615_s21 + $0xe0] sm:$0xff] }
 0x51a   : > { %23084 = vst [vmem:[#allocation28_spill] sm:$0xff] %v20138_v0  ;;  %v20140_v47 = vpop.f32.mrf.mxu1  ;;  %v20147_v21 = vadd.f32 %v16316_v46, %v5898_v3  ;;  %v7168_v40 = vadd.f32 %v19977_v13, %v7130_v6  ;;  %v7198_v2 = vmax.f32 %v7166_v35, 0.0  ;;  %v7131_v35 = vmul.f32 %v17286_v15, %v19949_v26 }
 0x51b   : > { %23085 = vst [vmem:[#allocation29_spill] sm:$0xff] %v20140_v47  ;;  %v16285_v22 = vpop.f32.mrf.mxu0  ;;  %v7199_v46 = vmax.f32 %v7167_v29, 0.0 }
 0x51c   : > { %v16319_v9 = vpop.f32.mrf.mxu1  ;;  %v5901_v30 = vadd.f32 %v16285_v22, %v19932_v24  ;;  %v7200_v3 = vmax.f32 %v7168_v40, 0.0  ;;  %v7217_v12 = vpack.c.bf16 %v7198_v2, %v7197_v59  ;;  %v17287_v22 = vld [vmem:[%s17615_s21 + $0xe8] sm:$0xff]  ;;  %v17288_v40 = vld [vmem:[%s17615_s21 + $0xf0] sm:$0xff]  ;;  %v17289_v59 = vld [vmem:[%s17615_s21 + $0xf8] sm:$0xff] }
 0x51d   : > { %v5856_v62 = vpop.f32.mrf.mxu0 }
 0x51e   : > { %v6154_v25 = vpop.f32.mrf.mxu1  ;;  %v20154_v38 = vadd.f32 %v16319_v9, %v5901_v30  ;;  %v5899_v52 = vadd.f32 %v5856_v62, %v19937_v54  ;;  %v7218_v6 = vpack.c.bf16 %v7200_v3, %v7199_v46  ;;  %16483 = vmatprep.mubr.msk.bf16.mxu0 %vm674_vm2, %v7217_v12  ;;  %v7132_v9 = vmul.f32 %v17287_v22, %v19949_v26 }
 0x51f   : > { %v16286_v51 = vpop.f32.mrf.mxu0  ;;  %v7133_v30 = vmul.f32 %v17288_v40, %v19949_v26  ;;  %v7169_v62 = vadd.f32 %v19977_v13, %v7131_v35 }
 0x520   : > { %v16320_v47 = vpop.f32.mrf.mxu1  ;;  %v20157_v0 = vadd.f32 %v6154_v25, %v5899_v52  ;;  %v5902_v24 = vadd.f32 %v16286_v51, %v19942_v48  ;;  %16484 = vmatmul.mubr.msk.bf16.gmra.mxu0 %vm674_vm2, %v7218_v6  ;;  %v7134_v48 = vmul.f32 %v17289_v59, %v19949_v26  ;;  %v7170_v25 = vadd.f32 %v19977_v13, %v7132_v9 }
 0x521   : > { %v20165_v29 = vpop.f32.mrf.mxu0  ;;  %v7171_v52 = vadd.f32 %v19977_v13, %v7133_v30  ;;  %v7201_v6 = vmax.f32 %v7169_v62, 0.0 }
 0x522   : > { %23086 = vst [vmem:[#allocation8_spill] sm:$0xff] %v20165_v29  ;;  %v20167_v54 = vpop.f32.mrf.mxu1  ;;  %v20174_v2 = vadd.f32 %v16320_v47, %v5902_v24  ;;  %v7172_v12 = vadd.f32 %v19977_v13, %v7134_v48  ;;  %v7202_v15 = vmax.f32 %v7170_v25, 0.0 }
 0x523   : > { %23087 = vst [vmem:[#allocation30_spill] sm:$0xff] %v20167_v54  ;;  %v16325_v46 = vpop.f32.mrf.mxu0  ;;  %v7203_v26 = vmax.f32 %v7171_v52, 0.0 }
 0x524   : > { %v20178_v3 = vpop.f32.mrf.mxu1  ;;  %v20183_v51 = vadd.f32 %v16325_v46, %v19952_v14  ;;  %v7204_v47 = vmax.f32 %v7172_v12, 0.0  ;;  %v7219_v9 = vpack.c.bf16 %v7202_v15, %v7201_v6  ;;  %v20209_v46 = vld [vmem:[%s23003_s12 + $0x8] sm:$0xff]  }
 0x525   : > { %v6340_v22 = vpop.f32.mrf.mxu0  ;;  %16491 = vmatprep.subr.bf16.mxu1 %v20209_v46 }
 0x526   : > { %v20186_v24 = vadd.f32 %v6340_v22, %v19963_v27  ;;  %v20188_v35 = vpop.f32.mrf.mxu1  ;;  %v7220_v59 = vpack.c.bf16 %v7204_v47, %v7203_v26  ;;  %16487 = vmatprep.mubr.msk.bf16.mxu0 %vm674_vm2, %v7219_v9 }
 0x527   : > { %v20190_v40 = vpop.f32.mrf.mxu0 }
 0x528   : > { %16488 = vmatmul.mubr.msk.bf16.gmra.mxu0 %vm674_vm2, %v7220_v59  ;;  %v20196_v14 = vpop.f32.mrf.mxu1 }
 0x529   : > { %v20193_v13 = vpop.f32.mrf.mxu0 }
 0x52a   : > { %v20201_v62 = vpop.f32.mrf.mxu1 }
 0x52b   : > { %v16329_v30 = vpop.f32.mrf.mxu0 }
 0x52c   : > { %v20199_v48 = vadd.f32 %v16329_v30, %v19986_v11  ;;  %v20217_v11 = vpop.f32.mrf.mxu1 }
 0x52d   : > { %v6356_v27 = vpop.f32.mrf.mxu0 }
 0x52e   : > { %v20204_v25 = vadd.f32 %v6356_v27, %v19991_v32  ;;  %v20222_v26 = vpop.f32.mrf.mxu1 }
 0x52f   : > { %v16330_v52 = vpop.f32.mrf.mxu0 }
 0x530   : > { %v20212_v12 = vadd.f32 %v16330_v52, %v20006_v60  ;;  %v20232_v30 = vpop.f32.mrf.mxu1 }
 0x531   : > { %v20215_v6 = vpop.f32.mrf.mxu0 }
 0x533   : > { %v16333_v15 = vpop.f32.mrf.mxu0 }
 0x534   : > { %v20220_v22 = vadd.f32 %v16333_v15, %v20015_v49  ;;  %v20237_v15 = vpop.f32.mrf.mxu1 }
 0x535   : > { %v6372_v32 = vpop.f32.mrf.mxu0 }
 0x536   : > { %v20225_v47 = vadd.f32 %v6372_v32, %v20020_v28 }
 0x537   : > { %v16334_v9 = vpop.f32.mrf.mxu0 }
 0x538   : > { %v20228_v60 = vadd.f32 %v16334_v9, %v20035_v17  ;;  %v20247_v9 = vpop.f32.mrf.mxu1 }
 0x539   : > { %v20230_v59 = vpop.f32.mrf.mxu0 }
 0x53b   : > { %v16337_v27 = vpop.f32.mrf.mxu0 }
 0x53c   : > { %v20235_v52 = vadd.f32 %v16337_v27, %v20044_v43  ;;  %v20252_v27 = vpop.f32.mrf.mxu1 }
 0x53d   : > { %v6388_v49 = vpop.f32.mrf.mxu0 }
 0x53e   : > { %v20240_v54 = vadd.f32 %v6388_v49, %v20049_v4 }
 0x53f   : > { %v16338_v28 = vpop.f32.mrf.mxu0 }
 0x540   : > { %v20243_v32 = vadd.f32 %v16338_v28, %v20064_v44  ;;  %v20262_v28 = vpop.f32.mrf.mxu1 }
 0x541   : > { %v20245_v17 = vpop.f32.mrf.mxu0 }
 0x543   : > { %v16341_v29 = vpop.f32.mrf.mxu0 }
 0x544   : > { %v20250_v63 = vadd.f32 %v16341_v29, %v20073_v45  ;;  %v20267_v29 = vpop.f32.mrf.mxu1 }
 0x545   : > { %v6404_v43 = vpop.f32.mrf.mxu0 }
 0x546   : > { %v20255_v8 = vadd.f32 %v6404_v43, %v20076_v50 }
 0x547   : > { %v16342_v4 = vpop.f32.mrf.mxu0 }
 0x548   : > { %v20258_v49 = vadd.f32 %v16342_v4, %v20093_v20  ;;  %v20277_v4 = vpop.f32.mrf.mxu1 }
 0x549   : > { %v20260_v44 = vpop.f32.mrf.mxu0 }
 0x54a   : > { %23088 = vst [vmem:[#allocation31_spill] sm:$0xff] %v20258_v49  ;;  %23089 = vst [vmem:[#allocation32_spill] sm:$0xff] %v20260_v44 }
 0x54b   : > { %v16345_v1 = vpop.f32.mrf.mxu0 }
 0x54c   : > { %v20265_v58 = vadd.f32 %v16345_v1, %v20100_v57  ;;  %v20282_v1 = vpop.f32.mrf.mxu1 }
 0x54d   : > { %v6420_v45 = vpop.f32.mrf.mxu0 }
 0x54e   : > { %23090 = vst [vmem:[#allocation33_spill] sm:$0xff] %v20265_v58  ;;  %v20270_v39 = vadd.f32 %v6420_v45, %v20103_v56 }
 0x54f   : > { %v16346_v50 = vpop.f32.mrf.mxu0 }
 0x550   : > { %v20273_v43 = vadd.f32 %v16346_v50, %v20120_v31  ;;  %v20292_v50 = vpop.f32.mrf.mxu1 }
 0x551   : > { %v20275_v20 = vpop.f32.mrf.mxu0 }
 0x552   : > { %23091 = vst [vmem:[#allocation34_spill] sm:$0xff] %v20273_v43  ;;  %23092 = vst [vmem:[#allocation35_spill] sm:$0xff] %v20275_v20 }
 0x553   : > { %v16349_v49 = vpop.f32.mrf.mxu0 }
 0x554   : > { %v20280_v44 = vadd.f32 %v16349_v49, %v20127_v42  ;;  %v20297_v49 = vpop.f32.mrf.mxu1 }
 0x555   : > { %v6436_v57 = vpop.f32.mrf.mxu0 }
 0x556   : > { %23093 = vst [vmem:[#allocation36_spill] sm:$0xff] %v20280_v44  ;;  %v20285_v58 = vadd.f32 %v6436_v57, %v20130_v5  ;;  %v6172_v57 = vadd.f32 %v19961_v61, %v19966_v36  ;;  %v20319_v61 = vld [vmem:[%s22998_s7 + $0x1] ss:$0 sm:$0xff]  ;;  %v6765_v36 = vadd.f32 %v20188_v35, %v20186_v24 }
 0x557   : > { %v16350_v56 = vpop.f32.mrf.mxu0 }
 0x558   : > { %v20288_v45 = vadd.f32 %v16350_v56, %v20147_v21 }
 0x559   : > { %v20290_v31 = vpop.f32.mrf.mxu0 }
 0x55a   : > { %23094 = vst [vmem:[#allocation37_spill] sm:$0xff] %v20288_v45  ;;  %v6170_v45 = vadd.f32 %v19972_v19, %v19979_v23 }
 0x55b   : > { %v16353_v43 = vpop.f32.mrf.mxu0 }
 0x55c   : > { %v20295_v20 = vadd.f32 %v16353_v43, %v20154_v38  ;;  %v6767_v38 = vadd.f32 %v20178_v3, %v20183_v51  ;;  %v6470_v43 = vadd.f32 %v20190_v40, %v6172_v57 }
 0x55d   : > { %v6452_v42 = vpop.f32.mrf.mxu0 }
 0x55e   : > { %23095 = vst [vmem:[#allocation38_spill] sm:$0xff] %v20295_v20  ;;  %v20300_v44 = vadd.f32 %v6452_v42, %v20157_v0  ;;  %v20314_v20 = vpop.f32.mrf.mxu1  ;;  %v6768_v23 = vadd.f32 %v20196_v14, %v6470_v43 }
 0x55f   : > { %v16354_v5 = vpop.f32.mrf.mxu0 }
 0x560   : > { %v20305_v21 = vadd.f32 %v16354_v5, %v20174_v2  ;;  %v6468_v2 = vadd.f32 %v20193_v13, %v6170_v45  ;;  %v20325_v3 = vpop.f32.mrf.mxu1  ;;  %v20331_v5 = vld [vmem:[%s22999_s8 + $0x1] ss:$0 sm:$0xff]  ;;  %v6174_v13 = vadd.f32 %v19999_v33, %v20008_v53  ;;  %v6771_v45 = vadd.f32 %v20217_v11, %v20199_v48 }
 0x561   : > { %v20307_v56 = vpop.f32.mrf.mxu0 }
 0x562   : > { %23096 = vst [vmem:[#allocation39_spill] sm:$0xff] %v20305_v21  ;;  %v6766_v21 = vadd.f32 %v20201_v62, %v6468_v2  ;;  %v6769_v62 = vadd.f32 %v20222_v26, %v20204_v25  ;;  %v6472_v2 = vadd.f32 %v20215_v6, %v6174_v13  ;;  %v6772_v25 = vadd.f32 %v20232_v30, %v20212_v12 }
 0x563   : > { %v16393_v0 = vpop.f32.mrf.mxu0 }
 0x564   : > { %v7065_v42 = vadd.f32 %v16393_v0, %v6767_v38  ;;  %v20339_v38 = vpop.f32.mrf.mxu1 }
 0x565   : > { %v6936_v19 = vpop.f32.mrf.mxu0 }
 0x566   : > { %v7234_v51 = vmul.f32 %v20319_v61, %v7065_v42  ;;  %v7063_v40 = vadd.f32 %v6936_v19, %v6765_v36 }
 0x567   : > { %v16394_v57 = vpop.f32.mrf.mxu0 }
 0x568   : > { %v7232_v24 = vmul.f32 %v20319_v61, %v7063_v40  ;;  %v7066_v35 = vadd.f32 %v16394_v57, %v6768_v23  ;;  %v7272_v43 = vadd.f32 %v20331_v5, %v7234_v51  ;;  %v20349_v23 = vpop.f32.mrf.mxu1 }
 0x569   : > { %v6939_v14 = vpop.f32.mrf.mxu0 }
 0x56a   : > { %v7235_v0 = vmul.f32 %v20319_v61, %v7066_v35  ;;  %v7064_v36 = vadd.f32 %v6939_v14, %v6766_v21  ;;  %v7270_v19 = vadd.f32 %v20331_v5, %v7232_v24  ;;  %v7304_v51 = vmax.f32 %v7272_v43, 0.0 }
 0x56b   : > { %v16397_v42 = vpop.f32.mrf.mxu0  ;;  %v6770_v24 = vadd.f32 %v20237_v15, %v6472_v2  ;;  %v6178_v43 = vadd.f32 %v20028_v34, %v20037_v18 }
 0x56c   : > { %v7273_v33 = vadd.f32 %v20331_v5, %v7235_v0  ;;  %v7233_v53 = vmul.f32 %v20319_v61, %v7064_v36  ;;  %v7069_v48 = vadd.f32 %v16397_v42, %v6771_v45  ;;  %v7302_v35 = vmax.f32 %v7270_v19, 0.0  ;;  %v20361_v42 = vpop.f32.mrf.mxu1 }
 0x56d   : > { %v6952_v11 = vpop.f32.mrf.mxu0  ;;  %v6773_v19 = vadd.f32 %v20252_v27, %v20225_v47 }
 0x56e   : > { %v7305_v40 = vmax.f32 %v7273_v33, 0.0  ;;  %v7271_v21 = vadd.f32 %v20331_v5, %v7233_v53  ;;  %v7067_v57 = vadd.f32 %v6952_v11, %v6769_v62  ;;  %v7238_v6 = vmul.f32 %v20319_v61, %v7069_v48 }
 0x56f   : > { %v16398_v26 = vpop.f32.mrf.mxu0  ;;  %v6775_v62 = vadd.f32 %v20247_v9, %v20220_v22  ;;  %v6476_v53 = vadd.f32 %v20230_v59, %v6178_v43  ;;  %v6776_v11 = vadd.f32 %v20262_v28, %v20228_v60  ;;  %v6182_v60 = vadd.f32 %v20057_v55, %v20066_v37 }
 0x570   : > { %v7335_v13 = vpack.c.bf16 %v7305_v40, %v7304_v51  ;;  %v7303_v14 = vmax.f32 %v7271_v21, 0.0  ;;  %v7236_v45 = vmul.f32 %v20319_v61, %v7067_v57  ;;  %v7070_v0 = vadd.f32 %v16398_v26, %v6772_v25  ;;  %v20375_v51 = vpop.f32.mrf.mxu1 }
 0x571   : > { %v6955_v36 = vpop.f32.mrf.mxu0  ;;  %v7276_v33 = vadd.f32 %v20331_v5, %v7238_v6  ;;  %v6774_v25 = vadd.f32 %v20267_v29, %v6476_v53  ;;  %v6777_v43 = vadd.f32 %v20282_v1, %v20240_v54  ;;  %v6480_v55 = vadd.f32 %v20245_v17, %v6182_v60 }
 0x572   : > { %v7068_v12 = vadd.f32 %v6955_v36, %v6770_v24  ;;  %v7334_v30 = vpack.c.bf16 %v7303_v14, %v7302_v35  ;;  %v7239_v15 = vmul.f32 %v20319_v61, %v7070_v0  ;;  %v7274_v18 = vadd.f32 %v20331_v5, %v7236_v45  ;;  %v20386_v45 = vpop.f32.mrf.mxu1 }
 0x573   : > { %v16401_v2 = vpop.f32.mrf.mxu0  ;;  %v7308_v40 = vmax.f32 %v7276_v33, 0.0  ;;  %v6779_v14 = vadd.f32 %v20277_v4, %v20235_v52  ;;  %v5590_v36 = vadd.f32 %v19889_v7, %v19893_v41 }
 0x574   : > { %v7237_v48 = vmul.f32 %v20319_v61, %v7068_v12  ;;  %v7073_v34 = vadd.f32 %v16401_v2, %v6775_v62  ;;  %16425 = vmatprep.mubr.msk.bf16.mxu1 %vm674_vm2, %v7334_v30  ;;  %v7277_v22 = vadd.f32 %v20331_v5, %v7239_v15  ;;  %v7306_v28 = vmax.f32 %v7274_v18, 0.0  ;;  %v20400_v7 = vpop.f32.mrf.mxu1 }
 0x575   : > { %v6968_v9 = vpop.f32.mrf.mxu0  ;;  %16426 = vmatmul.mubr.msk.bf16.vlgmr.msra.gmra.mxu1 %vm674_vm2, %v7335_v13  ;;  %v5888_v33 = vadd.f32 %v20084_v10, %v5590_v36  ;;  %v6780_v2 = vadd.f32 %v20292_v50, %v20243_v32  ;;  %v6778_v10 = vadd.f32 %v20297_v49, %v6480_v55 }
 0x576   : > { %v7275_v47 = vadd.f32 %v20331_v5, %v7237_v48  ;;  %v7242_v59 = vmul.f32 %v20319_v61, %v7073_v34  ;;  %v7071_v27 = vadd.f32 %v6968_v9, %v6773_v19  ;;  %16492 = vmatpush3.bf16.msra.mxu1 %v20209_v46  ;;  %v7309_v21 = vmax.f32 %v7277_v22, 0.0 }
 0x577   : > { %v16402_v57 = vpop.f32.mrf.mxu0 }
 0x578   : > { %v7307_v6 = vmax.f32 %v7275_v47, 0.0  ;;  %v7240_v26 = vmul.f32 %v20319_v61, %v7071_v27  ;;  %v7074_v24 = vadd.f32 %v16402_v57, %v6776_v11  ;;  %v7337_v35 = vpack.c.bf16 %v7309_v21, %v7308_v40  ;;  %v20412_v27 = vpop.f32.mrf.mxu1  ;;  %v23097_v40 = vld [vmem:[#allocation21_spill] sm:$0xff]  ;;  %v23098_v21 = vld [vmem:[#allocation20_spill] sm:$0xff] }
 0x579   : > { %v6971_v13 = vpop.f32.mrf.mxu0  ;;  %v7280_v46 = vadd.f32 %v20331_v5, %v7242_v59  ;;  %v6186_v47 = vadd.f32 %v20086_v16, %v5888_v33  ;;  %v6783_v59 = vadd.f32 %v20314_v20, %v20250_v63  ;;  %v5594_v57 = vadd.f32 %v23098_v21, %v23097_v40  ;;  %v23100_v20 = vld [vmem:[#allocation26_spill] sm:$0xff] }
 0x57a   : > { %v7243_v0 = vmul.f32 %v20319_v61, %v7074_v24  ;;  %v7072_v29 = vadd.f32 %v6971_v13, %v6774_v25  ;;  %v7336_v62 = vpack.c.bf16 %v7307_v6, %v7306_v28  ;;  %v7278_v12 = vadd.f32 %v20331_v5, %v7240_v26  ;;  %v23099_v24 = vld [vmem:[#allocation32_spill] sm:$0xff] }
 0x57b   : > { %v16405_v37 = vpop.f32.mrf.mxu0  ;;  %v7312_v41 = vmax.f32 %v7280_v46, 0.0  ;;  %v6781_v26 = vadd.f32 %v20325_v3, %v20255_v8  ;;  %v6484_v16 = vadd.f32 %v23099_v24, %v6186_v47  ;;  %v5892_v28 = vadd.f32 %v23100_v20, %v5594_v57  ;;  %v23101_v46 = vld [vmem:[#allocation31_spill] sm:$0xff] }
 0x57c   : > { %v7281_v52 = vadd.f32 %v20331_v5, %v7243_v0  ;;  %v7241_v4 = vmul.f32 %v20319_v61, %v7072_v29  ;;  %v7077_v30 = vadd.f32 %v16405_v37, %v6779_v14  ;;  %16429 = vmatprep.mubr.msk.bf16.mxu1 %vm674_vm2, %v7336_v62  ;;  %v7310_v48 = vmax.f32 %v7278_v12, 0.0  ;;  %v6734_v29 = vpop.f32.mrf.mxu1 }
 0x57d   : > { %v6984_v15 = vpop.f32.mrf.mxu0  ;;  %16430 = vmatmul.mubr.msk.bf16.gmra.mxu1 %vm674_vm2, %v7337_v35  ;;  %v6784_v0 = vadd.f32 %v20339_v38, %v23101_v46  ;;  %v6782_v62 = vadd.f32 %v20349_v23, %v6484_v16  ;;  %v23105_v23 = vld [vmem:[#allocation22_spill] sm:$0xff] }
 0x57e   : > { %v7313_v54 = vmax.f32 %v7281_v52, 0.0  ;;  %v7279_v17 = vadd.f32 %v20331_v5, %v7241_v4  ;;  %v7075_v1 = vadd.f32 %v6984_v15, %v6777_v43  ;;  %v7246_v19 = vmul.f32 %v20319_v61, %v7077_v30  ;;  %v23102_v30 = vld [vmem:[#allocation27_spill] sm:$0xff] }
 0x57f   : > { %v16406_v53 = vpop.f32.mrf.mxu0  ;;  %v6190_v33 = vadd.f32 %v23102_v30, %v5892_v28 }
 0x580   : > { %v7339_v34 = vpack.c.bf16 %v7313_v54, %v7312_v41  ;;  %v7311_v18 = vmax.f32 %v7279_v17, 0.0  ;;  %v7244_v22 = vmul.f32 %v20319_v61, %v7075_v1  ;;  %v7078_v9 = vadd.f32 %v16406_v53, %v6780_v2  ;;  %v23103_v54 = vld [vmem:[#allocation33_spill] sm:$0xff]  ;;  %v16384_v1 = vpop.f32.mrf.mxu1 }
 0x581   : > { %v6987_v11 = vpop.f32.mrf.mxu0  ;;  %v7284_v49 = vadd.f32 %v20331_v5, %v7246_v19  ;;  %v6787_v17 = vadd.f32 %v20361_v42, %v23103_v54 }
 0x582   : > { %v7076_v32 = vadd.f32 %v6987_v11, %v6778_v10  ;;  %v7338_v50 = vpack.c.bf16 %v7311_v18, %v7310_v48  ;;  %v7247_v25 = vmul.f32 %v20319_v61, %v7078_v9  ;;  %v7282_v35 = vadd.f32 %v20331_v5, %v7244_v22  ;;  %v23104_v10 = vld [vmem:[#allocation23_spill] sm:$0xff]  ;;  %v6737_v57 = vpop.f32.mrf.mxu1 }
 0x583   : > { %v16409_v6 = vpop.f32.mrf.mxu0  ;;  %v7316_v43 = vmax.f32 %v7284_v49, 0.0  ;;  %v5598_v48 = vadd.f32 %v23105_v23, %v23104_v10  ;;  %v23106_v18 = vld [vmem:[#allocation35_spill] sm:$0xff] }
 0x584   : > { %v7245_v60 = vmul.f32 %v20319_v61, %v7076_v32  ;;  %v7081_v63 = vadd.f32 %v16409_v6, %v6783_v59  ;;  %16433 = vmatprep.mubr.msk.bf16.mxu1 %vm674_vm2, %v7338_v50  ;;  %v7285_v13 = vadd.f32 %v20331_v5, %v7247_v25  ;;  %v7314_v38 = vmax.f32 %v7282_v35, 0.0  ;;  %v23107_v50 = vld [vmem:[#allocation28_spill] sm:$0xff]  ;;  %v23108_v6 = vld [vmem:[#allocation34_spill] sm:$0xff] }
 0x585   : > { %v7000_v14 = vpop.f32.mrf.mxu0  ;;  %16434 = vmatmul.mubr.msk.bf16.gmra.mxu1 %vm674_vm2, %v7339_v34  ;;  %v6785_v34 = vadd.f32 %v20375_v51, %v20270_v39  ;;  %v6488_v22 = vadd.f32 %v23106_v18, %v6190_v33  ;;  %v5896_v40 = vadd.f32 %v23107_v50, %v5598_v48  ;;  %v23116_v50 = vld [vmem:[#allocation38_spill] sm:$0xff] }
 0x586   : > { %v7283_v8 = vadd.f32 %v20331_v5, %v7245_v60  ;;  %v7250_v3 = vmul.f32 %v20319_v61, %v7081_v63  ;;  %v7079_v36 = vadd.f32 %v7000_v14, %v6781_v26  ;;  %v7317_v55 = vmax.f32 %v7285_v13, 0.0  ;;  %v16387_v63 = vpop.f32.mrf.mxu1 }
 0x587   : > { %v16410_v37 = vpop.f32.mrf.mxu0  ;;  %v6788_v26 = vadd.f32 %v20386_v45, %v23108_v6  ;;  %v6786_v60 = vadd.f32 %v20400_v7, %v6488_v22 }
 0x588   : > { %v7315_v12 = vmax.f32 %v7283_v8, 0.0  ;;  %v7248_v52 = vmul.f32 %v20319_v61, %v7079_v36  ;;  %v7082_v4 = vadd.f32 %v16410_v37, %v6784_v0  ;;  %v7341_v15 = vpack.c.bf16 %v7317_v55, %v7316_v43  ;;  %v23109_v0 = vld [vmem:[#allocation29_spill] sm:$0xff]  ;;  %v23112_v37 = vld [vmem:[#allocation24_spill] sm:$0xff]  ;;  %v6750_v33 = vpop.f32.mrf.mxu1 }
 0x589   : > { %v7003_v41 = vpop.f32.mrf.mxu0  ;;  %v7288_v2 = vadd.f32 %v20331_v5, %v7250_v3  ;;  %v6194_v8 = vadd.f32 %v23109_v0, %v5896_v40  ;;  %v23110_v3 = vld [vmem:[#allocation36_spill] sm:$0xff]  ;;  %v23111_v55 = vld [vmem:[#allocation25_spill] sm:$0xff]  ;;  %v6795_v40 = vadd.f32 %v16387_v63, %v23116_v50 }
 0x58a   : > { %v7251_v19 = vmul.f32 %v20319_v61, %v7082_v4  ;;  %v7080_v53 = vadd.f32 %v7003_v41, %v6782_v62  ;;  %v7340_v11 = vpack.c.bf16 %v7315_v12, %v7314_v38  ;;  %v7286_v47 = vadd.f32 %v20331_v5, %v7248_v52  ;;  %v16388_v18 = vpop.f32.mrf.mxu1 }
 0x58b   : > { %v16413_v9 = vpop.f32.mrf.mxu0  ;;  %v7320_v49 = vmax.f32 %v7288_v2, 0.0  ;;  %v6791_v36 = vadd.f32 %v20412_v27, %v23110_v3  ;;  %v5602_v62 = vadd.f32 %v23112_v37, %v23111_v55  ;;  %v6789_v4 = vadd.f32 %v6734_v29, %v20285_v58  ;;  %v23113_v27 = vld [vmem:[#allocation8_spill] sm:$0xff] }
 0x58c   : > { %v7289_v42 = vadd.f32 %v20331_v5, %v7251_v19  ;;  %v7249_v59 = vmul.f32 %v20319_v61, %v7080_v53  ;;  %v7085_v32 = vadd.f32 %v16413_v9, %v6787_v17  ;;  %16437 = vmatprep.mubr.msk.bf16.mxu1 %vm674_vm2, %v7340_v11  ;;  %v7318_v20 = vmax.f32 %v7286_v47, 0.0  ;;  %v23114_v19 = vld [vmem:[#allocation37_spill] sm:$0xff]  ;;  %v23115_v47 = vld [vmem:[#allocation30_spill] sm:$0xff] }
 0x58d   : > { %v7016_v21 = vpop.f32.mrf.mxu0  ;;  %16438 = vmatmul.mubr.msk.bf16.gmra.mxu1 %vm674_vm2, %v7341_v15  ;;  %v6492_v30 = vadd.f32 %v20290_v31, %v6194_v8  ;;  %v5900_v41 = vadd.f32 %v23113_v27, %v5602_v62  ;;  %v6792_v53 = vadd.f32 %v16384_v1, %v23114_v19  ;;  %v7968_v19 = vld [vmem:[#allocation2 + $0x8] sm:$0xff] }
 0x58e   : > { %v7321_v25 = vmax.f32 %v7289_v42, 0.0  ;;  %v7287_v39 = vadd.f32 %v20331_v5, %v7249_v59  ;;  %v7083_v51 = vadd.f32 %v7016_v21, %v6785_v34  ;;  %v7254_v24 = vmul.f32 %v20319_v61, %v7085_v32 }
 0x58f   : > { %v16414_v16 = vpop.f32.mrf.mxu0  ;;  %v6790_v34 = vadd.f32 %v6737_v57, %v6492_v30  ;;  %v6198_v42 = vadd.f32 %v23115_v47, %v5900_v41 }
 0x590   : > { %v7343_v28 = vpack.c.bf16 %v7321_v25, %v7320_v49  ;;  %v7319_v35 = vmax.f32 %v7287_v39, 0.0  ;;  %v7252_v13 = vmul.f32 %v20319_v61, %v7083_v51  ;;  %v7086_v14 = vadd.f32 %v16414_v16, %v6788_v26  ;;  %v6753_v26 = vpop.f32.mrf.mxu1 }
 0x591   : > { %v7019_v46 = vpop.f32.mrf.mxu0  ;;  %v7292_v7 = vadd.f32 %v20331_v5, %v7254_v24  ;;  %v6793_v39 = vadd.f32 %v6750_v33, %v20300_v44  ;;  %v6496_v57 = vadd.f32 %v20307_v56, %v6198_v42  ;;  %v23117_v56 = vld [vmem:[#allocation39_spill] sm:$0xff] }
 0x592   : > { %v7084_v43 = vadd.f32 %v7019_v46, %v6786_v60  ;;  %v7342_v45 = vpack.c.bf16 %v7319_v35, %v7318_v20  ;;  %v7255_v12 = vmul.f32 %v20319_v61, %v7086_v14  ;;  %v7290_v54 = vadd.f32 %v20331_v5, %v7252_v13 }
 0x593   : > { %v16417_v52 = vpop.f32.mrf.mxu0  ;;  %v7324_v29 = vmax.f32 %v7292_v7, 0.0  ;;  %v6796_v14 = vadd.f32 %v16388_v18, %v23117_v56  ;;  %v6794_v46 = vadd.f32 %v6753_v26, %v6496_v57  ;;  %v20533_v57 = vld [vmem:[%s23001_s10] ss:$0 sm:$0xff] }
 0x594   : > { %v7253_v38 = vmul.f32 %v20319_v61, %v7084_v43  ;;  %v7089_v15 = vadd.f32 %v16417_v52, %v6791_v36  ;;  %16441 = vmatprep.mubr.msk.bf16.mxu1 %vm674_vm2, %v7342_v45  ;;  %v7293_v17 = vadd.f32 %v20331_v5, %v7255_v12  ;;  %v7322_v59 = vmax.f32 %v7290_v54, 0.0 }
 0x595   : > { %v7032_v2 = vpop.f32.mrf.mxu0  ;;  %16442 = vmatmul.mubr.msk.bf16.gmra.mxu1 %vm674_vm2, %v7343_v28 }
 0x596   : > { %v7291_v10 = vadd.f32 %v20331_v5, %v7253_v38  ;;  %v7258_v58 = vmul.f32 %v20319_v61, %v7089_v15  ;;  %v7087_v31 = vadd.f32 %v7032_v2, %v6789_v4  ;;  %v7325_v23 = vmax.f32 %v7293_v17, 0.0 }
 0x597   : > { %v16418_v48 = vpop.f32.mrf.mxu0 }
 0x598   : > { %v7323_v22 = vmax.f32 %v7291_v10, 0.0  ;;  %v7256_v9 = vmul.f32 %v20319_v61, %v7087_v31  ;;  %v7090_v11 = vadd.f32 %v16418_v48, %v6792_v53  ;;  %v7345_v1 = vpack.c.bf16 %v7325_v23, %v7324_v29  ;;  %v7969_v53 = vld [vmem:[#allocation2 + $0x10] sm:$0xff] }
 0x599   : > { %v7035_v32 = vpop.f32.mrf.mxu0  ;;  %v7296_v21 = vadd.f32 %v20331_v5, %v7258_v58  ;;  %v8000_v10 = vpack.c.bf16 %v7969_v53, %v7968_v19  ;;  %v7919_v58 = vld [vmem:[#allocation2 + $0xf] sm:$0xff] }
 0x59a   : > { %v7259_v49 = vmul.f32 %v20319_v61, %v7090_v11  ;;  %v7088_v25 = vadd.f32 %v7035_v32, %v6790_v34  ;;  %v7344_v6 = vpack.c.bf16 %v7323_v22, %v7322_v59  ;;  %v7294_v24 = vadd.f32 %v20331_v5, %v7256_v9  ;;  %v20507_v29 = vld [vmem:[%s23003_s12 + $0x10] sm:$0xff]   ;;  %v20513_v9 = vld [vmem:[%s23003_s12 + $0x18] sm:$0xff]  }
 0x59b   : > { %v16421_v51 = vpop.f32.mrf.mxu0  ;;  %v7328_v28 = vmax.f32 %v7296_v21, 0.0  ;;  %16559 = vmatprep.subr.bf16.mxu1 %v20507_v29 }
 0x59c   : > { %v7297_v16 = vadd.f32 %v20331_v5, %v7259_v49  ;;  %v7257_v60 = vmul.f32 %v20319_v61, %v7088_v25  ;;  %v7093_v20 = vadd.f32 %v16421_v51, %v6795_v40  ;;  %16445 = vmatprep.mubr.msk.bf16.mxu1 %vm674_vm2, %v7344_v6  ;;  %v7326_v3 = vmax.f32 %v7294_v24, 0.0  ;;  %v20538_v6 = vld [vmem:[%s23002_s11] ss:$0 sm:$0xff] }
 0x59d   : > { %v7048_v63 = vpop.f32.mrf.mxu0  ;;  %16446 = vmatmul.mubr.msk.bf16.gmra.mxu1 %vm674_vm2, %v7345_v1 }
 0x59e   : > { %v7329_v35 = vmax.f32 %v7297_v16, 0.0  ;;  %v7295_v13 = vadd.f32 %v20331_v5, %v7257_v60  ;;  %v7091_v44 = vadd.f32 %v7048_v63, %v6793_v39  ;;  %v7262_v0 = vmul.f32 %v20319_v61, %v7093_v20 }
 0x59f   : > { %v16422_v8 = vpop.f32.mrf.mxu0 }
 0x5a0   : > { %v7347_v36 = vpack.c.bf16 %v7329_v35, %v7328_v28  ;;  %v7327_v43 = vmax.f32 %v7295_v13, 0.0  ;;  %v7260_v45 = vmul.f32 %v20319_v61, %v7091_v44  ;;  %v7094_v55 = vadd.f32 %v16422_v8, %v6796_v14 }
 0x5a1   : > { %v7051_v37 = vpop.f32.mrf.mxu0  ;;  %v7300_v12 = vadd.f32 %v20331_v5, %v7262_v0 }
 0x5a2   : > { %v7092_v62 = vadd.f32 %v7051_v37, %v6794_v46  ;;  %v7346_v7 = vpack.c.bf16 %v7327_v43, %v7326_v3  ;;  %v7263_v52 = vmul.f32 %v20319_v61, %v7094_v55  ;;  %v7298_v4 = vadd.f32 %v20331_v5, %v7260_v45 }
 0x5a3   : > { %v7332_v15 = vmax.f32 %v7300_v12, 0.0 }
 0x5a4   : > { %v7261_v30 = vmul.f32 %v20319_v61, %v7092_v62  ;;  %16449 = vmatprep.mubr.msk.bf16.mxu1 %vm674_vm2, %v7346_v7  ;;  %v7301_v33 = vadd.f32 %v20331_v5, %v7263_v52  ;;  %v7330_v41 = vmax.f32 %v7298_v4, 0.0  ;;  %v17209_v61 = vld [vmem:[%s23003_s12] sm:$0xff]  }
 0x5a5   : > { %16450 = vmatmul.mubr.msk.bf16.gmra.mxu1 %vm674_vm2, %v7347_v36  ;;  %16525 = vmatprep.subr.bf16.mxu0 %v17209_v61 }
 0x5a6   : > { %v7299_v38 = vadd.f32 %v20331_v5, %v7261_v30  ;;  %v7333_v27 = vmax.f32 %v7301_v33, 0.0  ;;  %v7918_v5 = vld [vmem:[#allocation2 + $0x7] sm:$0xff]  ;;  %16526 = vmatpush3.bf16.msra.mxu0 %v17209_v61 }
 0x5a7   : > { %v7950_v31 = vpack.c.bf16 %v7919_v58, %v7918_v5  ;;  %16593 = vmatprep.subr.bf16.mxu0 %v20513_v9 }
 0x5a8   : > { %v7331_v54 = vmax.f32 %v7299_v38, 0.0  ;;  %v7349_v17 = vpack.c.bf16 %v7333_v27, %v7332_v15 }
 0x5a9   : > { %16527 = vmatprep.mubr.msk.bf16.mxu0 %vm442_vm1, %v7950_v31 }
 0x5aa   : > { %v7348_v2 = vpack.c.bf16 %v7331_v54, %v7330_v41 }
 0x5ac   : > { %16453 = vmatprep.mubr.msk.bf16.mxu1 %vm674_vm2, %v7348_v2 }
 0x5ad   : > { %16454 = vmatmul.mubr.msk.bf16.gmra.mxu1 %vm674_vm2, %v7349_v17 }
 0x5ae   : > { %16493 = vmatprep.mubr.msk.bf16.mxu1 %vm442_vm1, %v8000_v10 }
 0x5af   : > { %v16461_v23 = vpop.f32.mrf.mxu0 }
 0x5b1   : > { %v7649_v48 = vpop.f32.mrf.mxu0 }
 0x5b3   : > { %v16462_v34 = vpop.f32.mrf.mxu0 }
 0x5b5   : > { %v7652_v18 = vpop.f32.mrf.mxu0 }
 0x5b7   : > { %v16465_v22 = vpop.f32.mrf.mxu0 }
 0x5b9   : > { %v7665_v11 = vpop.f32.mrf.mxu0 }
 0x5bb   : > { %v16466_v47 = vpop.f32.mrf.mxu0 }
 0x5bd   : > { %v7668_v42 = vpop.f32.mrf.mxu0 }
 0x5bf   : > { %v16469_v59 = vpop.f32.mrf.mxu0 }
 0x5c1   : > { %v20516_v1 = vpop.f32.mrf.mxu0 }
 0x5c3   : > { %v20518_v32 = vpop.f32.mrf.mxu0 }
 0x5c5   : > { %v20520_v50 = vpop.f32.mrf.mxu0 }
 0x5c7   : > { %v20522_v40 = vpop.f32.mrf.mxu0 }
 0x5c9   : > { %v20524_v21 = vpop.f32.mrf.mxu0 }
 0x5cb   : > { %v20526_v49 = vpop.f32.mrf.mxu0 }
 0x5cd   : > { %v20528_v25 = vpop.f32.mrf.mxu0 }
 0x5d0   : > { %v20541_v60 = vpop.f32.mrf.mxu0 }
 0x5d2   : > { %v20547_v0 = vpop.f32.mrf.mxu0 }
 0x5d4   : > { %v20554_v7 = vpop.f32.mrf.mxu0 }
 0x5d6   : > { %v20561_v41 = vpop.f32.mrf.mxu0 }
 0x635   : > { %v16427_v39 = vpop.f32.mrf.mxu1 }
 0x636   : > { %v7658_v51 = vadd.f32 %v16461_v23, %v16427_v39  ;;  %v20568_v23 = vpop.f32.mrf.mxu0 }
 0x637   : > { %v7437_v26 = vpop.f32.mrf.mxu1 }
 0x638   : > { %v7786_v24 = vmul.f32 %v20533_v57, %v7658_v51  ;;  %v7650_v16 = vadd.f32 %v7649_v48, %v7437_v26 }
 0x639   : > { %v16428_v20 = vpop.f32.mrf.mxu1 }
 0x63a   : > { %v7824_v63 = vadd.f32 %v20538_v6, %v7786_v24  ;;  %v7784_v28 = vmul.f32 %v20533_v57, %v7650_v16  ;;  %v7661_v35 = vadd.f32 %v16462_v34, %v16428_v20 }
 0x63b   : > { %v7440_v13 = vpop.f32.mrf.mxu1 }
 0x63c   : > { %v7856_v44 = vmax.f32 %v7824_v63, 0.0  ;;  %v7822_v56 = vadd.f32 %v20538_v6, %v7784_v28  ;;  %v7787_v14 = vmul.f32 %v20533_v57, %v7661_v35  ;;  %v7653_v46 = vadd.f32 %v7652_v18, %v7440_v13 }
 0x63d   : > { %v16431_v43 = vpop.f32.mrf.mxu1 }
 0x63e   : > { %7888 = vst.msk [vmem:[#allocation2 + $0x48] sm:$0xff] %vm442_vm1, %v7856_v44  ;;  %v7854_v8 = vmax.f32 %v7822_v56, 0.0  ;;  %v7825_v3 = vadd.f32 %v20538_v6, %v7787_v14  ;;  %v7785_v36 = vmul.f32 %v20533_v57, %v7653_v46  ;;  %v7674_v45 = vadd.f32 %v16465_v22, %v16431_v43  ;;  %v20584_v56 = vpop.f32.mrf.mxu0  ;;  %v20598_v43 = vld [vmem:[%s23003_s12 + $0x28] sm:$0xff]  }
 0x63f   : > { %v7453_v62 = vpop.f32.mrf.mxu1 }
 0x640   : > { %7886 = vst.msk [vmem:[#allocation2 + $0x28] sm:$0xff] %vm442_vm1, %v7854_v8  ;;  %v7857_v55 = vmax.f32 %v7825_v3, 0.0  ;;  %v7823_v37 = vadd.f32 %v20538_v6, %v7785_v36  ;;  %v7790_v12 = vmul.f32 %v20533_v57, %v7674_v45  ;;  %v7666_v52 = vadd.f32 %v7665_v11, %v7453_v62  ;;  %v20593_v36 = vld [vmem:[%s23003_s12 + $0x20] sm:$0xff]  }
 0x641   : > { %v16432_v30 = vpop.f32.mrf.mxu1 }
 0x642   : > { %7889 = vst.msk [vmem:[#allocation2 + $0x50] sm:$0xff] %vm442_vm1, %v7857_v55  ;;  %v7855_v4 = vmax.f32 %v7823_v37, 0.0  ;;  %v7828_v33 = vadd.f32 %v20538_v6, %v7790_v12  ;;  %v7788_v38 = vmul.f32 %v20533_v57, %v7666_v52  ;;  %v7677_v15 = vadd.f32 %v16466_v47, %v16432_v30 }
 0x643   : > { %v7456_v27 = vpop.f32.mrf.mxu1 }
 0x644   : > { %7887 = vst.msk [vmem:[#allocation2 + $0x30] sm:$0xff] %vm442_vm1, %v7855_v4  ;;  %v7860_v54 = vmax.f32 %v7828_v33, 0.0  ;;  %v7826_v17 = vadd.f32 %v20538_v6, %v7788_v38  ;;  %v7791_v2 = vmul.f32 %v20533_v57, %v7677_v15  ;;  %v7669_v61 = vadd.f32 %v7668_v42, %v7456_v27  ;;  %v20615_v4 = vpop.f32.mrf.mxu0 }
 0x645   : > { %v16435_v19 = vpop.f32.mrf.mxu1  ;;  %v7972_v51 = vld [vmem:[#allocation2 + $0x48] sm:$0xff] }
 0x646   : > { %7892 = vst.msk [vmem:[#allocation2 + $0x88] sm:$0xff] %vm442_vm1, %v7860_v54  ;;  %v7858_v53 = vmax.f32 %v7826_v17, 0.0  ;;  %v7829_v5 = vadd.f32 %v20538_v6, %v7791_v2  ;;  %v7789_v10 = vmul.f32 %v20533_v57, %v7669_v61  ;;  %v7690_v58 = vadd.f32 %v16469_v59, %v16435_v19  ;;  %v7922_v3 = vld [vmem:[#allocation2 + $0x47] sm:$0xff] }
 0x647   : > { %v7469_v31 = vpop.f32.mrf.mxu1  ;;  %v7970_v42 = vld [vmem:[#allocation2 + $0x28] sm:$0xff] }
 0x648   : > { %7890 = vst.msk [vmem:[#allocation2 + $0x68] sm:$0xff] %vm442_vm1, %v7858_v53  ;;  %v7861_v48 = vmax.f32 %v7829_v5, 0.0  ;;  %v7827_v34 = vadd.f32 %v20538_v6, %v7789_v10  ;;  %v7794_v18 = vmul.f32 %v20533_v57, %v7690_v58  ;;  %v7682_v22 = vadd.f32 %v20516_v1, %v7469_v31  ;;  %v7920_v39 = vld [vmem:[#allocation2 + $0x27] sm:$0xff]  ;;  %v20628_v5 = vpop.f32.mrf.mxu0 }
 0x649   : > { %v7973_v11 = vld [vmem:[#allocation2 + $0x50] sm:$0xff]  ;;  %v16436_v47 = vpop.f32.mrf.mxu1 }
 0x64a   : > { %7893 = vst.msk [vmem:[#allocation2 + $0x90] sm:$0xff] %vm442_vm1, %v7861_v48  ;;  %v7859_v59 = vmax.f32 %v7827_v34, 0.0  ;;  %v7832_v26 = vadd.f32 %v20538_v6, %v7794_v18  ;;  %v7792_v24 = vmul.f32 %v20533_v57, %v7682_v22  ;;  %v7693_v16 = vadd.f32 %v20518_v32, %v16436_v47  ;;  %v7923_v28 = vld [vmem:[#allocation2 + $0x4f] sm:$0xff] }
 0x64b   : > { %v7971_v20 = vld [vmem:[#allocation2 + $0x30] sm:$0xff]  ;;  %v7472_v35 = vpop.f32.mrf.mxu1  ;;  %v20582_v44 = vpack.c.bf16 %v7973_v11, %v7972_v51  ;;  %v20604_v55 = vpack.c.bf16 %v7923_v28, %v7922_v3 }
 0x64c   : > { %v7921_v63 = vld [vmem:[#allocation2 + $0x2f] sm:$0xff]  ;;  %v20578_v13 = vpack.c.bf16 %v7971_v20, %v7970_v42  ;;  %7891 = vst.msk [vmem:[#allocation2 + $0x70] sm:$0xff] %vm442_vm1, %v7859_v59  ;;  %v7864_v14 = vmax.f32 %v7832_v26, 0.0  ;;  %v7830_v46 = vadd.f32 %v20538_v6, %v7792_v24  ;;  %v7795_v8 = vmul.f32 %v20533_v57, %v7693_v16  ;;  %v20650_v16 = vpop.f32.mrf.mxu0 }
 0x64d   : > { %v20580_v1 = vpack.c.bf16 %v7921_v63, %v7920_v39  ;;  %v7685_v32 = vadd.f32 %v20520_v50, %v7472_v35  ;;  %v16439_v45 = vpop.f32.mrf.mxu1 }
 0x64e   : > { %16494 = vmatmul.mubr.msk.bf16.vlgmr.msra.gmra.mxu1 %vm442_vm1, %v20578_v13  ;;  %7896 = vst.msk [vmem:[#allocation2 + $0xc8] sm:$0xff] %vm442_vm1, %v7864_v14  ;;  %v7862_v50 = vmax.f32 %v7830_v46, 0.0  ;;  %v7833_v37 = vadd.f32 %v20538_v6, %v7795_v8  ;;  %v7706_v12 = vadd.f32 %v20522_v40, %v16439_v45 }
 0x64f   : > { %16528 = vmatmul.mubr.msk.bf16.vlgmr.msra.gmra.mxu0 %vm442_vm1, %v20580_v1  ;;  %v7793_v62 = vmul.f32 %v20533_v57, %v7685_v32  ;;  %16560 = vmatpush3.bf16.msra.mxu1 %v20507_v29  ;;  %v7485_v52 = vpop.f32.mrf.mxu1  ;;  %v7974_v34 = vld [vmem:[#allocation2 + $0x68] sm:$0xff] }
 0x650   : > { %16497 = vmatprep.mubr.msk.bf16.mxu1 %vm442_vm1, %v20582_v44  ;;  %16531 = vmatprep.mubr.msk.bf16.mxu0 %vm442_vm1, %v20604_v55  ;;  %7894 = vst.msk [vmem:[#allocation2 + $0xa8] sm:$0xff] %vm442_vm1, %v7862_v50  ;;  %v7865_v30 = vmax.f32 %v7833_v37, 0.0  ;;  %v7798_v40 = vmul.f32 %v20533_v57, %v7706_v12  ;;  %v7698_v29 = vadd.f32 %v20524_v21, %v7485_v52  ;;  %v7976_v21 = vld [vmem:[#allocation2 + $0x88] sm:$0xff]  ;;  %v20664_v12 = vpop.f32.mrf.mxu0 }
 0x651   : > { %16594 = vmatpush3.bf16.msra.mxu0 %v20513_v9  ;;  %v7831_v33 = vadd.f32 %v20538_v6, %v7793_v62  ;;  %16627 = vmatprep.subr.bf16.mxu1 %v20593_v36  ;;  %v16440_v38 = vpop.f32.mrf.mxu1  ;;  %v7977_v17 = vld [vmem:[#allocation2 + $0x90] sm:$0xff]  ;;  %v7924_v18 = vld [vmem:[#allocation2 + $0x67] sm:$0xff] }
 0x652   : > { %16661 = vmatprep.subr.bf16.mxu0 %v20598_v43  ;;  %7897 = vst.msk [vmem:[#allocation2 + $0xd0] sm:$0xff] %vm442_vm1, %v7865_v30  ;;  %v7836_v27 = vadd.f32 %v20538_v6, %v7798_v40  ;;  %v7796_v9 = vmul.f32 %v20533_v57, %v7698_v29  ;;  %v7709_v54 = vadd.f32 %v20526_v49, %v16440_v38  ;;  %v7927_v2 = vld [vmem:[#allocation2 + $0x8f] sm:$0xff]  ;;  %v7926_v49 = vld [vmem:[#allocation2 + $0x87] sm:$0xff] }
 0x653   : > { %v7863_v15 = vmax.f32 %v7831_v33, 0.0  ;;  %v7488_v61 = vpop.f32.mrf.mxu1  ;;  %v7975_v19 = vld [vmem:[#allocation2 + $0x70] sm:$0xff]  ;;  %v20638_v42 = vpack.c.bf16 %v7977_v17, %v7976_v21  ;;  %v20640_v39 = vpack.c.bf16 %v7927_v2, %v7926_v49  ;;  %v16486_v21 = vpop.f32.mrf.mxu0 }
 0x654   : > { %v7925_v53 = vld [vmem:[#allocation2 + $0x6f] sm:$0xff]  ;;  %v7868_v10 = vmax.f32 %v7836_v27, 0.0  ;;  %v7834_v58 = vadd.f32 %v20538_v6, %v7796_v9  ;;  %v7799_v31 = vmul.f32 %v20533_v57, %v7709_v54  ;;  %v7701_v48 = vadd.f32 %v20528_v25, %v7488_v61 }
 0x655   : > { %7895 = vst.msk [vmem:[#allocation2 + $0xb0] sm:$0xff] %vm442_vm1, %v7863_v15  ;;  %v16443_v22 = vpop.f32.mrf.mxu1  ;;  %v20634_v11 = vpack.c.bf16 %v7975_v19, %v7974_v34  ;;  %v20636_v47 = vpack.c.bf16 %v7925_v53, %v7924_v18  ;;  %v7980_v62 = vld [vmem:[#allocation2 + $0xc8] sm:$0xff] }
 0x656   : > { %7900 = vst.msk [vmem:[#allocation2 + $0x108] sm:$0xff] %vm442_vm1, %v7868_v10  ;;  %v7866_v51 = vmax.f32 %v7834_v58, 0.0  ;;  %v7837_v59 = vadd.f32 %v20538_v6, %v7799_v31  ;;  %v7797_v26 = vmul.f32 %v20533_v57, %v7701_v48  ;;  %v7722_v25 = vadd.f32 %v20541_v60, %v16443_v22 }
 0x657   : > { %16498 = vmatmul.mubr.msk.bf16.gmra.mxu1 %vm442_vm1, %v20634_v11  ;;  %16532 = vmatmul.mubr.msk.bf16.gmra.mxu0 %vm442_vm1, %v20636_v47  ;;  %v7501_v24 = vpop.f32.mrf.mxu1  ;;  %v7978_v29 = vld [vmem:[#allocation2 + $0xa8] sm:$0xff] }
 0x658   : > { %7898 = vst.msk [vmem:[#allocation2 + $0xe8] sm:$0xff] %vm442_vm1, %v7866_v51  ;;  %v7869_v20 = vmax.f32 %v7837_v59, 0.0  ;;  %v7835_v63 = vadd.f32 %v20538_v6, %v7797_v26  ;;  %v7802_v28 = vmul.f32 %v20533_v57, %v7722_v25  ;;  %v7714_v35 = vadd.f32 %v20547_v0, %v7501_v24  ;;  %16501 = vmatprep.mubr.msk.bf16.mxu1 %vm442_vm1, %v20638_v42  ;;  %v7928_v38 = vld [vmem:[#allocation2 + $0xa7] sm:$0xff] }
 0x659   : > { %16535 = vmatprep.mubr.msk.bf16.mxu0 %vm442_vm1, %v20640_v39  ;;  %v16444_v60 = vpop.f32.mrf.mxu1  ;;  %v7981_v3 = vld [vmem:[#allocation2 + $0xd0] sm:$0xff] }
 0x65a   : > { %7901 = vst.msk [vmem:[#allocation2 + $0x110] sm:$0xff] %vm442_vm1, %v7869_v20  ;;  %v7867_v14 = vmax.f32 %v7835_v63, 0.0  ;;  %v7840_v46 = vadd.f32 %v20538_v6, %v7802_v28  ;;  %v7800_v8 = vmul.f32 %v20533_v57, %v7714_v35  ;;  %v7725_v32 = vadd.f32 %v20554_v7, %v16444_v60  ;;  %v7931_v45 = vld [vmem:[#allocation2 + $0xcf] sm:$0xff]  ;;  %v7930_v7 = vld [vmem:[#allocation2 + $0xc7] sm:$0xff] }
 0x65b   : > { %v7504_v50 = vpop.f32.mrf.mxu1  ;;  %v20674_v54 = vpack.c.bf16 %v7981_v3, %v7980_v62  ;;  %v20676_v17 = vpack.c.bf16 %v7931_v45, %v7930_v7 }
 0x65c   : > { %v7979_v0 = vld [vmem:[#allocation2 + $0xb0] sm:$0xff]  ;;  %7899 = vst.msk [vmem:[#allocation2 + $0xf0] sm:$0xff] %vm442_vm1, %v7867_v14  ;;  %v7872_v52 = vmax.f32 %v7840_v46, 0.0  ;;  %v7838_v30 = vadd.f32 %v20538_v6, %v7800_v8  ;;  %v7803_v33 = vmul.f32 %v20533_v57, %v7725_v32  ;;  %v7717_v40 = vadd.f32 %v20561_v41, %v7504_v50 }
 0x65d   : > { %v7929_v37 = vld [vmem:[#allocation2 + $0xaf] sm:$0xff]  ;;  %v16447_v15 = vpop.f32.mrf.mxu1  ;;  %v20670_v27 = vpack.c.bf16 %v7979_v0, %v7978_v29  ;;  %v7934_v8 = vld [vmem:[#allocation2 + $0x107] sm:$0xff] }
 0x65e   : > { %v20672_v9 = vpack.c.bf16 %v7929_v37, %v7928_v38  ;;  %7904 = vst.msk [vmem:[#allocation2 + $0x148] sm:$0xff] %vm442_vm1, %v7872_v52  ;;  %v7870_v2 = vmax.f32 %v7838_v30, 0.0  ;;  %v7841_v61 = vadd.f32 %v20538_v6, %v7803_v33  ;;  %v7801_v19 = vmul.f32 %v20533_v57, %v7717_v40  ;;  %v7984_v20 = vld [vmem:[#allocation2 + $0x108] sm:$0xff] }
 0x65f   : > { %v7738_v41 = vadd.f32 %v20568_v23, %v16447_v15  ;;  %16502 = vmatmul.mubr.msk.bf16.gmra.mxu1 %vm442_vm1, %v20670_v27  ;;  %v7517_v53 = vpop.f32.mrf.mxu1  ;;  %v7982_v14 = vld [vmem:[#allocation2 + $0xe8] sm:$0xff] }
 0x660   : > { %16536 = vmatmul.mubr.msk.bf16.gmra.mxu0 %vm442_vm1, %v20672_v9  ;;  %7902 = vst.msk [vmem:[#allocation2 + $0x128] sm:$0xff] %vm442_vm1, %v7870_v2  ;;  %v7873_v10 = vmax.f32 %v7841_v61, 0.0  ;;  %v7839_v58 = vadd.f32 %v20538_v6, %v7801_v19  ;;  %v7730_v48 = vadd.f32 %v20584_v56, %v7517_v53  ;;  %16505 = vmatprep.mubr.msk.bf16.mxu1 %vm442_vm1, %v20674_v54  ;;  %v7748_v56 = vpop.f32.mrf.mxu0  ;;  %v7932_v46 = vld [vmem:[#allocation2 + $0xe7] sm:$0xff] }
 0x661   : > { %v7806_v31 = vmul.f32 %v20533_v57, %v7738_v41  ;;  %16539 = vmatprep.mubr.msk.bf16.mxu0 %vm442_vm1, %v20676_v17  ;;  %v16448_v23 = vpop.f32.mrf.mxu1  ;;  %v7985_v51 = vld [vmem:[#allocation2 + $0x110] sm:$0xff] }
 0x662   : > { %7905 = vst.msk [vmem:[#allocation2 + $0x150] sm:$0xff] %vm442_vm1, %v7873_v10  ;;  %v7871_v34 = vmax.f32 %v7839_v58, 0.0  ;;  %v7804_v49 = vmul.f32 %v20533_v57, %v7730_v48  ;;  %v7741_v22 = vadd.f32 %v20615_v4, %v16448_v23  ;;  %v7935_v59 = vld [vmem:[#allocation2 + $0x10f] sm:$0xff]  ;;  %v20706_v45 = vpack.c.bf16 %v7985_v51, %v7984_v20  ;;  %v16489_v30 = vpop.f32.mrf.mxu0 }
 0x663   : > { %v7844_v18 = vadd.f32 %v20538_v6, %v7806_v31  ;;  %v7520_v26 = vpop.f32.mrf.mxu1  ;;  %v7983_v25 = vld [vmem:[#allocation2 + $0xf0] sm:$0xff]  ;;  %v20708_v50 = vpack.c.bf16 %v7935_v59, %v7934_v8 }
 0x664   : > { %v7933_v24 = vld [vmem:[#allocation2 + $0xef] sm:$0xff]  ;;  %7903 = vst.msk [vmem:[#allocation2 + $0x130] sm:$0xff] %vm442_vm1, %v7871_v34  ;;  %v7842_v28 = vadd.f32 %v20538_v6, %v7804_v49  ;;  %v7807_v35 = vmul.f32 %v20533_v57, %v7741_v22  ;;  %v7733_v60 = vadd.f32 %v20628_v5, %v7520_v26  ;;  %v20702_v32 = vpack.c.bf16 %v7983_v25, %v7982_v14  ;;  %v7761_v53 = vpop.f32.mrf.mxu0 }
 0x665   : > { %v7876_v63 = vmax.f32 %v7844_v18, 0.0  ;;  %v16451_v4 = vpop.f32.mrf.mxu1  ;;  %v20704_v3 = vpack.c.bf16 %v7933_v24, %v7932_v46  ;;  %v7988_v31 = vld [vmem:[#allocation2 + $0x148] sm:$0xff] }
 0x666   : > { %v7874_v0 = vmax.f32 %v7842_v28, 0.0  ;;  %v7845_v37 = vadd.f32 %v20538_v6, %v7807_v35  ;;  %v7805_v62 = vmul.f32 %v20533_v57, %v7733_v60  ;;  %v7754_v5 = vadd.f32 %v20650_v16, %v16451_v4  ;;  %v7938_v51 = vld [vmem:[#allocation2 + $0x147] sm:$0xff]  ;;  %v16490_v35 = vpop.f32.mrf.mxu0 }
 0x667   : > { %7908 = vst.msk [vmem:[#allocation2 + $0x188] sm:$0xff] %vm442_vm1, %v7876_v63  ;;  %16506 = vmatmul.mubr.msk.bf16.gmra.mxu1 %vm442_vm1, %v20702_v32  ;;  %v7533_v52 = vpop.f32.mrf.mxu1  ;;  %v7986_v49 = vld [vmem:[#allocation2 + $0x128] sm:$0xff] }
 0x668   : > { %16540 = vmatmul.mubr.msk.bf16.gmra.mxu0 %vm442_vm1, %v20704_v3  ;;  %7906 = vst.msk [vmem:[#allocation2 + $0x168] sm:$0xff] %vm442_vm1, %v7874_v0  ;;  %v7877_v33 = vmax.f32 %v7845_v37, 0.0  ;;  %v7843_v40 = vadd.f32 %v20538_v6, %v7805_v62  ;;  %v7810_v29 = vmul.f32 %v20533_v57, %v7754_v5  ;;  %v7746_v38 = vadd.f32 %v20664_v12, %v7533_v52  ;;  %v7936_v22 = vld [vmem:[#allocation2 + $0x127] sm:$0xff] }
 0x669   : > { %16509 = vmatprep.mubr.msk.bf16.mxu1 %vm442_vm1, %v20706_v45  ;;  %16543 = vmatprep.mubr.msk.bf16.mxu0 %vm442_vm1, %v20708_v50  ;;  %v16452_v16 = vpop.f32.mrf.mxu1  ;;  %v7989_v19 = vld [vmem:[#allocation2 + $0x150] sm:$0xff] }
 0x66a   : > { %7909 = vst.msk [vmem:[#allocation2 + $0x190] sm:$0xff] %vm442_vm1, %v7877_v33  ;;  %v7875_v7 = vmax.f32 %v7843_v40, 0.0  ;;  %v7848_v15 = vadd.f32 %v20538_v6, %v7810_v29  ;;  %v7808_v2 = vmul.f32 %v20533_v57, %v7746_v38  ;;  %v7757_v61 = vadd.f32 %v16486_v21, %v16452_v16  ;;  %v7939_v41 = vld [vmem:[#allocation2 + $0x14f] sm:$0xff]  ;;  %v7764_v33 = vpop.f32.mrf.mxu0 }
 0x66b   : > { %v7536_v10 = vpop.f32.mrf.mxu1  ;;  %v7987_v12 = vld [vmem:[#allocation2 + $0x130] sm:$0xff]  ;;  %v20736_v25 = vpack.c.bf16 %v7989_v19, %v7988_v31  ;;  %v20738_v24 = vpack.c.bf16 %v7939_v41, %v7938_v51 }
 0x66c   : > { %v7937_v58 = vld [vmem:[#allocation2 + $0x12f] sm:$0xff]  ;;  %7907 = vst.msk [vmem:[#allocation2 + $0x170] sm:$0xff] %vm442_vm1, %v7875_v7  ;;  %v7880_v48 = vmax.f32 %v7848_v15, 0.0  ;;  %v7846_v23 = vadd.f32 %v20538_v6, %v7808_v2  ;;  %v7811_v34 = vmul.f32 %v20533_v57, %v7757_v61  ;;  %v7749_v18 = vadd.f32 %v7748_v56, %v7536_v10 }
 0x66d   : > { %v16455_v59 = vpop.f32.mrf.mxu1  ;;  %v20732_v21 = vpack.c.bf16 %v7987_v12, %v7986_v49  ;;  %v20734_v26 = vpack.c.bf16 %v7937_v58, %v7936_v22 }
 0x66e   : > { %7912 = vst.msk [vmem:[#allocation2 + $0x1c8] sm:$0xff] %vm442_vm1, %v7880_v48  ;;  %v7878_v20 = vmax.f32 %v7846_v23, 0.0  ;;  %v7849_v63 = vadd.f32 %v20538_v6, %v7811_v34  ;;  %v7809_v28 = vmul.f32 %v20533_v57, %v7749_v18  ;;  %v7770_v56 = vadd.f32 %v16489_v30, %v16455_v59  ;;  %v7942_v31 = vld [vmem:[#allocation2 + $0x187] sm:$0xff] }
 0x66f   : > { %16510 = vmatmul.mubr.msk.bf16.gmra.mxu1 %vm442_vm1, %v20732_v21  ;;  %v7549_v60 = vpop.f32.mrf.mxu1  ;;  %v7990_v19 = vld [vmem:[#allocation2 + $0x168] sm:$0xff] }
 0x670   : > { %16544 = vmatmul.mubr.msk.bf16.gmra.mxu0 %vm442_vm1, %v20734_v26  ;;  %7910 = vst.msk [vmem:[#allocation2 + $0x1a8] sm:$0xff] %vm442_vm1, %v7878_v20  ;;  %v7881_v14 = vmax.f32 %v7849_v63, 0.0  ;;  %v7847_v46 = vadd.f32 %v20538_v6, %v7809_v28  ;;  %v7814_v8 = vmul.f32 %v20533_v57, %v7770_v56  ;;  %v7762_v4 = vadd.f32 %v7761_v53, %v7549_v60  ;;  %v7940_v41 = vld [vmem:[#allocation2 + $0x167] sm:$0xff] }
 0x671   : > { %16513 = vmatprep.mubr.msk.bf16.mxu1 %vm442_vm1, %v20736_v25  ;;  %16547 = vmatprep.mubr.msk.bf16.mxu0 %vm442_vm1, %v20738_v24  ;;  %v16456_v0 = vpop.f32.mrf.mxu1  ;;  %v7993_v30 = vld [vmem:[#allocation2 + $0x190] sm:$0xff]  ;;  %v7992_v53 = vld [vmem:[#allocation2 + $0x188] sm:$0xff] }
 0x672   : > { %7913 = vst.msk [vmem:[#allocation2 + $0x1d0] sm:$0xff] %vm442_vm1, %v7881_v14  ;;  %v7879_v37 = vmax.f32 %v7847_v46, 0.0  ;;  %v7852_v62 = vadd.f32 %v20538_v6, %v7814_v8  ;;  %v7812_v5 = vmul.f32 %v20533_v57, %v7762_v4  ;;  %v7773_v52 = vadd.f32 %v16490_v35, %v16456_v0  ;;  %v7943_v16 = vld [vmem:[#allocation2 + $0x18f] sm:$0xff] }
 0x673   : > { %v7552_v40 = vpop.f32.mrf.mxu1  ;;  %v7991_v29 = vld [vmem:[#allocation2 + $0x170] sm:$0xff]  ;;  %v20764_v58 = vpack.c.bf16 %v7993_v30, %v7992_v53  ;;  %v20769_v18 = vpack.c.bf16 %v7943_v16, %v7942_v31 }
 0x674   : > { %v7941_v38 = vld [vmem:[#allocation2 + $0x16f] sm:$0xff]  ;;  %7911 = vst.msk [vmem:[#allocation2 + $0x1b0] sm:$0xff] %vm442_vm1, %v7879_v37  ;;  %v7884_v7 = vmax.f32 %v7852_v62, 0.0  ;;  %v7850_v15 = vadd.f32 %v20538_v6, %v7812_v5  ;;  %v7815_v2 = vmul.f32 %v20533_v57, %v7773_v52  ;;  %v7765_v61 = vadd.f32 %v7764_v33, %v7552_v40 }
 0x675   : > { %v20760_v10 = vpack.c.bf16 %v7991_v29, %v7990_v19  ;;  %v20762_v12 = vpack.c.bf16 %v7941_v38, %v7940_v41  ;;  %v7996_v60 = vld [vmem:[#allocation2 + $0x1c8] sm:$0xff]  ;;  %v8450_v0 = vld [vmem:[#allocation2 + $0x11] sm:$0xff] }
 0x676   : > { %7916 = vst.msk [vmem:[#allocation2 + $0x208] sm:$0xff] %vm442_vm1, %v7884_v7  ;;  %v7882_v48 = vmax.f32 %v7850_v15, 0.0  ;;  %v7853_v23 = vadd.f32 %v20538_v6, %v7815_v2  ;;  %v7813_v34 = vmul.f32 %v20533_v57, %v7765_v61  ;;  %v7946_v14 = vld [vmem:[#allocation2 + $0x1c7] sm:$0xff]  ;;  %v8452_v38 = vld [vmem:[#allocation2 + $0x31] sm:$0xff] }
 0x677   : > { %16514 = vmatmul.mubr.msk.bf16.gmra.mxu1 %vm442_vm1, %v20760_v10  ;;  %v7994_v51 = vld [vmem:[#allocation2 + $0x1a8] sm:$0xff]  ;;  %v8454_v7 = vld [vmem:[#allocation2 + $0x51] sm:$0xff] }
 0x678   : > { %16548 = vmatmul.mubr.msk.bf16.gmra.mxu0 %vm442_vm1, %v20762_v12  ;;  %7914 = vst.msk [vmem:[#allocation2 + $0x1e8] sm:$0xff] %vm442_vm1, %v7882_v48  ;;  %v7885_v49 = vmax.f32 %v7853_v23, 0.0  ;;  %v7851_v22 = vadd.f32 %v20538_v6, %v7813_v34  ;;  %16517 = vmatprep.mubr.msk.bf16.mxu1 %vm442_vm1, %v20764_v58  ;;  %v7944_v59 = vld [vmem:[#allocation2 + $0x1a7] sm:$0xff]  ;;  %v20817_v61 = vld [vmem:[%s23003_s12 + $0x30] sm:$0xff]   ;;  %v20822_v19 = vld [vmem:[%s23003_s12 + $0x38] sm:$0xff]  }
 0x679   : > { %16551 = vmatprep.mubr.msk.bf16.mxu0 %vm442_vm1, %v20769_v18  ;;  %v7997_v20 = vld [vmem:[#allocation2 + $0x1d0] sm:$0xff] }
 0x67a   : > { %7917 = vst.msk [vmem:[#allocation2 + $0x210] sm:$0xff] %vm442_vm1, %v7885_v49  ;;  %v7883_v57 = vmax.f32 %v7851_v22, 0.0  ;;  %v7947_v56 = vld [vmem:[#allocation2 + $0x1cf] sm:$0xff]  ;;  %v20787_v46 = vpack.c.bf16 %v7997_v20, %v7996_v60 }
 0x67b   : > { %v7995_v63 = vld [vmem:[#allocation2 + $0x1b0] sm:$0xff]  ;;  %v20789_v8 = vpack.c.bf16 %v7947_v56, %v7946_v14 }
 0x67c   : > { %v7945_v28 = vld [vmem:[#allocation2 + $0x1af] sm:$0xff]  ;;  %7915 = vst.msk [vmem:[#allocation2 + $0x1f0] sm:$0xff] %vm442_vm1, %v7883_v57  ;;  %v20783_v35 = vpack.c.bf16 %v7995_v63, %v7994_v51 }
 0x67d   : > { %v20785_v6 = vpack.c.bf16 %v7945_v28, %v7944_v59  ;;  %v8449_v4 = vld [vmem:[#allocation2 + $0x9] sm:$0xff]  ;;  %v8456_v41 = vld [vmem:[#allocation2 + $0x71] sm:$0xff] }
 0x67e   : > { %v8481_v40 = vpack.c.bf16 %v8450_v0, %v8449_v4  ;;  %v8451_v29 = vld [vmem:[#allocation2 + $0x29] sm:$0xff]  ;;  %v8458_v31 = vld [vmem:[#allocation2 + $0x91] sm:$0xff] }
 0x67f   : > { %16518 = vmatmul.mubr.msk.bf16.gmra.mxu1 %vm442_vm1, %v20783_v35  ;;  %v7998_v37 = vld [vmem:[#allocation2 + $0x1e8] sm:$0xff]  ;;  %v20810_v15 = vpack.c.bf16 %v8452_v38, %v8451_v29  ;;  %v8462_v49 = vld [vmem:[#allocation2 + $0xd1] sm:$0xff] }
 0x680   : > { %16552 = vmatmul.mubr.msk.bf16.gmra.mxu0 %vm442_vm1, %v20785_v6  ;;  %16521 = vmatprep.mubr.msk.bf16.mxu1 %vm442_vm1, %v20787_v46  ;;  %v7948_v5 = vld [vmem:[#allocation2 + $0x1e7] sm:$0xff]  ;;  %v8464_v59 = vld [vmem:[#allocation2 + $0xf1] sm:$0xff] }
 0x681   : > { %16555 = vmatprep.mubr.msk.bf16.mxu0 %vm442_vm1, %v20789_v8  ;;  %v8453_v16 = vld [vmem:[#allocation2 + $0x49] sm:$0xff]  ;;  %v8466_v63 = vld [vmem:[#allocation2 + $0x111] sm:$0xff] }
 0x682   : > { %v20812_v2 = vpack.c.bf16 %v8454_v7, %v8453_v16  ;;  %v8457_v53 = vld [vmem:[#allocation2 + $0x89] sm:$0xff]  ;;  %v8468_v14 = vld [vmem:[#allocation2 + $0x131] sm:$0xff] }
 0x683   : > { %v7999_v62 = vld [vmem:[#allocation2 + $0x1f0] sm:$0xff]  ;;  %v20838_v23 = vpack.c.bf16 %v8458_v31, %v8457_v53 }
 0x684   : > { %v7949_v52 = vld [vmem:[#allocation2 + $0x1ef] sm:$0xff]  ;;  %v20799_v30 = vpack.c.bf16 %v7999_v62, %v7998_v37 }
 0x685   : > { %v20801_v33 = vpack.c.bf16 %v7949_v52, %v7948_v5  ;;  %v8461_v34 = vld [vmem:[#allocation2 + $0xc9] sm:$0xff]  ;;  %v8470_v0 = vld [vmem:[#allocation2 + $0x151] sm:$0xff] }
 0x686   : > { %v20850_v57 = vpack.c.bf16 %v8462_v49, %v8461_v34  ;;  %v8463_v51 = vld [vmem:[#allocation2 + $0xe9] sm:$0xff]  ;;  %v8472_v52 = vld [vmem:[#allocation2 + $0x171] sm:$0xff] }
 0x687   : > { %16522 = vmatmul.mubr.msk.bf16.gmra.mxu1 %vm442_vm1, %v20799_v30  ;;  %v8465_v20 = vld [vmem:[#allocation2 + $0x109] sm:$0xff]  ;;  %v20860_v28 = vpack.c.bf16 %v8464_v59, %v8463_v51  ;;  %v8474_v29 = vld [vmem:[#allocation2 + $0x191] sm:$0xff] }
 0x688   : > { %16556 = vmatmul.mubr.msk.bf16.gmra.mxu0 %vm442_vm1, %v20801_v33  ;;  %16561 = vmatprep.mubr.msk.bf16.mxu1 %vm442_vm1, %v8481_v40  ;;  %v20862_v56 = vpack.c.bf16 %v8466_v63, %v8465_v20  ;;  %v8467_v60 = vld [vmem:[#allocation2 + $0x129] sm:$0xff]  ;;  %v8478_v53 = vld [vmem:[#allocation2 + $0x1d1] sm:$0xff]  ;;  %v17216_v63 = vld [vmem:[%s23003_s12 + $0x40] sm:$0xff]  }
 0x689   : > { %16595 = vmatprep.mubr.msk.bf16.mxu0 %vm442_vm1, %v20580_v1  ;;  %v8455_v1 = vld [vmem:[#allocation2 + $0x69] sm:$0xff]  ;;  %v8490_v37 = vpack.c.bf16 %v8468_v14, %v8467_v60  ;;  %v8480_v34 = vld [vmem:[#allocation2 + $0x1f1] sm:$0xff] }
 0x68a   : > { %v20836_v48 = vpack.c.bf16 %v8456_v41, %v8455_v1  ;;  %v8469_v4 = vld [vmem:[#allocation2 + $0x149] sm:$0xff]  ;;  %v8476_v1 = vld [vmem:[#allocation2 + $0x1b1] sm:$0xff] }
 0x68b   : > { %v8491_v62 = vpack.c.bf16 %v8470_v0, %v8469_v4  ;;  %v8471_v5 = vld [vmem:[#allocation2 + $0x169] sm:$0xff] }
 0x68c   : > { %v8473_v40 = vld [vmem:[#allocation2 + $0x189] sm:$0xff]  ;;  %v8492_v38 = vpack.c.bf16 %v8472_v52, %v8471_v5 }
 0x68d   : > { %v8493_v16 = vpack.c.bf16 %v8474_v29, %v8473_v40  ;;  %v8475_v7 = vld [vmem:[#allocation2 + $0x1a9] sm:$0xff] }
 0x68e   : > { %v8477_v41 = vld [vmem:[#allocation2 + $0x1c9] sm:$0xff]  ;;  %v8494_v31 = vpack.c.bf16 %v8476_v1, %v8475_v7 }
 0x68f   : > { %16562 = vmatmul.mubr.msk.bf16.vlgmr.msra.gmra.mxu1 %vm442_vm1, %v20810_v15  ;;  %v8778_v49 = vld [vmem:[#allocation2 + $0x20f] sm:$0xff]  ;;  %v8777_v51 = vld [vmem:[#allocation2 + $0x207] sm:$0xff] }
 0x690   : > { %16596 = vmatmul.mubr.msk.bf16.vlgmr.msra.gmra.mxu0 %vm442_vm1, %v20604_v55  ;;  %16628 = vmatpush3.bf16.msra.mxu1 %v20593_v36  ;;  %v8459_v36 = vld [vmem:[#allocation2 + $0xa9] sm:$0xff]  ;;  %v20890_v20 = vpack.c.bf16 %v8778_v49, %v8777_v51 }
 0x691   : > { %16565 = vmatprep.mubr.msk.bf16.mxu1 %vm442_vm1, %v20812_v2  ;;  %16599 = vmatprep.mubr.msk.bf16.mxu0 %vm442_vm1, %v20636_v47  ;;  %v14766_v60 = vld [vmem:[%s23000_s9 + $0xc] sm:$0xf] }
 0x692   : > { %16662 = vmatpush3.bf16.msra.mxu0 %v20598_v43  ;;  %16695 = vmatprep.subr.bf16.mxu1 %v20817_v61  ;;  %v8460_v43 = vld [vmem:[#allocation2 + $0xb1] sm:$0xff]  ;;  %v9939_v14 = vld [vmem:[#allocation2 + $0x48] sm:$0xff]  ;;  %v10844_v5 = vsel %vm723_vm0, %v14766_v60, 0 }
 0x693   : > { %16729 = vmatprep.subr.bf16.mxu0 %v20822_v19  ;;  %v20848_v22 = vpack.c.bf16 %v8460_v43, %v8459_v36  ;;  %v8495_v36 = vpack.c.bf16 %v8478_v53, %v8477_v41  ;;  %v8479_v43 = vld [vmem:[#allocation2 + $0x1e9] sm:$0xff] }
 0x694   : > { %v8496_v59 = vpack.c.bf16 %v8480_v34, %v8479_v43 }
 0x697   : > { %16566 = vmatmul.mubr.msk.bf16.gmra.mxu1 %vm442_vm1, %v20836_v48 }
 0x698   : > { %16600 = vmatmul.mubr.msk.bf16.gmra.mxu0 %vm442_vm1, %v20640_v39  ;;  %16569 = vmatprep.mubr.msk.bf16.mxu1 %vm442_vm1, %v20838_v23 }
 0x699   : > { %16603 = vmatprep.mubr.msk.bf16.mxu0 %vm442_vm1, %v20672_v9 }
 0x69f   : > { %16570 = vmatmul.mubr.msk.bf16.gmra.mxu1 %vm442_vm1, %v20848_v22 }
 0x6a0   : > { %16604 = vmatmul.mubr.msk.bf16.gmra.mxu0 %vm442_vm1, %v20676_v17  ;;  %16573 = vmatprep.mubr.msk.bf16.mxu1 %vm442_vm1, %v20850_v57 }
 0x6a1   : > { %16607 = vmatprep.mubr.msk.bf16.mxu0 %vm442_vm1, %v20704_v3 }
 0x6a7   : > { %16574 = vmatmul.mubr.msk.bf16.gmra.mxu1 %vm442_vm1, %v20860_v28 }
 0x6a8   : > { %16608 = vmatmul.mubr.msk.bf16.gmra.mxu0 %vm442_vm1, %v20708_v50  ;;  %16577 = vmatprep.mubr.msk.bf16.mxu1 %vm442_vm1, %v20862_v56 }
 0x6a9   : > { %16611 = vmatprep.mubr.msk.bf16.mxu0 %vm442_vm1, %v20734_v26 }
 0x6af   : > { %16578 = vmatmul.mubr.msk.bf16.gmra.mxu1 %vm442_vm1, %v8490_v37 }
 0x6b0   : > { %16612 = vmatmul.mubr.msk.bf16.gmra.mxu0 %vm442_vm1, %v20738_v24  ;;  %16581 = vmatprep.mubr.msk.bf16.mxu1 %vm442_vm1, %v8491_v62 }
 0x6b1   : > { %16615 = vmatprep.mubr.msk.bf16.mxu0 %vm442_vm1, %v20762_v12 }
 0x6b7   : > { %16582 = vmatmul.mubr.msk.bf16.gmra.mxu1 %vm442_vm1, %v8492_v38 }
 0x6b8   : > { %16616 = vmatmul.mubr.msk.bf16.gmra.mxu0 %vm442_vm1, %v20769_v18  ;;  %16585 = vmatprep.mubr.msk.bf16.mxu1 %vm442_vm1, %v8493_v16 }
 0x6b9   : > { %16619 = vmatprep.mubr.msk.bf16.mxu0 %vm442_vm1, %v20785_v6 }
 0x6bf   : > { %16586 = vmatmul.mubr.msk.bf16.gmra.mxu1 %vm442_vm1, %v8494_v31 }
 0x6c0   : > { %16620 = vmatmul.mubr.msk.bf16.gmra.mxu0 %vm442_vm1, %v20789_v8  ;;  %16589 = vmatprep.mubr.msk.bf16.mxu1 %vm442_vm1, %v8495_v36 }
 0x6c1   : > { %16623 = vmatprep.mubr.msk.bf16.mxu0 %vm442_vm1, %v20801_v33 }
 0x6c7   : > { %16590 = vmatmul.mubr.msk.bf16.gmra.mxu1 %vm442_vm1, %v8496_v59 }
 0x6c8   : > { %16624 = vmatmul.mubr.msk.bf16.gmra.mxu0 %vm442_vm1, %v20890_v20  ;;  %16629 = vmatprep.mubr.msk.bf16.mxu1 %vm442_vm1, %v20578_v13  ;;  %v9076_v13 = vld [vmem:[#allocation2 + $0x210] sm:$0xff] }
 0x6c9   : > { %16663 = vmatprep.mubr.msk.bf16.mxu0 %vm442_vm1, %v20810_v15  ;;  %v9374_v15 = vld [vmem:[#allocation2 + $0x211] sm:$0xff] }
 0x6cf   : > { %16630 = vmatmul.mubr.msk.bf16.vlgmr.msra.gmra.mxu1 %vm442_vm1, %v20582_v44  ;;  %v9373_v44 = vld [vmem:[#allocation2 + $0x209] sm:$0xff] }
 0x6d0   : > { %16664 = vmatmul.mubr.msk.bf16.vlgmr.msra.gmra.mxu0 %vm442_vm1, %v20812_v2  ;;  %16696 = vmatpush3.bf16.msra.mxu1 %v20817_v61  ;;  %v9940_v61 = vld [vmem:[#allocation2 + $0x50] sm:$0xff] }
 0x6d1   : > { %16633 = vmatprep.mubr.msk.bf16.mxu1 %vm442_vm1, %v20634_v11  ;;  %16667 = vmatprep.mubr.msk.bf16.mxu0 %vm442_vm1, %v20836_v48  ;;  %v9971_v4 = vpack.c.bf16 %v9940_v61, %v9939_v14 }
 0x6d2   : > { %16730 = vmatpush3.bf16.msra.mxu0 %v20822_v19  ;;  %16763 = vmatprep.subr.bf16.mxu1 %v17216_v63  ;;  %v9075_v19 = vld [vmem:[#allocation2 + $0x208] sm:$0xff] }
 0x6d3   : > { %17179 = vmatprep.subr.msk.bf16.mxu0 %vm723_vm0, %v14766_v60 }
 0x6d7   : > { %16634 = vmatmul.mubr.msk.bf16.gmra.mxu1 %vm442_vm1, %v20638_v42 }
 0x6d8   : > { %16668 = vmatmul.mubr.msk.bf16.gmra.mxu0 %vm442_vm1, %v20838_v23  ;;  %16637 = vmatprep.mubr.msk.bf16.mxu1 %vm442_vm1, %v20670_v27 }
 0x6d9   : > { %16671 = vmatprep.mubr.msk.bf16.mxu0 %vm442_vm1, %v20848_v22 }
 0x6df   : > { %16638 = vmatmul.mubr.msk.bf16.gmra.mxu1 %vm442_vm1, %v20674_v54 }
 0x6e0   : > { %16672 = vmatmul.mubr.msk.bf16.gmra.mxu0 %vm442_vm1, %v20850_v57  ;;  %16641 = vmatprep.mubr.msk.bf16.mxu1 %vm442_vm1, %v20702_v32 }
 0x6e1   : > { %16675 = vmatprep.mubr.msk.bf16.mxu0 %vm442_vm1, %v20860_v28  ;;  %v20957_v28 = vpack.c.bf16 %v9076_v13, %v9075_v19 }
 0x6e7   : > { %16642 = vmatmul.mubr.msk.bf16.gmra.mxu1 %vm442_vm1, %v20706_v45 }
 0x6e8   : > { %16676 = vmatmul.mubr.msk.bf16.gmra.mxu0 %vm442_vm1, %v20862_v56  ;;  %16645 = vmatprep.mubr.msk.bf16.mxu1 %vm442_vm1, %v20732_v21  ;;  %v20959_v56 = vpack.c.bf16 %v9374_v15, %v9373_v44 }
 0x6e9   : > { %16679 = vmatprep.mubr.msk.bf16.mxu0 %vm442_vm1, %v8490_v37 }
 0x6ef   : > { %16646 = vmatmul.mubr.msk.bf16.gmra.mxu1 %vm442_vm1, %v20736_v25 }
 0x6f0   : > { %16680 = vmatmul.mubr.msk.bf16.gmra.mxu0 %vm442_vm1, %v8491_v62  ;;  %16649 = vmatprep.mubr.msk.bf16.mxu1 %vm442_vm1, %v20760_v10 }
 0x6f1   : > { %16683 = vmatprep.mubr.msk.bf16.mxu0 %vm442_vm1, %v8492_v38 }
 0x6f7   : > { %16650 = vmatmul.mubr.msk.bf16.gmra.mxu1 %vm442_vm1, %v20764_v58 }
 0x6f8   : > { %16684 = vmatmul.mubr.msk.bf16.gmra.mxu0 %vm442_vm1, %v8493_v16  ;;  %16653 = vmatprep.mubr.msk.bf16.mxu1 %vm442_vm1, %v20783_v35 }
 0x6f9   : > { %16687 = vmatprep.mubr.msk.bf16.mxu0 %vm442_vm1, %v8494_v31 }
 0x6ff   : > { %16654 = vmatmul.mubr.msk.bf16.gmra.mxu1 %vm442_vm1, %v20787_v46 }
 0x700   : > { %16688 = vmatmul.mubr.msk.bf16.gmra.mxu0 %vm442_vm1, %v8495_v36  ;;  %16657 = vmatprep.mubr.msk.bf16.mxu1 %vm442_vm1, %v20799_v30 }
 0x701   : > { %16691 = vmatprep.mubr.msk.bf16.mxu0 %vm442_vm1, %v8496_v59 }
 0x707   : > { %16658 = vmatmul.mubr.msk.bf16.gmra.mxu1 %vm442_vm1, %v20957_v28 }
 0x708   : > { %16692 = vmatmul.mubr.msk.bf16.gmra.mxu0 %vm442_vm1, %v20959_v56  ;;  %16697 = vmatprep.mubr.msk.bf16.mxu1 %vm442_vm1, %v20604_v55  ;;  %v20978_v55 = vld [vmem:[%s23000_s9 + $0x8] sm:$0xf] }
 0x709   : > { %16731 = vmatprep.mubr.msk.bf16.mxu0 %vm442_vm1, %v9971_v4 }
 0x70e   : > { %v16495_v0 = vpop.f32.mrf.mxu1 }
 0x70f   : > { %v16529_v37 = vpop.f32.mrf.mxu0  ;;  %16698 = vmatmul.mubr.msk.bf16.vlgmr.msra.gmra.mxu1 %vm442_vm1, %v20636_v47 }
 0x710   : > { %v20968_v62 = vadd.f32 %v16529_v37, %v16495_v0  ;;  %16732 = vmatmul.mubr.msk.bf16.vlgmr.msra.gmra.mxu0 %vm442_vm1, %v20634_v11  ;;  %v8107_v52 = vpop.f32.mrf.mxu1  ;;  %16764 = vmatpush3.bf16.msra.mxu1 %v17216_v63 }
 0x711   : > { %v8322_v40 = vpop.f32.mrf.mxu0  ;;  %16701 = vmatprep.mubr.msk.bf16.mxu1 %vm442_vm1, %v20640_v39  ;;  %16735 = vmatprep.mubr.msk.bf16.mxu0 %vm442_vm1, %v20638_v42 }
 0x712   : > { %v20982_v29 = vadd.f32 %v8322_v40, %v8107_v52  ;;  %v16496_v47 = vpop.f32.mrf.mxu1  ;;  %16798 = vmatpush3.bf16.msra.mxu0 %v10844_v5  ;;  %17180 = vmatprep.subr.msk.bf16.mxu1 %vm723_vm0, %v20978_v55 }
 0x713   : > { %v16530_v38 = vpop.f32.mrf.mxu0 }
 0x714   : > { %v20986_v11 = vadd.f32 %v16530_v38, %v16496_v47  ;;  %v8110_v16 = vpop.f32.mrf.mxu1 }
 0x715   : > { %v8325_v7 = vpop.f32.mrf.mxu0 }
 0x716   : > { %v20990_v1 = vadd.f32 %v8325_v7, %v8110_v16 }
 0x717   : > { %v16499_v41 = vpop.f32.mrf.mxu1  ;;  %v16533_v53 = vpop.f32.mrf.mxu0  ;;  %16702 = vmatmul.mubr.msk.bf16.gmra.mxu1 %vm442_vm1, %v20672_v9 }
 0x718   : > { %16736 = vmatmul.mubr.msk.bf16.gmra.mxu0 %vm442_vm1, %v20670_v27  ;;  %v20996_v42 = vadd.f32 %v16533_v53, %v16499_v41  ;;  %16705 = vmatprep.mubr.msk.bf16.mxu1 %vm442_vm1, %v20676_v17 }
 0x719   : > { %16739 = vmatprep.mubr.msk.bf16.mxu0 %vm442_vm1, %v20674_v54  ;;  %v8123_v39 = vpop.f32.mrf.mxu1  ;;  %v8338_v31 = vpop.f32.mrf.mxu0 }
 0x71a   : > { %v21002_v36 = vadd.f32 %v8338_v31, %v8123_v39 }
 0x71b   : > { %v16500_v43 = vpop.f32.mrf.mxu1  ;;  %v16534_v34 = vpop.f32.mrf.mxu0 }
 0x71c   : > { %v21004_v49 = vadd.f32 %v16534_v34, %v16500_v43 }
 0x71d   : > { %v8126_v9 = vpop.f32.mrf.mxu1  ;;  %v8341_v51 = vpop.f32.mrf.mxu0 }
 0x71e   : > { %v21006_v59 = vadd.f32 %v8341_v51, %v8126_v9 }
 0x71f   : > { %v16503_v27 = vpop.f32.mrf.mxu1  ;;  %16706 = vmatmul.mubr.msk.bf16.gmra.mxu1 %vm442_vm1, %v20704_v3 }
 0x720   : > { %v16537_v63 = vpop.f32.mrf.mxu0  ;;  %16740 = vmatmul.mubr.msk.bf16.gmra.mxu0 %vm442_vm1, %v20702_v32  ;;  %16709 = vmatprep.mubr.msk.bf16.mxu1 %vm442_vm1, %v20708_v50 }
 0x721   : > { %v21012_v54 = vadd.f32 %v16537_v63, %v16503_v27  ;;  %16743 = vmatprep.mubr.msk.bf16.mxu0 %vm442_vm1, %v20706_v45  ;;  %v8139_v17 = vpop.f32.mrf.mxu1 }
 0x722   : > { %v8354_v60 = vpop.f32.mrf.mxu0 }
 0x723   : > { %v21018_v13 = vadd.f32 %v8354_v60, %v8139_v17  ;;  %v16504_v44 = vpop.f32.mrf.mxu1 }
 0x724   : > { %v16538_v15 = vpop.f32.mrf.mxu0 }
 0x725   : > { %v21020_v61 = vadd.f32 %v16538_v15, %v16504_v44  ;;  %v8142_v3 = vpop.f32.mrf.mxu1 }
 0x726   : > { %v8357_v19 = vpop.f32.mrf.mxu0 }
 0x727   : > { %v21022_v14 = vadd.f32 %v8357_v19, %v8142_v3  ;;  %v16507_v32 = vpop.f32.mrf.mxu1  ;;  %16710 = vmatmul.mubr.msk.bf16.gmra.mxu1 %vm442_vm1, %v20734_v26  ;;  %v9672_v19 = vld [vmem:[#allocation2 + $0x22f] sm:$0xff] }
 0x728   : > { %v16541_v4 = vpop.f32.mrf.mxu0  ;;  %16744 = vmatmul.mubr.msk.bf16.gmra.mxu0 %vm442_vm1, %v20732_v21  ;;  %16713 = vmatprep.mubr.msk.bf16.mxu1 %vm442_vm1, %v20738_v24 }
 0x729   : > { %v21028_v45 = vadd.f32 %v16541_v4, %v16507_v32  ;;  %16747 = vmatprep.mubr.msk.bf16.mxu0 %vm442_vm1, %v20736_v25  ;;  %v8155_v50 = vpop.f32.mrf.mxu1  ;;  %v9969_v32 = vld [vmem:[#allocation2 + $0x228] sm:$0xff]  ;;  %v9970_v4 = vld [vmem:[#allocation2 + $0x230] sm:$0xff] }
 0x72a   : > { %v8370_v0 = vpop.f32.mrf.mxu0 }
 0x72b   : > { %v21034_v37 = vadd.f32 %v8370_v0, %v8155_v50  ;;  %v16508_v5 = vpop.f32.mrf.mxu1 }
 0x72c   : > { %v16542_v52 = vpop.f32.mrf.mxu0 }
 0x72d   : > { %v21036_v40 = vadd.f32 %v16542_v52, %v16508_v5  ;;  %v8158_v26 = vpop.f32.mrf.mxu1 }
 0x72e   : > { %v8373_v47 = vpop.f32.mrf.mxu0 }
 0x72f   : > { %v21038_v38 = vadd.f32 %v8373_v47, %v8158_v26  ;;  %v16511_v21 = vpop.f32.mrf.mxu1  ;;  %16714 = vmatmul.mubr.msk.bf16.gmra.mxu1 %vm442_vm1, %v20762_v12 }
 0x730   : > { %v16545_v16 = vpop.f32.mrf.mxu0  ;;  %16748 = vmatmul.mubr.msk.bf16.gmra.mxu0 %vm442_vm1, %v20760_v10  ;;  %16717 = vmatprep.mubr.msk.bf16.mxu1 %vm442_vm1, %v20769_v18 }
 0x731   : > { %v21044_v25 = vadd.f32 %v16545_v16, %v16511_v21  ;;  %16751 = vmatprep.mubr.msk.bf16.mxu0 %vm442_vm1, %v20764_v58  ;;  %v8171_v24 = vpop.f32.mrf.mxu1 }
 0x732   : > { %v8386_v7 = vpop.f32.mrf.mxu0 }
 0x733   : > { %v21050_v41 = vadd.f32 %v8386_v7, %v8171_v24  ;;  %v16512_v53 = vpop.f32.mrf.mxu1 }
 0x734   : > { %v16546_v39 = vpop.f32.mrf.mxu0 }
 0x735   : > { %v21052_v31 = vadd.f32 %v16546_v39, %v16512_v53  ;;  %v8174_v12 = vpop.f32.mrf.mxu1  ;;  %v23118_v53 = vld [vmem:[#allocation4_spill] sm:$0xff] }
 0x736   : > { %v8389_v43 = vpop.f32.mrf.mxu0 }
 0x737   : > { %v21054_v34 = vadd.f32 %v8389_v43, %v8174_v12  ;;  %v16515_v10 = vpop.f32.mrf.mxu1  ;;  %16718 = vmatmul.mubr.msk.bf16.gmra.mxu1 %vm442_vm1, %v20785_v6 }
 0x738   : > { %v16549_v9 = vpop.f32.mrf.mxu0  ;;  %16752 = vmatmul.mubr.msk.bf16.gmra.mxu0 %vm442_vm1, %v20783_v35  ;;  %16721 = vmatprep.mubr.msk.bf16.mxu1 %vm442_vm1, %v20789_v8 }
 0x739   : > { %v21060_v58 = vadd.f32 %v16549_v9, %v16515_v10  ;;  %16755 = vmatprep.mubr.msk.bf16.mxu0 %vm442_vm1, %v20787_v46  ;;  %v8187_v18 = vpop.f32.mrf.mxu1  ;;  %v9671_v46 = vld [vmem:[#allocation2 + $0x227] sm:$0xff] }
 0x73a   : > { %v8402_v51 = vpop.f32.mrf.mxu0  ;;  %v9688_v26 = vpack.c.bf16 %v9672_v19, %v9671_v46  ;;  %v23120_v46 = vld [vmem:[#allocation7_spill] sm:$0xff] }
 0x73b   : > { %v21066_v27 = vadd.f32 %v8402_v51, %v8187_v18  ;;  %v16516_v63 = vpop.f32.mrf.mxu1 }
 0x73c   : > { %v16550_v17 = vpop.f32.mrf.mxu0 }
 0x73d   : > { %v21068_v60 = vadd.f32 %v16550_v17, %v16516_v63  ;;  %v8190_v6 = vpop.f32.mrf.mxu1  ;;  %v11056_v17 = vsel %vm723_vm0, %v20978_v55, 0 }
 0x73e   : > { %v8405_v44 = vpop.f32.mrf.mxu0 }
 0x73f   : > { %v21070_v15 = vadd.f32 %v8405_v44, %v8190_v6  ;;  %v16519_v35 = vpop.f32.mrf.mxu1  ;;  %16722 = vmatmul.mubr.msk.bf16.gmra.mxu1 %vm442_vm1, %v20801_v33 }
 0x740   : > { %v16553_v3 = vpop.f32.mrf.mxu0  ;;  %16756 = vmatmul.mubr.msk.bf16.gmra.mxu0 %vm442_vm1, %v20799_v30  ;;  %16725 = vmatprep.mubr.msk.bf16.mxu1 %vm442_vm1, %v20890_v20  ;;  %v9986_v30 = vpack.c.bf16 %v9970_v4, %v9969_v32 }
 0x741   : > { %v21076_v8 = vadd.f32 %v16553_v3, %v16519_v35  ;;  %16759 = vmatprep.mubr.msk.bf16.mxu0 %vm442_vm1, %v20957_v28  ;;  %v8203_v50 = vpop.f32.mrf.mxu1  ;;  %v23119_v35 = vld [vmem:[#allocation3_spill] sm:$0xff] }
 0x742   : > { %v8418_v0 = vpop.f32.mrf.mxu0 }
 0x743   : > { %v21082_v5 = vadd.f32 %v8418_v0, %v8203_v50  ;;  %v16520_v33 = vpop.f32.mrf.mxu1 }
 0x744   : > { %v16554_v52 = vpop.f32.mrf.mxu0 }
 0x745   : > { %v21084_v47 = vadd.f32 %v16554_v52, %v16520_v33  ;;  %v8206_v21 = vpop.f32.mrf.mxu1 }
 0x746   : > { %v8421_v16 = vpop.f32.mrf.mxu0 }
 0x747   : > { %v21086_v24 = vadd.f32 %v8421_v16, %v8206_v21  ;;  %v16523_v20 = vpop.f32.mrf.mxu1  ;;  %16726 = vmatmul.mubr.msk.bf16.gmra.mxu1 %vm442_vm1, %v9688_v26  ;;  %v23121_v16 = vld [vmem:[#allocation5_spill] sm:$0xff] }
 0x748   : > { %v16557_v7 = vpop.f32.mrf.mxu0  ;;  %16760 = vmatmul.mubr.msk.bf16.gmra.mxu0 %vm442_vm1, %v9986_v30  ;;  %16765 = vmatprep.mubr.msk.bf16.mxu1 %vm442_vm1, %v20812_v2 }
 0x749   : > { %v21090_v28 = vadd.f32 %v16557_v7, %v16523_v20  ;;  %16799 = vmatprep.mubr.msk.bf16.mxu0 %vm674_vm2, %v23118_v53  ;;  %v8219_v39 = vpop.f32.mrf.mxu1 }
 0x74a   : > { %v8434_v12 = vpop.f32.mrf.mxu0 }
 0x74b   : > { %v21096_v43 = vadd.f32 %v8434_v12, %v8219_v39  ;;  %v16524_v10 = vpop.f32.mrf.mxu1  ;;  %v10248_v12 = vld [vmem:[#allocation2 + $0xf1] sm:$0xff] }
 0x74c   : > { %v16558_v9 = vpop.f32.mrf.mxu0 }
 0x74d   : > { %v21098_v18 = vadd.f32 %v16558_v9, %v16524_v10  ;;  %v8222_v51 = vpop.f32.mrf.mxu1 }
 0x74e   : > { %v8437_v63 = vpop.f32.mrf.mxu0 }
 0x74f   : > { %v21102_v6 = vadd.f32 %v8437_v63, %v8222_v51  ;;  %v16563_v44 = vpop.f32.mrf.mxu1  ;;  %16766 = vmatmul.mubr.msk.bf16.vlgmr.msra.gmra.mxu1 %vm442_vm1, %v20836_v48  ;;  %v10249_v51 = vld [vmem:[#allocation2 + $0x109] sm:$0xff]  ;;  %v10250_v63 = vld [vmem:[#allocation2 + $0x111] sm:$0xff] }
 0x750   : > { %v16597_v2 = vpop.f32.mrf.mxu0  ;;  %16800 = vmatmul.mubr.msk.bf16.vlgmr.msra.gmra.mxu0 %vm674_vm2, %v23119_v35  ;;  %v8717_v3 = vadd.f32 %v16563_v44, %v20968_v62  ;;  %16832 = vmatpush3.bf16.msra.mxu1 %v11056_v17 }
 0x751   : > { %16769 = vmatprep.mubr.msk.bf16.mxu1 %vm442_vm1, %v20838_v23  ;;  %16803 = vmatprep.mubr.msk.bf16.mxu0 %vm674_vm2, %v23120_v46  ;;  %v8588_v55 = vpop.f32.mrf.mxu1  ;;  %v10275_v46 = vpack.c.bf16 %v10250_v63, %v10249_v51  ;;  %v23125_v51 = vld [vmem:[#allocation10_spill] sm:$0xff] }
 0x752   : > { %v8886_v19 = vpop.f32.mrf.mxu0  ;;  %v21113_v32 = vadd.f32 %v16597_v2, %v8717_v3  ;;  %v8715_v4 = vadd.f32 %v8588_v55, %v20982_v29 }
 0x753   : > { %v16564_v50 = vpop.f32.mrf.mxu1 }
 0x754   : > { %v16598_v48 = vpop.f32.mrf.mxu0  ;;  %v21116_v0 = vadd.f32 %v8886_v19, %v8715_v4  ;;  %v8718_v33 = vadd.f32 %v16564_v50, %v20986_v11  ;;  %v23122_v11 = vld [vmem:[#allocation9_spill] sm:$0xff]  ;;  %v23123_v19 = vld [vmem:[#allocation6_spill] sm:$0xff] }
 0x755   : > { %v8591_v62 = vpop.f32.mrf.mxu1 }
 0x756   : > { %v8889_v52 = vpop.f32.mrf.mxu0  ;;  %v21119_v26 = vadd.f32 %v16598_v48, %v8718_v33  ;;  %v8716_v23 = vadd.f32 %v8591_v62, %v20990_v1 }
 0x757   : > { %v16567_v30 = vpop.f32.mrf.mxu1  ;;  %16770 = vmatmul.mubr.msk.bf16.gmra.mxu1 %vm442_vm1, %v20848_v22  ;;  %v10247_v22 = vld [vmem:[#allocation2 + $0xe9] sm:$0xff] }
 0x758   : > { %v16601_v21 = vpop.f32.mrf.mxu0  ;;  %16804 = vmatmul.mubr.msk.bf16.gmra.mxu0 %vm674_vm2, %v23121_v16  ;;  %v21126_v29 = vadd.f32 %v8889_v52, %v8716_v23  ;;  %v8721_v20 = vadd.f32 %v16567_v30, %v20996_v42  ;;  %16773 = vmatprep.mubr.msk.bf16.mxu1 %vm442_vm1, %v20850_v57  ;;  %v10274_v2 = vpack.c.bf16 %v10248_v12, %v10247_v22  ;;  %v10251_v52 = vld [vmem:[#allocation2 + $0x129] sm:$0xff]  ;;  %v10252_v23 = vld [vmem:[#allocation2 + $0x131] sm:$0xff] }
 0x759   : > { %16807 = vmatprep.mubr.msk.bf16.mxu0 %vm674_vm2, %v23122_v11  ;;  %v8604_v7 = vpop.f32.mrf.mxu1  ;;  %v10253_v16 = vld [vmem:[#allocation2 + $0x149] sm:$0xff] }
 0x75a   : > { %v8902_v1 = vpop.f32.mrf.mxu0  ;;  %v21133_v53 = vadd.f32 %v16601_v21, %v8721_v20  ;;  %v8719_v39 = vadd.f32 %v8604_v7, %v21002_v36  ;;  %v10254_v20 = vld [vmem:[#allocation2 + $0x151] sm:$0xff] }
 0x75b   : > { %v16568_v10 = vpop.f32.mrf.mxu1 }
 0x75c   : > { %v16602_v9 = vpop.f32.mrf.mxu0  ;;  %v21136_v17 = vadd.f32 %v8902_v1, %v8719_v39  ;;  %v8722_v42 = vadd.f32 %v16568_v10, %v21004_v49  ;;  %v23124_v49 = vld [vmem:[#allocation11_spill] sm:$0xff]  ;;  %v10276_v39 = vpack.c.bf16 %v10252_v23, %v10251_v52  ;;  %v10277_v10 = vpack.c.bf16 %v10254_v20, %v10253_v16  ;;  %v23127_v16 = vld [vmem:[#allocation12_spill] sm:$0xff] }
 0x75d   : > { %v8607_v57 = vpop.f32.mrf.mxu1 }
 0x75e   : > { %v8905_v44 = vpop.f32.mrf.mxu0  ;;  %v21139_v35 = vadd.f32 %v16602_v9, %v8722_v42  ;;  %v8720_v3 = vadd.f32 %v8607_v57, %v21006_v59 }
 0x75f   : > { %v16571_v55 = vpop.f32.mrf.mxu1  ;;  %16774 = vmatmul.mubr.msk.bf16.gmra.mxu1 %vm442_vm1, %v10274_v2 }
 0x760   : > { %v16605_v36 = vpop.f32.mrf.mxu0  ;;  %16808 = vmatmul.mubr.msk.bf16.gmra.mxu0 %vm674_vm2, %v23123_v19  ;;  %v21145_v4 = vadd.f32 %v8905_v44, %v8720_v3  ;;  %v8725_v50 = vadd.f32 %v16571_v55, %v21012_v54  ;;  %16777 = vmatprep.mubr.msk.bf16.mxu1 %vm442_vm1, %v10275_v46  ;;  %v10255_v3 = vld [vmem:[#allocation2 + $0x169] sm:$0xff]  ;;  %v10256_v46 = vld [vmem:[#allocation2 + $0x171] sm:$0xff] }
 0x761   : > { %16811 = vmatprep.mubr.msk.bf16.mxu0 %vm674_vm2, %v23124_v49  ;;  %v8620_v48 = vpop.f32.mrf.mxu1  ;;  %v10257_v19 = vld [vmem:[#allocation2 + $0x189] sm:$0xff] }
 0x762   : > { %v8918_v33 = vpop.f32.mrf.mxu0  ;;  %v21151_v59 = vadd.f32 %v16605_v36, %v8725_v50  ;;  %v8723_v62 = vadd.f32 %v8620_v48, %v21018_v13  ;;  %v10258_v50 = vld [vmem:[#allocation2 + $0x191] sm:$0xff] }
 0x763   : > { %v16572_v30 = vpop.f32.mrf.mxu1 }
 0x764   : > { %v16606_v21 = vpop.f32.mrf.mxu0  ;;  %v21154_v11 = vadd.f32 %v8918_v33, %v8723_v62  ;;  %v8726_v54 = vadd.f32 %v16572_v30, %v21020_v61  ;;  %v23126_v61 = vld [vmem:[#allocation13_spill] sm:$0xff]  ;;  %v10278_v62 = vpack.c.bf16 %v10256_v46, %v10255_v3  ;;  %v10279_v30 = vpack.c.bf16 %v10258_v50, %v10257_v19  ;;  %v23131_v50 = vld [vmem:[#allocation14_spill] sm:$0xff] }
 0x765   : > { %v8623_v7 = vpop.f32.mrf.mxu1 }
 0x766   : > { %v8921_v1 = vpop.f32.mrf.mxu0  ;;  %v21157_v22 = vadd.f32 %v16606_v21, %v8726_v54  ;;  %v8724_v12 = vadd.f32 %v8623_v7, %v21022_v14 }
 0x767   : > { %v16575_v9 = vpop.f32.mrf.mxu1  ;;  %16778 = vmatmul.mubr.msk.bf16.gmra.mxu1 %vm442_vm1, %v10276_v39 }
 0x768   : > { %v16609_v13 = vpop.f32.mrf.mxu0  ;;  %16812 = vmatmul.mubr.msk.bf16.gmra.mxu0 %vm674_vm2, %v23125_v51  ;;  %v21163_v63 = vadd.f32 %v8921_v1, %v8724_v12  ;;  %v8729_v42 = vadd.f32 %v16575_v9, %v21028_v45  ;;  %16781 = vmatprep.mubr.msk.bf16.mxu1 %vm442_vm1, %v10277_v10  ;;  %v10259_v12 = vld [vmem:[#allocation2 + $0x1a9] sm:$0xff]  ;;  %v10260_v10 = vld [vmem:[#allocation2 + $0x1b1] sm:$0xff] }
 0x769   : > { %16815 = vmatprep.mubr.msk.bf16.mxu0 %vm674_vm2, %v23126_v61  ;;  %v8636_v57 = vpop.f32.mrf.mxu1  ;;  %v10261_v51 = vld [vmem:[#allocation2 + $0x1c9] sm:$0xff] }
 0x76a   : > { %v8934_v44 = vpop.f32.mrf.mxu0  ;;  %v21169_v14 = vadd.f32 %v16609_v13, %v8729_v42  ;;  %v8727_v2 = vadd.f32 %v8636_v57, %v21034_v37  ;;  %v10262_v42 = vld [vmem:[#allocation2 + $0x1d1] sm:$0xff] }
 0x76b   : > { %v16576_v55 = vpop.f32.mrf.mxu1 }
 0x76c   : > { %v16610_v36 = vpop.f32.mrf.mxu0  ;;  %v21172_v49 = vadd.f32 %v8934_v44, %v8727_v2  ;;  %v8730_v45 = vadd.f32 %v16576_v55, %v21036_v40  ;;  %v23128_v40 = vld [vmem:[#allocation15_spill] sm:$0xff]  ;;  %v10281_v55 = vpack.c.bf16 %v10262_v42, %v10261_v51 }
 0x76d   : > { %v8639_v48 = vpop.f32.mrf.mxu1 }
 0x76e   : > { %v8937_v33 = vpop.f32.mrf.mxu0  ;;  %v21175_v52 = vadd.f32 %v16610_v36, %v8730_v45  ;;  %v8728_v23 = vadd.f32 %v8639_v48, %v21038_v38  ;;  %v17290_v45 = vld [vmem:[%s17615_s21] sm:$0xff]  ;;  %v17291_v48 = vld [vmem:[%s17615_s21 + $0x8] sm:$0xff] }
 0x76f   : > { %v16579_v21 = vpop.f32.mrf.mxu1  ;;  %16782 = vmatmul.mubr.msk.bf16.gmra.mxu1 %vm442_vm1, %v10278_v62 }
 0x770   : > { %v16613_v37 = vpop.f32.mrf.mxu0  ;;  %16816 = vmatmul.mubr.msk.bf16.gmra.mxu0 %vm674_vm2, %v23127_v16  ;;  %v21181_v20 = vadd.f32 %v8937_v33, %v8728_v23  ;;  %v8733_v54 = vadd.f32 %v16579_v21, %v21044_v25  ;;  %16785 = vmatprep.mubr.msk.bf16.mxu1 %vm442_vm1, %v10279_v30  ;;  %v21193_v25 = vld [vmem:[%s22998_s7 + $0x2] ss:$0 sm:$0xff] }
 0x771   : > { %16819 = vmatprep.mubr.msk.bf16.mxu0 %vm674_vm2, %v23128_v40  ;;  %v8652_v7 = vpop.f32.mrf.mxu1  ;;  %v10546_v33 = vmul.f32 %v17291_v48, %v21193_v25  ;;  %v21219_v23 = vld [vmem:[%s22999_s8 + $0x2] ss:$0 sm:$0xff]  ;;  %v10267_v48 = vld [vmem:[#allocation2 + $0x229] sm:$0xff] }
 0x772   : > { %v8950_v1 = vpop.f32.mrf.mxu0  ;;  %v21187_v38 = vadd.f32 %v16613_v37, %v8733_v54  ;;  %v8731_v39 = vadd.f32 %v8652_v7, %v21050_v41  ;;  %v10280_v41 = vpack.c.bf16 %v10260_v10, %v10259_v12  ;;  %v10263_v54 = vld [vmem:[#allocation2 + $0x1e9] sm:$0xff] }
 0x773   : > { %v16580_v9 = vpop.f32.mrf.mxu1 }
 0x774   : > { %v16614_v13 = vpop.f32.mrf.mxu0  ;;  %v21195_v61 = vadd.f32 %v8950_v1, %v8731_v39  ;;  %v8734_v57 = vadd.f32 %v16580_v9, %v21052_v31  ;;  %v10545_v31 = vmul.f32 %v17290_v45, %v21193_v25  ;;  %v10584_v39 = vadd.f32 %v21219_v23, %v10546_v33  ;;  %v10268_v33 = vld [vmem:[#allocation2 + $0x231] sm:$0xff] }
 0x775   : > { %v8655_v44 = vpop.f32.mrf.mxu1 }
 0x776   : > { %v21198_v2 = vpop.f32.mrf.mxu0  ;;  %v21200_v3 = vadd.f32 %v16614_v13, %v8734_v57  ;;  %v21203_v46 = vadd.f32 %v8655_v44, %v21054_v34  ;;  %v23132_v34 = vld [vmem:[#allocation17_spill] sm:$0xff]  ;;  %v10583_v1 = vadd.f32 %v21219_v23, %v10545_v31  ;;  %v10616_v45 = vmax.f32 %v10584_v39, 0.0  ;;  %v23136_v31 = vld [vmem:[#allocation19_spill] sm:$0xff] }
 0x777   : > { %23129 = vst [vmem:[#allocation21_spill] sm:$0xff] %v21198_v2  ;;  %v16583_v36 = vpop.f32.mrf.mxu1  ;;  %16786 = vmatmul.mubr.msk.bf16.gmra.mxu1 %vm442_vm1, %v10280_v41  ;;  %v17292_v57 = vld [vmem:[%s17615_s21 + $0x10] sm:$0xff]  ;;  %v17293_v41 = vld [vmem:[%s17615_s21 + $0x18] sm:$0xff] }
 0x778   : > { %23130 = vst [vmem:[#allocation20_spill] sm:$0xff] %v21203_v46  ;;  %v16617_v19 = vpop.f32.mrf.mxu0  ;;  %16820 = vmatmul.mubr.msk.bf16.gmra.mxu0 %vm674_vm2, %v23131_v50  ;;  %v8737_v62 = vadd.f32 %v16583_v36, %v21060_v58  ;;  %16789 = vmatprep.mubr.msk.bf16.mxu1 %vm442_vm1, %v10281_v55  ;;  %v10264_v58 = vld [vmem:[#allocation2 + $0x1f1] sm:$0xff]  ;;  %v10547_v44 = vmul.f32 %v17292_v57, %v21193_v25  ;;  %v10615_v50 = vmax.f32 %v10583_v1, 0.0 }
 0x779   : > { %16823 = vmatprep.mubr.msk.bf16.mxu0 %vm674_vm2, %v23132_v34  ;;  %v8668_v30 = vpop.f32.mrf.mxu1  ;;  %v10282_v51 = vpack.c.bf16 %v10264_v58, %v10263_v54  ;;  %v10548_v55 = vmul.f32 %v17293_v41, %v21193_v25 }
 0x77a   : > { %v8966_v21 = vpop.f32.mrf.mxu0  ;;  %v21221_v37 = vadd.f32 %v16617_v19, %v8737_v62  ;;  %v8735_v16 = vadd.f32 %v8668_v30, %v21066_v27  ;;  %v17294_v62 = vld [vmem:[%s17615_s21 + $0x20] sm:$0xff]  ;;  %v17295_v30 = vld [vmem:[%s17615_s21 + $0x28] sm:$0xff]  ;;  %v10647_v1 = vpack.c.bf16 %v10616_v45, %v10615_v50  ;;  %v10585_v39 = vadd.f32 %v21219_v23, %v10547_v44  ;;  %v17296_v44 = vld [vmem:[%s17615_s21 + $0x30] sm:$0xff] }
 0x77b   : > { %v16584_v40 = vpop.f32.mrf.mxu1  ;;  %v10549_v34 = vmul.f32 %v17294_v62, %v21193_v25  ;;  %v17297_v50 = vld [vmem:[%s17615_s21 + $0x38] sm:$0xff]  ;;  %v17298_v62 = vld [vmem:[%s17615_s21 + $0x40] sm:$0xff] }
 0x77c   : > { %v16618_v7 = vpop.f32.mrf.mxu0  ;;  %v21226_v12 = vadd.f32 %v8966_v21, %v8735_v16  ;;  %v8738_v10 = vadd.f32 %v16584_v40, %v21068_v60  ;;  %v23135_v60 = vld [vmem:[#allocation16_spill] sm:$0xff]  ;;  %v10550_v21 = vmul.f32 %v17295_v30, %v21193_v25 }
 0x77d   : > { %v8671_v9 = vpop.f32.mrf.mxu1  ;;  %v10587_v57 = vadd.f32 %v21219_v23, %v10549_v34  ;;  %v10553_v34 = vmul.f32 %v17298_v62, %v21193_v25 }
 0x77e   : > { %v21229_v13 = vpop.f32.mrf.mxu0  ;;  %v21231_v42 = vadd.f32 %v16618_v7, %v8738_v10  ;;  %v21234_v27 = vadd.f32 %v8671_v9, %v21070_v15  ;;  %v10284_v7 = vpack.c.bf16 %v10268_v33, %v10267_v48  ;;  %v10586_v10 = vadd.f32 %v21219_v23, %v10548_v55 }
 0x77f   : > { %23133 = vst [vmem:[#allocation32_spill] sm:$0xff] %v21229_v13  ;;  %v16587_v36 = vpop.f32.mrf.mxu1  ;;  %16790 = vmatmul.mubr.msk.bf16.gmra.mxu1 %vm442_vm1, %v10282_v51  ;;  %v10588_v41 = vadd.f32 %v21219_v23, %v10550_v21  ;;  %v10551_v55 = vmul.f32 %v17296_v44, %v21193_v25  ;;  %v10617_v48 = vmax.f32 %v10585_v39, 0.0 }
 0x780   : > { %23134 = vst [vmem:[#allocation26_spill] sm:$0xff] %v21234_v27  ;;  %v16621_v19 = vpop.f32.mrf.mxu0  ;;  %16824 = vmatmul.mubr.msk.bf16.gmra.mxu0 %vm674_vm2, %v23135_v60  ;;  %v8741_v15 = vadd.f32 %v16587_v36, %v21076_v8  ;;  %16793 = vmatprep.mubr.msk.bf16.mxu1 %vm442_vm1, %v20959_v56  ;;  %v10618_v33 = vmax.f32 %v10586_v10, 0.0 }
 0x781   : > { %16827 = vmatprep.mubr.msk.bf16.mxu0 %vm674_vm2, %v23136_v31  ;;  %v8684_v16 = vpop.f32.mrf.mxu1  ;;  %v23139_v31 = vld [vmem:[#allocation18_spill] sm:$0xff]  ;;  %v10589_v39 = vadd.f32 %v21219_v23, %v10551_v55 }
 0x782   : > { %v8982_v54 = vpop.f32.mrf.mxu0  ;;  %v21252_v58 = vadd.f32 %v16621_v19, %v8741_v15  ;;  %v8739_v8 = vadd.f32 %v8684_v16, %v21082_v5  ;;  %v10619_v16 = vmax.f32 %v10587_v57, 0.0  ;;  %v10648_v44 = vpack.c.bf16 %v10618_v33, %v10617_v48 }
 0x783   : > { %v16588_v40 = vpop.f32.mrf.mxu1 }
 0x784   : > { %v16622_v56 = vpop.f32.mrf.mxu0  ;;  %v21257_v9 = vadd.f32 %v8982_v54, %v8739_v8  ;;  %v8742_v51 = vadd.f32 %v16588_v40, %v21084_v47  ;;  %v10552_v47 = vmul.f32 %v17297_v50, %v21193_v25  ;;  %v10620_v54 = vmax.f32 %v10588_v41, 0.0 }
 0x785   : > { %v8687_v36 = vpop.f32.mrf.mxu1  ;;  %v10591_v50 = vadd.f32 %v21219_v23, %v10553_v34 }
 0x786   : > { %v21262_v5 = vpop.f32.mrf.mxu0  ;;  %v21264_v19 = vadd.f32 %v16622_v56, %v8742_v51  ;;  %v21267_v60 = vadd.f32 %v8687_v36, %v21086_v24  ;;  %v17299_v24 = vld [vmem:[%s17615_s21 + $0x48] sm:$0xff]  ;;  %v10590_v10 = vadd.f32 %v21219_v23, %v10552_v47  ;;  %v10649_v41 = vpack.c.bf16 %v10620_v54, %v10619_v16 }
 0x787   : > { %23137 = vst [vmem:[#allocation31_spill] sm:$0xff] %v21262_v5  ;;  %v16591_v45 = vpop.f32.mrf.mxu1  ;;  %16794 = vmatmul.mubr.msk.bf16.gmra.mxu1 %vm442_vm1, %v10284_v7  ;;  %v10554_v30 = vmul.f32 %v17299_v24, %v21193_v25  ;;  %v10623_v62 = vmax.f32 %v10591_v50, 0.0 }
 0x788   : > { %23138 = vst [vmem:[#allocation27_spill] sm:$0xff] %v21267_v60  ;;  %v16625_v15 = vpop.f32.mrf.mxu0  ;;  %16828 = vmatmul.mubr.msk.bf16.gmra.mxu0 %vm674_vm2, %v23139_v31  ;;  %v8745_v21 = vadd.f32 %v16591_v45, %v21090_v28  ;;  %16833 = vmatprep.mubr.msk.bf16.mxu1 %vm674_vm2, %v10647_v1  ;;  %v10622_v31 = vmax.f32 %v10590_v10, 0.0 }
 0x789   : > { %v8700_v8 = vpop.f32.mrf.mxu1  ;;  %v10592_v28 = vadd.f32 %v21219_v23, %v10554_v30  ;;  %v17301_v30 = vld [vmem:[%s17615_s21 + $0x58] sm:$0xff] }
 0x78a   : > { %v8998_v40 = vpop.f32.mrf.mxu0  ;;  %v21282_v56 = vadd.f32 %v16625_v15, %v8745_v21  ;;  %v8743_v7 = vadd.f32 %v8700_v8, %v21096_v43  ;;  %v10621_v15 = vmax.f32 %v10589_v39, 0.0  ;;  %v10556_v21 = vmul.f32 %v17301_v30, %v21193_v25  ;;  %v17303_v8 = vld [vmem:[%s17615_s21 + $0x68] sm:$0xff] }
 0x78b   : > { %v16592_v51 = vpop.f32.mrf.mxu1  ;;  %v10624_v34 = vmax.f32 %v10592_v28, 0.0 }
 0x78c   : > { %v16626_v36 = vpop.f32.mrf.mxu0  ;;  %v21289_v1 = vadd.f32 %v8998_v40, %v8743_v7  ;;  %v8746_v57 = vadd.f32 %v16592_v51, %v21098_v18  ;;  %v17300_v18 = vld [vmem:[%s17615_s21 + $0x50] sm:$0xff]  ;;  %v10558_v40 = vmul.f32 %v17303_v8, %v21193_v25  ;;  %v10650_v50 = vpack.c.bf16 %v10622_v31, %v10621_v15 }
 0x78d   : > { %v8703_v45 = vpop.f32.mrf.mxu1  ;;  %v10555_v24 = vmul.f32 %v17300_v18, %v21193_v25  ;;  %v17304_v31 = vld [vmem:[%s17615_s21 + $0x70] sm:$0xff] }
 0x78e   : > { %v21292_v43 = vpop.f32.mrf.mxu0  ;;  %v21294_v55 = vadd.f32 %v16626_v36, %v8746_v57  ;;  %v21297_v47 = vadd.f32 %v8703_v45, %v21102_v6  ;;  %v17302_v6 = vld [vmem:[%s17615_s21 + $0x60] sm:$0xff]  ;;  %v10594_v57 = vadd.f32 %v21219_v23, %v10556_v21 }
 0x78f   : > { %23140 = vst [vmem:[#allocation33_spill] sm:$0xff] %v21292_v43  ;;  %v16631_v48 = vpop.f32.mrf.mxu1  ;;  %16834 = vmatmul.mubr.msk.bf16.vlgmr.msra.gmra.mxu1 %vm674_vm2, %v10648_v44  ;;  %v10557_v54 = vmul.f32 %v17302_v6, %v21193_v25  ;;  %v10593_v28 = vadd.f32 %v21219_v23, %v10555_v24 }
 0x790   : > { %23141 = vst [vmem:[#allocation23_spill] sm:$0xff] %v21297_v47  ;;  %v16665_v33 = vpop.f32.mrf.mxu0  ;;  %v9313_v16 = vadd.f32 %v16631_v48, %v21113_v32  ;;  %16837 = vmatprep.mubr.msk.bf16.mxu1 %vm674_vm2, %v10649_v41  ;;  %v10651_v32 = vpack.c.bf16 %v10624_v34, %v10623_v62  ;;  %v10559_v62 = vmul.f32 %v17304_v31, %v21193_v25  ;;  %v17305_v34 = vld [vmem:[%s17615_s21 + $0x78] sm:$0xff]  ;;  %v10626_v6 = vmax.f32 %v10594_v57, 0.0 }
 0x791   : > { %v9184_v7 = vpop.f32.mrf.mxu1  ;;  %v10595_v48 = vadd.f32 %v21219_v23, %v10557_v54  ;;  %v17306_v54 = vld [vmem:[%s17615_s21 + $0x80] sm:$0xff] }
 0x792   : > { %v9482_v39 = vpop.f32.mrf.mxu0  ;;  %v21310_v10 = vadd.f32 %v16665_v33, %v9313_v16  ;;  %v9311_v51 = vadd.f32 %v9184_v7, %v21116_v0  ;;  %v10596_v33 = vadd.f32 %v21219_v23, %v10558_v40  ;;  %v10625_v16 = vmax.f32 %v10593_v28, 0.0  ;;  %v17307_v40 = vld [vmem:[%s17615_s21 + $0x88] sm:$0xff] }
 0x793   : > { %v16632_v36 = vpop.f32.mrf.mxu1  ;;  %v10561_v8 = vmul.f32 %v17306_v54, %v21193_v25  ;;  %v10562_v7 = vmul.f32 %v17307_v40, %v21193_v25  ;;  %v10597_v28 = vadd.f32 %v21219_v23, %v10559_v62 }
 0x794   : > { %v16666_v44 = vpop.f32.mrf.mxu0  ;;  %v21315_v41 = vadd.f32 %v9482_v39, %v9311_v51  ;;  %v9314_v45 = vadd.f32 %v16632_v36, %v21119_v26  ;;  %v10560_v26 = vmul.f32 %v17305_v34, %v21193_v25  ;;  %v10627_v39 = vmax.f32 %v10595_v48, 0.0 }
 0x795   : > { %v9187_v0 = vpop.f32.mrf.mxu1  ;;  %v10628_v51 = vmax.f32 %v10596_v33, 0.0  ;;  %v10652_v34 = vpack.c.bf16 %v10626_v6, %v10625_v16  ;;  %v10599_v54 = vadd.f32 %v21219_v23, %v10561_v8 }
 0x796   : > { %v21320_v18 = vpop.f32.mrf.mxu0  ;;  %v21322_v30 = vadd.f32 %v16666_v44, %v9314_v45  ;;  %v21325_v15 = vadd.f32 %v9187_v0, %v21126_v29  ;;  %v10598_v57 = vadd.f32 %v21219_v23, %v10560_v26 }
 0x797   : > { %v16635_v24 = vpop.f32.mrf.mxu1  ;;  %16838 = vmatmul.mubr.msk.bf16.gmra.mxu1 %vm674_vm2, %v10650_v50  ;;  %v10653_v33 = vpack.c.bf16 %v10628_v51, %v10627_v39  ;;  %v10631_v40 = vmax.f32 %v10599_v54, 0.0  ;;  %v17309_v39 = vld [vmem:[%s17615_s21 + $0x98] sm:$0xff] }
 0x798   : > { %v16669_v21 = vpop.f32.mrf.mxu0  ;;  %v9317_v29 = vadd.f32 %v16635_v24, %v21133_v53  ;;  %16841 = vmatprep.mubr.msk.bf16.mxu1 %vm674_vm2, %v10651_v32  ;;  %v10600_v53 = vadd.f32 %v21219_v23, %v10562_v7  ;;  %v10630_v16 = vmax.f32 %v10598_v57, 0.0  ;;  %v10564_v51 = vmul.f32 %v17309_v39, %v21193_v25 }
 0x799   : > { %v9200_v36 = vpop.f32.mrf.mxu1 }
 0x79a   : > { %v9498_v44 = vpop.f32.mrf.mxu0  ;;  %v21338_v45 = vadd.f32 %v16669_v21, %v9317_v29  ;;  %v9315_v50 = vadd.f32 %v9200_v36, %v21136_v17  ;;  %v10629_v21 = vmax.f32 %v10597_v28, 0.0  ;;  %v10632_v7 = vmax.f32 %v10600_v53, 0.0 }
 0x79b   : > { %v16636_v0 = vpop.f32.mrf.mxu1 }
 0x79c   : > { %v16670_v31 = vpop.f32.mrf.mxu0  ;;  %v21345_v32 = vadd.f32 %v9498_v44, %v9315_v50  ;;  %v9318_v48 = vadd.f32 %v16636_v0, %v21139_v35  ;;  %v17308_v35 = vld [vmem:[%s17615_s21 + $0x90] sm:$0xff]  ;;  %v17311_v50 = vld [vmem:[%s17615_s21 + $0xa8] sm:$0xff] }
 0x79d   : > { %v9203_v24 = vpop.f32.mrf.mxu1  ;;  %v10563_v29 = vmul.f32 %v17308_v35, %v21193_v25  ;;  %v10566_v28 = vmul.f32 %v17311_v50, %v21193_v25 }
 0x79e   : > { %v21348_v17 = vpop.f32.mrf.mxu0  ;;  %v21350_v62 = vadd.f32 %v16670_v31, %v9318_v48  ;;  %v21353_v26 = vadd.f32 %v9203_v24, %v21145_v4  ;;  %v17310_v4 = vld [vmem:[%s17615_s21 + $0xa0] sm:$0xff]  ;;  %v10654_v48 = vpack.c.bf16 %v10630_v16, %v10629_v21  ;;  %v10602_v24 = vadd.f32 %v21219_v23, %v10564_v51  ;;  %v17312_v16 = vld [vmem:[%s17615_s21 + $0xb0] sm:$0xff] }
 0x79f   : > { %v16639_v6 = vpop.f32.mrf.mxu1  ;;  %16842 = vmatmul.mubr.msk.bf16.gmra.mxu1 %vm674_vm2, %v10652_v34  ;;  %v10565_v44 = vmul.f32 %v17310_v4, %v21193_v25  ;;  %v10604_v39 = vadd.f32 %v21219_v23, %v10566_v28  ;;  %v17314_v28 = vld [vmem:[%s17615_s21 + $0xc0] sm:$0xff] }
 0x7a0   : > { %v16673_v8 = vpop.f32.mrf.mxu0  ;;  %v9321_v36 = vadd.f32 %v16639_v6, %v21151_v59  ;;  %16845 = vmatprep.mubr.msk.bf16.mxu1 %vm674_vm2, %v10653_v33  ;;  %v10655_v59 = vpack.c.bf16 %v10632_v7, %v10631_v40  ;;  %v10601_v33 = vadd.f32 %v21219_v23, %v10563_v29  ;;  %v10567_v40 = vmul.f32 %v17312_v16, %v21193_v25  ;;  %v17313_v7 = vld [vmem:[%s17615_s21 + $0xb8] sm:$0xff] }
 0x7a1   : > { %v9216_v57 = vpop.f32.mrf.mxu1  ;;  %v10634_v50 = vmax.f32 %v10602_v24, 0.0 }
 0x7a2   : > { %v9514_v0 = vpop.f32.mrf.mxu0  ;;  %v21366_v31 = vadd.f32 %v16673_v8, %v9321_v36  ;;  %v9319_v34 = vadd.f32 %v9216_v57, %v21154_v11  ;;  %v10603_v8 = vadd.f32 %v21219_v23, %v10565_v44  ;;  %v10633_v44 = vmax.f32 %v10601_v33, 0.0 }
 0x7a3   : > { %v16640_v54 = vpop.f32.mrf.mxu1  ;;  %v10569_v57 = vmul.f32 %v17314_v28, %v21193_v25  ;;  %v10605_v33 = vadd.f32 %v21219_v23, %v10567_v40 }
 0x7a4   : > { %v16674_v53 = vpop.f32.mrf.mxu0  ;;  %v21371_v6 = vadd.f32 %v9514_v0, %v9319_v34  ;;  %v9322_v35 = vadd.f32 %v16640_v54, %v21157_v22  ;;  %v10568_v22 = vmul.f32 %v17313_v7, %v21193_v25  ;;  %v17315_v0 = vld [vmem:[%s17615_s21 + $0xc8] sm:$0xff]  ;;  %v10635_v54 = vmax.f32 %v10603_v8, 0.0  ;;  %v17217_v7 = vld [vmem:[%s23003_s12 + $0x50] sm:$0xff]  }
 0x7a5   : > { %v9219_v11 = vpop.f32.mrf.mxu1  ;;  %v10570_v34 = vmul.f32 %v17315_v0, %v21193_v25  ;;  %16865 = vmatprep.subr.bf16.mxu0 %v17217_v7 }
 0x7a6   : > { %v21376_v36 = vpop.f32.mrf.mxu0  ;;  %v21378_v4 = vadd.f32 %v16674_v53, %v9322_v35  ;;  %v21381_v21 = vadd.f32 %v9219_v11, %v21163_v63  ;;  %v10636_v53 = vmax.f32 %v10604_v39, 0.0  ;;  %v10606_v24 = vadd.f32 %v21219_v23, %v10568_v22  ;;  %16866 = vmatpush3.bf16.msra.mxu0 %v17217_v7 }
 0x7a7   : > { %23142 = vst [vmem:[#allocation22_spill] sm:$0xff] %v21376_v36  ;;  %v16643_v29 = vpop.f32.mrf.mxu1  ;;  %16846 = vmatmul.mubr.msk.bf16.gmra.mxu1 %vm674_vm2, %v10654_v48  ;;  %v10608_v8 = vadd.f32 %v21219_v23, %v10570_v34 }
 0x7a8   : > { %23143 = vst [vmem:[#allocation35_spill] sm:$0xff] %v21381_v21  ;;  %v16677_v51 = vpop.f32.mrf.mxu0  ;;  %v9325_v63 = vadd.f32 %v16643_v29, %v21169_v14  ;;  %16849 = vmatprep.mubr.msk.bf16.mxu1 %vm674_vm2, %v10655_v59  ;;  %v10656_v29 = vpack.c.bf16 %v10634_v50, %v10633_v44  ;;  %v10607_v59 = vadd.f32 %v21219_v23, %v10569_v57  ;;  %v10637_v50 = vmax.f32 %v10605_v33, 0.0 }
 0x7a9   : > { %v9232_v35 = vpop.f32.mrf.mxu1  ;;  %v10638_v57 = vmax.f32 %v10606_v24, 0.0  ;;  %v17319_v24 = vld [vmem:[%s17615_s21 + $0xe8] sm:$0xff] }
 0x7aa   : > { %v9530_v11 = vpop.f32.mrf.mxu0  ;;  %v21394_v16 = vadd.f32 %v16677_v51, %v9325_v63  ;;  %v9323_v48 = vadd.f32 %v9232_v35, %v21172_v49  ;;  %v10657_v51 = vpack.c.bf16 %v10636_v53, %v10635_v54  ;;  %v10640_v54 = vmax.f32 %v10608_v8, 0.0  ;;  %v17316_v53 = vld [vmem:[%s17615_s21 + $0xd0] sm:$0xff] }
 0x7ab   : > { %v16644_v28 = vpop.f32.mrf.mxu1  ;;  %v10571_v35 = vmul.f32 %v17316_v53, %v21193_v25  ;;  %v10658_v53 = vpack.c.bf16 %v10638_v57, %v10637_v50 }
 0x7ac   : > { %v16678_v14 = vpop.f32.mrf.mxu0  ;;  %v21404_v39 = vadd.f32 %v9530_v11, %v9323_v48  ;;  %v9326_v49 = vadd.f32 %v16644_v28, %v21175_v52  ;;  %v10639_v52 = vmax.f32 %v10607_v59, 0.0  ;;  %v17317_v11 = vld [vmem:[%s17615_s21 + $0xd8] sm:$0xff]  ;;  %v10574_v28 = vmul.f32 %v17319_v24, %v21193_v25 }
 0x7ad   : > { %v9235_v40 = vpop.f32.mrf.mxu1  ;;  %v10572_v48 = vmul.f32 %v17317_v11, %v21193_v25 }
 0x7ae   : > { %v21407_v22 = vpop.f32.mrf.mxu0  ;;  %v21409_v0 = vadd.f32 %v16678_v14, %v9326_v49  ;;  %v21412_v44 = vadd.f32 %v9235_v40, %v21181_v20  ;;  %v17318_v20 = vld [vmem:[%s17615_s21 + $0xe0] sm:$0xff]  ;;  %v10659_v11 = vpack.c.bf16 %v10640_v54, %v10639_v52 }
 0x7af   : > { %23144 = vst [vmem:[#allocation28_spill] sm:$0xff] %v21407_v22  ;;  %v16647_v34 = vpop.f32.mrf.mxu1  ;;  %16850 = vmatmul.mubr.msk.bf16.gmra.mxu1 %vm674_vm2, %v10656_v29  ;;  %v10573_v33 = vmul.f32 %v17318_v20, %v21193_v25 }
 0x7b0   : > { %23145 = vst [vmem:[#allocation34_spill] sm:$0xff] %v21412_v44  ;;  %v16681_v63 = vpop.f32.mrf.mxu0  ;;  %v9329_v7 = vadd.f32 %v16647_v34, %v21187_v38  ;;  %16853 = vmatprep.mubr.msk.bf16.mxu1 %vm674_vm2, %v10657_v51  ;;  %v10609_v38 = vadd.f32 %v21219_v23, %v10571_v35  ;;  %v10610_v51 = vadd.f32 %v21219_v23, %v10572_v48  ;;  %v17320_v48 = vld [vmem:[%s17615_s21 + $0xf0] sm:$0xff] }
 0x7b1   : > { %v9248_v14 = vpop.f32.mrf.mxu1  ;;  %v10611_v24 = vadd.f32 %v21219_v23, %v10573_v33 }
 0x7b2   : > { %v9546_v29 = vpop.f32.mrf.mxu0  ;;  %v21425_v59 = vadd.f32 %v16681_v63, %v9329_v7  ;;  %v9327_v8 = vadd.f32 %v9248_v14, %v21195_v61  ;;  %v10612_v63 = vadd.f32 %v21219_v23, %v10574_v28  ;;  %v10641_v54 = vmax.f32 %v10609_v38, 0.0 }
 0x7b3   : > { %v16648_v49 = vpop.f32.mrf.mxu1  ;;  %v10642_v35 = vmax.f32 %v10610_v51, 0.0  ;;  %v10575_v14 = vmul.f32 %v17320_v48, %v21193_v25 }
 0x7b4   : > { %v16682_v40 = vpop.f32.mrf.mxu0  ;;  %v21430_v34 = vadd.f32 %v9546_v29, %v9327_v8  ;;  %v9330_v20 = vadd.f32 %v16648_v49, %v21200_v3  ;;  %v17321_v3 = vld [vmem:[%s17615_s21 + $0xf8] sm:$0xff]  ;;  %v10643_v29 = vmax.f32 %v10611_v24, 0.0  ;;  %v10644_v8 = vmax.f32 %v10612_v63, 0.0 }
 0x7b5   : > { %v21435_v7 = vpop.f32.mrf.mxu1  ;;  %v10576_v33 = vmul.f32 %v17321_v3, %v21193_v25  ;;  %v10660_v43 = vpack.c.bf16 %v10642_v35, %v10641_v54  ;;  %v10613_v48 = vadd.f32 %v21219_v23, %v10575_v14 }
 0x7b6   : > { %23146 = vst [vmem:[#allocation29_spill] sm:$0xff] %v21435_v7  ;;  %v21437_v61 = vpop.f32.mrf.mxu0  ;;  %v21439_v50 = vadd.f32 %v16682_v40, %v9330_v20 }
 0x7b7   : > { %23147 = vst [vmem:[#allocation36_spill] sm:$0xff] %v21437_v61  ;;  %v16651_v57 = vpop.f32.mrf.mxu1  ;;  %16854 = vmatmul.mubr.msk.bf16.gmra.mxu1 %vm674_vm2, %v10658_v53  ;;  %v10614_v47 = vadd.f32 %v21219_v23, %v10576_v33  ;;  %v10645_v54 = vmax.f32 %v10613_v48, 0.0 }
 0x7b8   : > { %v16685_v52 = vpop.f32.mrf.mxu0  ;;  %v9333_v28 = vadd.f32 %v16651_v57, %v21221_v37  ;;  %16857 = vmatprep.mubr.msk.bf16.mxu1 %vm674_vm2, %v10659_v11  ;;  %v10661_v11 = vpack.c.bf16 %v10644_v8, %v10643_v29 }
 0x7b9   : > { %v9264_v49 = vpop.f32.mrf.mxu1  ;;  %v10646_v35 = vmax.f32 %v10614_v47, 0.0 }
 0x7ba   : > { %v9562_v40 = vpop.f32.mrf.mxu0  ;;  %v21448_v20 = vadd.f32 %v16685_v52, %v9333_v28  ;;  %v9331_v53 = vadd.f32 %v9264_v49, %v21226_v12 }
 0x7bb   : > { %v16652_v38 = vpop.f32.mrf.mxu1  ;;  %v10662_v8 = vpack.c.bf16 %v10646_v35, %v10645_v54 }
 0x7bc   : > { %v16686_v51 = vpop.f32.mrf.mxu0  ;;  %v21453_v25 = vadd.f32 %v9562_v40, %v9331_v53  ;;  %v9334_v37 = vadd.f32 %v16652_v38, %v21231_v42 }
 0x7bd   : > { %v21456_v24 = vpop.f32.mrf.mxu1 }
 0x7be   : > { %23148 = vst [vmem:[#allocation25_spill] sm:$0xff] %v21456_v24  ;;  %v21458_v63 = vpop.f32.mrf.mxu0  ;;  %v21460_v57 = vadd.f32 %v16686_v51, %v9334_v37 }
 0x7bf   : > { %23149 = vst [vmem:[#allocation24_spill] sm:$0xff] %v21458_v63  ;;  %v16655_v52 = vpop.f32.mrf.mxu1  ;;  %16858 = vmatmul.mubr.msk.bf16.gmra.mxu1 %vm674_vm2, %v10660_v43 }
 0x7c0   : > { %v16689_v12 = vpop.f32.mrf.mxu0  ;;  %v9337_v14 = vadd.f32 %v16655_v52, %v21252_v58  ;;  %16861 = vmatprep.mubr.msk.bf16.mxu1 %vm674_vm2, %v10661_v11 }
 0x7c1   : > { %v9280_v23 = vpop.f32.mrf.mxu1 }
 0x7c2   : > { %v9578_v3 = vpop.f32.mrf.mxu0  ;;  %v21465_v42 = vadd.f32 %v16689_v12, %v9337_v14  ;;  %v9335_v33 = vadd.f32 %v9280_v23, %v21257_v9 }
 0x7c3   : > { %v16656_v28 = vpop.f32.mrf.mxu1 }
 0x7c4   : > { %v16690_v29 = vpop.f32.mrf.mxu0  ;;  %v21468_v49 = vadd.f32 %v9578_v3, %v9335_v33  ;;  %v9338_v40 = vadd.f32 %v16656_v28, %v21264_v19 }
 0x7c5   : > { %v21471_v43 = vpop.f32.mrf.mxu1 }
 0x7c6   : > { %23150 = vst [vmem:[#allocation8_spill] sm:$0xff] %v21471_v43  ;;  %v21473_v47 = vpop.f32.mrf.mxu0  ;;  %v21475_v58 = vadd.f32 %v16690_v29, %v9338_v40 }
 0x7c7   : > { %23151 = vst [vmem:[#allocation37_spill] sm:$0xff] %v21473_v47  ;;  %v16659_v53 = vpop.f32.mrf.mxu1  ;;  %16862 = vmatmul.mubr.msk.bf16.gmra.mxu1 %vm674_vm2, %v10662_v8 }
 0x7c8   : > { %v16693_v38 = vpop.f32.mrf.mxu0  ;;  %v9341_v51 = vadd.f32 %v16659_v53, %v21282_v56 }
 0x7c9   : > { %v9296_v9 = vpop.f32.mrf.mxu1 }
 0x7ca   : > { %v9594_v48 = vpop.f32.mrf.mxu0  ;;  %v21479_v37 = vadd.f32 %v16693_v38, %v9341_v51  ;;  %v9339_v11 = vadd.f32 %v9296_v9, %v21289_v1 }
 0x7cb   : > { %v16660_v52 = vpop.f32.mrf.mxu1 }
 0x7cc   : > { %v16694_v19 = vpop.f32.mrf.mxu0  ;;  %v21482_v12 = vadd.f32 %v9594_v48, %v9339_v11  ;;  %v9342_v54 = vadd.f32 %v16660_v52, %v21294_v55 }
 0x7cd   : > { %v21485_v35 = vpop.f32.mrf.mxu1 }
 0x7ce   : > { %23152 = vst [vmem:[#allocation30_spill] sm:$0xff] %v21485_v35  ;;  %v21487_v14 = vpop.f32.mrf.mxu0  ;;  %v21489_v23 = vadd.f32 %v16694_v19, %v9342_v54 }
 0x7cf   : > { %23153 = vst [vmem:[#allocation38_spill] sm:$0xff] %v21487_v14  ;;  %v16699_v3 = vpop.f32.mrf.mxu1 }
 0x7d0   : > { %v16733_v56 = vpop.f32.mrf.mxu0  ;;  %v9909_v33 = vadd.f32 %v16699_v3, %v21310_v10 }
 0x7d1   : > { %v9780_v28 = vpop.f32.mrf.mxu1 }
 0x7d2   : > { %v10078_v29 = vpop.f32.mrf.mxu0  ;;  %v21492_v8 = vadd.f32 %v16733_v56, %v9909_v33  ;;  %v9907_v1 = vadd.f32 %v9780_v28, %v21315_v41 }
 0x7d3   : > { %v16700_v40 = vpop.f32.mrf.mxu1 }
 0x7d4   : > { %v16734_v53 = vpop.f32.mrf.mxu0  ;;  %v21495_v38 = vadd.f32 %v10078_v29, %v9907_v1  ;;  %v9910_v55 = vadd.f32 %v16700_v40, %v21322_v30 }
 0x7d5   : > { %v21498_v51 = vpop.f32.mrf.mxu1 }
 0x7d6   : > { %v21500_v9 = vpop.f32.mrf.mxu0  ;;  %v21502_v48 = vadd.f32 %v16734_v53, %v9910_v55 }
 0x7d7   : > { %v16703_v11 = vpop.f32.mrf.mxu1 }
 0x7d8   : > { %v16737_v10 = vpop.f32.mrf.mxu0  ;;  %v9913_v52 = vadd.f32 %v16703_v11, %v21338_v45 }
 0x7d9   : > { %v9796_v19 = vpop.f32.mrf.mxu1 }
 0x7da   : > { %v10094_v54 = vpop.f32.mrf.mxu0  ;;  %v21505_v3 = vadd.f32 %v16737_v10, %v9913_v52  ;;  %v9911_v41 = vadd.f32 %v9796_v19, %v21345_v32 }
 0x7db   : > { %v16704_v56 = vpop.f32.mrf.mxu1 }
 0x7dc   : > { %v16738_v33 = vpop.f32.mrf.mxu0  ;;  %v21508_v28 = vadd.f32 %v10094_v54, %v9911_v41  ;;  %v9914_v30 = vadd.f32 %v16704_v56, %v21350_v62  ;;  %v17218_v56 = vld [vmem:[%s23003_s12 + $0x48] sm:$0xff]  }
 0x7dd   : > { %v21511_v29 = vpop.f32.mrf.mxu1  ;;  %16899 = vmatprep.subr.bf16.mxu1 %v17218_v56 }
 0x7de   : > { %23154 = vst [vmem:[#allocation39_spill] sm:$0xff] %v21511_v29  ;;  %v21513_v1 = vpop.f32.mrf.mxu0  ;;  %v21515_v40 = vadd.f32 %v16738_v33, %v9914_v30  ;;  %16900 = vmatpush3.bf16.msra.mxu1 %v17218_v56 }
 0x7df   : > { %23155 = vst [vmem:[#allocation4_spill] sm:$0xff] %v21513_v1  ;;  %v16707_v53 = vpop.f32.mrf.mxu1 }
 0x7e0   : > { %v16741_v45 = vpop.f32.mrf.mxu0  ;;  %v9917_v55 = vadd.f32 %v16707_v53, %v21366_v31  ;;  %v11414_v53 = vld [vmem:[#allocation2 + $0x8] sm:$0xff] }
 0x7e1   : > { %v9812_v11 = vpop.f32.mrf.mxu1 }
 0x7e2   : > { %v10110_v10 = vpop.f32.mrf.mxu0  ;;  %v21518_v52 = vadd.f32 %v16741_v45, %v9917_v55  ;;  %v9915_v32 = vadd.f32 %v9812_v11, %v21371_v6  ;;  %v11415_v45 = vld [vmem:[#allocation2 + $0x10] sm:$0xff]  ;;  %v11363_v6 = vld [vmem:[#allocation2 + $0x7] sm:$0xff] }
 0x7e3   : > { %v16708_v19 = vpop.f32.mrf.mxu1 }
 0x7e4   : > { %v16742_v54 = vpop.f32.mrf.mxu0  ;;  %v21521_v41 = vadd.f32 %v10110_v10, %v9915_v32  ;;  %v9918_v62 = vadd.f32 %v16708_v19, %v21378_v4  ;;  %v11446_v10 = vpack.c.bf16 %v11415_v45, %v11414_v53  ;;  %v11364_v32 = vld [vmem:[#allocation2 + $0xf] sm:$0xff] }
 0x7e5   : > { %v21527_v33 = vpop.f32.mrf.mxu1  ;;  %v11395_v19 = vpack.c.bf16 %v11364_v32, %v11363_v6 }
 0x7e6   : > { %23156 = vst [vmem:[#allocation3_spill] sm:$0xff] %v21527_v33  ;;  %v21529_v30 = vpop.f32.mrf.mxu0  ;;  %v21531_v31 = vadd.f32 %v16742_v54, %v9918_v62  ;;  %16867 = vmatprep.mubr.msk.bf16.mxu0 %vm442_vm1, %v11446_v10 }
 0x7e7   : > { %23157 = vst [vmem:[#allocation7_spill] sm:$0xff] %v21529_v30  ;;  %v16711_v55 = vpop.f32.mrf.mxu1  ;;  %16901 = vmatprep.mubr.msk.bf16.mxu1 %vm442_vm1, %v11395_v19 }
 0x7e8   : > { %v16745_v11 = vpop.f32.mrf.mxu0  ;;  %v9921_v4 = vadd.f32 %v16711_v55, %v21394_v16 }
 0x7e9   : > { %v9828_v14 = vpop.f32.mrf.mxu1 }
 0x7ea   : > { %v10126_v35 = vpop.f32.mrf.mxu0  ;;  %v21535_v47 = vadd.f32 %v16745_v11, %v9921_v4  ;;  %v9919_v54 = vadd.f32 %v9828_v14, %v21404_v39  ;;  %v21552_v39 = vld [vmem:[%s23003_s12 + $0x58] sm:$0xff]  }
 0x7eb   : > { %v16712_v62 = vpop.f32.mrf.mxu1  ;;  %16933 = vmatprep.subr.bf16.mxu0 %v21552_v39 }
 0x7ec   : > { %v16746_v43 = vpop.f32.mrf.mxu0  ;;  %v21539_v5 = vadd.f32 %v10126_v35, %v9919_v54  ;;  %v9922_v56 = vadd.f32 %v16712_v62, %v21409_v0 }
 0x7ed   : > { %v21542_v53 = vpop.f32.mrf.mxu1 }
 0x7ee   : > { %23158 = vst [vmem:[#allocation5_spill] sm:$0xff] %v21542_v53  ;;  %v21544_v16 = vpop.f32.mrf.mxu0  ;;  %v21546_v45 = vadd.f32 %v16746_v43, %v9922_v56 }
 0x7ef   : > { %23159 = vst [vmem:[#allocation9_spill] sm:$0xff] %v21544_v16  ;;  %v16715_v6 = vpop.f32.mrf.mxu1 }
 0x7f0   : > { %v16749_v55 = vpop.f32.mrf.mxu0  ;;  %v9925_v11 = vadd.f32 %v16715_v6, %v21425_v59 }
 0x7f1   : > { %v9844_v14 = vpop.f32.mrf.mxu1 }
 0x7f2   : > { %v10142_v35 = vpop.f32.mrf.mxu0  ;;  %v21554_v10 = vadd.f32 %v16749_v55, %v9925_v11  ;;  %v9923_v0 = vadd.f32 %v9844_v14, %v21430_v34 }
 0x7f3   : > { %v16716_v32 = vpop.f32.mrf.mxu1 }
 0x7f4   : > { %v16750_v43 = vpop.f32.mrf.mxu0  ;;  %v21558_v4 = vadd.f32 %v10142_v35, %v9923_v0  ;;  %v9926_v19 = vadd.f32 %v16716_v32, %v21439_v50 }
 0x7f5   : > { %v21561_v59 = vpop.f32.mrf.mxu1 }
 0x7f6   : > { %23160 = vst [vmem:[#allocation6_spill] sm:$0xff] %v21561_v59  ;;  %v21563_v54 = vpop.f32.mrf.mxu0  ;;  %v21565_v62 = vadd.f32 %v16750_v43, %v9926_v19 }
 0x7f7   : > { %23161 = vst [vmem:[#allocation11_spill] sm:$0xff] %v21563_v54  ;;  %v16719_v56 = vpop.f32.mrf.mxu1 }
 0x7f8   : > { %v16753_v6 = vpop.f32.mrf.mxu0  ;;  %v9929_v55 = vadd.f32 %v16719_v56, %v21448_v20 }
 0x7f9   : > { %v9860_v11 = vpop.f32.mrf.mxu1 }
 0x7fa   : > { %v10158_v34 = vpop.f32.mrf.mxu0  ;;  %v21568_v14 = vadd.f32 %v16753_v6, %v9929_v55  ;;  %v9927_v60 = vadd.f32 %v9860_v11, %v21453_v25 }
 0x7fb   : > { %v16720_v35 = vpop.f32.mrf.mxu1 }
 0x7fc   : > { %v16754_v0 = vpop.f32.mrf.mxu0  ;;  %v21571_v63 = vadd.f32 %v10158_v34, %v9927_v60  ;;  %v9930_v50 = vadd.f32 %v16720_v35, %v21460_v57 }
 0x7fd   : > { %v21574_v32 = vpop.f32.mrf.mxu1 }
 0x7fe   : > { %23162 = vst [vmem:[#allocation10_spill] sm:$0xff] %v21574_v32  ;;  %v21576_v43 = vpop.f32.mrf.mxu0  ;;  %v21578_v19 = vadd.f32 %v16754_v0, %v9930_v50 }
 0x7ff   : > { %23163 = vst [vmem:[#allocation13_spill] sm:$0xff] %v21576_v43  ;;  %v16723_v54 = vpop.f32.mrf.mxu1 }
 0x800   : > { %v16757_v20 = vpop.f32.mrf.mxu0  ;;  %v9933_v56 = vadd.f32 %v16723_v54, %v21465_v42 }
 0x801   : > { %v9876_v6 = vpop.f32.mrf.mxu1 }
 0x802   : > { %v10174_v55 = vpop.f32.mrf.mxu0  ;;  %v21581_v24 = vadd.f32 %v16757_v20, %v9933_v56  ;;  %v9931_v25 = vadd.f32 %v9876_v6, %v21468_v49 }
 0x803   : > { %v16724_v60 = vpop.f32.mrf.mxu1 }
 0x804   : > { %v16758_v11 = vpop.f32.mrf.mxu0  ;;  %v21584_v34 = vadd.f32 %v10174_v55, %v9931_v25  ;;  %v9934_v57 = vadd.f32 %v16724_v60, %v21475_v58 }
 0x805   : > { %v21587_v35 = vpop.f32.mrf.mxu1 }
 0x806   : > { %23164 = vst [vmem:[#allocation12_spill] sm:$0xff] %v21587_v35  ;;  %v21589_v0 = vpop.f32.mrf.mxu0  ;;  %v21591_v50 = vadd.f32 %v16758_v11, %v9934_v57 }
 0x807   : > { %23165 = vst [vmem:[#allocation15_spill] sm:$0xff] %v21589_v0  ;;  %v16727_v43 = vpop.f32.mrf.mxu1 }
 0x808   : > { %v16761_v42 = vpop.f32.mrf.mxu0  ;;  %v9937_v54 = vadd.f32 %v16727_v43, %v21479_v37 }
 0x809   : > { %v9892_v20 = vpop.f32.mrf.mxu1 }
 0x80a   : > { %v10190_v56 = vpop.f32.mrf.mxu0  ;;  %v21594_v32 = vadd.f32 %v16761_v42, %v9937_v54  ;;  %v9935_v49 = vadd.f32 %v9892_v20, %v21482_v12 }
 0x80b   : > { %v16728_v6 = vpop.f32.mrf.mxu1 }
 0x80c   : > { %v16762_v55 = vpop.f32.mrf.mxu0  ;;  %v21597_v25 = vadd.f32 %v10190_v56, %v9935_v49  ;;  %v9938_v58 = vadd.f32 %v16728_v6, %v21489_v23 }
 0x80d   : > { %v21600_v60 = vpop.f32.mrf.mxu1 }
 0x80e   : > { %23166 = vst [vmem:[#allocation14_spill] sm:$0xff] %v21600_v60  ;;  %v21602_v11 = vpop.f32.mrf.mxu0  ;;  %v21604_v57 = vadd.f32 %v16762_v55, %v9938_v58 }
 0x80f   : > { %23167 = vst [vmem:[#allocation17_spill] sm:$0xff] %v21602_v11  ;;  %v16767_v0 = vpop.f32.mrf.mxu1 }
 0x810   : > { %v21607_v37 = vadd.f32 %v16767_v0, %v21492_v8  ;;  %v21609_v43 = vpop.f32.mrf.mxu0 }
 0x811   : > { %v10376_v42 = vpop.f32.mrf.mxu1 }
 0x812   : > { %v21612_v12 = vadd.f32 %v10376_v42, %v21495_v38  ;;  %v21617_v23 = vpop.f32.mrf.mxu0 }
 0x813   : > { %v16768_v54 = vpop.f32.mrf.mxu1 }
 0x814   : > { %v21615_v20 = vadd.f32 %v16768_v54, %v21502_v48  ;;  %v21624_v8 = vpop.f32.mrf.mxu0 }
 0x815   : > { %v21619_v56 = vpop.f32.mrf.mxu1 }
 0x816   : > { %23168 = vst [vmem:[#allocation16_spill] sm:$0xff] %v21615_v20  ;;  %v21632_v48 = vpop.f32.mrf.mxu0 }
 0x817   : > { %v16771_v49 = vpop.f32.mrf.mxu1 }
 0x818   : > { %v21622_v6 = vadd.f32 %v16771_v49, %v21505_v3  ;;  %v21639_v3 = vpop.f32.mrf.mxu0 }
 0x819   : > { %v10392_v0 = vpop.f32.mrf.mxu1 }
 0x81a   : > { %23169 = vst [vmem:[#allocation19_spill] sm:$0xff] %v21622_v6  ;;  %v21627_v55 = vadd.f32 %v10392_v0, %v21508_v28  ;;  %v21647_v28 = vld [vmem:[%s23003_s12 + $0x60] sm:$0xff]  }
 0x81b   : > { %v16772_v38 = vpop.f32.mrf.mxu1  ;;  %16967 = vmatprep.subr.bf16.mxu1 %v21647_v28 }
 0x81c   : > { %23170 = vst [vmem:[#allocation18_spill] sm:$0xff] %v21627_v55  ;;  %v21630_v58 = vadd.f32 %v16772_v38, %v21515_v40  ;;  %v21653_v38 = vpop.f32.mrf.mxu0 }
 0x81d   : > { %v21634_v42 = vpop.f32.mrf.mxu1 }
 0x81e   : > { %23171 = vst [vmem:[#allocation40_spill] sm:$0xff] %v21630_v58  ;;  %23172 = vst [vmem:[#allocation41_spill] sm:$0xff] %v21634_v42 }
 0x81f   : > { %v16775_v54 = vpop.f32.mrf.mxu1 }
 0x820   : > { %v21637_v11 = vadd.f32 %v16775_v54, %v21518_v52 }
 0x821   : > { %v10408_v49 = vpop.f32.mrf.mxu1 }
 0x822   : > { %23173 = vst [vmem:[#allocation42_spill] sm:$0xff] %v21637_v11  ;;  %v21642_v60 = vadd.f32 %v10408_v49, %v21521_v41  ;;  %v21660_v41 = vpop.f32.mrf.mxu0 }
 0x823   : > { %v16776_v40 = vpop.f32.mrf.mxu1 }
 0x824   : > { %23174 = vst [vmem:[#allocation43_spill] sm:$0xff] %v21642_v60  ;;  %v21650_v0 = vadd.f32 %v16776_v40, %v21531_v31  ;;  %v21668_v40 = vpop.f32.mrf.mxu0 }
 0x825   : > { %v21655_v52 = vpop.f32.mrf.mxu1 }
 0x826   : > { %23175 = vst [vmem:[#allocation44_spill] sm:$0xff] %v21650_v0  ;;  %23176 = vst [vmem:[#allocation45_spill] sm:$0xff] %v21655_v52 }
 0x827   : > { %v16779_v54 = vpop.f32.mrf.mxu1 }
 0x828   : > { %v21658_v35 = vadd.f32 %v16779_v54, %v21535_v47  ;;  %v21675_v47 = vpop.f32.mrf.mxu0 }
 0x829   : > { %v10424_v49 = vpop.f32.mrf.mxu1 }
 0x82a   : > { %23177 = vst [vmem:[#allocation46_spill] sm:$0xff] %v21658_v35  ;;  %v21663_v59 = vadd.f32 %v10424_v49, %v21539_v5 }
 0x82b   : > { %v16780_v13 = vpop.f32.mrf.mxu1 }
 0x82c   : > { %23178 = vst [vmem:[#allocation47_spill] sm:$0xff] %v21663_v59  ;;  %v21666_v31 = vadd.f32 %v16780_v13, %v21546_v45  ;;  %v21683_v13 = vpop.f32.mrf.mxu0 }
 0x82d   : > { %v21670_v27 = vpop.f32.mrf.mxu1 }
 0x82e   : > { %23179 = vst [vmem:[#allocation48_spill] sm:$0xff] %v21666_v31  ;;  %23180 = vst [vmem:[#allocation49_spill] sm:$0xff] %v21670_v27 }
 0x82f   : > { %v16783_v61 = vpop.f32.mrf.mxu1 }
 0x830   : > { %v21673_v16 = vadd.f32 %v16783_v61, %v21554_v10  ;;  %v21690_v61 = vpop.f32.mrf.mxu0 }
 0x831   : > { %v10440_v54 = vpop.f32.mrf.mxu1 }
 0x832   : > { %23181 = vst [vmem:[#allocation50_spill] sm:$0xff] %v21673_v16  ;;  %v21678_v35 = vadd.f32 %v10440_v54, %v21558_v4 }
 0x833   : > { %v16784_v5 = vpop.f32.mrf.mxu1 }
 0x834   : > { %23182 = vst [vmem:[#allocation51_spill] sm:$0xff] %v21678_v35  ;;  %v21681_v49 = vadd.f32 %v16784_v5, %v21565_v62  ;;  %v21698_v62 = vpop.f32.mrf.mxu0 }
 0x835   : > { %v21685_v45 = vpop.f32.mrf.mxu1 }
 0x836   : > { %23183 = vst [vmem:[#allocation52_spill] sm:$0xff] %v21681_v49  ;;  %23184 = vst [vmem:[#allocation53_spill] sm:$0xff] %v21685_v45 }
 0x837   : > { %v16787_v31 = vpop.f32.mrf.mxu1 }
 0x838   : > { %v21688_v27 = vadd.f32 %v16787_v31, %v21568_v14  ;;  %v21705_v14 = vpop.f32.mrf.mxu0 }
 0x839   : > { %v10456_v10 = vpop.f32.mrf.mxu1 }
 0x83a   : > { %23185 = vst [vmem:[#allocation54_spill] sm:$0xff] %v21688_v27  ;;  %v21693_v16 = vadd.f32 %v10456_v10, %v21571_v63 }
 0x83b   : > { %v16788_v4 = vpop.f32.mrf.mxu1 }
 0x83c   : > { %23186 = vst [vmem:[#allocation55_spill] sm:$0xff] %v21693_v16  ;;  %v21696_v54 = vadd.f32 %v16788_v4, %v21578_v19  ;;  %v21713_v19 = vpop.f32.mrf.mxu0 }
 0x83d   : > { %v21700_v5 = vpop.f32.mrf.mxu1 }
 0x83e   : > { %23187 = vst [vmem:[#allocation56_spill] sm:$0xff] %v21696_v54  ;;  %23188 = vst [vmem:[#allocation57_spill] sm:$0xff] %v21700_v5 }
 0x83f   : > { %v16791_v49 = vpop.f32.mrf.mxu1 }
 0x840   : > { %v21703_v45 = vadd.f32 %v16791_v49, %v21581_v24  ;;  %v21720_v24 = vpop.f32.mrf.mxu0 }
 0x841   : > { %v10472_v31 = vpop.f32.mrf.mxu1 }
 0x842   : > { %23189 = vst [vmem:[#allocation58_spill] sm:$0xff] %v21703_v45  ;;  %v21708_v27 = vadd.f32 %v10472_v31, %v21584_v34 }
 0x843   : > { %v16792_v63 = vpop.f32.mrf.mxu1 }
 0x844   : > { %23190 = vst [vmem:[#allocation59_spill] sm:$0xff] %v21708_v27  ;;  %v21711_v10 = vadd.f32 %v16792_v63, %v21591_v50  ;;  %v21728_v50 = vpop.f32.mrf.mxu0 }
 0x845   : > { %v21715_v4 = vpop.f32.mrf.mxu1 }
 0x846   : > { %23191 = vst [vmem:[#allocation60_spill] sm:$0xff] %v21711_v10  ;;  %23192 = vst [vmem:[#allocation61_spill] sm:$0xff] %v21715_v4 }
 0x847   : > { %v16795_v54 = vpop.f32.mrf.mxu1 }
 0x848   : > { %v21718_v5 = vadd.f32 %v16795_v54, %v21594_v32  ;;  %v21735_v32 = vld [vmem:[%s23001_s10 + $0x1] ss:$0 sm:$0xff] }
 0x849   : > { %v10488_v49 = vpop.f32.mrf.mxu1 }
 0x84a   : > { %23193 = vst [vmem:[#allocation62_spill] sm:$0xff] %v21718_v5  ;;  %v21723_v45 = vadd.f32 %v10488_v49, %v21597_v25  ;;  %v21738_v5 = vpop.f32.mrf.mxu0  ;;  %v21743_v25 = vld [vmem:[%s23002_s11 + $0x1] ss:$0 sm:$0xff] }
 0x84b   : > { %v16796_v34 = vpop.f32.mrf.mxu1 }
 0x84c   : > { %23194 = vst [vmem:[#allocation63_spill] sm:$0xff] %v21723_v45  ;;  %v21726_v31 = vadd.f32 %v16796_v34, %v21604_v57 }
 0x84d   : > { %v21730_v63 = vpop.f32.mrf.mxu1 }
 0x84e   : > { %23195 = vst [vmem:[#allocation64_spill] sm:$0xff] %v21726_v31  ;;  %23196 = vst [vmem:[#allocation65_spill] sm:$0xff] %v21730_v63 }
 0x84f   : > { %v16835_v10 = vpop.f32.mrf.mxu1 }
 0x850   : > { %v11101_v54 = vadd.f32 %v16835_v10, %v21609_v43  ;;  %v21750_v43 = vpop.f32.mrf.mxu0 }
 0x851   : > { %v11092_v57 = vpop.f32.mrf.mxu1 }
 0x852   : > { %v11231_v49 = vmul.f32 %v21735_v32, %v11101_v54  ;;  %v11093_v34 = vadd.f32 %v11092_v57, %v21617_v23 }
 0x853   : > { %v16836_v31 = vpop.f32.mrf.mxu1 }
 0x854   : > { %v11269_v63 = vadd.f32 %v21743_v25, %v11231_v49  ;;  %v11229_v45 = vmul.f32 %v21735_v32, %v11093_v34  ;;  %v11104_v4 = vadd.f32 %v16836_v31, %v21624_v8  ;;  %v21759_v31 = vpop.f32.mrf.mxu0 }
 0x855   : > { %v11095_v10 = vpop.f32.mrf.mxu1 }
 0x856   : > { %v11301_v27 = vmax.f32 %v11269_v63, 0.0  ;;  %v11267_v16 = vadd.f32 %v21743_v25, %v11229_v45  ;;  %v11232_v35 = vmul.f32 %v21735_v32, %v11104_v4  ;;  %v11096_v59 = vadd.f32 %v11095_v10, %v21632_v48  ;;  %v21769_v10 = vpop.f32.mrf.mxu0 }
 0x857   : > { %v16839_v54 = vpop.f32.mrf.mxu1 }
 0x858   : > { %11333 = vst.msk [vmem:[#allocation2 + $0x48] sm:$0xff] %vm442_vm1, %v11301_v27  ;;  %v11299_v23 = vmax.f32 %v11267_v16, 0.0  ;;  %v11270_v57 = vadd.f32 %v21743_v25, %v11232_v35  ;;  %v11230_v49 = vmul.f32 %v21735_v32, %v11096_v59  ;;  %v11117_v8 = vadd.f32 %v16839_v54, %v21639_v3 }
 0x859   : > { %v11108_v34 = vpop.f32.mrf.mxu1 }
 0x85a   : > { %11331 = vst.msk [vmem:[#allocation2 + $0x28] sm:$0xff] %vm442_vm1, %v11299_v23  ;;  %v11302_v45 = vmax.f32 %v11270_v57, 0.0  ;;  %v11268_v4 = vadd.f32 %v21743_v25, %v11230_v49  ;;  %v11235_v48 = vmul.f32 %v21735_v32, %v11117_v8  ;;  %v11109_v63 = vadd.f32 %v11108_v34, %v21653_v38 }
 0x85b   : > { %v16840_v27 = vpop.f32.mrf.mxu1 }
 0x85c   : > { %11334 = vst.msk [vmem:[#allocation2 + $0x50] sm:$0xff] %vm442_vm1, %v11302_v45  ;;  %v11300_v16 = vmax.f32 %v11268_v4, 0.0  ;;  %v11273_v59 = vadd.f32 %v21743_v25, %v11235_v48  ;;  %v11233_v35 = vmul.f32 %v21735_v32, %v11109_v63  ;;  %v11120_v3 = vadd.f32 %v16840_v27, %v21660_v41  ;;  %v21779_v48 = vpop.f32.mrf.mxu0 }
 0x85d   : > { %v11111_v54 = vpop.f32.mrf.mxu1 }
 0x85e   : > { %11332 = vst.msk [vmem:[#allocation2 + $0x30] sm:$0xff] %vm442_vm1, %v11300_v16  ;;  %v11305_v23 = vmax.f32 %v11273_v59, 0.0  ;;  %v11271_v57 = vadd.f32 %v21743_v25, %v11233_v35  ;;  %v11236_v38 = vmul.f32 %v21735_v32, %v11120_v3  ;;  %v11112_v49 = vadd.f32 %v11111_v54, %v21668_v40 }
 0x85f   : > { %v16843_v8 = vpop.f32.mrf.mxu1 }
 0x860   : > { %11337 = vst.msk [vmem:[#allocation2 + $0x88] sm:$0xff] %vm442_vm1, %v11305_v23  ;;  %v11303_v34 = vmax.f32 %v11271_v57, 0.0  ;;  %v11274_v45 = vadd.f32 %v21743_v25, %v11236_v38  ;;  %v11234_v41 = vmul.f32 %v21735_v32, %v11112_v49  ;;  %v11133_v4 = vadd.f32 %v16843_v8, %v21675_v47  ;;  %v21789_v38 = vpop.f32.mrf.mxu0 }
 0x861   : > { %v11124_v63 = vpop.f32.mrf.mxu1 }
 0x862   : > { %11335 = vst.msk [vmem:[#allocation2 + $0x68] sm:$0xff] %vm442_vm1, %v11303_v34  ;;  %v11306_v27 = vmax.f32 %v11274_v45, 0.0  ;;  %v11272_v16 = vadd.f32 %v21743_v25, %v11234_v41  ;;  %v11239_v40 = vmul.f32 %v21735_v32, %v11133_v4  ;;  %v11125_v59 = vadd.f32 %v11124_v63, %v21683_v13  ;;  %v11418_v45 = vld [vmem:[#allocation2 + $0x48] sm:$0xff] }
 0x863   : > { %v16844_v35 = vpop.f32.mrf.mxu1  ;;  %v11419_v57 = vld [vmem:[#allocation2 + $0x50] sm:$0xff] }
 0x864   : > { %11338 = vst.msk [vmem:[#allocation2 + $0x90] sm:$0xff] %vm442_vm1, %v11306_v27  ;;  %v11304_v3 = vmax.f32 %v11272_v16, 0.0  ;;  %v11277_v54 = vadd.f32 %v21743_v25, %v11239_v40  ;;  %v11237_v47 = vmul.f32 %v21735_v32, %v11125_v59  ;;  %v11136_v23 = vadd.f32 %v16844_v35, %v21690_v61  ;;  %v11416_v27 = vld [vmem:[#allocation2 + $0x28] sm:$0xff] }
 0x865   : > { %v11127_v49 = vpop.f32.mrf.mxu1  ;;  %v11417_v8 = vld [vmem:[#allocation2 + $0x30] sm:$0xff]  ;;  %v11365_v16 = vld [vmem:[#allocation2 + $0x27] sm:$0xff]  ;;  %v21799_v7 = vpack.c.bf16 %v11419_v57, %v11418_v45 }
 0x866   : > { %v11366_v34 = vld [vmem:[#allocation2 + $0x2f] sm:$0xff]  ;;  %11336 = vst.msk [vmem:[#allocation2 + $0x70] sm:$0xff] %vm442_vm1, %v11304_v3  ;;  %v11309_v13 = vmax.f32 %v11277_v54, 0.0  ;;  %v11275_v41 = vadd.f32 %v21743_v25, %v11237_v47  ;;  %v11240_v4 = vmul.f32 %v21735_v32, %v11136_v23  ;;  %v11128_v63 = vadd.f32 %v11127_v49, %v21698_v62  ;;  %v11367_v62 = vld [vmem:[#allocation2 + $0x47] sm:$0xff] }
 0x867   : > { %v11368_v40 = vld [vmem:[#allocation2 + $0x4f] sm:$0xff]  ;;  %v16847_v61 = vpop.f32.mrf.mxu1  ;;  %v21795_v59 = vpack.c.bf16 %v11417_v8, %v11416_v27  ;;  %v21797_v35 = vpack.c.bf16 %v11366_v34, %v11365_v16  ;;  %v21815_v8 = vpop.f32.mrf.mxu0 }
 0x868   : > { %11341 = vst.msk [vmem:[#allocation2 + $0xc8] sm:$0xff] %vm442_vm1, %v11309_v13  ;;  %v11307_v3 = vmax.f32 %v11275_v41, 0.0  ;;  %v11278_v54 = vadd.f32 %v21743_v25, %v11240_v4  ;;  %v11238_v47 = vmul.f32 %v21735_v32, %v11128_v63  ;;  %v11149_v23 = vadd.f32 %v16847_v61, %v21705_v14  ;;  %v21808_v49 = vld [vmem:[%s23003_s12 + $0x68] sm:$0xff]   ;;  %v21813_v57 = vld [vmem:[%s23003_s12 + $0x70] sm:$0xff]  }
 0x869   : > { %16868 = vmatmul.mubr.msk.bf16.vlgmr.msra.gmra.mxu0 %vm442_vm1, %v21795_v59  ;;  %16902 = vmatmul.mubr.msk.bf16.vlgmr.msra.gmra.mxu1 %vm442_vm1, %v21797_v35  ;;  %v11140_v14 = vpop.f32.mrf.mxu1  ;;  %v21821_v34 = vpack.c.bf16 %v11368_v40, %v11367_v62 }
 0x86a   : > { %11339 = vst.msk [vmem:[#allocation2 + $0xa8] sm:$0xff] %vm442_vm1, %v11307_v3  ;;  %v11310_v45 = vmax.f32 %v11278_v54, 0.0  ;;  %v11276_v13 = vadd.f32 %v21743_v25, %v11238_v47  ;;  %v11243_v41 = vmul.f32 %v21735_v32, %v11149_v23  ;;  %16934 = vmatpush3.bf16.msra.mxu0 %v21552_v39  ;;  %v11141_v4 = vadd.f32 %v11140_v14, %v21713_v19  ;;  %v21839_v3 = vpop.f32.mrf.mxu0  ;;  %v11422_v23 = vld [vmem:[#allocation2 + $0x88] sm:$0xff] }
 0x86b   : > { %16871 = vmatprep.mubr.msk.bf16.mxu0 %vm442_vm1, %v21799_v7  ;;  %16905 = vmatprep.mubr.msk.bf16.mxu1 %vm442_vm1, %v21821_v34  ;;  %v16848_v63 = vpop.f32.mrf.mxu1  ;;  %v11423_v61 = vld [vmem:[#allocation2 + $0x90] sm:$0xff] }
 0x86c   : > { %16968 = vmatpush3.bf16.msra.mxu1 %v21647_v28  ;;  %11342 = vst.msk [vmem:[#allocation2 + $0xd0] sm:$0xff] %vm442_vm1, %v11310_v45  ;;  %v11308_v27 = vmax.f32 %v11276_v13, 0.0  ;;  %v11281_v16 = vadd.f32 %v21743_v25, %v11243_v41  ;;  %v11241_v40 = vmul.f32 %v21735_v32, %v11141_v4  ;;  %v11152_v39 = vadd.f32 %v16848_v63, %v21720_v24  ;;  %v11372_v19 = vld [vmem:[#allocation2 + $0x8f] sm:$0xff]  ;;  %v11369_v41 = vld [vmem:[#allocation2 + $0x67] sm:$0xff] }
 0x86d   : > { %17001 = vmatprep.subr.bf16.mxu0 %v21808_v49  ;;  %17035 = vmatprep.subr.bf16.mxu1 %v21813_v57  ;;  %v11143_v54 = vpop.f32.mrf.mxu1  ;;  %v11421_v47 = vld [vmem:[#allocation2 + $0x70] sm:$0xff]  ;;  %v11420_v13 = vld [vmem:[#allocation2 + $0x68] sm:$0xff]  ;;  %v21849_v2 = vpack.c.bf16 %v11423_v61, %v11422_v23 }
 0x86e   : > { %v11370_v28 = vld [vmem:[#allocation2 + $0x6f] sm:$0xff]  ;;  %11340 = vst.msk [vmem:[#allocation2 + $0xb0] sm:$0xff] %vm442_vm1, %v11308_v27  ;;  %v11313_v62 = vmax.f32 %v11281_v16, 0.0  ;;  %v11279_v14 = vadd.f32 %v21743_v25, %v11241_v40  ;;  %v11244_v45 = vmul.f32 %v21735_v32, %v11152_v39  ;;  %v11144_v24 = vadd.f32 %v11143_v54, %v21728_v50  ;;  %v11371_v4 = vld [vmem:[#allocation2 + $0x87] sm:$0xff]  ;;  %v21857_v39 = vpop.f32.mrf.mxu0 }
 0x86f   : > { %v16851_v63 = vpop.f32.mrf.mxu1  ;;  %v21845_v0 = vpack.c.bf16 %v11421_v47, %v11420_v13  ;;  %v21847_v53 = vpack.c.bf16 %v11370_v28, %v11369_v41  ;;  %v21851_v46 = vpack.c.bf16 %v11372_v19, %v11371_v4 }
 0x870   : > { %11345 = vst.msk [vmem:[#allocation2 + $0x108] sm:$0xff] %vm442_vm1, %v11313_v62  ;;  %v11311_v27 = vmax.f32 %v11279_v14, 0.0  ;;  %v11282_v16 = vadd.f32 %v21743_v25, %v11244_v45  ;;  %v11242_v40 = vmul.f32 %v21735_v32, %v11144_v24  ;;  %v11165_v50 = vadd.f32 %v16851_v63, %v21738_v5  ;;  %v21875_v41 = vpop.f32.mrf.mxu0 }
 0x871   : > { %16872 = vmatmul.mubr.msk.bf16.gmra.mxu0 %vm442_vm1, %v21845_v0  ;;  %16906 = vmatmul.mubr.msk.bf16.gmra.mxu1 %vm442_vm1, %v21847_v53  ;;  %v11156_v61 = vpop.f32.mrf.mxu1 }
 0x872   : > { %11343 = vst.msk [vmem:[#allocation2 + $0xe8] sm:$0xff] %vm442_vm1, %v11311_v27  ;;  %v11314_v19 = vmax.f32 %v11282_v16, 0.0  ;;  %v11280_v54 = vadd.f32 %v21743_v25, %v11242_v40  ;;  %v11247_v47 = vmul.f32 %v21735_v32, %v11165_v50  ;;  %v11157_v28 = vadd.f32 %v11156_v61, %v21750_v43  ;;  %16875 = vmatprep.mubr.msk.bf16.mxu0 %vm442_vm1, %v21849_v2  ;;  %v11426_v27 = vld [vmem:[#allocation2 + $0xc8] sm:$0xff] }
 0x873   : > { %16909 = vmatprep.mubr.msk.bf16.mxu1 %vm442_vm1, %v21851_v46  ;;  %v16852_v5 = vpop.f32.mrf.mxu1  ;;  %v11427_v24 = vld [vmem:[#allocation2 + $0xd0] sm:$0xff] }
 0x874   : > { %11346 = vst.msk [vmem:[#allocation2 + $0x110] sm:$0xff] %vm442_vm1, %v11314_v19  ;;  %v11312_v23 = vmax.f32 %v11280_v54, 0.0  ;;  %v11285_v62 = vadd.f32 %v21743_v25, %v11247_v47  ;;  %v11245_v14 = vmul.f32 %v21735_v32, %v11157_v28  ;;  %v11168_v45 = vadd.f32 %v16852_v5, %v21759_v31  ;;  %v11376_v13 = vld [vmem:[#allocation2 + $0xcf] sm:$0xff]  ;;  %v11373_v54 = vld [vmem:[#allocation2 + $0xa7] sm:$0xff] }
 0x875   : > { %v11159_v43 = vpop.f32.mrf.mxu1  ;;  %v11425_v4 = vld [vmem:[#allocation2 + $0xb0] sm:$0xff]  ;;  %v11424_v19 = vld [vmem:[#allocation2 + $0xa8] sm:$0xff]  ;;  %v21885_v52 = vpack.c.bf16 %v11427_v24, %v11426_v27 }
 0x876   : > { %v11374_v63 = vld [vmem:[#allocation2 + $0xaf] sm:$0xff]  ;;  %11344 = vst.msk [vmem:[#allocation2 + $0xf0] sm:$0xff] %vm442_vm1, %v11312_v23  ;;  %v11317_v16 = vmax.f32 %v11285_v62, 0.0  ;;  %v11283_v40 = vadd.f32 %v21743_v25, %v11245_v14  ;;  %v11248_v50 = vmul.f32 %v21735_v32, %v11168_v45  ;;  %v11160_v61 = vadd.f32 %v11159_v43, %v21769_v10  ;;  %v11375_v31 = vld [vmem:[#allocation2 + $0xc7] sm:$0xff]  ;;  %v16826_v45 = vpop.f32.mrf.mxu0 }
 0x877   : > { %v16855_v47 = vpop.f32.mrf.mxu1  ;;  %v21881_v28 = vpack.c.bf16 %v11425_v4, %v11424_v19  ;;  %v21883_v5 = vpack.c.bf16 %v11374_v63, %v11373_v54  ;;  %v21887_v60 = vpack.c.bf16 %v11376_v13, %v11375_v31 }
 0x878   : > { %11349 = vst.msk [vmem:[#allocation2 + $0x148] sm:$0xff] %vm442_vm1, %v11317_v16  ;;  %v11315_v23 = vmax.f32 %v11283_v40, 0.0  ;;  %v11286_v62 = vadd.f32 %v21743_v25, %v11248_v50  ;;  %v11246_v14 = vmul.f32 %v21735_v32, %v11160_v61  ;;  %v11181_v10 = vadd.f32 %v16855_v47, %v21779_v48  ;;  %v10979_v54 = vpop.f32.mrf.mxu0 }
 0x879   : > { %16876 = vmatmul.mubr.msk.bf16.gmra.mxu0 %vm442_vm1, %v21881_v28  ;;  %16910 = vmatmul.mubr.msk.bf16.gmra.mxu1 %vm442_vm1, %v21883_v5  ;;  %v11172_v24 = vpop.f32.mrf.mxu1 }
 0x87a   : > { %11347 = vst.msk [vmem:[#allocation2 + $0x128] sm:$0xff] %vm442_vm1, %v11315_v23  ;;  %v11318_v13 = vmax.f32 %v11286_v62, 0.0  ;;  %v11284_v43 = vadd.f32 %v21743_v25, %v11246_v14  ;;  %v11251_v4 = vmul.f32 %v21735_v32, %v11181_v10  ;;  %v11173_v63 = vadd.f32 %v11172_v24, %v21789_v38  ;;  %16879 = vmatprep.mubr.msk.bf16.mxu0 %vm442_vm1, %v21885_v52  ;;  %v11430_v23 = vld [vmem:[#allocation2 + $0x108] sm:$0xff] }
 0x87b   : > { %16913 = vmatprep.mubr.msk.bf16.mxu1 %vm442_vm1, %v21887_v60  ;;  %v16856_v48 = vpop.f32.mrf.mxu1  ;;  %v11431_v61 = vld [vmem:[#allocation2 + $0x110] sm:$0xff] }
 0x87c   : > { %11350 = vst.msk [vmem:[#allocation2 + $0x150] sm:$0xff] %vm442_vm1, %v11318_v13  ;;  %v11316_v27 = vmax.f32 %v11284_v43, 0.0  ;;  %v11289_v16 = vadd.f32 %v21743_v25, %v11251_v4  ;;  %v11249_v40 = vmul.f32 %v21735_v32, %v11173_v63  ;;  %v11184_v50 = vadd.f32 %v16856_v48, %v21815_v8  ;;  %v11380_v19 = vld [vmem:[#allocation2 + $0x10f] sm:$0xff]  ;;  %v11377_v43 = vld [vmem:[#allocation2 + $0xe7] sm:$0xff] }
 0x87d   : > { %v11175_v38 = vpop.f32.mrf.mxu1  ;;  %v11429_v31 = vld [vmem:[#allocation2 + $0xf0] sm:$0xff]  ;;  %v11428_v13 = vld [vmem:[#allocation2 + $0xe8] sm:$0xff]  ;;  %v21917_v22 = vpack.c.bf16 %v11431_v61, %v11430_v23 }
 0x87e   : > { %v11378_v47 = vld [vmem:[#allocation2 + $0xef] sm:$0xff]  ;;  %11348 = vst.msk [vmem:[#allocation2 + $0x130] sm:$0xff] %vm442_vm1, %v11316_v27  ;;  %v11321_v62 = vmax.f32 %v11289_v16, 0.0  ;;  %v11287_v14 = vadd.f32 %v21743_v25, %v11249_v40  ;;  %v11252_v10 = vmul.f32 %v21735_v32, %v11184_v50  ;;  %v11176_v24 = vadd.f32 %v11175_v38, %v21839_v3  ;;  %v11379_v4 = vld [vmem:[#allocation2 + $0x107] sm:$0xff]  ;;  %v16829_v50 = vpop.f32.mrf.mxu0 }
 0x87f   : > { %v16859_v8 = vpop.f32.mrf.mxu1  ;;  %v21913_v63 = vpack.c.bf16 %v11429_v31, %v11428_v13  ;;  %v21915_v48 = vpack.c.bf16 %v11378_v47, %v11377_v43  ;;  %v21919_v44 = vpack.c.bf16 %v11380_v19, %v11379_v4 }
 0x880   : > { %11353 = vst.msk [vmem:[#allocation2 + $0x188] sm:$0xff] %vm442_vm1, %v11321_v62  ;;  %v11319_v27 = vmax.f32 %v11287_v14, 0.0  ;;  %v11290_v16 = vadd.f32 %v21743_v25, %v11252_v10  ;;  %v11250_v40 = vmul.f32 %v21735_v32, %v11176_v24  ;;  %v11197_v3 = vadd.f32 %v16859_v8, %v21857_v39  ;;  %v10992_v43 = vpop.f32.mrf.mxu0 }
 0x881   : > { %16880 = vmatmul.mubr.msk.bf16.gmra.mxu0 %vm442_vm1, %v21913_v63  ;;  %16914 = vmatmul.mubr.msk.bf16.gmra.mxu1 %vm442_vm1, %v21915_v48  ;;  %v11188_v61 = vpop.f32.mrf.mxu1 }
 0x882   : > { %11351 = vst.msk [vmem:[#allocation2 + $0x168] sm:$0xff] %vm442_vm1, %v11319_v27  ;;  %v11322_v19 = vmax.f32 %v11290_v16, 0.0  ;;  %v11288_v38 = vadd.f32 %v21743_v25, %v11250_v40  ;;  %v11255_v31 = vmul.f32 %v21735_v32, %v11197_v3  ;;  %v11189_v47 = vadd.f32 %v11188_v61, %v21875_v41  ;;  %16883 = vmatprep.mubr.msk.bf16.mxu0 %vm442_vm1, %v21917_v22  ;;  %v11434_v27 = vld [vmem:[#allocation2 + $0x148] sm:$0xff] }
 0x883   : > { %16917 = vmatprep.mubr.msk.bf16.mxu1 %vm442_vm1, %v21919_v44  ;;  %v16860_v39 = vpop.f32.mrf.mxu1  ;;  %v11435_v24 = vld [vmem:[#allocation2 + $0x150] sm:$0xff] }
 0x884   : > { %11354 = vst.msk [vmem:[#allocation2 + $0x190] sm:$0xff] %vm442_vm1, %v11322_v19  ;;  %v11320_v23 = vmax.f32 %v11288_v38, 0.0  ;;  %v11293_v62 = vadd.f32 %v21743_v25, %v11255_v31  ;;  %v11253_v14 = vmul.f32 %v21735_v32, %v11189_v47  ;;  %v11200_v10 = vadd.f32 %v16860_v39, %v16826_v45  ;;  %v11384_v13 = vld [vmem:[#allocation2 + $0x14f] sm:$0xff]  ;;  %v11381_v38 = vld [vmem:[#allocation2 + $0x127] sm:$0xff] }
 0x885   : > { %v11191_v4 = vpop.f32.mrf.mxu1  ;;  %v11433_v41 = vld [vmem:[#allocation2 + $0x130] sm:$0xff]  ;;  %v11432_v19 = vld [vmem:[#allocation2 + $0x128] sm:$0xff]  ;;  %v21947_v11 = vpack.c.bf16 %v11435_v24, %v11434_v27 }
 0x886   : > { %v11382_v8 = vld [vmem:[#allocation2 + $0x12f] sm:$0xff]  ;;  %11352 = vst.msk [vmem:[#allocation2 + $0x170] sm:$0xff] %vm442_vm1, %v11320_v23  ;;  %v11325_v16 = vmax.f32 %v11293_v62, 0.0  ;;  %v11291_v40 = vadd.f32 %v21743_v25, %v11253_v14  ;;  %v11256_v3 = vmul.f32 %v21735_v32, %v11200_v10  ;;  %v11192_v61 = vadd.f32 %v11191_v4, %v10979_v54  ;;  %v11383_v31 = vld [vmem:[#allocation2 + $0x147] sm:$0xff]  ;;  %v16830_v10 = vpop.f32.mrf.mxu0 }
 0x887   : > { %v16863_v47 = vpop.f32.mrf.mxu1  ;;  %v21943_v45 = vpack.c.bf16 %v11433_v41, %v11432_v19  ;;  %v21945_v39 = vpack.c.bf16 %v11382_v8, %v11381_v38  ;;  %v21949_v30 = vpack.c.bf16 %v11384_v13, %v11383_v31  ;;  %v11916_v33 = vld [vmem:[#allocation2 + $0x151] sm:$0xff] }
 0x888   : > { %11357 = vst.msk [vmem:[#allocation2 + $0x1c8] sm:$0xff] %vm442_vm1, %v11325_v16  ;;  %v11323_v23 = vmax.f32 %v11291_v40, 0.0  ;;  %v11294_v62 = vadd.f32 %v21743_v25, %v11256_v3  ;;  %v11254_v14 = vmul.f32 %v21735_v32, %v11192_v61  ;;  %v11213_v54 = vadd.f32 %v16863_v47, %v16829_v50  ;;  %v10995_v19 = vpop.f32.mrf.mxu0 }
 0x889   : > { %16884 = vmatmul.mubr.msk.bf16.gmra.mxu0 %vm442_vm1, %v21943_v45  ;;  %16918 = vmatmul.mubr.msk.bf16.gmra.mxu1 %vm442_vm1, %v21945_v39  ;;  %v11204_v4 = vpop.f32.mrf.mxu1 }
 0x88a   : > { %11355 = vst.msk [vmem:[#allocation2 + $0x1a8] sm:$0xff] %vm442_vm1, %v11323_v23  ;;  %v11326_v24 = vmax.f32 %v11294_v62, 0.0  ;;  %v11292_v13 = vadd.f32 %v21743_v25, %v11254_v14  ;;  %v11259_v41 = vmul.f32 %v21735_v32, %v11213_v54  ;;  %v11205_v8 = vadd.f32 %v11204_v4, %v10992_v43  ;;  %16887 = vmatprep.mubr.msk.bf16.mxu0 %vm442_vm1, %v21947_v11  ;;  %v11436_v4 = vld [vmem:[#allocation2 + $0x168] sm:$0xff] }
 0x88b   : > { %16921 = vmatprep.mubr.msk.bf16.mxu1 %vm442_vm1, %v21949_v30  ;;  %v16864_v50 = vpop.f32.mrf.mxu1  ;;  %v11439_v61 = vld [vmem:[#allocation2 + $0x190] sm:$0xff] }
 0x88c   : > { %11358 = vst.msk [vmem:[#allocation2 + $0x1d0] sm:$0xff] %vm442_vm1, %v11326_v24  ;;  %v11324_v27 = vmax.f32 %v11292_v13, 0.0  ;;  %v11297_v16 = vadd.f32 %v21743_v25, %v11259_v41  ;;  %v11257_v40 = vmul.f32 %v21735_v32, %v11205_v8  ;;  %v11216_v3 = vadd.f32 %v16864_v50, %v16830_v10  ;;  %v11388_v47 = vld [vmem:[#allocation2 + $0x18f] sm:$0xff]  ;;  %v11385_v24 = vld [vmem:[#allocation2 + $0x167] sm:$0xff] }
 0x88d   : > { %v11207_v38 = vpop.f32.mrf.mxu1  ;;  %v11437_v31 = vld [vmem:[#allocation2 + $0x170] sm:$0xff]  ;;  %v11438_v13 = vld [vmem:[#allocation2 + $0x188] sm:$0xff] }
 0x88e   : > { %v11386_v43 = vld [vmem:[#allocation2 + $0x16f] sm:$0xff]  ;;  %11356 = vst.msk [vmem:[#allocation2 + $0x1b0] sm:$0xff] %vm442_vm1, %v11324_v27  ;;  %v11329_v23 = vmax.f32 %v11297_v16, 0.0  ;;  %v11295_v62 = vadd.f32 %v21743_v25, %v11257_v40  ;;  %v11260_v14 = vmul.f32 %v21735_v32, %v11216_v3  ;;  %v11208_v54 = vadd.f32 %v11207_v38, %v10995_v19  ;;  %v11387_v50 = vld [vmem:[#allocation2 + $0x187] sm:$0xff] }
 0x88f   : > { %v21971_v41 = vpack.c.bf16 %v11437_v31, %v11436_v4  ;;  %v21973_v10 = vpack.c.bf16 %v11386_v43, %v11385_v24  ;;  %v21975_v8 = vpack.c.bf16 %v11439_v61, %v11438_v13  ;;  %v21980_v40 = vpack.c.bf16 %v11388_v47, %v11387_v50  ;;  %v11895_v24 = vld [vmem:[#allocation2 + $0x9] sm:$0xff]  ;;  %v11896_v13 = vld [vmem:[#allocation2 + $0x11] sm:$0xff] }
 0x890   : > { %11361 = vst.msk [vmem:[#allocation2 + $0x208] sm:$0xff] %vm442_vm1, %v11329_v23  ;;  %v11327_v58 = vmax.f32 %v11295_v62, 0.0  ;;  %v11298_v27 = vadd.f32 %v21743_v25, %v11260_v14  ;;  %v11258_v16 = vmul.f32 %v21735_v32, %v11208_v54  ;;  %v11442_v62 = vld [vmem:[#allocation2 + $0x1c8] sm:$0xff]  ;;  %v11920_v55 = vld [vmem:[#allocation2 + $0x191] sm:$0xff] }
 0x891   : > { %16888 = vmatmul.mubr.msk.bf16.gmra.mxu0 %vm442_vm1, %v21971_v41  ;;  %16922 = vmatmul.mubr.msk.bf16.gmra.mxu1 %vm442_vm1, %v21973_v10  ;;  %v11440_v19 = vld [vmem:[#allocation2 + $0x1a8] sm:$0xff] }
 0x892   : > { %11359 = vst.msk [vmem:[#allocation2 + $0x1e8] sm:$0xff] %vm442_vm1, %v11327_v58  ;;  %v11330_v3 = vmax.f32 %v11298_v27, 0.0  ;;  %v11296_v61 = vadd.f32 %v21743_v25, %v11258_v16  ;;  %16891 = vmatprep.mubr.msk.bf16.mxu0 %vm442_vm1, %v21975_v8  ;;  %16925 = vmatprep.mubr.msk.bf16.mxu1 %vm442_vm1, %v21980_v40  ;;  %v11389_v38 = vld [vmem:[#allocation2 + $0x1a7] sm:$0xff] }
 0x893   : > { %v11443_v31 = vld [vmem:[#allocation2 + $0x1d0] sm:$0xff]  ;;  %v11391_v14 = vld [vmem:[#allocation2 + $0x1c7] sm:$0xff] }
 0x894   : > { %11362 = vst.msk [vmem:[#allocation2 + $0x210] sm:$0xff] %vm442_vm1, %v11330_v3  ;;  %v11328_v32 = vmax.f32 %v11296_v61, 0.0  ;;  %v11392_v23 = vld [vmem:[#allocation2 + $0x1cf] sm:$0xff]  ;;  %v21998_v54 = vpack.c.bf16 %v11443_v31, %v11442_v62 }
 0x895   : > { %v11441_v43 = vld [vmem:[#allocation2 + $0x1b0] sm:$0xff]  ;;  %v22000_v4 = vpack.c.bf16 %v11392_v23, %v11391_v14  ;;  %v22028_v14 = vld [vmem:[%s23003_s12 + $0x78] sm:$0xff]  }
 0x896   : > { %v11390_v47 = vld [vmem:[#allocation2 + $0x1af] sm:$0xff]  ;;  %11360 = vst.msk [vmem:[#allocation2 + $0x1f0] sm:$0xff] %vm442_vm1, %v11328_v32  ;;  %v21994_v58 = vpack.c.bf16 %v11441_v43, %v11440_v19  ;;  %v11927_v19 = vpack.c.bf16 %v11896_v13, %v11895_v24  ;;  %v22033_v24 = vld [vmem:[%s23003_s12 + $0x80] sm:$0xff]  }
 0x897   : > { %v21996_v25 = vpack.c.bf16 %v11390_v47, %v11389_v38  ;;  %v11897_v38 = vld [vmem:[#allocation2 + $0x29] sm:$0xff]  ;;  %v11898_v31 = vld [vmem:[#allocation2 + $0x31] sm:$0xff] }
 0x898   : > { %v11899_v43 = vld [vmem:[#allocation2 + $0x49] sm:$0xff]  ;;  %v11900_v47 = vld [vmem:[#allocation2 + $0x51] sm:$0xff]  ;;  %v22021_v23 = vpack.c.bf16 %v11898_v31, %v11897_v38 }
 0x899   : > { %16892 = vmatmul.mubr.msk.bf16.gmra.mxu0 %vm442_vm1, %v21994_v58  ;;  %16926 = vmatmul.mubr.msk.bf16.gmra.mxu1 %vm442_vm1, %v21996_v25  ;;  %v11444_v50 = vld [vmem:[#allocation2 + $0x1e8] sm:$0xff]  ;;  %v22023_v62 = vpack.c.bf16 %v11900_v47, %v11899_v43  ;;  %v11902_v13 = vld [vmem:[#allocation2 + $0x71] sm:$0xff] }
 0x89a   : > { %16895 = vmatprep.mubr.msk.bf16.mxu0 %vm442_vm1, %v21998_v54  ;;  %16929 = vmatprep.mubr.msk.bf16.mxu1 %vm442_vm1, %v22000_v4  ;;  %v11393_v16 = vld [vmem:[#allocation2 + $0x1e7] sm:$0xff]  ;;  %v11908_v38 = vld [vmem:[#allocation2 + $0xd1] sm:$0xff] }
 0x89b   : > { %v11909_v47 = vld [vmem:[#allocation2 + $0xe9] sm:$0xff]  ;;  %v11924_v21 = vld [vmem:[#allocation2 + $0x1d1] sm:$0xff] }
 0x89c   : > { %v11919_v42 = vld [vmem:[#allocation2 + $0x189] sm:$0xff] }
 0x89d   : > { %v11445_v27 = vld [vmem:[#allocation2 + $0x1f0] sm:$0xff] }
 0x89e   : > { %v11394_v3 = vld [vmem:[#allocation2 + $0x1ef] sm:$0xff]  ;;  %v22010_v61 = vpack.c.bf16 %v11445_v27, %v11444_v50 }
 0x89f   : > { %v22012_v32 = vpack.c.bf16 %v11394_v3, %v11393_v16  ;;  %v11903_v50 = vld [vmem:[#allocation2 + $0x89] sm:$0xff]  ;;  %v11904_v27 = vld [vmem:[#allocation2 + $0x91] sm:$0xff] }
 0x8a0   : > { %v22049_v3 = vpack.c.bf16 %v11904_v27, %v11903_v50  ;;  %v11912_v50 = vld [vmem:[#allocation2 + $0x111] sm:$0xff]  ;;  %v11923_v36 = vld [vmem:[#allocation2 + $0x1c9] sm:$0xff] }
 0x8a1   : > { %16896 = vmatmul.mubr.msk.bf16.gmra.mxu0 %vm442_vm1, %v22010_v61  ;;  %16930 = vmatmul.mubr.msk.bf16.gmra.mxu1 %vm442_vm1, %v22012_v32  ;;  %v11941_v1 = vpack.c.bf16 %v11924_v21, %v11923_v36  ;;  %v17225_v36 = vld [vmem:[%s23003_s12 + $0x88] sm:$0xff]   ;;  %v12522_v21 = vld [vmem:[#allocation2 + $0x210] sm:$0xff] }
 0x8a2   : > { %16969 = vmatprep.mubr.msk.bf16.mxu1 %vm442_vm1, %v21797_v35  ;;  %16935 = vmatprep.mubr.msk.bf16.mxu0 %vm442_vm1, %v11927_v19  ;;  %v11901_v35 = vld [vmem:[#allocation2 + $0x69] sm:$0xff] }
 0x8a3   : > { %v22047_v16 = vpack.c.bf16 %v11902_v13, %v11901_v35  ;;  %v11907_v19 = vld [vmem:[#allocation2 + $0xc9] sm:$0xff]  ;;  %v11910_v35 = vld [vmem:[#allocation2 + $0xf1] sm:$0xff] }
 0x8a4   : > { %v22061_v43 = vpack.c.bf16 %v11908_v38, %v11907_v19  ;;  %v11911_v13 = vld [vmem:[#allocation2 + $0x109] sm:$0xff]  ;;  %v22071_v27 = vpack.c.bf16 %v11910_v35, %v11909_v47  ;;  %v11914_v19 = vld [vmem:[#allocation2 + $0x131] sm:$0xff] }
 0x8a5   : > { %v11915_v38 = vld [vmem:[#allocation2 + $0x149] sm:$0xff] }
 0x8a6   : > { %v22085_v35 = vpack.c.bf16 %v11916_v33, %v11915_v38  ;;  %v11921_v33 = vld [vmem:[#allocation2 + $0x1a9] sm:$0xff]  ;;  %v11922_v38 = vld [vmem:[#allocation2 + $0x1b1] sm:$0xff] }
 0x8a7   : > { %v11940_v6 = vpack.c.bf16 %v11922_v38, %v11921_v33 }
 0x8a9   : > { %16936 = vmatmul.mubr.msk.bf16.vlgmr.msra.gmra.mxu0 %vm442_vm1, %v22021_v23  ;;  %16970 = vmatmul.mubr.msk.bf16.vlgmr.msra.gmra.mxu1 %vm442_vm1, %v21821_v34 }
 0x8aa   : > { %17002 = vmatpush3.bf16.msra.mxu0 %v21808_v49  ;;  %16939 = vmatprep.mubr.msk.bf16.mxu0 %vm442_vm1, %v22023_v62  ;;  %v11905_v49 = vld [vmem:[#allocation2 + $0xa9] sm:$0xff] }
 0x8ab   : > { %16973 = vmatprep.mubr.msk.bf16.mxu1 %vm442_vm1, %v21847_v53  ;;  %17036 = vmatpush3.bf16.msra.mxu1 %v21813_v57  ;;  %v11906_v57 = vld [vmem:[#allocation2 + $0xb1] sm:$0xff] }
 0x8ac   : > { %17069 = vmatprep.subr.bf16.mxu0 %v22028_v14  ;;  %17103 = vmatprep.subr.bf16.mxu1 %v22033_v24  ;;  %v22059_v31 = vpack.c.bf16 %v11906_v57, %v11905_v49  ;;  %v22073_v49 = vpack.c.bf16 %v11912_v50, %v11911_v13  ;;  %v11913_v57 = vld [vmem:[#allocation2 + $0x129] sm:$0xff]  ;;  %v11918_v50 = vld [vmem:[#allocation2 + $0x171] sm:$0xff] }
 0x8ad   : > { %v22083_v47 = vpack.c.bf16 %v11914_v19, %v11913_v57  ;;  %v11917_v13 = vld [vmem:[#allocation2 + $0x169] sm:$0xff]  ;;  %v22095_v19 = vpack.c.bf16 %v11920_v55, %v11919_v42  ;;  %v11926_v42 = vld [vmem:[#allocation2 + $0x1f1] sm:$0xff] }
 0x8ae   : > { %v11938_v57 = vpack.c.bf16 %v11918_v50, %v11917_v13  ;;  %v11925_v55 = vld [vmem:[#allocation2 + $0x1e9] sm:$0xff] }
 0x8af   : > { %v12224_v13 = vld [vmem:[#allocation2 + $0x20f] sm:$0xff]  ;;  %v12223_v50 = vld [vmem:[#allocation2 + $0x207] sm:$0xff]  ;;  %v11942_v20 = vpack.c.bf16 %v11926_v42, %v11925_v55 }
 0x8b0   : > { %v22110_v29 = vpack.c.bf16 %v12224_v13, %v12223_v50 }
 0x8b1   : > { %16940 = vmatmul.mubr.msk.bf16.gmra.mxu0 %vm442_vm1, %v22047_v16  ;;  %16974 = vmatmul.mubr.msk.bf16.gmra.mxu1 %vm442_vm1, %v21851_v46 }
 0x8b2   : > { %16943 = vmatprep.mubr.msk.bf16.mxu0 %vm442_vm1, %v22049_v3  ;;  %16977 = vmatprep.mubr.msk.bf16.mxu1 %vm442_vm1, %v21883_v5 }
 0x8b9   : > { %16944 = vmatmul.mubr.msk.bf16.gmra.mxu0 %vm442_vm1, %v22059_v31  ;;  %16978 = vmatmul.mubr.msk.bf16.gmra.mxu1 %vm442_vm1, %v21887_v60 }
 0x8ba   : > { %16947 = vmatprep.mubr.msk.bf16.mxu0 %vm442_vm1, %v22061_v43  ;;  %16981 = vmatprep.mubr.msk.bf16.mxu1 %vm442_vm1, %v21915_v48 }
 0x8c1   : > { %16948 = vmatmul.mubr.msk.bf16.gmra.mxu0 %vm442_vm1, %v22071_v27  ;;  %16982 = vmatmul.mubr.msk.bf16.gmra.mxu1 %vm442_vm1, %v21919_v44 }
 0x8c2   : > { %16951 = vmatprep.mubr.msk.bf16.mxu0 %vm442_vm1, %v22073_v49  ;;  %16985 = vmatprep.mubr.msk.bf16.mxu1 %vm442_vm1, %v21945_v39 }
 0x8c9   : > { %16952 = vmatmul.mubr.msk.bf16.gmra.mxu0 %vm442_vm1, %v22083_v47  ;;  %16986 = vmatmul.mubr.msk.bf16.gmra.mxu1 %vm442_vm1, %v21949_v30 }
 0x8ca   : > { %16955 = vmatprep.mubr.msk.bf16.mxu0 %vm442_vm1, %v22085_v35  ;;  %16989 = vmatprep.mubr.msk.bf16.mxu1 %vm442_vm1, %v21973_v10 }
 0x8d1   : > { %16956 = vmatmul.mubr.msk.bf16.gmra.mxu0 %vm442_vm1, %v11938_v57  ;;  %16990 = vmatmul.mubr.msk.bf16.gmra.mxu1 %vm442_vm1, %v21980_v40 }
 0x8d2   : > { %16959 = vmatprep.mubr.msk.bf16.mxu0 %vm442_vm1, %v22095_v19  ;;  %16993 = vmatprep.mubr.msk.bf16.mxu1 %vm442_vm1, %v21996_v25 }
 0x8d9   : > { %16960 = vmatmul.mubr.msk.bf16.gmra.mxu0 %vm442_vm1, %v11940_v6  ;;  %16994 = vmatmul.mubr.msk.bf16.gmra.mxu1 %vm442_vm1, %v22000_v4 }
 0x8da   : > { %16963 = vmatprep.mubr.msk.bf16.mxu0 %vm442_vm1, %v11941_v1  ;;  %16997 = vmatprep.mubr.msk.bf16.mxu1 %vm442_vm1, %v22012_v32 }
 0x8e1   : > { %16964 = vmatmul.mubr.msk.bf16.gmra.mxu0 %vm442_vm1, %v11942_v20  ;;  %16998 = vmatmul.mubr.msk.bf16.gmra.mxu1 %vm442_vm1, %v22110_v29 }
 0x8e2   : > { %17003 = vmatprep.mubr.msk.bf16.mxu0 %vm442_vm1, %v21795_v59  ;;  %17037 = vmatprep.mubr.msk.bf16.mxu1 %vm442_vm1, %v22021_v23  ;;  %v12819_v59 = vld [vmem:[#allocation2 + $0x209] sm:$0xff]  ;;  %v12820_v23 = vld [vmem:[#allocation2 + $0x211] sm:$0xff] }
 0x8e9   : > { %17004 = vmatmul.mubr.msk.bf16.vlgmr.msra.gmra.mxu0 %vm442_vm1, %v21799_v7  ;;  %17038 = vmatmul.mubr.msk.bf16.vlgmr.msra.gmra.mxu1 %vm442_vm1, %v22023_v62 }
 0x8ea   : > { %17070 = vmatpush3.bf16.msra.mxu0 %v22028_v14  ;;  %17007 = vmatprep.mubr.msk.bf16.mxu0 %vm442_vm1, %v21845_v0  ;;  %v12521_v14 = vld [vmem:[#allocation2 + $0x208] sm:$0xff] }
 0x8eb   : > { %17041 = vmatprep.mubr.msk.bf16.mxu1 %vm442_vm1, %v22047_v16  ;;  %17104 = vmatpush3.bf16.msra.mxu1 %v22033_v24  ;;  %v22176_v24 = vpack.c.bf16 %v12522_v21, %v12521_v14 }
 0x8ec   : > { %17137 = vmatprep.subr.bf16.mxu0 %v17225_v36 }
 0x8f1   : > { %17008 = vmatmul.mubr.msk.bf16.gmra.mxu0 %vm442_vm1, %v21849_v2  ;;  %17042 = vmatmul.mubr.msk.bf16.gmra.mxu1 %vm442_vm1, %v22049_v3 }
 0x8f2   : > { %17011 = vmatprep.mubr.msk.bf16.mxu0 %vm442_vm1, %v21881_v28  ;;  %17045 = vmatprep.mubr.msk.bf16.mxu1 %vm442_vm1, %v22059_v31 }
 0x8f9   : > { %17012 = vmatmul.mubr.msk.bf16.gmra.mxu0 %vm442_vm1, %v21885_v52  ;;  %17046 = vmatmul.mubr.msk.bf16.gmra.mxu1 %vm442_vm1, %v22061_v43 }
 0x8fa   : > { %17015 = vmatprep.mubr.msk.bf16.mxu0 %vm442_vm1, %v21913_v63  ;;  %17049 = vmatprep.mubr.msk.bf16.mxu1 %vm442_vm1, %v22071_v27 }
 0x901   : > { %17016 = vmatmul.mubr.msk.bf16.gmra.mxu0 %vm442_vm1, %v21917_v22  ;;  %17050 = vmatmul.mubr.msk.bf16.gmra.mxu1 %vm442_vm1, %v22073_v49 }
 0x902   : > { %17019 = vmatprep.mubr.msk.bf16.mxu0 %vm442_vm1, %v21943_v45  ;;  %17053 = vmatprep.mubr.msk.bf16.mxu1 %vm442_vm1, %v22083_v47 }
 0x909   : > { %17020 = vmatmul.mubr.msk.bf16.gmra.mxu0 %vm442_vm1, %v21947_v11  ;;  %17054 = vmatmul.mubr.msk.bf16.gmra.mxu1 %vm442_vm1, %v22085_v35 }
 0x90a   : > { %17023 = vmatprep.mubr.msk.bf16.mxu0 %vm442_vm1, %v21971_v41  ;;  %17057 = vmatprep.mubr.msk.bf16.mxu1 %vm442_vm1, %v11938_v57  ;;  %v22178_v57 = vpack.c.bf16 %v12820_v23, %v12819_v59 }
 0x911   : > { %17024 = vmatmul.mubr.msk.bf16.gmra.mxu0 %vm442_vm1, %v21975_v8  ;;  %17058 = vmatmul.mubr.msk.bf16.gmra.mxu1 %vm442_vm1, %v22095_v19 }
 0x912   : > { %17027 = vmatprep.mubr.msk.bf16.mxu0 %vm442_vm1, %v21994_v58  ;;  %17061 = vmatprep.mubr.msk.bf16.mxu1 %vm442_vm1, %v11940_v6 }
 0x919   : > { %17028 = vmatmul.mubr.msk.bf16.gmra.mxu0 %vm442_vm1, %v21998_v54  ;;  %17062 = vmatmul.mubr.msk.bf16.gmra.mxu1 %vm442_vm1, %v11941_v1 }
 0x91a   : > { %17031 = vmatprep.mubr.msk.bf16.mxu0 %vm442_vm1, %v22010_v61  ;;  %17065 = vmatprep.mubr.msk.bf16.mxu1 %vm442_vm1, %v11942_v20 }
 0x921   : > { %17032 = vmatmul.mubr.msk.bf16.gmra.mxu0 %vm442_vm1, %v22176_v24  ;;  %17066 = vmatmul.mubr.msk.bf16.gmra.mxu1 %vm442_vm1, %v22178_v57 }
 0x922   : > { %17071 = vmatprep.mubr.msk.bf16.mxu0 %vm442_vm1, %v21821_v34  ;;  %17105 = vmatprep.mubr.msk.bf16.mxu1 %vm442_vm1, %v21799_v7 }
 0x929   : > { %v16869_v1 = vpop.f32.mrf.mxu0  ;;  %v16903_v20 = vpop.f32.mrf.mxu1  ;;  %17072 = vmatmul.mubr.msk.bf16.vlgmr.msra.gmra.mxu0 %vm442_vm1, %v21847_v53  ;;  %17106 = vmatmul.mubr.msk.bf16.vlgmr.msra.gmra.mxu1 %vm442_vm1, %v21845_v0 }
 0x92a   : > { %v22192_v6 = vadd.f32 %v16903_v20, %v16869_v1  ;;  %17138 = vmatpush3.bf16.msra.mxu0 %v17225_v36  ;;  %17075 = vmatprep.mubr.msk.bf16.mxu0 %vm442_vm1, %v21851_v46 }
 0x92b   : > { %17109 = vmatprep.mubr.msk.bf16.mxu1 %vm442_vm1, %v21849_v2  ;;  %v11553_v34 = vpop.f32.mrf.mxu0  ;;  %v11768_v33 = vpop.f32.mrf.mxu1 }
 0x92c   : > { %v22198_v7 = vadd.f32 %v11768_v33, %v11553_v34 }
 0x92d   : > { %v16870_v38 = vpop.f32.mrf.mxu0  ;;  %v16904_v55 = vpop.f32.mrf.mxu1 }
 0x92e   : > { %v22200_v42 = vadd.f32 %v16904_v55, %v16870_v38 }
 0x92f   : > { %v11556_v53 = vpop.f32.mrf.mxu0  ;;  %v11771_v13 = vpop.f32.mrf.mxu1 }
 0x930   : > { %v22202_v0 = vadd.f32 %v11771_v13, %v11556_v53 }
 0x931   : > { %v16873_v50 = vpop.f32.mrf.mxu0  ;;  %v16907_v36 = vpop.f32.mrf.mxu1  ;;  %17076 = vmatmul.mubr.msk.bf16.gmra.mxu0 %vm442_vm1, %v21883_v5  ;;  %17110 = vmatmul.mubr.msk.bf16.gmra.mxu1 %vm442_vm1, %v21881_v28 }
 0x932   : > { %v22208_v2 = vadd.f32 %v16907_v36, %v16873_v50  ;;  %17079 = vmatprep.mubr.msk.bf16.mxu0 %vm442_vm1, %v21887_v60  ;;  %17113 = vmatprep.mubr.msk.bf16.mxu1 %vm442_vm1, %v21885_v52 }
 0x933   : > { %v11569_v46 = vpop.f32.mrf.mxu0  ;;  %v11784_v21 = vpop.f32.mrf.mxu1 }
 0x934   : > { %v22214_v59 = vadd.f32 %v11784_v21, %v11569_v46 }
 0x935   : > { %v16874_v23 = vpop.f32.mrf.mxu0  ;;  %v16908_v14 = vpop.f32.mrf.mxu1 }
 0x936   : > { %v22216_v1 = vadd.f32 %v16908_v14, %v16874_v23 }
 0x937   : > { %v11572_v5 = vpop.f32.mrf.mxu0  ;;  %v11787_v20 = vpop.f32.mrf.mxu1 }
 0x938   : > { %v22218_v34 = vadd.f32 %v11787_v20, %v11572_v5 }
 0x939   : > { %v16877_v28 = vpop.f32.mrf.mxu0  ;;  %v16911_v33 = vpop.f32.mrf.mxu1  ;;  %17080 = vmatmul.mubr.msk.bf16.gmra.mxu0 %vm442_vm1, %v21915_v48  ;;  %17114 = vmatmul.mubr.msk.bf16.gmra.mxu1 %vm442_vm1, %v21913_v63 }
 0x93a   : > { %v22224_v60 = vadd.f32 %v16911_v33, %v16877_v28  ;;  %17083 = vmatprep.mubr.msk.bf16.mxu0 %vm442_vm1, %v21919_v44  ;;  %17117 = vmatprep.mubr.msk.bf16.mxu1 %vm442_vm1, %v21917_v22 }
 0x93b   : > { %v11585_v52 = vpop.f32.mrf.mxu0  ;;  %v11800_v38 = vpop.f32.mrf.mxu1 }
 0x93c   : > { %v22230_v55 = vadd.f32 %v11800_v38, %v11585_v52 }
 0x93d   : > { %v16878_v53 = vpop.f32.mrf.mxu0  ;;  %v16912_v13 = vpop.f32.mrf.mxu1 }
 0x93e   : > { %v22232_v50 = vadd.f32 %v16912_v13, %v16878_v53 }
 0x93f   : > { %v11588_v48 = vpop.f32.mrf.mxu0  ;;  %v11803_v36 = vpop.f32.mrf.mxu1 }
 0x940   : > { %v22234_v46 = vadd.f32 %v11803_v36, %v11588_v48 }
 0x941   : > { %v16881_v63 = vpop.f32.mrf.mxu0  ;;  %v16915_v21 = vpop.f32.mrf.mxu1  ;;  %17084 = vmatmul.mubr.msk.bf16.gmra.mxu0 %vm442_vm1, %v21945_v39  ;;  %17118 = vmatmul.mubr.msk.bf16.gmra.mxu1 %vm442_vm1, %v21943_v45 }
 0x942   : > { %v22240_v22 = vadd.f32 %v16915_v21, %v16881_v63  ;;  %17087 = vmatprep.mubr.msk.bf16.mxu0 %vm442_vm1, %v21949_v30  ;;  %17121 = vmatprep.mubr.msk.bf16.mxu1 %vm442_vm1, %v21947_v11 }
 0x943   : > { %v11601_v44 = vpop.f32.mrf.mxu0  ;;  %v11816_v23 = vpop.f32.mrf.mxu1 }
 0x944   : > { %v22246_v14 = vadd.f32 %v11816_v23, %v11601_v44 }
 0x945   : > { %v16882_v5 = vpop.f32.mrf.mxu0  ;;  %v16916_v20 = vpop.f32.mrf.mxu1 }
 0x946   : > { %v22248_v28 = vadd.f32 %v16916_v20, %v16882_v5 }
 0x947   : > { %v11604_v39 = vpop.f32.mrf.mxu0  ;;  %v11819_v33 = vpop.f32.mrf.mxu1 }
 0x948   : > { %v22250_v52 = vadd.f32 %v11819_v33, %v11604_v39 }
 0x949   : > { %v16885_v45 = vpop.f32.mrf.mxu0  ;;  %v16919_v38 = vpop.f32.mrf.mxu1  ;;  %17088 = vmatmul.mubr.msk.bf16.gmra.mxu0 %vm442_vm1, %v21973_v10  ;;  %17122 = vmatmul.mubr.msk.bf16.gmra.mxu1 %vm442_vm1, %v21971_v41 }
 0x94a   : > { %v22256_v30 = vadd.f32 %v16919_v38, %v16885_v45  ;;  %17091 = vmatprep.mubr.msk.bf16.mxu0 %vm442_vm1, %v21980_v40  ;;  %17125 = vmatprep.mubr.msk.bf16.mxu1 %vm442_vm1, %v21975_v8 }
 0x94b   : > { %v11617_v11 = vpop.f32.mrf.mxu0  ;;  %v11832_v53 = vpop.f32.mrf.mxu1 }
 0x94c   : > { %v22262_v13 = vadd.f32 %v11832_v53, %v11617_v11 }
 0x94d   : > { %v16886_v48 = vpop.f32.mrf.mxu0  ;;  %v16920_v36 = vpop.f32.mrf.mxu1 }
 0x94e   : > { %v22264_v63 = vadd.f32 %v16920_v36, %v16886_v48  ;;  %v13118_v48 = vld [vmem:[#allocation2 + $0x22f] sm:$0xff] }
 0x94f   : > { %v11620_v10 = vpop.f32.mrf.mxu0  ;;  %v11835_v21 = vpop.f32.mrf.mxu1  ;;  %v13415_v36 = vld [vmem:[#allocation2 + $0x228] sm:$0xff] }
 0x950   : > { %v22266_v44 = vadd.f32 %v11835_v21, %v11620_v10  ;;  %v13416_v10 = vld [vmem:[#allocation2 + $0x230] sm:$0xff] }
 0x951   : > { %v16889_v41 = vpop.f32.mrf.mxu0  ;;  %v16923_v23 = vpop.f32.mrf.mxu1  ;;  %17092 = vmatmul.mubr.msk.bf16.gmra.mxu0 %vm442_vm1, %v21996_v25  ;;  %17126 = vmatmul.mubr.msk.bf16.gmra.mxu1 %vm442_vm1, %v21994_v58 }
 0x952   : > { %v22272_v8 = vadd.f32 %v16923_v23, %v16889_v41  ;;  %17095 = vmatprep.mubr.msk.bf16.mxu0 %vm442_vm1, %v22000_v4  ;;  %17129 = vmatprep.mubr.msk.bf16.mxu1 %vm442_vm1, %v21998_v54  ;;  %v13117_v54 = vld [vmem:[#allocation2 + $0x227] sm:$0xff] }
 0x953   : > { %v11633_v40 = vpop.f32.mrf.mxu0  ;;  %v11848_v5 = vpop.f32.mrf.mxu1 }
 0x954   : > { %v22278_v20 = vadd.f32 %v11848_v5, %v11633_v40  ;;  %v13134_v5 = vpack.c.bf16 %v13118_v48, %v13117_v54 }
 0x955   : > { %v16890_v39 = vpop.f32.mrf.mxu0  ;;  %v16924_v33 = vpop.f32.mrf.mxu1 }
 0x956   : > { %v22280_v45 = vadd.f32 %v16924_v33, %v16890_v39 }
 0x957   : > { %v11636_v25 = vpop.f32.mrf.mxu0  ;;  %v11851_v38 = vpop.f32.mrf.mxu1 }
 0x958   : > { %v22282_v11 = vadd.f32 %v11851_v38, %v11636_v25 }
 0x959   : > { %v16893_v58 = vpop.f32.mrf.mxu0  ;;  %v16927_v53 = vpop.f32.mrf.mxu1  ;;  %17096 = vmatmul.mubr.msk.bf16.gmra.mxu0 %vm442_vm1, %v22012_v32  ;;  %17130 = vmatmul.mubr.msk.bf16.gmra.mxu1 %vm442_vm1, %v22010_v61  ;;  %v13432_v61 = vpack.c.bf16 %v13416_v10, %v13415_v36 }
 0x95a   : > { %v22288_v4 = vadd.f32 %v16927_v53, %v16893_v58  ;;  %17099 = vmatprep.mubr.msk.bf16.mxu0 %vm442_vm1, %v22110_v29  ;;  %17133 = vmatprep.mubr.msk.bf16.mxu1 %vm442_vm1, %v22176_v24 }
 0x95b   : > { %v11649_v21 = vpop.f32.mrf.mxu0  ;;  %v11864_v41 = vpop.f32.mrf.mxu1 }
 0x95c   : > { %v22294_v23 = vadd.f32 %v11864_v41, %v11649_v21 }
 0x95d   : > { %v16894_v32 = vpop.f32.mrf.mxu0  ;;  %v16928_v40 = vpop.f32.mrf.mxu1 }
 0x95e   : > { %v22296_v39 = vadd.f32 %v16928_v40, %v16894_v32 }
 0x95f   : > { %v11652_v33 = vpop.f32.mrf.mxu0  ;;  %v11867_v25 = vpop.f32.mrf.mxu1 }
 0x960   : > { %v22298_v38 = vadd.f32 %v11867_v25, %v11652_v33 }
 0x961   : > { %v16897_v29 = vpop.f32.mrf.mxu0  ;;  %v16931_v58 = vpop.f32.mrf.mxu1  ;;  %17100 = vmatmul.mubr.msk.bf16.gmra.mxu0 %vm442_vm1, %v13134_v5  ;;  %17134 = vmatmul.mubr.msk.bf16.gmra.mxu1 %vm442_vm1, %v13432_v61 }
 0x962   : > { %v22302_v24 = vadd.f32 %v16931_v58, %v16897_v29  ;;  %17139 = vmatprep.mubr.msk.bf16.mxu0 %vm442_vm1, %v22023_v62 }
 0x963   : > { %v11665_v53 = vpop.f32.mrf.mxu0  ;;  %v11880_v54 = vpop.f32.mrf.mxu1 }
 0x964   : > { %v22306_v48 = vadd.f32 %v11880_v54, %v11665_v53 }
 0x965   : > { %v16898_v36 = vpop.f32.mrf.mxu0  ;;  %v16932_v10 = vpop.f32.mrf.mxu1 }
 0x966   : > { %v22308_v21 = vadd.f32 %v16932_v10, %v16898_v36 }
 0x967   : > { %v11668_v41 = vpop.f32.mrf.mxu0  ;;  %v11883_v32 = vpop.f32.mrf.mxu1 }
 0x968   : > { %v22310_v40 = vadd.f32 %v11883_v32, %v11668_v41 }
 0x969   : > { %v16937_v5 = vpop.f32.mrf.mxu0  ;;  %v16971_v33 = vpop.f32.mrf.mxu1  ;;  %17140 = vmatmul.mubr.msk.bf16.vlgmr.msra.gmra.mxu0 %vm442_vm1, %v22047_v16 }
 0x96a   : > { %v12163_v61 = vadd.f32 %v16937_v5, %v22192_v6  ;;  %17143 = vmatprep.mubr.msk.bf16.mxu0 %vm442_vm1, %v22049_v3 }
 0x96b   : > { %v12034_v62 = vpop.f32.mrf.mxu0  ;;  %v12332_v25 = vpop.f32.mrf.mxu1 }
 0x96c   : > { %v22317_v29 = vadd.f32 %v16971_v33, %v12163_v61  ;;  %v12161_v58 = vadd.f32 %v12034_v62, %v22198_v7 }
 0x96d   : > { %v16938_v53 = vpop.f32.mrf.mxu0  ;;  %v16972_v54 = vpop.f32.mrf.mxu1 }
 0x96e   : > { %v22320_v36 = vadd.f32 %v12332_v25, %v12161_v58  ;;  %v12164_v10 = vadd.f32 %v16938_v53, %v22200_v42 }
 0x96f   : > { %v12037_v41 = vpop.f32.mrf.mxu0  ;;  %v12335_v32 = vpop.f32.mrf.mxu1 }
 0x970   : > { %v22323_v16 = vadd.f32 %v16972_v54, %v12164_v10  ;;  %v12162_v6 = vadd.f32 %v12037_v41, %v22202_v0 }
 0x971   : > { %v16941_v5 = vpop.f32.mrf.mxu0  ;;  %v16975_v3 = vpop.f32.mrf.mxu1  ;;  %17144 = vmatmul.mubr.msk.bf16.gmra.mxu0 %vm442_vm1, %v22059_v31 }
 0x972   : > { %v22328_v33 = vadd.f32 %v12335_v32, %v12162_v6  ;;  %v12167_v7 = vadd.f32 %v16941_v5, %v22208_v2  ;;  %17147 = vmatprep.mubr.msk.bf16.mxu0 %vm442_vm1, %v22061_v43 }
 0x973   : > { %v12050_v61 = vpop.f32.mrf.mxu0  ;;  %v12348_v42 = vpop.f32.mrf.mxu1 }
 0x974   : > { %v22333_v62 = vadd.f32 %v16975_v3, %v12167_v7  ;;  %v12165_v25 = vadd.f32 %v12050_v61, %v22214_v59 }
 0x975   : > { %v16942_v58 = vpop.f32.mrf.mxu0  ;;  %v16976_v0 = vpop.f32.mrf.mxu1 }
 0x976   : > { %v22336_v53 = vadd.f32 %v12348_v42, %v12165_v25  ;;  %v12168_v54 = vadd.f32 %v16942_v58, %v22216_v1 }
 0x977   : > { %v12053_v31 = vpop.f32.mrf.mxu0  ;;  %v12351_v10 = vpop.f32.mrf.mxu1 }
 0x978   : > { %v22339_v41 = vadd.f32 %v16976_v0, %v12168_v54  ;;  %v12166_v2 = vadd.f32 %v12053_v31, %v22218_v34 }
 0x979   : > { %v16945_v32 = vpop.f32.mrf.mxu0  ;;  %v16979_v43 = vpop.f32.mrf.mxu1  ;;  %17148 = vmatmul.mubr.msk.bf16.gmra.mxu0 %vm442_vm1, %v22071_v27 }
 0x97a   : > { %v22344_v6 = vadd.f32 %v12351_v10, %v12166_v2  ;;  %v12171_v59 = vadd.f32 %v16945_v32, %v22224_v60  ;;  %17151 = vmatprep.mubr.msk.bf16.mxu0 %vm442_vm1, %v22073_v49 }
 0x97b   : > { %v12066_v5 = vpop.f32.mrf.mxu0  ;;  %v12364_v1 = vpop.f32.mrf.mxu1 }
 0x97c   : > { %v22349_v3 = vadd.f32 %v16979_v43, %v12171_v59  ;;  %v12169_v7 = vadd.f32 %v12066_v5, %v22230_v55  ;;  %v13701_v43 = vld [vmem:[#allocation2 + $0x169] sm:$0xff] }
 0x97d   : > { %v16946_v61 = vpop.f32.mrf.mxu0  ;;  %v16980_v34 = vpop.f32.mrf.mxu1 }
 0x97e   : > { %v22352_v42 = vadd.f32 %v12364_v1, %v12169_v7  ;;  %v12172_v25 = vadd.f32 %v16946_v61, %v22232_v50 }
 0x97f   : > { %v12069_v27 = vpop.f32.mrf.mxu0  ;;  %v12367_v58 = vpop.f32.mrf.mxu1 }
 0x980   : > { %v22355_v0 = vadd.f32 %v16980_v34, %v12172_v25  ;;  %v12170_v60 = vadd.f32 %v12069_v27, %v22234_v46  ;;  %v13702_v46 = vld [vmem:[#allocation2 + $0x171] sm:$0xff] }
 0x981   : > { %v16949_v54 = vpop.f32.mrf.mxu0  ;;  %v16983_v49 = vpop.f32.mrf.mxu1  ;;  %17152 = vmatmul.mubr.msk.bf16.gmra.mxu0 %vm442_vm1, %v22083_v47 }
 0x982   : > { %v22360_v31 = vadd.f32 %v12367_v58, %v12170_v60  ;;  %v12175_v55 = vadd.f32 %v16949_v54, %v22240_v22  ;;  %17155 = vmatprep.mubr.msk.bf16.mxu0 %vm442_vm1, %v22085_v35  ;;  %v13724_v22 = vpack.c.bf16 %v13702_v46, %v13701_v43  ;;  %v13708_v43 = vld [vmem:[#allocation2 + $0x1d1] sm:$0xff] }
 0x983   : > { %v12082_v10 = vpop.f32.mrf.mxu0  ;;  %v12380_v50 = vpop.f32.mrf.mxu1 }
 0x984   : > { %v22365_v2 = vadd.f32 %v16983_v49, %v12175_v55  ;;  %v12173_v32 = vadd.f32 %v12082_v10, %v22246_v14  ;;  %v13705_v55 = vld [vmem:[#allocation2 + $0x1a9] sm:$0xff]  ;;  %v13706_v10 = vld [vmem:[#allocation2 + $0x1b1] sm:$0xff] }
 0x985   : > { %v16950_v59 = vpop.f32.mrf.mxu0  ;;  %v16984_v5 = vpop.f32.mrf.mxu1 }
 0x986   : > { %v22368_v1 = vadd.f32 %v12380_v50, %v12173_v32  ;;  %v12176_v47 = vadd.f32 %v16950_v59, %v22248_v28  ;;  %v13707_v32 = vld [vmem:[#allocation2 + $0x1c9] sm:$0xff] }
 0x987   : > { %v12085_v7 = vpop.f32.mrf.mxu0  ;;  %v12383_v61 = vpop.f32.mrf.mxu1 }
 0x988   : > { %v22371_v34 = vadd.f32 %v16984_v5, %v12176_v47  ;;  %v12174_v35 = vadd.f32 %v12085_v7, %v22250_v52  ;;  %v13726_v47 = vpack.c.bf16 %v13706_v10, %v13705_v55 }
 0x989   : > { %v16953_v25 = vpop.f32.mrf.mxu0  ;;  %v16987_v27 = vpop.f32.mrf.mxu1  ;;  %17156 = vmatmul.mubr.msk.bf16.gmra.mxu0 %vm442_vm1, %v13724_v22 }
 0x98a   : > { %v22375_v14 = vadd.f32 %v12383_v61, %v12174_v35  ;;  %v12179_v58 = vadd.f32 %v16953_v25, %v22256_v30  ;;  %17159 = vmatprep.mubr.msk.bf16.mxu0 %vm442_vm1, %v22095_v19  ;;  %v13727_v61 = vpack.c.bf16 %v13708_v43, %v13707_v32 }
 0x98b   : > { %v12098_v60 = vpop.f32.mrf.mxu0  ;;  %v12396_v28 = vpop.f32.mrf.mxu1 }
 0x98c   : > { %v22380_v54 = vadd.f32 %v16987_v27, %v12179_v58  ;;  %v12177_v49 = vadd.f32 %v12098_v60, %v22262_v13 }
 0x98d   : > { %v16954_v52 = vpop.f32.mrf.mxu0  ;;  %v16988_v50 = vpop.f32.mrf.mxu1 }
 0x98e   : > { %v22383_v46 = vadd.f32 %v12396_v28, %v12177_v49  ;;  %v12180_v59 = vadd.f32 %v16954_v52, %v22264_v63  ;;  %v13709_v28 = vld [vmem:[#allocation2 + $0x1e9] sm:$0xff]  ;;  %v13710_v49 = vld [vmem:[#allocation2 + $0x1f1] sm:$0xff] }
 0x98f   : > { %v12101_v30 = vpop.f32.mrf.mxu0  ;;  %v12399_v5 = vpop.f32.mrf.mxu1  ;;  %v13728_v43 = vpack.c.bf16 %v13710_v49, %v13709_v28 }
 0x990   : > { %v22386_v19 = vadd.f32 %v16988_v50, %v12180_v59  ;;  %v12178_v7 = vadd.f32 %v12101_v30, %v22266_v44 }
 0x991   : > { %v16957_v22 = vpop.f32.mrf.mxu0  ;;  %v16991_v13 = vpop.f32.mrf.mxu1  ;;  %17160 = vmatmul.mubr.msk.bf16.gmra.mxu0 %vm442_vm1, %v13726_v47 }
 0x992   : > { %v22390_v35 = vadd.f32 %v12399_v5, %v12178_v7  ;;  %v12183_v25 = vadd.f32 %v16957_v22, %v22272_v8  ;;  %17163 = vmatprep.mubr.msk.bf16.mxu0 %vm442_vm1, %v13727_v61  ;;  %v13713_v7 = vld [vmem:[#allocation2 + $0x229] sm:$0xff] }
 0x993   : > { %v12114_v27 = vpop.f32.mrf.mxu0  ;;  %v12412_v63 = vpop.f32.mrf.mxu1 }
 0x994   : > { %v22394_v58 = vadd.f32 %v16991_v13, %v12183_v25  ;;  %v12181_v60 = vadd.f32 %v12114_v27, %v22278_v20 }
 0x995   : > { %v16958_v44 = vpop.f32.mrf.mxu0  ;;  %v16992_v55 = vpop.f32.mrf.mxu1 }
 0x996   : > { %v22397_v10 = vadd.f32 %v12412_v63, %v12181_v60  ;;  %v12184_v52 = vadd.f32 %v16958_v44, %v22280_v45  ;;  %v13714_v45 = vld [vmem:[#allocation2 + $0x231] sm:$0xff] }
 0x997   : > { %v12117_v50 = vpop.f32.mrf.mxu0  ;;  %v12415_v32 = vpop.f32.mrf.mxu1  ;;  %v13730_v63 = vpack.c.bf16 %v13714_v45, %v13713_v7 }
 0x998   : > { %v22400_v8 = vadd.f32 %v16992_v55, %v12184_v52  ;;  %v12182_v59 = vadd.f32 %v12117_v50, %v22282_v11 }
 0x999   : > { %v16961_v30 = vpop.f32.mrf.mxu0  ;;  %v16995_v5 = vpop.f32.mrf.mxu1  ;;  %17164 = vmatmul.mubr.msk.bf16.gmra.mxu0 %vm442_vm1, %v13728_v43 }
 0x99a   : > { %v22404_v20 = vadd.f32 %v12415_v32, %v12182_v59  ;;  %v12187_v47 = vadd.f32 %v16961_v30, %v22288_v4  ;;  %17167 = vmatprep.mubr.msk.bf16.mxu0 %vm442_vm1, %v22178_v57 }
 0x99b   : > { %v12130_v61 = vpop.f32.mrf.mxu0  ;;  %v12428_v22 = vpop.f32.mrf.mxu1 }
 0x99c   : > { %v22409_v13 = vadd.f32 %v16995_v5, %v12187_v47  ;;  %v12185_v25 = vadd.f32 %v12130_v61, %v22294_v23 }
 0x99d   : > { %v16962_v11 = vpop.f32.mrf.mxu0  ;;  %v16996_v27 = vpop.f32.mrf.mxu1 }
 0x99e   : > { %v22412_v60 = vadd.f32 %v12428_v22, %v12185_v25  ;;  %v12188_v28 = vadd.f32 %v16962_v11, %v22296_v39 }
 0x99f   : > { %v12133_v49 = vpop.f32.mrf.mxu0  ;;  %v12431_v4 = vpop.f32.mrf.mxu1 }
 0x9a0   : > { %v22415_v44 = vadd.f32 %v16996_v27, %v12188_v28  ;;  %v12186_v57 = vadd.f32 %v12133_v49, %v22298_v38 }
 0x9a1   : > { %v16965_v55 = vpop.f32.mrf.mxu0  ;;  %v16999_v52 = vpop.f32.mrf.mxu1  ;;  %17168 = vmatmul.mubr.msk.bf16.gmra.mxu0 %vm442_vm1, %v13730_v63 }
 0x9a2   : > { %v22419_v50 = vadd.f32 %v12431_v4, %v12186_v57  ;;  %v12191_v23 = vadd.f32 %v16965_v55, %v22302_v24 }
 0x9a3   : > { %v12146_v32 = vpop.f32.mrf.mxu0  ;;  %v12444_v43 = vpop.f32.mrf.mxu1 }
 0x9a4   : > { %v22422_v59 = vadd.f32 %v16999_v52, %v12191_v23  ;;  %v12189_v39 = vadd.f32 %v12146_v32, %v22306_v48 }
 0x9a5   : > { %v16966_v30 = vpop.f32.mrf.mxu0  ;;  %v17000_v5 = vpop.f32.mrf.mxu1 }
 0x9a6   : > { %v22425_v47 = vadd.f32 %v12444_v43, %v12189_v39  ;;  %v12192_v38 = vadd.f32 %v16966_v30, %v22308_v21 }
 0x9a7   : > { %v12149_v7 = vpop.f32.mrf.mxu0  ;;  %v12447_v45 = vpop.f32.mrf.mxu1 }
 0x9a8   : > { %v22428_v61 = vadd.f32 %v17000_v5, %v12192_v38  ;;  %v12190_v22 = vadd.f32 %v12149_v7, %v22310_v40 }
 0x9a9   : > { %v17005_v25 = vpop.f32.mrf.mxu0  ;;  %v22431_v24 = vpop.f32.mrf.mxu1 }
 0x9aa   : > { %v22433_v11 = vadd.f32 %v12447_v45, %v12190_v22  ;;  %v22436_v27 = vadd.f32 %v17005_v25, %v22317_v29 }
 0x9ab   : > { %v12630_v48 = vpop.f32.mrf.mxu0  ;;  %v22438_v63 = vpop.f32.mrf.mxu1 }
 0x9ac   : > { %v22441_v28 = vadd.f32 %v12630_v48, %v22320_v36 }
 0x9ad   : > { %v17006_v21 = vpop.f32.mrf.mxu0  ;;  %v22443_v49 = vpop.f32.mrf.mxu1 }
 0x9ae   : > { %v22446_v4 = vadd.f32 %v17006_v21, %v22323_v16 }
 0x9af   : > { %v12633_v40 = vpop.f32.mrf.mxu0  ;;  %v22448_v57 = vpop.f32.mrf.mxu1 }
 0x9b0   : > { %v22451_v55 = vadd.f32 %v12633_v40, %v22328_v33 }
 0x9b1   : > { %v17009_v29 = vpop.f32.mrf.mxu0  ;;  %v22453_v52 = vpop.f32.mrf.mxu1 }
 0x9b2   : > { %v22456_v23 = vadd.f32 %v17009_v29, %v22333_v62 }
 0x9b3   : > { %v12646_v36 = vpop.f32.mrf.mxu0  ;;  %v22458_v32 = vpop.f32.mrf.mxu1 }
 0x9b4   : > { %v22461_v43 = vadd.f32 %v12646_v36, %v22336_v53 }
 0x9b5   : > { %v17010_v16 = vpop.f32.mrf.mxu0  ;;  %v22463_v39 = vpop.f32.mrf.mxu1 }
 0x9b6   : > { %v22466_v30 = vadd.f32 %v17010_v16, %v22339_v41 }
 0x9b7   : > { %v12649_v33 = vpop.f32.mrf.mxu0  ;;  %v22468_v5 = vpop.f32.mrf.mxu1 }
 0x9b8   : > { %v22471_v38 = vadd.f32 %v12649_v33, %v22344_v6 }
 0x9b9   : > { %v17013_v62 = vpop.f32.mrf.mxu0  ;;  %v22473_v7 = vpop.f32.mrf.mxu1 }
 0x9ba   : > { %v22476_v45 = vadd.f32 %v17013_v62, %v22349_v3 }
 0x9bb   : > { %v12662_v53 = vpop.f32.mrf.mxu0  ;;  %v22478_v22 = vpop.f32.mrf.mxu1 }
 0x9bc   : > { %v22481_v25 = vadd.f32 %v12662_v53, %v22352_v42 }
 0x9bd   : > { %v17014_v41 = vpop.f32.mrf.mxu0  ;;  %v22483_v48 = vpop.f32.mrf.mxu1 }
 0x9be   : > { %v22486_v21 = vadd.f32 %v17014_v41, %v22355_v0 }
 0x9bf   : > { %v12665_v6 = vpop.f32.mrf.mxu0  ;;  %v22488_v40 = vpop.f32.mrf.mxu1 }
 0x9c0   : > { %v22491_v29 = vadd.f32 %v12665_v6, %v22360_v31 }
 0x9c1   : > { %v17017_v3 = vpop.f32.mrf.mxu0  ;;  %v22493_v36 = vpop.f32.mrf.mxu1 }
 0x9c2   : > { %23197 = vst [vmem:[#allocation66_spill] sm:$0xff] %v22493_v36  ;;  %v22496_v16 = vadd.f32 %v17017_v3, %v22365_v2 }
 0x9c3   : > { %v12678_v42 = vpop.f32.mrf.mxu0  ;;  %v22498_v33 = vpop.f32.mrf.mxu1 }
 0x9c4   : > { %23198 = vst [vmem:[#allocation67_spill] sm:$0xff] %v22496_v16  ;;  %23199 = vst [vmem:[#allocation68_spill] sm:$0xff] %v22498_v33  ;;  %v22501_v62 = vadd.f32 %v12678_v42, %v22368_v1 }
 0x9c5   : > { %v17018_v0 = vpop.f32.mrf.mxu0  ;;  %v22503_v53 = vpop.f32.mrf.mxu1 }
 0x9c6   : > { %23200 = vst [vmem:[#allocation69_spill] sm:$0xff] %v22501_v62  ;;  %23201 = vst [vmem:[#allocation70_spill] sm:$0xff] %v22503_v53  ;;  %v22506_v41 = vadd.f32 %v17018_v0, %v22371_v34 }
 0x9c7   : > { %v12681_v31 = vpop.f32.mrf.mxu0  ;;  %v22508_v6 = vpop.f32.mrf.mxu1 }
 0x9c8   : > { %23202 = vst [vmem:[#allocation71_spill] sm:$0xff] %v22506_v41  ;;  %23203 = vst [vmem:[#allocation72_spill] sm:$0xff] %v22508_v6  ;;  %v22511_v36 = vadd.f32 %v12681_v31, %v22375_v14 }
 0x9c9   : > { %v17021_v2 = vpop.f32.mrf.mxu0  ;;  %v22513_v3 = vpop.f32.mrf.mxu1 }
 0x9ca   : > { %23204 = vst [vmem:[#allocation73_spill] sm:$0xff] %v22511_v36  ;;  %23205 = vst [vmem:[#allocation74_spill] sm:$0xff] %v22513_v3  ;;  %v22516_v33 = vadd.f32 %v17021_v2, %v22380_v54 }
 0x9cb   : > { %v12694_v1 = vpop.f32.mrf.mxu0  ;;  %v22518_v42 = vpop.f32.mrf.mxu1 }
 0x9cc   : > { %23206 = vst [vmem:[#allocation75_spill] sm:$0xff] %v22516_v33  ;;  %23207 = vst [vmem:[#allocation76_spill] sm:$0xff] %v22518_v42  ;;  %v22521_v53 = vadd.f32 %v12694_v1, %v22383_v46 }
 0x9cd   : > { %v17022_v34 = vpop.f32.mrf.mxu0  ;;  %v22523_v0 = vpop.f32.mrf.mxu1 }
 0x9ce   : > { %23208 = vst [vmem:[#allocation77_spill] sm:$0xff] %v22521_v53  ;;  %23209 = vst [vmem:[#allocation78_spill] sm:$0xff] %v22523_v0  ;;  %v22526_v6 = vadd.f32 %v17022_v34, %v22386_v19 }
 0x9cf   : > { %v12697_v14 = vpop.f32.mrf.mxu0  ;;  %v22528_v31 = vpop.f32.mrf.mxu1 }
 0x9d0   : > { %23210 = vst [vmem:[#allocation79_spill] sm:$0xff] %v22526_v6  ;;  %23211 = vst [vmem:[#allocation80_spill] sm:$0xff] %v22528_v31  ;;  %v22531_v3 = vadd.f32 %v12697_v14, %v22390_v35 }
 0x9d1   : > { %v17025_v54 = vpop.f32.mrf.mxu0  ;;  %v22533_v2 = vpop.f32.mrf.mxu1 }
 0x9d2   : > { %23212 = vst [vmem:[#allocation81_spill] sm:$0xff] %v22531_v3  ;;  %23213 = vst [vmem:[#allocation82_spill] sm:$0xff] %v22533_v2  ;;  %v22536_v42 = vadd.f32 %v17025_v54, %v22394_v58 }
 0x9d3   : > { %v12710_v46 = vpop.f32.mrf.mxu0  ;;  %v22538_v1 = vpop.f32.mrf.mxu1 }
 0x9d4   : > { %23214 = vst [vmem:[#allocation83_spill] sm:$0xff] %v22536_v42  ;;  %23215 = vst [vmem:[#allocation84_spill] sm:$0xff] %v22538_v1  ;;  %v22541_v0 = vadd.f32 %v12710_v46, %v22397_v10 }
 0x9d5   : > { %v17026_v19 = vpop.f32.mrf.mxu0  ;;  %v22543_v34 = vpop.f32.mrf.mxu1 }
 0x9d6   : > { %23216 = vst [vmem:[#allocation85_spill] sm:$0xff] %v22541_v0  ;;  %23217 = vst [vmem:[#allocation86_spill] sm:$0xff] %v22543_v34  ;;  %v22546_v31 = vadd.f32 %v17026_v19, %v22400_v8 }
 0x9d7   : > { %v12713_v35 = vpop.f32.mrf.mxu0  ;;  %v22548_v14 = vpop.f32.mrf.mxu1 }
 0x9d8   : > { %23218 = vst [vmem:[#allocation87_spill] sm:$0xff] %v22546_v31  ;;  %23219 = vst [vmem:[#allocation88_spill] sm:$0xff] %v22548_v14  ;;  %v22551_v2 = vadd.f32 %v12713_v35, %v22404_v20 }
 0x9d9   : > { %v17029_v58 = vpop.f32.mrf.mxu0  ;;  %v22553_v54 = vpop.f32.mrf.mxu1 }
 0x9da   : > { %23220 = vst [vmem:[#allocation89_spill] sm:$0xff] %v22551_v2  ;;  %23221 = vst [vmem:[#allocation90_spill] sm:$0xff] %v22553_v54  ;;  %v22556_v1 = vadd.f32 %v17029_v58, %v22409_v13 }
 0x9db   : > { %v12726_v10 = vpop.f32.mrf.mxu0  ;;  %v22558_v46 = vpop.f32.mrf.mxu1 }
 0x9dc   : > { %23222 = vst [vmem:[#allocation91_spill] sm:$0xff] %v22556_v1  ;;  %23223 = vst [vmem:[#allocation92_spill] sm:$0xff] %v22558_v46  ;;  %v22561_v34 = vadd.f32 %v12726_v10, %v22412_v60 }
 0x9dd   : > { %v17030_v8 = vpop.f32.mrf.mxu0  ;;  %v22563_v19 = vpop.f32.mrf.mxu1 }
 0x9de   : > { %23224 = vst [vmem:[#allocation93_spill] sm:$0xff] %v22561_v34  ;;  %23225 = vst [vmem:[#allocation94_spill] sm:$0xff] %v22563_v19  ;;  %v22566_v14 = vadd.f32 %v17030_v8, %v22415_v44 }
 0x9df   : > { %v12729_v20 = vpop.f32.mrf.mxu0  ;;  %v22568_v35 = vpop.f32.mrf.mxu1 }
 0x9e0   : > { %23226 = vst [vmem:[#allocation95_spill] sm:$0xff] %v22566_v14  ;;  %23227 = vst [vmem:[#allocation96_spill] sm:$0xff] %v22568_v35  ;;  %v22571_v54 = vadd.f32 %v12729_v20, %v22419_v50 }
 0x9e1   : > { %v17033_v13 = vpop.f32.mrf.mxu0  ;;  %v22573_v58 = vpop.f32.mrf.mxu1 }
 0x9e2   : > { %23228 = vst [vmem:[#allocation97_spill] sm:$0xff] %v22571_v54  ;;  %23229 = vst [vmem:[#allocation98_spill] sm:$0xff] %v22573_v58  ;;  %v22576_v46 = vadd.f32 %v17033_v13, %v22422_v59 }
 0x9e3   : > { %v12742_v60 = vpop.f32.mrf.mxu0  ;;  %v22578_v10 = vpop.f32.mrf.mxu1 }
 0x9e4   : > { %23230 = vst [vmem:[#allocation99_spill] sm:$0xff] %v22576_v46  ;;  %23231 = vst [vmem:[#allocation100_spill] sm:$0xff] %v22578_v10  ;;  %v22581_v19 = vadd.f32 %v12742_v60, %v22425_v47 }
 0x9e5   : > { %v17034_v44 = vpop.f32.mrf.mxu0  ;;  %v22583_v8 = vpop.f32.mrf.mxu1 }
 0x9e6   : > { %23232 = vst [vmem:[#allocation101_spill] sm:$0xff] %v22581_v19  ;;  %23233 = vst [vmem:[#allocation102_spill] sm:$0xff] %v22583_v8  ;;  %v22586_v35 = vadd.f32 %v17034_v44, %v22428_v61 }
 0x9e7   : > { %v12745_v50 = vpop.f32.mrf.mxu0  ;;  %v22588_v20 = vpop.f32.mrf.mxu1 }
 0x9e8   : > { %23234 = vst [vmem:[#allocation103_spill] sm:$0xff] %v22586_v35  ;;  %23235 = vst [vmem:[#allocation104_spill] sm:$0xff] %v22588_v20  ;;  %v22591_v58 = vadd.f32 %v12745_v50, %v22433_v11 }
 0x9e9   : > { %v17073_v59 = vpop.f32.mrf.mxu0  ;;  %v17107_v13 = vpop.f32.mrf.mxu1 }
 0x9ea   : > { %23236 = vst [vmem:[#allocation105_spill] sm:$0xff] %v22591_v58 }
 0x9eb   : > { %v13226_v46 = vpop.f32.mrf.mxu0  ;;  %v13524_v54 = vpop.f32.mrf.mxu1 }
 0x9ed   : > { %v17074_v10 = vpop.f32.mrf.mxu0  ;;  %v22593_v47 = vpop.f32.mrf.mxu1 }
 0x9ef   : > { %v13229_v14 = vpop.f32.mrf.mxu0  ;;  %v22599_v61 = vpop.f32.mrf.mxu1 }
 0x9f1   : > { %v22595_v60 = vpop.f32.mrf.mxu0  ;;  %v22605_v11 = vpop.f32.mrf.mxu1 }
 0x9f3   : > { %v22597_v8 = vpop.f32.mrf.mxu0  ;;  %v22611_v35 = vpop.f32.mrf.mxu1 }
 0x9f5   : > { %v22601_v44 = vpop.f32.mrf.mxu0  ;;  %v22617_v1 = vpop.f32.mrf.mxu1 }
 0x9f7   : > { %v22603_v20 = vpop.f32.mrf.mxu0  ;;  %v22623_v0 = vpop.f32.mrf.mxu1 }
 0x9f9   : > { %v22607_v50 = vpop.f32.mrf.mxu0  ;;  %v22629_v6 = vpop.f32.mrf.mxu1 }
 0x9fb   : > { %v22609_v58 = vpop.f32.mrf.mxu0  ;;  %v22635_v36 = vpop.f32.mrf.mxu1 }
 0x9fc   : > { %23244 = vst [vmem:[#allocation113_spill] sm:$0xff] %v22635_v36 }
 0x9fd   : > { %v22613_v19 = vpop.f32.mrf.mxu0 }
 0x9ff   : > { %v22615_v34 = vpop.f32.mrf.mxu0 }
 0xa00   : > { %23237 = vst [vmem:[#allocation106_spill] sm:$0xff] %v22615_v34 }
 0xa01   : > { %v22619_v2 = vpop.f32.mrf.mxu0 }
 0xa02   : > { %23238 = vst [vmem:[#allocation107_spill] sm:$0xff] %v22619_v2  ;;  %v22641_v2 = vpop.f32.mrf.mxu1 }
 0xa03   : > { %v22621_v31 = vpop.f32.mrf.mxu0  ;;  %23247 = vst [vmem:[#allocation116_spill] sm:$0xff] %v22641_v2 }
 0xa04   : > { %23239 = vst [vmem:[#allocation108_spill] sm:$0xff] %v22621_v31 }
 0xa05   : > { %v22625_v42 = vpop.f32.mrf.mxu0 }
 0xa06   : > { %23240 = vst [vmem:[#allocation109_spill] sm:$0xff] %v22625_v42  ;;  %v22647_v42 = vpop.f32.mrf.mxu1 }
 0xa07   : > { %v22627_v3 = vpop.f32.mrf.mxu0 }
 0xa08   : > { %23241 = vst [vmem:[#allocation110_spill] sm:$0xff] %v22627_v3 }
 0xa09   : > { %v22631_v53 = vpop.f32.mrf.mxu0 }
 0xa0a   : > { %23242 = vst [vmem:[#allocation111_spill] sm:$0xff] %v22631_v53  ;;  %v22653_v53 = vpop.f32.mrf.mxu1 }
 0xa0b   : > { %v22633_v33 = vpop.f32.mrf.mxu0 }
 0xa0c   : > { %23243 = vst [vmem:[#allocation112_spill] sm:$0xff] %v22633_v33 }
 0xa0d   : > { %v22637_v41 = vpop.f32.mrf.mxu0 }
 0xa0e   : > { %23245 = vst [vmem:[#allocation114_spill] sm:$0xff] %v22637_v41  ;;  %v22659_v41 = vpop.f32.mrf.mxu1 }
 0xa0f   : > { %v22639_v62 = vpop.f32.mrf.mxu0  ;;  %23254 = vst [vmem:[#allocation123_spill] sm:$0xff] %v22659_v41 }
 0xa10   : > { %23246 = vst [vmem:[#allocation115_spill] sm:$0xff] %v22639_v62 }
 0xa11   : > { %v22643_v31 = vpop.f32.mrf.mxu0 }
 0xa12   : > { %23248 = vst [vmem:[#allocation117_spill] sm:$0xff] %v22643_v31  ;;  %v22665_v31 = vpop.f32.mrf.mxu1 }
 0xa13   : > { %v22645_v34 = vpop.f32.mrf.mxu0  ;;  %23257 = vst [vmem:[#allocation126_spill] sm:$0xff] %v22665_v31 }
 0xa14   : > { %23249 = vst [vmem:[#allocation118_spill] sm:$0xff] %v22645_v34 }
 0xa15   : > { %v22649_v3 = vpop.f32.mrf.mxu0 }
 0xa16   : > { %23250 = vst [vmem:[#allocation119_spill] sm:$0xff] %v22649_v3  ;;  %v9610_v3 = vadd.f32 %v21320_v18, %v21325_v15  ;;  %v13056_v18 = vadd.f32 %v22448_v57, %v22451_v55  ;;  %v9614_v57 = vadd.f32 %v21348_v17, %v21353_v26  ;;  %v17323_v55 = vld [vmem:[%s17615_s21] sm:$0xff] }
 0xa17   : > { %v22651_v16 = vpop.f32.mrf.mxu0 }
 0xa18   : > { %23251 = vst [vmem:[#allocation120_spill] sm:$0xff] %v22651_v16  ;;  %v13057_v16 = vadd.f32 %v22431_v24, %v22436_v27 }
 0xa19   : > { %v22655_v33 = vpop.f32.mrf.mxu0 }
 0xa1a   : > { %23252 = vst [vmem:[#allocation121_spill] sm:$0xff] %v22655_v33  ;;  %v13355_v41 = vadd.f32 %v17073_v59, %v13057_v16 }
 0xa1b   : > { %v22657_v36 = vpop.f32.mrf.mxu0 }
 0xa1c   : > { %23253 = vst [vmem:[#allocation122_spill] sm:$0xff] %v22657_v36  ;;  %v13055_v36 = vadd.f32 %v22438_v63, %v22441_v28  ;;  %v13653_v15 = vadd.f32 %v17107_v13, %v13355_v41  ;;  %v13981_v41 = vadd.f32 %v17323_v55, %v21612_v12  ;;  %v23263_v55 = vld [vmem:[#allocation35_spill] sm:$0xff] }
 0xa1d   : > { %v22661_v62 = vpop.f32.mrf.mxu0 }
 0xa1e   : > { %23255 = vst [vmem:[#allocation124_spill] sm:$0xff] %v22661_v62  ;;  %v9908_v62 = vadd.f32 %v21498_v51, %v9610_v3  ;;  %v13353_v24 = vadd.f32 %v13226_v46, %v13055_v36  ;;  %v17322_v51 = vld [vmem:[%s17615_s21 + $0x10] sm:$0xff]  ;;  %v13354_v36 = vadd.f32 %v13229_v14, %v13056_v18  ;;  %v23260_v14 = vld [vmem:[#allocation16_spill] sm:$0xff] }
 0xa1f   : > { %v22663_v2 = vpop.f32.mrf.mxu0  ;;  %v13983_v16 = vadd.f32 %v17322_v51, %v21607_v37  ;;  %v13059_v37 = vadd.f32 %v22458_v32, %v22461_v43  ;;  %v13062_v43 = vadd.f32 %v22463_v39, %v22466_v30  ;;  %v17325_v18 = vld [vmem:[%s17615_s21 + $0x8] sm:$0xff] }
 0xa20   : > { %23256 = vst [vmem:[#allocation125_spill] sm:$0xff] %v22663_v2  ;;  %v22678_v2 = vpop.f32.mrf.mxu1  ;;  %v10206_v28 = vadd.f32 %v21500_v9, %v9908_v62  ;;  %v23259_v62 = vld [vmem:[#allocation39_spill] sm:$0xff]  ;;  %v13652_v13 = vadd.f32 %v22599_v61, %v13354_v36  ;;  %v23261_v51 = vld [vmem:[#allocation4_spill] sm:$0xff]  ;;  %v13065_v36 = vadd.f32 %v22473_v7, %v22476_v45  ;;  %v23266_v7 = vld [vmem:[#allocation41_spill] sm:$0xff] }
 0xa21   : > { %v22667_v34 = vpop.f32.mrf.mxu0  ;;  %v13360_v30 = vadd.f32 %v22601_v44, %v13062_v43 }
 0xa22   : > { %23258 = vst [vmem:[#allocation127_spill] sm:$0xff] %v22667_v34  ;;  %v13058_v34 = vadd.f32 %v22443_v49, %v22446_v4  ;;  %v22691_v3 = vpop.f32.mrf.mxu1  ;;  %v13061_v49 = vadd.f32 %v22453_v52, %v22456_v23  ;;  %v13651_v4 = vadd.f32 %v13524_v54, %v13353_v24  ;;  %v10504_v9 = vadd.f32 %v21619_v56, %v10206_v28 }
 0xa23   : > { %v22673_v33 = vpop.f32.mrf.mxu0  ;;  %v9912_v56 = vadd.f32 %v23259_v62, %v9614_v57 }
 0xa24   : > { %v13356_v63 = vadd.f32 %v17074_v10, %v13058_v34  ;;  %v13359_v17 = vadd.f32 %v22595_v60, %v13061_v49  ;;  %v17324_v34 = vld [vmem:[%s17615_s21 + $0x18] sm:$0xff]  ;;  %v22716_v54 = vpop.f32.mrf.mxu1  ;;  %v23262_v49 = vld [vmem:[#allocation19_spill] sm:$0xff] }
 0xa25   : > { %v22680_v31 = vpop.f32.mrf.mxu0  ;;  %v13984_v32 = vadd.f32 %v17324_v34, %v23260_v14  ;;  %v17328_v14 = vld [vmem:[%s17615_s21 + $0x38] sm:$0xff] }
 0xa26   : > { %v13654_v23 = vadd.f32 %v22593_v47, %v13356_v63  ;;  %v13357_v47 = vadd.f32 %v22597_v8, %v13059_v37  ;;  %v13060_v63 = vadd.f32 %v22468_v5, %v22471_v38  ;;  %v13657_v39 = vadd.f32 %v22605_v11, %v13359_v17  ;;  %v22734_v5 = vpop.f32.mrf.mxu1  ;;  %v17327_v37 = vld [vmem:[%s17615_s21 + $0x20] sm:$0xff] }
 0xa27   : > { %v22684_v27 = vpop.f32.mrf.mxu0  ;;  %v13063_v17 = vadd.f32 %v22478_v22, %v22481_v25 }
 0xa28   : > { %v13655_v11 = vadd.f32 %v22611_v35, %v13357_v47  ;;  %v13358_v44 = vadd.f32 %v22603_v20, %v13060_v63  ;;  %v13658_v20 = vadd.f32 %v22617_v1, %v13360_v30  ;;  %v22756_v22 = vpop.f32.mrf.mxu1  ;;  %v23269_v63 = vld [vmem:[#allocation7_spill] sm:$0xff]  ;;  %v23270_v30 = vld [vmem:[#allocation42_spill] sm:$0xff] }
 0xa29   : > { %v17141_v59 = vpop.f32.mrf.mxu0 }
 0xa2a   : > { %v13951_v46 = vadd.f32 %v17141_v59, %v13653_v15  ;;  %v13982_v15 = vadd.f32 %v17325_v18, %v10504_v9  ;;  %v17326_v59 = vld [vmem:[%s17615_s21 + $0x30] sm:$0xff]  ;;  %v13656_v1 = vadd.f32 %v22623_v0, %v13358_v44  ;;  %v13064_v18 = vadd.f32 %v22488_v40, %v22491_v29  ;;  %v22774_v40 = vpop.f32.mrf.mxu1 }
 0xa2b   : > { %v13822_v52 = vpop.f32.mrf.mxu0 }
 0xa2c   : > { %v14015_v26 = vadd.f32 %v13983_v16, %v13951_v46  ;;  %v13949_v12 = vadd.f32 %v13822_v52, %v13651_v4  ;;  %v10210_v16 = vadd.f32 %v23261_v51, %v9912_v56  ;;  %v13987_v4 = vadd.f32 %v17326_v59, %v23262_v49  ;;  %v23265_v52 = vld [vmem:[#allocation18_spill] sm:$0xff]  ;;  %v23267_v56 = vld [vmem:[#allocation3_spill] sm:$0xff] }
 0xa2d   : > { %v17142_v10 = vpop.f32.mrf.mxu0  ;;  %v23272_v51 = vld [vmem:[#allocation66_spill] sm:$0xff] }
 0xa2e   : > { %14047 = vst.msk [vmem:[%s22707_s14 + $0x10] sm:$0xff] %vm674_vm2, %v14015_v26  ;;  %v14013_v60 = vadd.f32 %v13981_v41, %v13949_v12  ;;  %v13952_v24 = vadd.f32 %v17142_v10, %v13654_v23  ;;  %v23264_v41 = vld [vmem:[#allocation22_spill] sm:$0xff]  ;;  %v13985_v23 = vadd.f32 %v17327_v37, %v23265_v52  ;;  %v10508_v45 = vadd.f32 %v23266_v7, %v10210_v16  ;;  %v23279_v37 = vld [vmem:[#allocation69_spill] sm:$0xff]  ;;  %v23280_v52 = vld [vmem:[#allocation68_spill] sm:$0xff] }
 0xa2f   : > { %v13825_v28 = vpop.f32.mrf.mxu0  ;;  %v9618_v9 = vadd.f32 %v23264_v41, %v23263_v55  ;;  %v13363_v26 = vadd.f32 %v22607_v50, %v13065_v36  ;;  %v13066_v10 = vadd.f32 %v22483_v48, %v22486_v21  ;;  %v13361_v50 = vadd.f32 %v22609_v58, %v13063_v17  ;;  %v23278_v41 = vld [vmem:[#allocation45_spill] sm:$0xff] }
 0xa30   : > { %14045 = vst.msk [vmem:[%s22707_s14] sm:$0xff] %vm674_vm2, %v14013_v60  ;;  %v14016_v61 = vadd.f32 %v13984_v32, %v13952_v24  ;;  %v13950_v8 = vadd.f32 %v13825_v28, %v13652_v13  ;;  %v23268_v32 = vld [vmem:[#allocation40_spill] sm:$0xff] }
 0xa31   : > { %v17145_v38 = vpop.f32.mrf.mxu0  ;;  %v9916_v34 = vadd.f32 %v23267_v56, %v9618_v9  ;;  %v13988_v43 = vadd.f32 %v17328_v14, %v23268_v32  ;;  %v17329_v60 = vld [vmem:[%s17615_s21 + $0x28] sm:$0xff]  ;;  %v13661_v48 = vadd.f32 %v22629_v6, %v13363_v26  ;;  %v13364_v21 = vadd.f32 %v22613_v19, %v13066_v10  ;;  %v23273_v6 = vld [vmem:[#allocation113_spill] sm:$0xff]  ;;  %v23274_v19 = vld [vmem:[#allocation106_spill] sm:$0xff] }
 0xa32   : > { %14048 = vst.msk [vmem:[%s22707_s14 + $0x18] sm:$0xff] %vm674_vm2, %v14016_v61  ;;  %v14014_v46 = vadd.f32 %v13982_v15, %v13950_v8  ;;  %v13955_v57 = vadd.f32 %v17145_v38, %v13657_v39  ;;  %v13986_v24 = vadd.f32 %v17329_v60, %v10508_v45  ;;  %v17330_v39 = vld [vmem:[%s17615_s21 + $0x50] sm:$0xff]  ;;  %v23271_v8 = vld [vmem:[#allocation67_spill] sm:$0xff]  ;;  %v13659_v59 = vadd.f32 %v23273_v6, %v13361_v50  ;;  %v23275_v38 = vld [vmem:[#allocation34_spill] sm:$0xff] }
 0xa33   : > { %v13838_v35 = vpop.f32.mrf.mxu0  ;;  %v10214_v28 = vadd.f32 %v23269_v63, %v9916_v34  ;;  %v13991_v61 = vadd.f32 %v17330_v39, %v23270_v30  ;;  %v13069_v16 = vadd.f32 %v23272_v51, %v23271_v8  ;;  %v13362_v49 = vadd.f32 %v23274_v19, %v13064_v18  ;;  %v23281_v45 = vld [vmem:[#allocation116_spill] sm:$0xff]  ;;  %v23284_v56 = vld [vmem:[#allocation21_spill] sm:$0xff]  ;;  %v23288_v50 = vld [vmem:[#allocation70_spill] sm:$0xff] }
 0xa34   : > { %14046 = vst.msk [vmem:[%s22707_s14 + $0x8] sm:$0xff] %vm674_vm2, %v14014_v46  ;;  %v14019_v12 = vadd.f32 %v13987_v4, %v13955_v57  ;;  %v13953_v62 = vadd.f32 %v13838_v35, %v13655_v11  ;;  %v23276_v11 = vld [vmem:[#allocation28_spill] sm:$0xff]  ;;  %v17331_v46 = vld [vmem:[%s17615_s21 + $0x40] sm:$0xff]  ;;  %v13662_v17 = vadd.f32 %v23281_v45, %v13364_v21  ;;  %v23285_v14 = vld [vmem:[#allocation5_spill] sm:$0xff] }
 0xa35   : > { %v17146_v25 = vpop.f32.mrf.mxu0  ;;  %v9622_v44 = vadd.f32 %v23276_v11, %v23275_v38  ;;  %v23277_v57 = vld [vmem:[#allocation43_spill] sm:$0xff]  ;;  %v10512_v9 = vadd.f32 %v23278_v41, %v10214_v28  ;;  %v23286_v10 = vld [vmem:[#allocation44_spill] sm:$0xff]  ;;  %v23291_v39 = vld [vmem:[#allocation73_spill] sm:$0xff] }
 0xa36   : > { %14051 = vst.msk [vmem:[%s22707_s14 + $0x30] sm:$0xff] %vm674_vm2, %v14019_v12  ;;  %v14017_v13 = vadd.f32 %v13985_v23, %v13953_v62  ;;  %v13956_v47 = vadd.f32 %v17146_v25, %v13658_v20  ;;  %v13989_v55 = vadd.f32 %v17331_v46, %v23277_v57  ;;  %v13067_v23 = vadd.f32 %v23280_v52, %v23279_v37  ;;  %v23282_v35 = vld [vmem:[#allocation107_spill] sm:$0xff]  ;;  %v23283_v62 = vld [vmem:[#allocation20_spill] sm:$0xff]  ;;  %v23297_v11 = vld [vmem:[#allocation74_spill] sm:$0xff] }
 0xa37   : > { %v13841_v15 = vpop.f32.mrf.mxu0  ;;  %v13367_v20 = vadd.f32 %v23282_v35, %v13069_v16  ;;  %v9030_v34 = vadd.f32 %v23284_v56, %v23283_v62  ;;  %v9920_v32 = vadd.f32 %v23285_v14, %v9622_v44  ;;  %v23289_v18 = vld [vmem:[#allocation108_spill] sm:$0xff]  ;;  %v23293_v16 = vld [vmem:[#allocation109_spill] sm:$0xff]  ;;  %v23296_v38 = vld [vmem:[#allocation75_spill] sm:$0xff] }
 0xa38   : > { %14049 = vst.msk [vmem:[%s22707_s14 + $0x20] sm:$0xff] %vm674_vm2, %v14017_v13  ;;  %v14020_v0 = vadd.f32 %v13988_v43, %v13956_v47  ;;  %v13954_v58 = vadd.f32 %v13841_v15, %v13656_v1  ;;  %v17332_v43 = vld [vmem:[%s17615_s21 + $0x58] sm:$0xff]  ;;  %v23287_v1 = vld [vmem:[#allocation71_spill] sm:$0xff]  ;;  %v22798_v47 = vpop.f32.mrf.mxu1  ;;  %v13365_v15 = vadd.f32 %v23289_v18, %v13067_v23  ;;  %v17333_v63 = vld [vmem:[%s17615_s21 + $0x48] sm:$0xff]  ;;  %v13073_v44 = vadd.f32 %v23297_v11, %v23296_v38 }
 0xa39   : > { %v17149_v29 = vpop.f32.mrf.mxu0  ;;  %v13992_v25 = vadd.f32 %v17332_v43, %v23286_v10  ;;  %v13070_v13 = vadd.f32 %v23288_v50, %v23287_v1  ;;  %v13990_v28 = vadd.f32 %v17333_v63, %v10512_v9  ;;  %v23292_v30 = vld [vmem:[#allocation72_spill] sm:$0xff]  ;;  %v13665_v51 = vadd.f32 %v22653_v53, %v13367_v20  ;;  %v23298_v53 = vld [vmem:[#allocation123_spill] sm:$0xff]  ;;  %v23299_v41 = vld [vmem:[#allocation110_spill] sm:$0xff] }
 0xa3a   : > { %14052 = vst.msk [vmem:[%s22707_s14 + $0x38] sm:$0xff] %vm674_vm2, %v14020_v0  ;;  %v14018_v4 = vadd.f32 %v13986_v24, %v13954_v58  ;;  %v13959_v36 = vadd.f32 %v17149_v29, %v13661_v48  ;;  %v13660_v24 = vadd.f32 %v22647_v42, %v13362_v49  ;;  %v23290_v0 = vld [vmem:[#allocation29_spill] sm:$0xff]  ;;  %v22817_v46 = vpop.f32.mrf.mxu1  ;;  %v23300_v23 = vld [vmem:[#allocation36_spill] sm:$0xff]  ;;  %v17335_v45 = vld [vmem:[%s17615_s21 + $0x60] sm:$0xff] }
 0xa3b   : > { %v13854_v7 = vpop.f32.mrf.mxu0  ;;  %v9328_v58 = vadd.f32 %v23290_v0, %v9030_v34  ;;  %v13368_v42 = vadd.f32 %v23293_v16, %v13070_v13  ;;  %v17334_v49 = vld [vmem:[%s17615_s21 + $0x70] sm:$0xff]  ;;  %v23304_v62 = vld [vmem:[#allocation76_spill] sm:$0xff]  ;;  %v23305_v14 = vld [vmem:[#allocation126_spill] sm:$0xff] }
 0xa3c   : > { %14050 = vst.msk [vmem:[%s22707_s14 + $0x28] sm:$0xff] %vm674_vm2, %v14018_v4  ;;  %v14023_v26 = vadd.f32 %v13991_v61, %v13959_v36  ;;  %v13957_v12 = vadd.f32 %v13854_v7, %v13659_v59  ;;  %v13068_v61 = vadd.f32 %v23292_v30, %v23291_v39  ;;  %v23294_v59 = vld [vmem:[#allocation9_spill] sm:$0xff]  ;;  %v23295_v4 = vld [vmem:[#allocation46_spill] sm:$0xff]  ;;  %v23306_v43 = vld [vmem:[#allocation111_spill] sm:$0xff] }
 0xa3d   : > { %v17150_v60 = vpop.f32.mrf.mxu0  ;;  %v10218_v19 = vadd.f32 %v23294_v59, %v9920_v32  ;;  %v13995_v36 = vadd.f32 %v17334_v49, %v23295_v4  ;;  %v9626_v7 = vadd.f32 %v23300_v23, %v9328_v58  ;;  %v23302_v20 = vld [vmem:[#allocation49_spill] sm:$0xff]  ;;  %v13666_v32 = vadd.f32 %v23305_v14, %v13368_v42  ;;  %v23307_v50 = vld [vmem:[#allocation26_spill] sm:$0xff]  ;;  %v23308_v13 = vld [vmem:[#allocation32_spill] sm:$0xff] }
 0xa3e   : > { %14055 = vst.msk [vmem:[%s22707_s14 + $0x50] sm:$0xff] %vm674_vm2, %v14023_v26  ;;  %v14021_v48 = vadd.f32 %v13989_v55, %v13957_v12  ;;  %v13960_v21 = vadd.f32 %v17150_v60, %v13662_v17  ;;  %v13663_v55 = vadd.f32 %v23298_v53, %v13365_v15  ;;  %v13366_v9 = vadd.f32 %v23299_v41, %v13068_v61  ;;  %v23301_v17 = vld [vmem:[#allocation47_spill] sm:$0xff]  ;;  %v23303_v12 = vld [vmem:[#allocation77_spill] sm:$0xff]  ;;  %v17336_v15 = vld [vmem:[%s17615_s21 + $0x78] sm:$0xff] }
 0xa3f   : > { %v13857_v8 = vpop.f32.mrf.mxu0  ;;  %v13993_v35 = vadd.f32 %v17335_v45, %v23301_v17  ;;  %v10516_v26 = vadd.f32 %v23302_v20, %v10218_v19  ;;  %v13071_v56 = vadd.f32 %v23304_v62, %v23303_v12  ;;  %v13371_v10 = vadd.f32 %v23306_v43, %v13073_v44  ;;  %v23311_v0 = vld [vmem:[#allocation79_spill] sm:$0xff]  ;;  %v23312_v58 = vld [vmem:[#allocation78_spill] sm:$0xff]  ;;  %v23313_v61 = vld [vmem:[#allocation112_spill] sm:$0xff] }
 0xa40   : > { %14053 = vst.msk [vmem:[%s22707_s14 + $0x40] sm:$0xff] %vm674_vm2, %v14021_v48  ;;  %v14024_v29 = vadd.f32 %v13992_v25, %v13960_v21  ;;  %v13958_v6 = vadd.f32 %v13857_v8, %v13660_v24  ;;  %v9034_v60 = vadd.f32 %v23308_v13, %v23307_v50  ;;  %v23309_v24 = vld [vmem:[#allocation6_spill] sm:$0xff]  ;;  %v23310_v48 = vld [vmem:[#allocation48_spill] sm:$0xff]  ;;  %v13074_v63 = vadd.f32 %v23312_v58, %v23311_v0  ;;  %v23314_v42 = vld [vmem:[#allocation25_spill] sm:$0xff] }
 0xa41   : > { %v17153_v57 = vpop.f32.mrf.mxu0  ;;  %v9924_v18 = vadd.f32 %v23309_v24, %v9626_v7  ;;  %v13996_v21 = vadd.f32 %v17336_v15, %v23310_v48  ;;  %v13664_v30 = vadd.f32 %v22678_v2, %v13366_v9  ;;  %v13369_v8 = vadd.f32 %v23313_v61, %v13071_v56  ;;  %v23315_v19 = vld [vmem:[#allocation81_spill] sm:$0xff]  ;;  %v23316_v49 = vld [vmem:[#allocation80_spill] sm:$0xff]  ;;  %v23317_v11 = vld [vmem:[#allocation114_spill] sm:$0xff] }
 0xa42   : > { %14056 = vst.msk [vmem:[%s22707_s14 + $0x58] sm:$0xff] %vm674_vm2, %v14024_v29  ;;  %v14022_v37 = vadd.f32 %v13990_v28, %v13958_v6  ;;  %v13963_v52 = vadd.f32 %v17153_v57, %v13665_v51  ;;  %v22840_v28 = vpop.f32.mrf.mxu1  ;;  %v9332_v29 = vadd.f32 %v23314_v42, %v9034_v60  ;;  %v17337_v6 = vld [vmem:[%s17615_s21 + $0x68] sm:$0xff]  ;;  %v13072_v4 = vadd.f32 %v23316_v49, %v23315_v19  ;;  %v23318_v53 = vld [vmem:[#allocation11_spill] sm:$0xff]  ;;  %v17338_v41 = vld [vmem:[%s17615_s21 + $0x90] sm:$0xff] }
 0xa43   : > { %v13870_v34 = vpop.f32.mrf.mxu0  ;;  %v13994_v59 = vadd.f32 %v17337_v6, %v10516_v26  ;;  %v13669_v38 = vadd.f32 %v22691_v3, %v13371_v10  ;;  %v13372_v2 = vadd.f32 %v23317_v11, %v13074_v63  ;;  %v23319_v9 = vld [vmem:[#allocation50_spill] sm:$0xff]  ;;  %v13667_v3 = vadd.f32 %v22716_v54, %v13369_v8  ;;  %v23323_v62 = vld [vmem:[#allocation24_spill] sm:$0xff]  ;;  %v23324_v14 = vld [vmem:[#allocation51_spill] sm:$0xff] }
 0xa44   : > { %14054 = vst.msk [vmem:[%s22707_s14 + $0x48] sm:$0xff] %vm674_vm2, %v14022_v37  ;;  %v14027_v25 = vadd.f32 %v13995_v36, %v13963_v52  ;;  %v13961_v1 = vadd.f32 %v13870_v34, %v13663_v55  ;;  %v10222_v55 = vadd.f32 %v23318_v53, %v9924_v18  ;;  %v13999_v37 = vadd.f32 %v17338_v41, %v23319_v9  ;;  %v23320_v52 = vld [vmem:[#allocation83_spill] sm:$0xff]  ;;  %v23321_v23 = vld [vmem:[#allocation82_spill] sm:$0xff]  ;;  %v22859_v45 = vpop.f32.mrf.mxu1  ;;  %v23325_v43 = vld [vmem:[#allocation53_spill] sm:$0xff] }
 0xa45   : > { %v17154_v39 = vpop.f32.mrf.mxu0  ;;  %v13077_v7 = vadd.f32 %v23321_v23, %v23320_v52  ;;  %v9630_v56 = vadd.f32 %v23323_v62, %v9332_v29  ;;  %v17339_v34 = vld [vmem:[%s17615_s21 + $0x80] sm:$0xff]  ;;  %v13670_v54 = vadd.f32 %v22734_v5, %v13372_v2  ;;  %v23328_v60 = vld [vmem:[#allocation117_spill] sm:$0xff]  ;;  %v23331_v58 = vld [vmem:[#allocation10_spill] sm:$0xff] }
 0xa46   : > { %14059 = vst.msk [vmem:[%s22707_s14 + $0x70] sm:$0xff] %vm674_vm2, %v14027_v25  ;;  %v14025_v51 = vadd.f32 %v13993_v35, %v13961_v1  ;;  %v13964_v16 = vadd.f32 %v17154_v39, %v13666_v32  ;;  %v23322_v35 = vld [vmem:[#allocation115_spill] sm:$0xff]  ;;  %v13997_v32 = vadd.f32 %v17339_v34, %v23324_v14  ;;  %v10520_v10 = vadd.f32 %v23325_v43, %v10222_v55  ;;  %v23326_v25 = vld [vmem:[#allocation85_spill] sm:$0xff]  ;;  %v23327_v1 = vld [vmem:[#allocation84_spill] sm:$0xff]  ;;  %v22882_v5 = vpop.f32.mrf.mxu1 }
 0xa47   : > { %v13873_v36 = vpop.f32.mrf.mxu0  ;;  %v13370_v20 = vadd.f32 %v23322_v35, %v13072_v4  ;;  %v13075_v50 = vadd.f32 %v23327_v1, %v23326_v25  ;;  %v13375_v24 = vadd.f32 %v23328_v60, %v13077_v7  ;;  %v23329_v48 = vld [vmem:[#allocation27_spill] sm:$0xff]  ;;  %v9928_v63 = vadd.f32 %v23331_v58, %v9630_v56  ;;  %v17340_v39 = vld [vmem:[%s17615_s21 + $0x98] sm:$0xff]  ;;  %v23336_v4 = vld [vmem:[#allocation8_spill] sm:$0xff] }
 0xa48   : > { %14057 = vst.msk [vmem:[%s22707_s14 + $0x60] sm:$0xff] %vm674_vm2, %v14025_v51  ;;  %v14028_v44 = vadd.f32 %v13996_v21, %v13964_v16  ;;  %v13962_v57 = vadd.f32 %v13873_v36, %v13664_v30  ;;  %v23330_v21 = vld [vmem:[#allocation31_spill] sm:$0xff]  ;;  %v23332_v30 = vld [vmem:[#allocation52_spill] sm:$0xff]  ;;  %v23334_v51 = vld [vmem:[#allocation86_spill] sm:$0xff] }
 0xa49   : > { %v17157_v17 = vpop.f32.mrf.mxu0  ;;  %v9038_v0 = vadd.f32 %v23330_v21, %v23329_v48  ;;  %v14000_v61 = vadd.f32 %v17340_v39, %v23332_v30  ;;  %v23333_v8 = vld [vmem:[#allocation87_spill] sm:$0xff]  ;;  %v13668_v29 = vadd.f32 %v22756_v22, %v13370_v20  ;;  %v23335_v6 = vld [vmem:[#allocation118_spill] sm:$0xff]  ;;  %v23337_v2 = vld [vmem:[#allocation89_spill] sm:$0xff]  ;;  %v13673_v55 = vadd.f32 %v22774_v40, %v13375_v24 }
 0xa4a   : > { %14060 = vst.msk [vmem:[%s22707_s14 + $0x78] sm:$0xff] %vm674_vm2, %v14028_v44  ;;  %v14026_v26 = vadd.f32 %v13994_v59, %v13962_v57  ;;  %v13967_v12 = vadd.f32 %v17157_v17, %v13669_v38  ;;  %v13078_v16 = vadd.f32 %v23334_v51, %v23333_v8  ;;  %v13373_v59 = vadd.f32 %v23335_v6, %v13075_v50  ;;  %v17341_v38 = vld [vmem:[%s17615_s21 + $0x88] sm:$0xff]  ;;  %v23339_v41 = vld [vmem:[#allocation119_spill] sm:$0xff]  ;;  %v23340_v52 = vld [vmem:[#allocation13_spill] sm:$0xff] }
 0xa4b   : > { %v13886_v13 = vpop.f32.mrf.mxu0  ;;  %v9336_v36 = vadd.f32 %v23336_v4, %v9038_v0  ;;  %v13998_v11 = vadd.f32 %v17341_v38, %v10520_v10  ;;  %v23338_v44 = vld [vmem:[#allocation88_spill] sm:$0xff]  ;;  %v10226_v23 = vadd.f32 %v23340_v52, %v9928_v63  ;;  %v17342_v7 = vld [vmem:[%s17615_s21 + $0xb0] sm:$0xff]  ;;  %v23341_v17 = vld [vmem:[#allocation54_spill] sm:$0xff] }
 0xa4c   : > { %14058 = vst.msk [vmem:[%s22707_s14 + $0x68] sm:$0xff] %vm674_vm2, %v14026_v26  ;;  %v14031_v18 = vadd.f32 %v13999_v37, %v13967_v12  ;;  %v13965_v15 = vadd.f32 %v13886_v13, %v13667_v3  ;;  %v13076_v57 = vadd.f32 %v23338_v44, %v23337_v2  ;;  %v13376_v22 = vadd.f32 %v23339_v41, %v13078_v16  ;;  %v23342_v35 = vld [vmem:[#allocation91_spill] sm:$0xff]  ;;  %v23343_v20 = vld [vmem:[#allocation90_spill] sm:$0xff]  ;;  %v17132_v12 = vpop.f32.mrf.mxu1  ;;  %v23344_v56 = vld [vmem:[#allocation120_spill] sm:$0xff] }
 0xa4d   : > { %v17158_v42 = vpop.f32.mrf.mxu0  ;;  %v14003_v3 = vadd.f32 %v17342_v7, %v23341_v17  ;;  %v13081_v26 = vadd.f32 %v23343_v20, %v23342_v35  ;;  %v13671_v40 = vadd.f32 %v22798_v47, %v13373_v59  ;;  %v23345_v43 = vld [vmem:[#allocation37_spill] sm:$0xff]  ;;  %v17343_v25 = vld [vmem:[%s17615_s21 + $0xa0] sm:$0xff]  ;;  %v23349_v24 = vld [vmem:[#allocation92_spill] sm:$0xff] }
 0xa4e   : > { %14063 = vst.msk [vmem:[%s22707_s14 + $0x90] sm:$0xff] %vm674_vm2, %v14031_v18  ;;  %v14029_v19 = vadd.f32 %v13997_v32, %v13965_v15  ;;  %v13968_v49 = vadd.f32 %v17158_v42, %v13670_v54  ;;  %v13374_v34 = vadd.f32 %v23344_v56, %v13076_v57  ;;  %v9634_v10 = vadd.f32 %v23345_v43, %v9336_v36  ;;  %v23346_v1 = vld [vmem:[#allocation55_spill] sm:$0xff]  ;;  %v23347_v13 = vld [vmem:[#allocation57_spill] sm:$0xff]  ;;  %v17344_v51 = vld [vmem:[%s17615_s21 + $0xb8] sm:$0xff] }
 0xa4f   : > { %v13889_v53 = vpop.f32.mrf.mxu0  ;;  %v14001_v50 = vadd.f32 %v17343_v25, %v23346_v1  ;;  %v10524_v54 = vadd.f32 %v23347_v13, %v10226_v23  ;;  %v23348_v60 = vld [vmem:[#allocation93_spill] sm:$0xff]  ;;  %v13674_v47 = vadd.f32 %v22817_v46, %v13376_v22  ;;  %v23351_v63 = vld [vmem:[#allocation23_spill] sm:$0xff]  ;;  %v23354_v16 = vld [vmem:[#allocation56_spill] sm:$0xff]  ;;  %v13623_v46 = vpop.f32.mrf.mxu1 }
 0xa50   : > { %14061 = vst.msk [vmem:[%s22707_s14 + $0x80] sm:$0xff] %vm674_vm2, %v14029_v19  ;;  %v14032_v9 = vadd.f32 %v14000_v61, %v13968_v49  ;;  %v13966_v37 = vadd.f32 %v13889_v53, %v13668_v29  ;;  %v13079_v18 = vadd.f32 %v23349_v24, %v23348_v60  ;;  %v23350_v48 = vld [vmem:[#allocation121_spill] sm:$0xff]  ;;  %v23353_v61 = vld [vmem:[#allocation12_spill] sm:$0xff]  ;;  %v14004_v42 = vadd.f32 %v17344_v51, %v23354_v16  ;;  %v23355_v29 = vld [vmem:[#allocation95_spill] sm:$0xff] }
 0xa51   : > { %v17161_v62 = vpop.f32.mrf.mxu0  ;;  %v13379_v21 = vadd.f32 %v23350_v48, %v13081_v26  ;;  %v23352_v39 = vld [vmem:[#allocation33_spill] sm:$0xff]  ;;  %v9932_v8 = vadd.f32 %v23353_v61, %v9634_v10  ;;  %v23356_v6 = vld [vmem:[#allocation94_spill] sm:$0xff]  ;;  %v13672_v49 = vadd.f32 %v22840_v28, %v13374_v34  ;;  %v17345_v57 = vld [vmem:[%s17615_s21 + $0xa8] sm:$0xff] }
 0xa52   : > { %14064 = vst.msk [vmem:[%s22707_s14 + $0x98] sm:$0xff] %vm674_vm2, %v14032_v9  ;;  %v14030_v14 = vadd.f32 %v13998_v11, %v13966_v37  ;;  %v13971_v32 = vadd.f32 %v17161_v62, %v13673_v55  ;;  %v9042_v30 = vadd.f32 %v23352_v39, %v23351_v63  ;;  %v13082_v59 = vadd.f32 %v23356_v6, %v23355_v29  ;;  %v23357_v4 = vld [vmem:[#allocation122_spill] sm:$0xff]  ;;  %v23359_v55 = vld [vmem:[#allocation97_spill] sm:$0xff]  ;;  %v23360_v41 = vld [vmem:[#allocation96_spill] sm:$0xff]  ;;  %v17135_v9 = vpop.f32.mrf.mxu1 }
 0xa53   : > { %v13902_v15 = vpop.f32.mrf.mxu0  ;;  %v13377_v36 = vadd.f32 %v23357_v4, %v13079_v18  ;;  %v23358_v2 = vld [vmem:[#allocation30_spill] sm:$0xff]  ;;  %v14002_v53 = vadd.f32 %v17345_v57, %v10524_v54  ;;  %v13080_v22 = vadd.f32 %v23360_v41, %v23359_v55  ;;  %v13677_v52 = vadd.f32 %v22859_v45, %v13379_v21  ;;  %v23361_v28 = vld [vmem:[#allocation124_spill] sm:$0xff]  ;;  %v17346_v20 = vld [vmem:[%s17615_s21 + $0xd0] sm:$0xff] }
 0xa54   : > { %14062 = vst.msk [vmem:[%s22707_s14 + $0x88] sm:$0xff] %vm674_vm2, %v14030_v14  ;;  %v14035_v0 = vadd.f32 %v14003_v3, %v13971_v32  ;;  %v13969_v58 = vadd.f32 %v13902_v15, %v13671_v40  ;;  %v9340_v44 = vadd.f32 %v23358_v2, %v9042_v30  ;;  %v13380_v23 = vadd.f32 %v23361_v28, %v13082_v59  ;;  %v23362_v3 = vld [vmem:[#allocation15_spill] sm:$0xff]  ;;  %v23363_v26 = vld [vmem:[#allocation58_spill] sm:$0xff]  ;;  %v23366_v45 = vld [vmem:[#allocation125_spill] sm:$0xff]  ;;  %v13636_v21 = vpop.f32.mrf.mxu1 }
 0xa55   : > { %v17162_v19 = vpop.f32.mrf.mxu0  ;;  %v10230_v35 = vadd.f32 %v23362_v3, %v9932_v8  ;;  %v14007_v62 = vadd.f32 %v17346_v20, %v23363_v26  ;;  %v23364_v40 = vld [vmem:[#allocation99_spill] sm:$0xff]  ;;  %v23365_v56 = vld [vmem:[#allocation98_spill] sm:$0xff]  ;;  %v13675_v32 = vadd.f32 %v22882_v5, %v13377_v36  ;;  %v13378_v43 = vadd.f32 %v23366_v45, %v13080_v22  ;;  %v23369_v24 = vld [vmem:[#allocation61_spill] sm:$0xff] }
 0xa56   : > { %14067 = vst.msk [vmem:[%s22707_s14 + $0xb0] sm:$0xff] %vm674_vm2, %v14035_v0  ;;  %v14033_v38 = vadd.f32 %v14001_v50, %v13969_v58  ;;  %v13972_v11 = vadd.f32 %v17162_v19, %v13674_v47  ;;  %v13085_v34 = vadd.f32 %v23365_v56, %v23364_v40  ;;  %v23367_v1 = vld [vmem:[#allocation38_spill] sm:$0xff]  ;;  %v17347_v13 = vld [vmem:[%s17615_s21 + $0xc0] sm:$0xff]  ;;  %v23370_v15 = vld [vmem:[#allocation101_spill] sm:$0xff]  ;;  %v13678_v0 = vadd.f32 %v17132_v12, %v13380_v23 }
 0xa57   : > { %v13905_v37 = vpop.f32.mrf.mxu0  ;;  %v9638_v50 = vadd.f32 %v23367_v1, %v9340_v44  ;;  %v23368_v54 = vld [vmem:[#allocation59_spill] sm:$0xff]  ;;  %v10528_v18 = vadd.f32 %v23369_v24, %v10230_v35  ;;  %v23371_v47 = vld [vmem:[#allocation100_spill] sm:$0xff]  ;;  %v23373_v61 = vld [vmem:[#allocation14_spill] sm:$0xff] }
 0xa58   : > { %14065 = vst.msk [vmem:[%s22707_s14 + $0xa0] sm:$0xff] %vm674_vm2, %v14033_v38  ;;  %v14036_v7 = vadd.f32 %v14004_v42, %v13972_v11  ;;  %v13970_v17 = vadd.f32 %v13905_v37, %v13672_v49  ;;  %v14005_v60 = vadd.f32 %v17347_v13, %v23368_v54  ;;  %v13083_v48 = vadd.f32 %v23371_v47, %v23370_v15  ;;  %v23372_v58 = vld [vmem:[#allocation127_spill] sm:$0xff]  ;;  %v17348_v51 = vld [vmem:[%s17615_s21 + $0xd8] sm:$0xff]  ;;  %v23374_v16 = vld [vmem:[#allocation60_spill] sm:$0xff] }
 0xa59   : > { %v17165_v14 = vpop.f32.mrf.mxu0  ;;  %v13383_v63 = vadd.f32 %v23372_v58, %v13085_v34  ;;  %v9936_v8 = vadd.f32 %v23373_v61, %v9638_v50  ;;  %v14008_v42 = vadd.f32 %v17348_v51, %v23374_v16  ;;  %v23375_v29 = vld [vmem:[#allocation103_spill] sm:$0xff]  ;;  %v23376_v6 = vld [vmem:[#allocation102_spill] sm:$0xff]  ;;  %v13676_v49 = vadd.f32 %v13623_v46, %v13378_v43  ;;  %v17349_v38 = vld [vmem:[%s17615_s21 + $0xc8] sm:$0xff] }
 0xa5a   : > { %14068 = vst.msk [vmem:[%s22707_s14 + $0xb8] sm:$0xff] %vm674_vm2, %v14036_v7  ;;  %v14034_v10 = vadd.f32 %v14002_v53, %v13970_v17  ;;  %v13975_v25 = vadd.f32 %v17165_v14, %v13677_v52  ;;  %v13086_v59 = vadd.f32 %v23376_v6, %v23375_v29  ;;  %v13381_v12 = vadd.f32 %v22673_v33, %v13083_v48  ;;  %v23377_v2 = vld [vmem:[#allocation105_spill] sm:$0xff]  ;;  %v23378_v44 = vld [vmem:[#allocation104_spill] sm:$0xff]  ;;  %v17136_v53 = vpop.f32.mrf.mxu1  ;;  %v23380_v23 = vld [vmem:[#allocation62_spill] sm:$0xff] }
 0xa5b   : > { %v13918_v5 = vpop.f32.mrf.mxu0  ;;  %v14006_v11 = vadd.f32 %v17349_v38, %v10528_v18  ;;  %v13084_v57 = vadd.f32 %v23378_v44, %v23377_v2  ;;  %v13681_v41 = vadd.f32 %v17135_v9, %v13383_v63  ;;  %v23379_v37 = vld [vmem:[#allocation17_spill] sm:$0xff]  ;;  %v17351_v20 = vld [vmem:[%s17615_s21 + $0xe0] sm:$0xff]  ;;  %v17353_v24 = vld [vmem:[%s17615_s21 + $0xe8] sm:$0xff] }
 0xa5c   : > { %14066 = vst.msk [vmem:[%s22707_s14 + $0xa8] sm:$0xff] %vm674_vm2, %v14034_v10  ;;  %v14039_v39 = vadd.f32 %v14007_v62, %v13975_v25  ;;  %v13973_v30 = vadd.f32 %v13918_v5, %v13675_v32  ;;  %v13384_v22 = vadd.f32 %v22680_v31, %v13086_v59  ;;  %v10234_v52 = vadd.f32 %v23379_v37, %v9936_v8  ;;  %v17350_v28 = vld [vmem:[%s17615_s21 + $0xf0] sm:$0xff]  ;;  %v23381_v26 = vld [vmem:[#allocation63_spill] sm:$0xff]  ;;  %v13639_v40 = vpop.f32.mrf.mxu1  ;;  %v17352_v10 = vld [vmem:[%s17615_s21 + $0xf8] sm:$0xff] }
 0xa5d   : > { %v17166_v19 = vpop.f32.mrf.mxu0  ;;  %v14011_v7 = vadd.f32 %v17350_v28, %v23380_v23  ;;  %v13679_v3 = vadd.f32 %v13636_v21, %v13381_v12  ;;  %v13382_v35 = vadd.f32 %v22684_v27, %v13084_v57  ;;  %v14009_v62 = vadd.f32 %v17351_v20, %v23381_v26  ;;  %v23382_v34 = vld [vmem:[#allocation65_spill] sm:$0xff]  ;;  %v23383_v25 = vld [vmem:[#allocation64_spill] sm:$0xff] }
 0xa5e   : > { %14071 = vst.msk [vmem:[%s22707_s14 + $0xd0] sm:$0xff] %vm674_vm2, %v14039_v39  ;;  %v14037_v4 = vadd.f32 %v14005_v60, %v13973_v30  ;;  %v13976_v36 = vadd.f32 %v17166_v19, %v13678_v0  ;;  %v10532_v14 = vadd.f32 %v23382_v34, %v10234_v52  ;;  %v13682_v32 = vadd.f32 %v17136_v53, %v13384_v22 }
 0xa5f   : > { %v13921_v55 = vpop.f32.mrf.mxu0  ;;  %v14012_v1 = vadd.f32 %v17352_v10, %v23383_v25  ;;  %v13680_v50 = vadd.f32 %v13639_v40, %v13382_v35 }
 0xa60   : > { %14069 = vst.msk [vmem:[%s22707_s14 + $0xc0] sm:$0xff] %vm674_vm2, %v14037_v4  ;;  %v14040_v46 = vadd.f32 %v14008_v42, %v13976_v36  ;;  %v13974_v33 = vadd.f32 %v13921_v55, %v13676_v49  ;;  %v14010_v18 = vadd.f32 %v17353_v24, %v10532_v14 }
 0xa61   : > { %v17169_v17 = vpop.f32.mrf.mxu0 }
 0xa62   : > { %14072 = vst.msk [vmem:[%s22707_s14 + $0xd8] sm:$0xff] %vm674_vm2, %v14040_v46  ;;  %v14038_v9 = vadd.f32 %v14006_v11, %v13974_v33  ;;  %v13979_v31 = vadd.f32 %v17169_v17, %v13681_v41 }
 0xa63   : > { %v13934_v56 = vpop.f32.mrf.mxu0 }
 0xa64   : > { %14070 = vst.msk [vmem:[%s22707_s14 + $0xc8] sm:$0xff] %vm674_vm2, %v14038_v9  ;;  %v14043_v45 = vadd.f32 %v14011_v7, %v13979_v31  ;;  %v13977_v27 = vadd.f32 %v13934_v56, %v13679_v3 }
 0xa65   : > { %v17170_v43 = vpop.f32.mrf.mxu0 }
 0xa66   : > { %14075 = vst.msk [vmem:[%s22707_s14 + $0xf0] sm:$0xff] %vm674_vm2, %v14043_v45  ;;  %v14041_v13 = vadd.f32 %v14009_v62, %v13977_v27  ;;  %v13980_v54 = vadd.f32 %v17170_v43, %v13682_v32 }
 0xa67   : > { %v13937_v60 = vpop.f32.mrf.mxu0 }
 0xa68   : > { %14073 = vst.msk [vmem:[%s22707_s14 + $0xe0] sm:$0xff] %vm674_vm2, %v14041_v13  ;;  %v14044_v15 = vadd.f32 %v14012_v1, %v13980_v54  ;;  %v13978_v47 = vadd.f32 %v13937_v60, %v13680_v50 }
 0xa6a   : > { %14076 = vst.msk [vmem:[%s22707_s14 + $0xf8] sm:$0xff] %vm674_vm2, %v14044_v15  ;;  %v14042_v48 = vadd.f32 %v14010_v18, %v13978_v47 }
 0xa6c   : > { %14074 = vst.msk [vmem:[%s22707_s14 + $0xe8] sm:$0xff] %vm674_vm2, %v14042_v48 }
 0xa6d PF: > { %s23_s25 = sadd.s32 1, %s17360_s25  }
 0xa6e   : > { %p20_p4 = scmp.ge.s32.totalorder %s23_s25, 4  }
 0xa70   :  { %22 = sbr.rel (!%p20_p4) target bundleno = 1 (0x1), region = 157 }

</bundles_post_ra>
